<compile_context>
chip_gen: v7x
topology: tpu7x:2x2x1
jax: 0.10.0
libtpu: 0.0.40
codegen_flags: <defaults>
</compile_context>

<pallas_src>
import math

import jax
import jax.numpy as jnp
from jax.experimental import pallas as pl
from jax.experimental.pallas import tpu as pltpu

# ----------------------------- configuration --------------------------------
BATCH = 2
N_TOKENS_IN = 8           # text tokens
EMBED_DIM = 128           # stand-in for 768
NUM_HEADS = 4
FF_DIM = 4 * EMBED_DIM
IMAGE_DIM = 64
CONV_OUT = 16
KP = 32                   # im2col K (9*3=27) padded to 32
N_ENC_LAYERS = 2          # "main" encoder layers (featurizer adds one more)
N_TOKENS_OUT = 4
CLASSIFIER_DIMS = 128
NUM_CLASSES = 2
CLS_PAD = 128             # classifier logits padded to a full lane width
VOCAB = 100
MAX_POS = 16
LN_EPS = 1e-12
S_PAD = 16                # text(8) + image(1) padded to 16 tokens

ENC_KEYS = ("wqkv", "bqkv", "wo", "bo", "ln1g", "ln1b",
            "w1", "b1", "w2", "b2", "ln2g", "ln2b")

INPUT_ORDER = (
    "text_sum", "patches", "mask_add",
    "emb_lng", "emb_lnb",
    "conv_w", "conv_b", "imfc_w", "imfc_b", "improj_w", "improj_b",
    "img_pos", "img_lng", "img_lnb",
    "e_wqkv", "e_bqkv", "e_wo", "e_bo", "e_ln1g", "e_ln1b",
    "e_w1", "e_b1", "e_w2", "e_b2", "e_ln2g", "e_ln2b",
    "sa_wqkv", "sa_bqkv", "sa_wo", "sa_bo", "d_ln1g", "d_ln1b",
    "ca_wq", "ca_bq", "ca_wkv", "ca_bkv", "ca_wo", "ca_bo", "d_ln2g", "d_ln2b",
    "d_w1", "d_b1", "d_w2", "d_b2", "d_ln3g", "d_ln3b",
    "query_emb", "featout_w", "featout_b", "cls_w", "cls_b",
)
_N_IN = len(INPUT_ORDER)


# --------------------------- in-kernel math helpers ---------------------------
def _layernorm(x, g, b, eps=LN_EPS):
    mu = jnp.mean(x, axis=-1, keepdims=True)
    xc = x - mu
    var = jnp.mean(xc * xc, axis=-1, keepdims=True)
    return xc * jax.lax.rsqrt(var + eps) * g + b


def _gelu(x):
    # tanh-approx GELU (EUP-friendly, f32)
    return 0.5 * x * (1.0 + jnp.tanh(0.7978845608028654 * (x + 0.044715 * x * x * x)))


def _mm(a, w_bf16):
    """(M, K) f32 @ (K, N) bf16 -> (M, N) f32 accumulation on the MXU."""
    return jnp.dot(a.astype(jnp.bfloat16), w_bf16, preferred_element_type=jnp.float32)


def _mha(q3, k3, v3, mask_add, wo_bf16, num_heads):
    """Multi-head attention, batched over B per head, wo accumulated per head.

    q3: (B, T, D) f32   k3/v3: (B, S, D) f32   mask_add: (B, 1, S) f32 or None
    wo_bf16: (D, D) bf16.  Returns (B*T, D) f32 (pre output-bias).
    """
    B, T, D = q3.shape
    hd = D // num_heads
    scale = 1.0 / math.sqrt(hd)
    qb = q3.astype(jnp.bfloat16)
    kb = k3.astype(jnp.bfloat16)
    vb = v3.astype(jnp.bfloat16)
    out = jnp.zeros((B * T, D), jnp.float32)
    for h in range(num_heads):
        lo, hi = h * hd, (h + 1) * hd
        s = jax.lax.dot_general(qb[:, :, lo:hi], kb[:, :, lo:hi],
                                (((2,), (2,)), ((0,), (0,))),
                                preferred_element_type=jnp.float32) * scale   # (B,T,S)
        if mask_add is not None:
            s = s + mask_add
        s = s - jnp.max(s, axis=-1, keepdims=True)
        p = jnp.exp(s)
        p = p * pl.reciprocal(jnp.sum(p, axis=-1, keepdims=True), approx=True)
        ctx = jax.lax.dot_general(p.astype(jnp.bfloat16), vb[:, :, lo:hi],
                                  (((2,), (1,)), ((0,), (0,))),
                                  preferred_element_type=jnp.float32)          # (B,T,hd)
        out = out + jnp.dot(ctx.reshape(B * T, hd).astype(jnp.bfloat16),
                            wo_bf16[lo:hi, :], preferred_element_type=jnp.float32)
    return out


def _encoder_layer(x3, mask_add, w, num_heads):
    B, S, D = x3.shape
    x2 = x3.reshape(B * S, D)
    qkv = _mm(x2, w["wqkv"]) + w["bqkv"]
    qkv3 = qkv.reshape(B, S, 3 * D)
    attn = _mha(qkv3[:, :, :D], qkv3[:, :, D:2 * D], qkv3[:, :, 2 * D:],
                mask_add, w["wo"], num_heads) + w["bo"]
    h1 = _layernorm(x2 + attn, w["ln1g"], w["ln1b"])
    ff = _gelu(_mm(h1, w["w1"]) + w["b1"])
    ff = _mm(ff, w["w2"]) + w["b2"]
    return _layernorm(h1 + ff, w["ln2g"], w["ln2b"]).reshape(B, S, D)


def _decoder_layer(tgt3, mem3, mmask, w, num_heads):
    B, T, D = tgt3.shape
    S = mem3.shape[1]
    t2 = tgt3.reshape(B * T, D)
    # self-attention over target query tokens (no mask)
    qkv = _mm(t2, w["sa_wqkv"]) + w["sa_bqkv"]
    qkv3 = qkv.reshape(B, T, 3 * D)
    sa = _mha(qkv3[:, :, :D], qkv3[:, :, D:2 * D], qkv3[:, :, 2 * D:],
              None, w["sa_wo"], num_heads) + w["sa_bo"]
    h1 = _layernorm(t2 + sa, w["ln1g"], w["ln1b"])
    # cross-attention to encoder memory (additive key mask)
    q = _mm(h1, w["ca_wq"]) + w["ca_bq"]
    kv = _mm(mem3.reshape(B * S, D), w["ca_wkv"]) + w["ca_bkv"]
    kv3 = kv.reshape(B, S, 2 * D)
    ca = _mha(q.reshape(B, T, D), kv3[:, :, :D], kv3[:, :, D:],
              mmask, w["ca_wo"], num_heads) + w["ca_bo"]
    h2 = _layernorm(h1 + ca, w["ln2g"], w["ln2b"])
    ff = _gelu(_mm(h2, w["w1"]) + w["b1"])
    ff = _mm(ff, w["w2"]) + w["b2"]
    return _layernorm(h2 + ff, w["ln3g"], w["ln3b"])     # (B*T, D)


# --------------------------------- mega kernel --------------------------------
def mega_kernel(*refs):
    r = {name: refs[i] for i, name in enumerate(INPUT_ORDER)}
    vec_out = refs[_N_IN]
    pooled_out = refs[_N_IN + 1]
    logits_out = refs[_N_IN + 2]
    x_scr = refs[_N_IN + 3]

    B, T_text, D = r["text_sum"].shape
    S = x_scr.shape[1]

    # ---- text embeddings: (word + pos + type) LayerNorm ---------------------
    text = _layernorm(r["text_sum"][...].reshape(B * T_text, D),
                      r["emb_lng"][...], r["emb_lnb"][...])

    # ---- image branch: im2col conv + ReLU + GAP + fc + proj + pos + LN ------
    _, P, K = r["patches"].shape
    pat = r["patches"][...].reshape(B * P, K)
    y = jnp.maximum(_mm(pat, r["conv_w"][...]) + r["conv_b"][...], 0.0)
    pooled_im = jnp.mean(y.reshape(B, P, y.shape[-1]), axis=1)          # (B, CONV_OUT)
    im_repr = _mm(pooled_im, r["imfc_w"][...]) + r["imfc_b"][...]       # (B, IMAGE_DIM)
    img_tok = _mm(im_repr, r["improj_w"][...]) + r["improj_b"][...]     # (B, D)
    img_tok = _layernorm(img_tok + r["img_pos"][...],
                         r["img_lng"][...], r["img_lnb"][...])

    # ---- assemble padded (B, S_pad, D) token sequence in VMEM ---------------
    x_scr[...] = jnp.zeros((B, S, D), jnp.float32)
    x_scr[:, :T_text, :] = text.reshape(B, T_text, D)
    x_scr[:, T_text:T_text + 1, :] = img_tok[:, None, :]
    h = x_scr[...]

    mask_add = r["mask_add"][...]                                        # (B, 1, S)

    # ---- encoder stack: 2 main layers + 1 featurizer encoder ----------------
    for l in range(r["e_wqkv"].shape[0]):
        lw = {k: r["e_" + k][l] for k in ENC_KEYS}
        h = _encoder_layer(h, mask_add, lw, NUM_HEADS)

    # ---- featurizer decoder over learned query tokens -----------------------
    dw = dict(
        sa_wqkv=r["sa_wqkv"][...], sa_bqkv=r["sa_bqkv"][...],
        sa_wo=r["sa_wo"][...], sa_bo=r["sa_bo"][...],
        ln1g=r["d_ln1g"][...], ln1b=r["d_ln1b"][...],
        ca_wq=r["ca_wq"][...], ca_bq=r["ca_bq"][...],
        ca_wkv=r["ca_wkv"][...], ca_bkv=r["ca_bkv"][...],
        ca_wo=r["ca_wo"][...], ca_bo=r["ca_bo"][...],
        ln2g=r["d_ln2g"][...], ln2b=r["d_ln2b"][...],
        w1=r["d_w1"][...], b1=r["d_b1"][...],
        w2=r["d_w2"][...], b2=r["d_b2"][...],
        ln3g=r["d_ln3g"][...], ln3b=r["d_ln3b"][...],
    )
    T_out = r["query_emb"].shape[0]
    tgt = jnp.broadcast_to(r["query_emb"][...][None], (B, T_out, D))
    dec = _decoder_layer(tgt, h, mask_add, dw, NUM_HEADS)                # (B*T_out, D)

    # ---- tail: feature projection, token-mean pool, padded classifier -------
    vec = _mm(dec, r["featout_w"][...]) + r["featout_b"][...]            # (B*T_out, C)
    vec_out[...] = vec
    pooled = jnp.mean(vec.reshape(B, T_out, vec.shape[-1]), axis=1)      # (B, C)
    pooled_out[...] = pooled
    logits_out[...] = _mm(pooled, r["cls_w"][...]) + r["cls_b"][...]     # (B, CLS_PAD)


def mega_forward(flat_inputs):
    out_shape = (
        jax.ShapeDtypeStruct((BATCH * N_TOKENS_OUT, CLASSIFIER_DIMS), jnp.float32),
        jax.ShapeDtypeStruct((BATCH, CLASSIFIER_DIMS), jnp.float32),
        jax.ShapeDtypeStruct((BATCH, CLS_PAD), jnp.float32),
    )
    # Everything fits comfortably in VMEM (<4 MiB), so no grid / pipelining:
    # each operand is mapped whole into VMEM and the kernel runs once.
    return pl.pallas_call(
        mega_kernel,
        out_shape=out_shape,
        scratch_shapes=[pltpu.VMEM((BATCH, S_PAD, EMBED_DIM), jnp.float32)],
    )(*flat_inputs)


# --------------------------- params / input packing ---------------------------
def _dense(key, shape):
    return 0.02 * jax.random.normal(key, shape, dtype=jnp.float32)


def _init_encoder_layer(key, D, F):
    ks = jax.random.split(key, 4)
    z = lambda n: jnp.zeros((1, n), jnp.float32)
    o = lambda n: jnp.ones((1, n), jnp.float32)
    return dict(wqkv=_dense(ks[0], (D, 3 * D)), bqkv=z(3 * D),
                wo=_dense(ks[1], (D, D)), bo=z(D),
                ln1g=o(D), ln1b=z(D),
                w1=_dense(ks[2], (D, F)), b1=z(F),
                w2=_dense(ks[3], (F, D)), b2=z(D),
                ln2g=o(D), ln2b=z(D))


def _init_decoder_layer(key, D, F):
    ks = jax.random.split(key, 7)
    z = lambda n: jnp.zeros((1, n), jnp.float32)
    o = lambda n: jnp.ones((1, n), jnp.float32)
    return dict(sa_wqkv=_dense(ks[0], (D, 3 * D)), sa_bqkv=z(3 * D),
                sa_wo=_dense(ks[1], (D, D)), sa_bo=z(D),
                ln1g=o(D), ln1b=z(D),
                ca_wq=_dense(ks[2], (D, D)), ca_bq=z(D),
                ca_wkv=_dense(ks[3], (D, 2 * D)), ca_bkv=z(2 * D),
                ca_wo=_dense(ks[4], (D, D)), ca_bo=z(D),
                ln2g=o(D), ln2b=z(D),
                w1=_dense(ks[5], (D, F)), b1=z(F),
                w2=_dense(ks[6], (F, D)), b2=z(D),
                ln3g=o(D), ln3b=z(D))


def init_params(key):
    D = EMBED_DIM
    keys = jax.random.split(key, 16)
    z = lambda n: jnp.zeros((1, n), jnp.float32)
    o = lambda n: jnp.ones((1, n), jnp.float32)
    return dict(
        word_emb=_dense(keys[0], (VOCAB, D)),
        pos_emb=_dense(keys[1], (MAX_POS, D)),
        type_emb=_dense(keys[2], (2, D)),
        emb_lng=o(D), emb_lnb=z(D),
        conv_w=_dense(keys[3], (27, CONV_OUT)), conv_b=z(CONV_OUT),
        im_fc_w=_dense(keys[4], (CONV_OUT, IMAGE_DIM)), im_fc_b=z(IMAGE_DIM),
        im_proj_w=_dense(keys[5], (IMAGE_DIM, D)), im_proj_b=z(D),
        img_lng=o(D), img_lnb=z(D),
        encoder_layers=[_init_encoder_layer(keys[6 + i], D, FF_DIM)
                        for i in range(N_ENC_LAYERS)],
        feat_enc=_init_encoder_layer(keys[9], D, FF_DIM),
        feat_dec=_init_decoder_layer(keys[10], D, FF_DIM),
        query_emb=_dense(keys[11], (N_TOKENS_OUT, D)),
        feat_out_w=_dense(keys[12], (D, CLASSIFIER_DIMS)), feat_out_b=z(CLASSIFIER_DIMS),
        cls_w=_dense(keys[13], (CLASSIFIER_DIMS, NUM_CLASSES)), cls_b=z(NUM_CLASSES),
    )


def pack_inputs(params, text_sum, patches, mask_add, img_pos):
    """Build the flat kernel operand list (matmul weights bf16, rest f32)."""
    bf = lambda x: x.astype(jnp.bfloat16)
    enc_all = list(params["encoder_layers"]) + [params["feat_enc"]]

    d = {
        "text_sum": text_sum.astype(jnp.float32),
        "patches": patches.astype(jnp.float32),
        "mask_add": mask_add.astype(jnp.float32),
        "emb_lng": params["emb_lng"], "emb_lnb": params["emb_lnb"],
        "conv_w": bf(jnp.pad(params["conv_w"],
                             ((0, KP - params["conv_w"].shape[0]), (0, 0)))),
        "conv_b": params["conv_b"],
        "imfc_w": bf(params["im_fc_w"]), "imfc_b": params["im_fc_b"],
        "improj_w": bf(params["im_proj_w"]), "improj_b": params["im_proj_b"],
        "img_pos": img_pos,
        "img_lng": params["img_lng"], "img_lnb": params["img_lnb"],
        "query_emb": params["query_emb"],
        "featout_w": bf(params["feat_out_w"]), "featout_b": params["feat_out_b"],
        "cls_w": bf(jnp.pad(params["cls_w"], ((0, 0), (0, CLS_PAD - NUM_CLASSES)))),
        "cls_b": jnp.pad(params["cls_b"], ((0, 0), (0, CLS_PAD - NUM_CLASSES))),
    }
    for k in ("wqkv", "wo", "w1", "w2"):
        d["e_" + k] = jnp.stack([bf(lp[k]) for lp in enc_all])
    for k in ("bqkv", "bo", "ln1g", "ln1b", "b1", "b2", "ln2g", "ln2b"):
        d["e_" + k] = jnp.stack([lp[k] for lp in enc_all])
    dp = params["feat_dec"]
    d.update({
        "sa_wqkv": bf(dp["sa_wqkv"]), "sa_bqkv": dp["sa_bqkv"],
        "sa_wo": bf(dp["sa_wo"]), "sa_bo": dp["sa_bo"],
        "d_ln1g": dp["ln1g"], "d_ln1b": dp["ln1b"],
        "ca_wq": bf(dp["ca_wq"]), "ca_bq": dp["ca_bq"],
        "ca_wkv": bf(dp["ca_wkv"]), "ca_bkv": dp["ca_bkv"],
        "ca_wo": bf(dp["ca_wo"]), "ca_bo": dp["ca_bo"],
        "d_ln2g": dp["ln2g"], "d_ln2b": dp["ln2b"],
        "d_w1": bf(dp["w1"]), "d_b1": dp["b1"],
        "d_w2": bf(dp["w2"]), "d_b2": dp["b2"],
        "d_ln3g": dp["ln3g"], "d_ln3b": dp["ln3b"],
    })
    assert set(d) == set(INPUT_ORDER), set(d) ^ set(INPUT_ORDER)
    return [d[k] for k in INPUT_ORDER]


def extract_patches_3x3_s2(img_nhwc):
    """im2col for a 3x3 / stride-2 / pad-1 conv: (B,H,W,C) -> (B,(H//2)*(W//2),9*C)."""
    B, H, W, C = img_nhwc.shape
    pad = jnp.pad(img_nhwc, ((0, 0), (1, 1), (1, 1), (0, 0)))
    cols = []
    for di in range(3):
        for dj in range(3):
            cols.append(pad[:, di:di + H:2, dj:dj + W:2, :])   # (B, H//2, W//2, C)
    patches = jnp.stack(cols, axis=3)                          # (B, H//2, W//2, 9, C)
    return patches.reshape(B, (H // 2) * (W // 2), 9 * C)


# ------------------------------- model forward --------------------------------
def transformer_image_v2_forward(params, input_ids, attention_mask, img_nchw, labels):
    """Eval-mode forward. Returns (logits, vectors.mean(1), vectors, loss)."""
    B, T_text = input_ids.shape

    # Text embedding gather stays in JAX; its LayerNorm runs inside the kernel.
    we = params["word_emb"][input_ids]                        # (B, T, D)
    pe = params["pos_emb"][:T_text][None]                     # (1, T, D)
    te = params["type_emb"][0][None, None]                    # (1, 1, D)
    text_sum = we + pe + te
    img_pos = params["pos_emb"][T_text:T_text + 1]            # (1, D)

    # Image im2col patches (padded to a lane-friendly K).
    img_nhwc = jnp.transpose(img_nchw, (0, 2, 3, 1)).astype(jnp.float32)
    patches = extract_patches_3x3_s2(img_nhwc)                # (B, 64, 27)
    patches = jnp.pad(patches, ((0, 0), (0, 0), (0, KP - patches.shape[-1])))

    # Additive attention mask padded to S_PAD (text + image + padding tokens).
    mask_full = jnp.concatenate(
        [attention_mask.astype(jnp.float32),
         jnp.ones((B, 1), jnp.float32),
         jnp.zeros((B, S_PAD - T_text - 1), jnp.float32)], axis=1)
    mask_add = ((1.0 - mask_full) * -10000.0)[:, None, :]     # (B, 1, S_PAD)

    flat = pack_inputs(params, text_sum, patches, mask_add, img_pos)
    vec_flat, pooled, logits_pad = mega_forward(flat)

    vectors = vec_flat.reshape(B, N_TOKENS_OUT, CLASSIFIER_DIMS)
    logits = logits_pad[:, :NUM_CLASSES]
    logp = jax.nn.log_softmax(logits, axis=-1)
    loss = -jnp.mean(jnp.take_along_axis(logp, labels[:, None], axis=1))
    return logits, pooled, vectors, loss


# ------------------------------------ main -------------------------------------
if __name__ == "__main__":
    root = jax.random.PRNGKey(0)
    k_params, k_img, k_ids = jax.random.split(root, 3)

    params = init_params(k_params)

    img = jax.random.normal(k_img, (BATCH, 3, 16, 16), dtype=jnp.float32)   # NCHW
    input_ids = jax.random.randint(k_ids, (BATCH, N_TOKENS_IN), 0, VOCAB, dtype=jnp.int32)
    lengths = jnp.array([N_TOKENS_IN, 5], dtype=jnp.int32)
    attention_mask = (jnp.arange(N_TOKENS_IN)[None, :] < lengths[:, None]).astype(jnp.int32)
    labels = jnp.array([0, 1], dtype=jnp.int32)

    fwd = jax.jit(transformer_image_v2_forward)
    out = jax.block_until_ready(fwd(params, input_ids, attention_mask, img, labels))

    logits, mean_vec, vectors, loss = out
    assert logits.shape == (BATCH, NUM_CLASSES)
    assert mean_vec.shape == (BATCH, CLASSIFIER_DIMS)
    assert vectors.shape == (BATCH, N_TOKENS_OUT, CLASSIFIER_DIMS)
    assert loss.shape == ()
    assert bool(jnp.all(jnp.isfinite(logits))) and bool(jnp.isfinite(loss))
    print("KERNEL_OK")
</pallas_src>

<mosaic_0001>
module attributes {stable_mosaic.version = 11 : i64} {
  func.func @mega_kernel(%arg0: memref<2x8x128xf32, #tpu.memory_space<vmem>>, %arg1: memref<2x64x32xf32, #tpu.memory_space<vmem>>, %arg2: memref<2x1x16xf32, #tpu.memory_space<vmem>>, %arg3: memref<1x128xf32, #tpu.memory_space<vmem>>, %arg4: memref<1x128xf32, #tpu.memory_space<vmem>>, %arg5: memref<32x16xbf16, #tpu.memory_space<vmem>>, %arg6: memref<1x16xf32, #tpu.memory_space<vmem>>, %arg7: memref<16x64xbf16, #tpu.memory_space<vmem>>, %arg8: memref<1x64xf32, #tpu.memory_space<vmem>>, %arg9: memref<64x128xbf16, #tpu.memory_space<vmem>>, %arg10: memref<1x128xf32, #tpu.memory_space<vmem>>, %arg11: memref<1x128xf32, #tpu.memory_space<vmem>>, %arg12: memref<1x128xf32, #tpu.memory_space<vmem>>, %arg13: memref<1x128xf32, #tpu.memory_space<vmem>>, %arg14: memref<3x128x384xbf16, #tpu.memory_space<vmem>>, %arg15: memref<3x1x384xf32, #tpu.memory_space<vmem>>, %arg16: memref<3x128x128xbf16, #tpu.memory_space<vmem>>, %arg17: memref<3x1x128xf32, #tpu.memory_space<vmem>>, %arg18: memref<3x1x128xf32, #tpu.memory_space<vmem>>, %arg19: memref<3x1x128xf32, #tpu.memory_space<vmem>>, %arg20: memref<3x128x512xbf16, #tpu.memory_space<vmem>>, %arg21: memref<3x1x512xf32, #tpu.memory_space<vmem>>, %arg22: memref<3x512x128xbf16, #tpu.memory_space<vmem>>, %arg23: memref<3x1x128xf32, #tpu.memory_space<vmem>>, %arg24: memref<3x1x128xf32, #tpu.memory_space<vmem>>, %arg25: memref<3x1x128xf32, #tpu.memory_space<vmem>>, %arg26: memref<128x384xbf16, #tpu.memory_space<vmem>>, %arg27: memref<1x384xf32, #tpu.memory_space<vmem>>, %arg28: memref<128x128xbf16, #tpu.memory_space<vmem>>, %arg29: memref<1x128xf32, #tpu.memory_space<vmem>>, %arg30: memref<1x128xf32, #tpu.memory_space<vmem>>, %arg31: memref<1x128xf32, #tpu.memory_space<vmem>>, %arg32: memref<128x128xbf16, #tpu.memory_space<vmem>>, %arg33: memref<1x128xf32, #tpu.memory_space<vmem>>, %arg34: memref<128x256xbf16, #tpu.memory_space<vmem>>, %arg35: memref<1x256xf32, #tpu.memory_space<vmem>>, %arg36: memref<128x128xbf16, #tpu.memory_space<vmem>>, %arg37: memref<1x128xf32, #tpu.memory_space<vmem>>, %arg38: memref<1x128xf32, #tpu.memory_space<vmem>>, %arg39: memref<1x128xf32, #tpu.memory_space<vmem>>, %arg40: memref<128x512xbf16, #tpu.memory_space<vmem>>, %arg41: memref<1x512xf32, #tpu.memory_space<vmem>>, %arg42: memref<512x128xbf16, #tpu.memory_space<vmem>>, %arg43: memref<1x128xf32, #tpu.memory_space<vmem>>, %arg44: memref<1x128xf32, #tpu.memory_space<vmem>>, %arg45: memref<1x128xf32, #tpu.memory_space<vmem>>, %arg46: memref<4x128xf32, #tpu.memory_space<vmem>>, %arg47: memref<128x128xbf16, #tpu.memory_space<vmem>>, %arg48: memref<1x128xf32, #tpu.memory_space<vmem>>, %arg49: memref<128x128xbf16, #tpu.memory_space<vmem>>, %arg50: memref<1x128xf32, #tpu.memory_space<vmem>>, %arg51: memref<8x128xf32, #tpu.memory_space<vmem>>, %arg52: memref<2x128xf32, #tpu.memory_space<vmem>>, %arg53: memref<2x128xf32, #tpu.memory_space<vmem>>, %arg54: memref<2x16x128xf32, #tpu.memory_space<vmem>>) attributes {dimension_semantics = [], scalar_prefetch = 0 : i64, scratch_operands = 1 : i64, tpu.core_type = #tpu.core_type<tc>} {
    %c0 = arith.constant 0 : index
    %c0_0 = arith.constant 0 : index
    %c0_1 = arith.constant 0 : index
    %0 = vector.load %arg0[%c0, %c0_0, %c0_1] : memref<2x8x128xf32, #tpu.memory_space<vmem>>, vector<2x8x128xf32>
    %1 = vector.shape_cast %0 : vector<2x8x128xf32> to vector<16x128xf32>
    %c0_2 = arith.constant 0 : index
    %c0_3 = arith.constant 0 : index
    %2 = vector.load %arg3[%c0_2, %c0_3] : memref<1x128xf32, #tpu.memory_space<vmem>>, vector<1x128xf32>
    %c0_4 = arith.constant 0 : index
    %c0_5 = arith.constant 0 : index
    %3 = vector.load %arg4[%c0_4, %c0_5] : memref<1x128xf32, #tpu.memory_space<vmem>>, vector<1x128xf32>
    %cst = arith.constant dense<0.000000e+00> : vector<16xf32>
    %4 = vector.multi_reduction <add>, %1, %cst [1] : vector<16x128xf32> to vector<16xf32>
    %5 = vector.shape_cast %4 : vector<16xf32> to vector<16x1xf32>
    %cst_6 = arith.constant 1.280000e+02 : f32
    %6 = vector.broadcast %cst_6 : f32 to vector<16x1xf32>
    %7 = arith.divf %5, %6 : vector<16x1xf32>
    %8 = vector.broadcast %7 : vector<16x1xf32> to vector<16x128xf32>
    %9 = arith.subf %1, %8 : vector<16x128xf32>
    %10 = arith.mulf %9, %9 : vector<16x128xf32>
    %cst_7 = arith.constant dense<0.000000e+00> : vector<16xf32>
    %11 = vector.multi_reduction <add>, %10, %cst_7 [1] : vector<16x128xf32> to vector<16xf32>
    %12 = vector.shape_cast %11 : vector<16xf32> to vector<16x1xf32>
    %cst_8 = arith.constant 1.280000e+02 : f32
    %13 = vector.broadcast %cst_8 : f32 to vector<16x1xf32>
    %14 = arith.divf %12, %13 : vector<16x1xf32>
    %cst_9 = arith.constant 9.99999996E-13 : f32
    %15 = vector.broadcast %cst_9 : f32 to vector<16x1xf32>
    %16 = arith.addf %14, %15 : vector<16x1xf32>
    %17 = math.rsqrt %16 : vector<16x1xf32>
    %18 = vector.broadcast %17 : vector<16x1xf32> to vector<16x128xf32>
    %19 = arith.mulf %9, %18 : vector<16x128xf32>
    %20 = vector.broadcast %2 : vector<1x128xf32> to vector<16x128xf32>
    %21 = arith.mulf %19, %20 : vector<16x128xf32>
    %22 = vector.broadcast %3 : vector<1x128xf32> to vector<16x128xf32>
    %23 = arith.addf %21, %22 : vector<16x128xf32>
    %c0_10 = arith.constant 0 : index
    %c0_11 = arith.constant 0 : index
    %c0_12 = arith.constant 0 : index
    %24 = vector.load %arg1[%c0_10, %c0_11, %c0_12] : memref<2x64x32xf32, #tpu.memory_space<vmem>>, vector<2x64x32xf32>
    %25 = vector.shape_cast %24 : vector<2x64x32xf32> to vector<128x32xf32>
    %c0_13 = arith.constant 0 : index
    %c0_14 = arith.constant 0 : index
    %26 = vector.load %arg5[%c0_13, %c0_14] : memref<32x16xbf16, #tpu.memory_space<vmem>>, vector<32x16xbf16>
    %27 = arith.truncf %25 : vector<128x32xf32> to vector<128x32xbf16>
    %cst_15 = arith.constant dense<0.000000e+00> : vector<128x16xf32>
    %28 = tpu.matmul %27, %26, %cst_15 {dimension_numbers = #tpu.dot_dimension_numbers<[1], [0], [0], [1], [0, 0, 1, 1], [], []>} : vector<128x32xbf16>, vector<32x16xbf16>, vector<128x16xf32> -> vector<128x16xf32>
    %c0_16 = arith.constant 0 : index
    %c0_17 = arith.constant 0 : index
    %29 = vector.load %arg6[%c0_16, %c0_17] : memref<1x16xf32, #tpu.memory_space<vmem>>, vector<1x16xf32>
    %30 = vector.broadcast %29 : vector<1x16xf32> to vector<128x16xf32>
    %31 = arith.addf %28, %30 : vector<128x16xf32>
    %cst_18 = arith.constant 0.000000e+00 : f32
    %32 = vector.broadcast %cst_18 : f32 to vector<128x16xf32>
    %33 = arith.maximumf %31, %32 : vector<128x16xf32>
    %34 = vector.shape_cast %33 : vector<128x16xf32> to vector<2x64x16xf32>
    %cst_19 = arith.constant dense<0.000000e+00> : vector<2x16xf32>
    %35 = vector.multi_reduction <add>, %34, %cst_19 [1] : vector<2x64x16xf32> to vector<2x16xf32>
    %cst_20 = arith.constant 6.400000e+01 : f32
    %36 = vector.broadcast %cst_20 : f32 to vector<2x16xf32>
    %37 = arith.divf %35, %36 : vector<2x16xf32>
    %c0_21 = arith.constant 0 : index
    %c0_22 = arith.constant 0 : index
    %38 = vector.load %arg7[%c0_21, %c0_22] : memref<16x64xbf16, #tpu.memory_space<vmem>>, vector<16x64xbf16>
    %39 = arith.truncf %37 : vector<2x16xf32> to vector<2x16xbf16>
    %cst_23 = arith.constant dense<0.000000e+00> : vector<2x64xf32>
    %40 = tpu.matmul %39, %38, %cst_23 {dimension_numbers = #tpu.dot_dimension_numbers<[1], [0], [0], [1], [0, 0, 1, 1], [], []>} : vector<2x16xbf16>, vector<16x64xbf16>, vector<2x64xf32> -> vector<2x64xf32>
    %c0_24 = arith.constant 0 : index
    %c0_25 = arith.constant 0 : index
    %41 = vector.load %arg8[%c0_24, %c0_25] : memref<1x64xf32, #tpu.memory_space<vmem>>, vector<1x64xf32>
    %42 = vector.broadcast %41 : vector<1x64xf32> to vector<2x64xf32>
    %43 = arith.addf %40, %42 : vector<2x64xf32>
    %c0_26 = arith.constant 0 : index
    %c0_27 = arith.constant 0 : index
    %44 = vector.load %arg9[%c0_26, %c0_27] : memref<64x128xbf16, #tpu.memory_space<vmem>>, vector<64x128xbf16>
    %45 = arith.truncf %43 : vector<2x64xf32> to vector<2x64xbf16>
    %cst_28 = arith.constant dense<0.000000e+00> : vector<2x128xf32>
    %46 = tpu.matmul %45, %44, %cst_28 {dimension_numbers = #tpu.dot_dimension_numbers<[1], [0], [0], [1], [0, 0, 1, 1], [], []>} : vector<2x64xbf16>, vector<64x128xbf16>, vector<2x128xf32> -> vector<2x128xf32>
    %c0_29 = arith.constant 0 : index
    %c0_30 = arith.constant 0 : index
    %47 = vector.load %arg10[%c0_29, %c0_30] : memref<1x128xf32, #tpu.memory_space<vmem>>, vector<1x128xf32>
    %48 = vector.broadcast %47 : vector<1x128xf32> to vector<2x128xf32>
    %49 = arith.addf %46, %48 : vector<2x128xf32>
    %c0_31 = arith.constant 0 : index
    %c0_32 = arith.constant 0 : index
    %50 = vector.load %arg11[%c0_31, %c0_32] : memref<1x128xf32, #tpu.memory_space<vmem>>, vector<1x128xf32>
    %51 = vector.broadcast %50 : vector<1x128xf32> to vector<2x128xf32>
    %52 = arith.addf %49, %51 : vector<2x128xf32>
    %c0_33 = arith.constant 0 : index
    %c0_34 = arith.constant 0 : index
    %53 = vector.load %arg12[%c0_33, %c0_34] : memref<1x128xf32, #tpu.memory_space<vmem>>, vector<1x128xf32>
    %c0_35 = arith.constant 0 : index
    %c0_36 = arith.constant 0 : index
    %54 = vector.load %arg13[%c0_35, %c0_36] : memref<1x128xf32, #tpu.memory_space<vmem>>, vector<1x128xf32>
    %cst_37 = arith.constant dense<0.000000e+00> : vector<2xf32>
    %55 = vector.multi_reduction <add>, %52, %cst_37 [1] : vector<2x128xf32> to vector<2xf32>
    %56 = vector.shape_cast %55 : vector<2xf32> to vector<2x1xf32>
    %cst_38 = arith.constant 1.280000e+02 : f32
    %57 = vector.broadcast %cst_38 : f32 to vector<2x1xf32>
    %58 = arith.divf %56, %57 : vector<2x1xf32>
    %59 = vector.broadcast %58 : vector<2x1xf32> to vector<2x128xf32>
    %60 = arith.subf %52, %59 : vector<2x128xf32>
    %61 = arith.mulf %60, %60 : vector<2x128xf32>
    %cst_39 = arith.constant dense<0.000000e+00> : vector<2xf32>
    %62 = vector.multi_reduction <add>, %61, %cst_39 [1] : vector<2x128xf32> to vector<2xf32>
    %63 = vector.shape_cast %62 : vector<2xf32> to vector<2x1xf32>
    %cst_40 = arith.constant 1.280000e+02 : f32
    %64 = vector.broadcast %cst_40 : f32 to vector<2x1xf32>
    %65 = arith.divf %63, %64 : vector<2x1xf32>
    %cst_41 = arith.constant 9.99999996E-13 : f32
    %66 = vector.broadcast %cst_41 : f32 to vector<2x1xf32>
    %67 = arith.addf %65, %66 : vector<2x1xf32>
    %68 = math.rsqrt %67 : vector<2x1xf32>
    %69 = vector.broadcast %68 : vector<2x1xf32> to vector<2x128xf32>
    %70 = arith.mulf %60, %69 : vector<2x128xf32>
    %71 = vector.broadcast %53 : vector<1x128xf32> to vector<2x128xf32>
    %72 = arith.mulf %70, %71 : vector<2x128xf32>
    %73 = vector.broadcast %54 : vector<1x128xf32> to vector<2x128xf32>
    %74 = arith.addf %72, %73 : vector<2x128xf32>
    %cst_42 = arith.constant 0.000000e+00 : f32
    %75 = vector.broadcast %cst_42 : f32 to vector<2x16x128xf32>
    %c0_43 = arith.constant 0 : index
    %c0_44 = arith.constant 0 : index
    %c0_45 = arith.constant 0 : index
    %76 = vector.load %arg54[%c0_43, %c0_44, %c0_45] : memref<2x16x128xf32, #tpu.memory_space<vmem>>, vector<2x16x128xf32>
    tpu.vector_store %arg54[%c0_43, %c0_44, %c0_45], %75 {strides = array<i32>} : memref<2x16x128xf32, #tpu.memory_space<vmem>>, vector<2x16x128xf32>,
    %77 = vector.shape_cast %23 : vector<16x128xf32> to vector<2x8x128xf32>
    %c0_46 = arith.constant 0 : index
    %c0_47 = arith.constant 0 : index
    %c0_48 = arith.constant 0 : index
    %78 = vector.load %arg54[%c0_46, %c0_47, %c0_48] : memref<2x16x128xf32, #tpu.memory_space<vmem>>, vector<2x8x128xf32>
    tpu.vector_store %arg54[%c0_46, %c0_47, %c0_48], %77 {strides = array<i32>} : memref<2x16x128xf32, #tpu.memory_space<vmem>>, vector<2x8x128xf32>,
    %79 = vector.shape_cast %74 : vector<2x128xf32> to vector<2x1x128xf32>
    %c0_49 = arith.constant 0 : index
    %c8 = arith.constant 8 : index
    %c0_50 = arith.constant 0 : index
    %80 = vector.load %arg54[%c0_49, %c8, %c0_50] : memref<2x16x128xf32, #tpu.memory_space<vmem>>, vector<2x1x128xf32>
    tpu.vector_store %arg54[%c0_49, %c8, %c0_50], %79 {strides = array<i32>} : memref<2x16x128xf32, #tpu.memory_space<vmem>>, vector<2x1x128xf32>,
    %c0_51 = arith.constant 0 : index
    %c0_52 = arith.constant 0 : index
    %c0_53 = arith.constant 0 : index
    %81 = vector.load %arg54[%c0_51, %c0_52, %c0_53] : memref<2x16x128xf32, #tpu.memory_space<vmem>>, vector<2x16x128xf32>
    %c0_54 = arith.constant 0 : index
    %c0_55 = arith.constant 0 : index
    %c0_56 = arith.constant 0 : index
    %82 = vector.load %arg2[%c0_54, %c0_55, %c0_56] : memref<2x1x16xf32, #tpu.memory_space<vmem>>, vector<2x1x16xf32>
    %c0_57 = arith.constant 0 : index
    %c0_58 = arith.constant 0 : index
    %c0_59 = arith.constant 0 : index
    %83 = vector.load %arg14[%c0_57, %c0_58, %c0_59] : memref<3x128x384xbf16, #tpu.memory_space<vmem>>, vector<1x128x384xbf16>
    %84 = vector.shape_cast %83 : vector<1x128x384xbf16> to vector<128x384xbf16>
    %c0_60 = arith.constant 0 : index
    %c0_61 = arith.constant 0 : index
    %c0_62 = arith.constant 0 : index
    %85 = vector.load %arg15[%c0_60, %c0_61, %c0_62] : memref<3x1x384xf32, #tpu.memory_space<vmem>>, vector<1x1x384xf32>
    %86 = vector.shape_cast %85 : vector<1x1x384xf32> to vector<1x384xf32>
    %c0_63 = arith.constant 0 : index
    %c0_64 = arith.constant 0 : index
    %c0_65 = arith.constant 0 : index
    %87 = vector.load %arg16[%c0_63, %c0_64, %c0_65] : memref<3x128x128xbf16, #tpu.memory_space<vmem>>, vector<1x128x128xbf16>
    %88 = vector.shape_cast %87 : vector<1x128x128xbf16> to vector<128x128xbf16>
    %c0_66 = arith.constant 0 : index
    %c0_67 = arith.constant 0 : index
    %c0_68 = arith.constant 0 : index
    %89 = vector.load %arg17[%c0_66, %c0_67, %c0_68] : memref<3x1x128xf32, #tpu.memory_space<vmem>>, vector<1x1x128xf32>
    %90 = vector.shape_cast %89 : vector<1x1x128xf32> to vector<1x128xf32>
    %c0_69 = arith.constant 0 : index
    %c0_70 = arith.constant 0 : index
    %c0_71 = arith.constant 0 : index
    %91 = vector.load %arg18[%c0_69, %c0_70, %c0_71] : memref<3x1x128xf32, #tpu.memory_space<vmem>>, vector<1x1x128xf32>
    %92 = vector.shape_cast %91 : vector<1x1x128xf32> to vector<1x128xf32>
    %c0_72 = arith.constant 0 : index
    %c0_73 = arith.constant 0 : index
    %c0_74 = arith.constant 0 : index
    %93 = vector.load %arg19[%c0_72, %c0_73, %c0_74] : memref<3x1x128xf32, #tpu.memory_space<vmem>>, vector<1x1x128xf32>
    %94 = vector.shape_cast %93 : vector<1x1x128xf32> to vector<1x128xf32>
    %c0_75 = arith.constant 0 : index
    %c0_76 = arith.constant 0 : index
    %c0_77 = arith.constant 0 : index
    %95 = vector.load %arg20[%c0_75, %c0_76, %c0_77] : memref<3x128x512xbf16, #tpu.memory_space<vmem>>, vector<1x128x512xbf16>
    %96 = vector.shape_cast %95 : vector<1x128x512xbf16> to vector<128x512xbf16>
    %c0_78 = arith.constant 0 : index
    %c0_79 = arith.constant 0 : index
    %c0_80 = arith.constant 0 : index
    %97 = vector.load %arg21[%c0_78, %c0_79, %c0_80] : memref<3x1x512xf32, #tpu.memory_space<vmem>>, vector<1x1x512xf32>
    %98 = vector.shape_cast %97 : vector<1x1x512xf32> to vector<1x512xf32>
    %c0_81 = arith.constant 0 : index
    %c0_82 = arith.constant 0 : index
    %c0_83 = arith.constant 0 : index
    %99 = vector.load %arg22[%c0_81, %c0_82, %c0_83] : memref<3x512x128xbf16, #tpu.memory_space<vmem>>, vector<1x512x128xbf16>
    %100 = vector.shape_cast %99 : vector<1x512x128xbf16> to vector<512x128xbf16>
    %c0_84 = arith.constant 0 : index
    %c0_85 = arith.constant 0 : index
    %c0_86 = arith.constant 0 : index
    %101 = vector.load %arg23[%c0_84, %c0_85, %c0_86] : memref<3x1x128xf32, #tpu.memory_space<vmem>>, vector<1x1x128xf32>
    %102 = vector.shape_cast %101 : vector<1x1x128xf32> to vector<1x128xf32>
    %c0_87 = arith.constant 0 : index
    %c0_88 = arith.constant 0 : index
    %c0_89 = arith.constant 0 : index
    %103 = vector.load %arg24[%c0_87, %c0_88, %c0_89] : memref<3x1x128xf32, #tpu.memory_space<vmem>>, vector<1x1x128xf32>
    %104 = vector.shape_cast %103 : vector<1x1x128xf32> to vector<1x128xf32>
    %c0_90 = arith.constant 0 : index
    %c0_91 = arith.constant 0 : index
    %c0_92 = arith.constant 0 : index
    %105 = vector.load %arg25[%c0_90, %c0_91, %c0_92] : memref<3x1x128xf32, #tpu.memory_space<vmem>>, vector<1x1x128xf32>
    %106 = vector.shape_cast %105 : vector<1x1x128xf32> to vector<1x128xf32>
    %107 = vector.shape_cast %81 : vector<2x16x128xf32> to vector<32x128xf32>
    %108 = arith.truncf %107 : vector<32x128xf32> to vector<32x128xbf16>
    %cst_93 = arith.constant dense<0.000000e+00> : vector<32x384xf32>
    %109 = tpu.matmul %108, %84, %cst_93 {dimension_numbers = #tpu.dot_dimension_numbers<[1], [0], [0], [1], [0, 0, 1, 1], [], []>} : vector<32x128xbf16>, vector<128x384xbf16>, vector<32x384xf32> -> vector<32x384xf32>
    %110 = vector.broadcast %86 : vector<1x384xf32> to vector<32x384xf32>
    %111 = arith.addf %109, %110 : vector<32x384xf32>
    %112 = vector.shape_cast %111 : vector<32x384xf32> to vector<2x16x384xf32>
    %113 = vector.extract_strided_slice %112 {offsets = [0, 0, 0], sizes = [2, 16, 128], strides = [1, 1, 1]} : vector<2x16x384xf32> to vector<2x16x128xf32>
    %114 = vector.extract_strided_slice %112 {offsets = [0, 0, 128], sizes = [2, 16, 128], strides = [1, 1, 1]} : vector<2x16x384xf32> to vector<2x16x128xf32>
    %115 = vector.extract_strided_slice %112 {offsets = [0, 0, 256], sizes = [2, 16, 128], strides = [1, 1, 1]} : vector<2x16x384xf32> to vector<2x16x128xf32>
    %116 = arith.truncf %113 : vector<2x16x128xf32> to vector<2x16x128xbf16>
    %117 = arith.truncf %114 : vector<2x16x128xf32> to vector<2x16x128xbf16>
    %118 = arith.truncf %115 : vector<2x16x128xf32> to vector<2x16x128xbf16>
    %cst_94 = arith.constant 0.000000e+00 : f32
    %119 = vector.broadcast %cst_94 : f32 to vector<32x128xf32>
    %120 = vector.extract_strided_slice %116 {offsets = [0, 0, 0], sizes = [2, 16, 32], strides = [1, 1, 1]} : vector<2x16x128xbf16> to vector<2x16x32xbf16>
    %121 = vector.extract_strided_slice %117 {offsets = [0, 0, 0], sizes = [2, 16, 32], strides = [1, 1, 1]} : vector<2x16x128xbf16> to vector<2x16x32xbf16>
    %cst_95 = arith.constant dense<0.000000e+00> : vector<2x16x16xf32>
    %122 = tpu.matmul %120, %121, %cst_95 {dimension_numbers = #tpu.dot_dimension_numbers<[2], [2], [1], [1], [0, 0, 0, 1, 1, 1], [0], [0]>} : vector<2x16x32xbf16>, vector<2x16x32xbf16>, vector<2x16x16xf32> -> vector<2x16x16xf32>
    %cst_96 = arith.constant 0.176776692 : f32
    %123 = vector.broadcast %cst_96 : f32 to vector<2x16x16xf32>
    %124 = arith.mulf %122, %123 : vector<2x16x16xf32>
    %125 = vector.broadcast %82 : vector<2x1x16xf32> to vector<2x16x16xf32>
    %126 = arith.addf %124, %125 : vector<2x16x16xf32>
    %cst_97 = arith.constant dense<0xFF800000> : vector<2x16xf32>
    %127 = vector.multi_reduction <maximumf>, %126, %cst_97 [2] : vector<2x16x16xf32> to vector<2x16xf32>
    %128 = vector.shape_cast %127 : vector<2x16xf32> to vector<2x16x1xf32>
    %129 = vector.broadcast %128 : vector<2x16x1xf32> to vector<2x16x16xf32>
    %130 = arith.subf %126, %129 : vector<2x16x16xf32>
    %131 = math.exp %130 : vector<2x16x16xf32>
    %cst_98 = arith.constant dense<0.000000e+00> : vector<2x16xf32>
    %132 = vector.multi_reduction <add>, %131, %cst_98 [2] : vector<2x16x16xf32> to vector<2x16xf32>
    %133 = vector.shape_cast %132 : vector<2x16xf32> to vector<2x16x1xf32>
    %134 = tpu.reciprocal %133 {approx = true} : vector<2x16x1xf32> -> vector<2x16x1xf32>
    %135 = vector.broadcast %134 : vector<2x16x1xf32> to vector<2x16x16xf32>
    %136 = arith.mulf %131, %135 : vector<2x16x16xf32>
    %137 = arith.truncf %136 : vector<2x16x16xf32> to vector<2x16x16xbf16>
    %138 = vector.extract_strided_slice %118 {offsets = [0, 0, 0], sizes = [2, 16, 32], strides = [1, 1, 1]} : vector<2x16x128xbf16> to vector<2x16x32xbf16>
    %cst_99 = arith.constant dense<0.000000e+00> : vector<2x16x32xf32>
    %139 = tpu.matmul %137, %138, %cst_99 {dimension_numbers = #tpu.dot_dimension_numbers<[2], [1], [1], [2], [0, 0, 0, 1, 1, 2], [0], [0]>} : vector<2x16x16xbf16>, vector<2x16x32xbf16>, vector<2x16x32xf32> -> vector<2x16x32xf32>
    %140 = vector.shape_cast %139 : vector<2x16x32xf32> to vector<32x32xf32>
    %141 = arith.truncf %140 : vector<32x32xf32> to vector<32x32xbf16>
    %142 = vector.extract_strided_slice %88 {offsets = [0, 0], sizes = [32, 128], strides = [1, 1]} : vector<128x128xbf16> to vector<32x128xbf16>
    %cst_100 = arith.constant dense<0.000000e+00> : vector<32x128xf32>
    %143 = tpu.matmul %141, %142, %cst_100 {dimension_numbers = #tpu.dot_dimension_numbers<[1], [0], [0], [1], [0, 0, 1, 1], [], []>} : vector<32x32xbf16>, vector<32x128xbf16>, vector<32x128xf32> -> vector<32x128xf32>
    %144 = arith.addf %119, %143 : vector<32x128xf32>
    %145 = vector.extract_strided_slice %116 {offsets = [0, 0, 32], sizes = [2, 16, 32], strides = [1, 1, 1]} : vector<2x16x128xbf16> to vector<2x16x32xbf16>
    %146 = vector.extract_strided_slice %117 {offsets = [0, 0, 32], sizes = [2, 16, 32], strides = [1, 1, 1]} : vector<2x16x128xbf16> to vector<2x16x32xbf16>
    %cst_101 = arith.constant dense<0.000000e+00> : vector<2x16x16xf32>
    %147 = tpu.matmul %145, %146, %cst_101 {dimension_numbers = #tpu.dot_dimension_numbers<[2], [2], [1], [1], [0, 0, 0, 1, 1, 1], [0], [0]>} : vector<2x16x32xbf16>, vector<2x16x32xbf16>, vector<2x16x16xf32> -> vector<2x16x16xf32>
    %cst_102 = arith.constant 0.176776692 : f32
    %148 = vector.broadcast %cst_102 : f32 to vector<2x16x16xf32>
    %149 = arith.mulf %147, %148 : vector<2x16x16xf32>
    %150 = vector.broadcast %82 : vector<2x1x16xf32> to vector<2x16x16xf32>
    %151 = arith.addf %149, %150 : vector<2x16x16xf32>
    %cst_103 = arith.constant dense<0xFF800000> : vector<2x16xf32>
    %152 = vector.multi_reduction <maximumf>, %151, %cst_103 [2] : vector<2x16x16xf32> to vector<2x16xf32>
    %153 = vector.shape_cast %152 : vector<2x16xf32> to vector<2x16x1xf32>
    %154 = vector.broadcast %153 : vector<2x16x1xf32> to vector<2x16x16xf32>
    %155 = arith.subf %151, %154 : vector<2x16x16xf32>
    %156 = math.exp %155 : vector<2x16x16xf32>
    %cst_104 = arith.constant dense<0.000000e+00> : vector<2x16xf32>
    %157 = vector.multi_reduction <add>, %156, %cst_104 [2] : vector<2x16x16xf32> to vector<2x16xf32>
    %158 = vector.shape_cast %157 : vector<2x16xf32> to vector<2x16x1xf32>
    %159 = tpu.reciprocal %158 {approx = true} : vector<2x16x1xf32> -> vector<2x16x1xf32>
    %160 = vector.broadcast %159 : vector<2x16x1xf32> to vector<2x16x16xf32>
    %161 = arith.mulf %156, %160 : vector<2x16x16xf32>
    %162 = arith.truncf %161 : vector<2x16x16xf32> to vector<2x16x16xbf16>
    %163 = vector.extract_strided_slice %118 {offsets = [0, 0, 32], sizes = [2, 16, 32], strides = [1, 1, 1]} : vector<2x16x128xbf16> to vector<2x16x32xbf16>
    %cst_105 = arith.constant dense<0.000000e+00> : vector<2x16x32xf32>
    %164 = tpu.matmul %162, %163, %cst_105 {dimension_numbers = #tpu.dot_dimension_numbers<[2], [1], [1], [2], [0, 0, 0, 1, 1, 2], [0], [0]>} : vector<2x16x16xbf16>, vector<2x16x32xbf16>, vector<2x16x32xf32> -> vector<2x16x32xf32>
    %165 = vector.shape_cast %164 : vector<2x16x32xf32> to vector<32x32xf32>
    %166 = arith.truncf %165 : vector<32x32xf32> to vector<32x32xbf16>
    %167 = vector.extract_strided_slice %88 {offsets = [32, 0], sizes = [32, 128], strides = [1, 1]} : vector<128x128xbf16> to vector<32x128xbf16>
    %cst_106 = arith.constant dense<0.000000e+00> : vector<32x128xf32>
    %168 = tpu.matmul %166, %167, %cst_106 {dimension_numbers = #tpu.dot_dimension_numbers<[1], [0], [0], [1], [0, 0, 1, 1], [], []>} : vector<32x32xbf16>, vector<32x128xbf16>, vector<32x128xf32> -> vector<32x128xf32>
    %169 = arith.addf %144, %168 : vector<32x128xf32>
    %170 = vector.extract_strided_slice %116 {offsets = [0, 0, 64], sizes = [2, 16, 32], strides = [1, 1, 1]} : vector<2x16x128xbf16> to vector<2x16x32xbf16>
    %171 = vector.extract_strided_slice %117 {offsets = [0, 0, 64], sizes = [2, 16, 32], strides = [1, 1, 1]} : vector<2x16x128xbf16> to vector<2x16x32xbf16>
    %cst_107 = arith.constant dense<0.000000e+00> : vector<2x16x16xf32>
    %172 = tpu.matmul %170, %171, %cst_107 {dimension_numbers = #tpu.dot_dimension_numbers<[2], [2], [1], [1], [0, 0, 0, 1, 1, 1], [0], [0]>} : vector<2x16x32xbf16>, vector<2x16x32xbf16>, vector<2x16x16xf32> -> vector<2x16x16xf32>
    %cst_108 = arith.constant 0.176776692 : f32
    %173 = vector.broadcast %cst_108 : f32 to vector<2x16x16xf32>
    %174 = arith.mulf %172, %173 : vector<2x16x16xf32>
    %175 = vector.broadcast %82 : vector<2x1x16xf32> to vector<2x16x16xf32>
    %176 = arith.addf %174, %175 : vector<2x16x16xf32>
    %cst_109 = arith.constant dense<0xFF800000> : vector<2x16xf32>
    %177 = vector.multi_reduction <maximumf>, %176, %cst_109 [2] : vector<2x16x16xf32> to vector<2x16xf32>
    %178 = vector.shape_cast %177 : vector<2x16xf32> to vector<2x16x1xf32>
    %179 = vector.broadcast %178 : vector<2x16x1xf32> to vector<2x16x16xf32>
    %180 = arith.subf %176, %179 : vector<2x16x16xf32>
    %181 = math.exp %180 : vector<2x16x16xf32>
    %cst_110 = arith.constant dense<0.000000e+00> : vector<2x16xf32>
    %182 = vector.multi_reduction <add>, %181, %cst_110 [2] : vector<2x16x16xf32> to vector<2x16xf32>
    %183 = vector.shape_cast %182 : vector<2x16xf32> to vector<2x16x1xf32>
    %184 = tpu.reciprocal %183 {approx = true} : vector<2x16x1xf32> -> vector<2x16x1xf32>
    %185 = vector.broadcast %184 : vector<2x16x1xf32> to vector<2x16x16xf32>
    %186 = arith.mulf %181, %185 : vector<2x16x16xf32>
    %187 = arith.truncf %186 : vector<2x16x16xf32> to vector<2x16x16xbf16>
    %188 = vector.extract_strided_slice %118 {offsets = [0, 0, 64], sizes = [2, 16, 32], strides = [1, 1, 1]} : vector<2x16x128xbf16> to vector<2x16x32xbf16>
    %cst_111 = arith.constant dense<0.000000e+00> : vector<2x16x32xf32>
    %189 = tpu.matmul %187, %188, %cst_111 {dimension_numbers = #tpu.dot_dimension_numbers<[2], [1], [1], [2], [0, 0, 0, 1, 1, 2], [0], [0]>} : vector<2x16x16xbf16>, vector<2x16x32xbf16>, vector<2x16x32xf32> -> vector<2x16x32xf32>
    %190 = vector.shape_cast %189 : vector<2x16x32xf32> to vector<32x32xf32>
    %191 = arith.truncf %190 : vector<32x32xf32> to vector<32x32xbf16>
    %192 = vector.extract_strided_slice %88 {offsets = [64, 0], sizes = [32, 128], strides = [1, 1]} : vector<128x128xbf16> to vector<32x128xbf16>
    %cst_112 = arith.constant dense<0.000000e+00> : vector<32x128xf32>
    %193 = tpu.matmul %191, %192, %cst_112 {dimension_numbers = #tpu.dot_dimension_numbers<[1], [0], [0], [1], [0, 0, 1, 1], [], []>} : vector<32x32xbf16>, vector<32x128xbf16>, vector<32x128xf32> -> vector<32x128xf32>
    %194 = arith.addf %169, %193 : vector<32x128xf32>
    %195 = vector.extract_strided_slice %116 {offsets = [0, 0, 96], sizes = [2, 16, 32], strides = [1, 1, 1]} : vector<2x16x128xbf16> to vector<2x16x32xbf16>
    %196 = vector.extract_strided_slice %117 {offsets = [0, 0, 96], sizes = [2, 16, 32], strides = [1, 1, 1]} : vector<2x16x128xbf16> to vector<2x16x32xbf16>
    %cst_113 = arith.constant dense<0.000000e+00> : vector<2x16x16xf32>
    %197 = tpu.matmul %195, %196, %cst_113 {dimension_numbers = #tpu.dot_dimension_numbers<[2], [2], [1], [1], [0, 0, 0, 1, 1, 1], [0], [0]>} : vector<2x16x32xbf16>, vector<2x16x32xbf16>, vector<2x16x16xf32> -> vector<2x16x16xf32>
    %cst_114 = arith.constant 0.176776692 : f32
    %198 = vector.broadcast %cst_114 : f32 to vector<2x16x16xf32>
    %199 = arith.mulf %197, %198 : vector<2x16x16xf32>
    %200 = vector.broadcast %82 : vector<2x1x16xf32> to vector<2x16x16xf32>
    %201 = arith.addf %199, %200 : vector<2x16x16xf32>
    %cst_115 = arith.constant dense<0xFF800000> : vector<2x16xf32>
    %202 = vector.multi_reduction <maximumf>, %201, %cst_115 [2] : vector<2x16x16xf32> to vector<2x16xf32>
    %203 = vector.shape_cast %202 : vector<2x16xf32> to vector<2x16x1xf32>
    %204 = vector.broadcast %203 : vector<2x16x1xf32> to vector<2x16x16xf32>
    %205 = arith.subf %201, %204 : vector<2x16x16xf32>
    %206 = math.exp %205 : vector<2x16x16xf32>
    %cst_116 = arith.constant dense<0.000000e+00> : vector<2x16xf32>
    %207 = vector.multi_reduction <add>, %206, %cst_116 [2] : vector<2x16x16xf32> to vector<2x16xf32>
    %208 = vector.shape_cast %207 : vector<2x16xf32> to vector<2x16x1xf32>
    %209 = tpu.reciprocal %208 {approx = true} : vector<2x16x1xf32> -> vector<2x16x1xf32>
    %210 = vector.broadcast %209 : vector<2x16x1xf32> to vector<2x16x16xf32>
    %211 = arith.mulf %206, %210 : vector<2x16x16xf32>
    %212 = arith.truncf %211 : vector<2x16x16xf32> to vector<2x16x16xbf16>
    %213 = vector.extract_strided_slice %118 {offsets = [0, 0, 96], sizes = [2, 16, 32], strides = [1, 1, 1]} : vector<2x16x128xbf16> to vector<2x16x32xbf16>
    %cst_117 = arith.constant dense<0.000000e+00> : vector<2x16x32xf32>
    %214 = tpu.matmul %212, %213, %cst_117 {dimension_numbers = #tpu.dot_dimension_numbers<[2], [1], [1], [2], [0, 0, 0, 1, 1, 2], [0], [0]>} : vector<2x16x16xbf16>, vector<2x16x32xbf16>, vector<2x16x32xf32> -> vector<2x16x32xf32>
    %215 = vector.shape_cast %214 : vector<2x16x32xf32> to vector<32x32xf32>
    %216 = arith.truncf %215 : vector<32x32xf32> to vector<32x32xbf16>
    %217 = vector.extract_strided_slice %88 {offsets = [96, 0], sizes = [32, 128], strides = [1, 1]} : vector<128x128xbf16> to vector<32x128xbf16>
    %cst_118 = arith.constant dense<0.000000e+00> : vector<32x128xf32>
    %218 = tpu.matmul %216, %217, %cst_118 {dimension_numbers = #tpu.dot_dimension_numbers<[1], [0], [0], [1], [0, 0, 1, 1], [], []>} : vector<32x32xbf16>, vector<32x128xbf16>, vector<32x128xf32> -> vector<32x128xf32>
    %219 = arith.addf %194, %218 : vector<32x128xf32>
    %220 = vector.broadcast %90 : vector<1x128xf32> to vector<32x128xf32>
    %221 = arith.addf %219, %220 : vector<32x128xf32>
    %222 = arith.addf %107, %221 : vector<32x128xf32>
    %cst_119 = arith.constant dense<0.000000e+00> : vector<32xf32>
    %223 = vector.multi_reduction <add>, %222, %cst_119 [1] : vector<32x128xf32> to vector<32xf32>
    %224 = vector.shape_cast %223 : vector<32xf32> to vector<32x1xf32>
    %cst_120 = arith.constant 1.280000e+02 : f32
    %225 = vector.broadcast %cst_120 : f32 to vector<32x1xf32>
    %226 = arith.divf %224, %225 : vector<32x1xf32>
    %227 = vector.broadcast %226 : vector<32x1xf32> to vector<32x128xf32>
    %228 = arith.subf %222, %227 : vector<32x128xf32>
    %229 = arith.mulf %228, %228 : vector<32x128xf32>
    %cst_121 = arith.constant dense<0.000000e+00> : vector<32xf32>
    %230 = vector.multi_reduction <add>, %229, %cst_121 [1] : vector<32x128xf32> to vector<32xf32>
    %231 = vector.shape_cast %230 : vector<32xf32> to vector<32x1xf32>
    %cst_122 = arith.constant 1.280000e+02 : f32
    %232 = vector.broadcast %cst_122 : f32 to vector<32x1xf32>
    %233 = arith.divf %231, %232 : vector<32x1xf32>
    %cst_123 = arith.constant 9.99999996E-13 : f32
    %234 = vector.broadcast %cst_123 : f32 to vector<32x1xf32>
    %235 = arith.addf %233, %234 : vector<32x1xf32>
    %236 = math.rsqrt %235 : vector<32x1xf32>
    %237 = vector.broadcast %236 : vector<32x1xf32> to vector<32x128xf32>
    %238 = arith.mulf %228, %237 : vector<32x128xf32>
    %239 = vector.broadcast %92 : vector<1x128xf32> to vector<32x128xf32>
    %240 = arith.mulf %238, %239 : vector<32x128xf32>
    %241 = vector.broadcast %94 : vector<1x128xf32> to vector<32x128xf32>
    %242 = arith.addf %240, %241 : vector<32x128xf32>
    %243 = arith.truncf %242 : vector<32x128xf32> to vector<32x128xbf16>
    %cst_124 = arith.constant dense<0.000000e+00> : vector<32x512xf32>
    %244 = tpu.matmul %243, %96, %cst_124 {dimension_numbers = #tpu.dot_dimension_numbers<[1], [0], [0], [1], [0, 0, 1, 1], [], []>} : vector<32x128xbf16>, vector<128x512xbf16>, vector<32x512xf32> -> vector<32x512xf32>
    %245 = vector.broadcast %98 : vector<1x512xf32> to vector<32x512xf32>
    %246 = arith.addf %244, %245 : vector<32x512xf32>
    %cst_125 = arith.constant 5.000000e-01 : f32
    %247 = vector.broadcast %cst_125 : f32 to vector<32x512xf32>
    %248 = arith.mulf %247, %246 : vector<32x512xf32>
    %cst_126 = arith.constant 4.471500e-02 : f32
    %249 = vector.broadcast %cst_126 : f32 to vector<32x512xf32>
    %250 = arith.mulf %249, %246 : vector<32x512xf32>
    %251 = arith.mulf %250, %246 : vector<32x512xf32>
    %252 = arith.mulf %251, %246 : vector<32x512xf32>
    %253 = arith.addf %246, %252 : vector<32x512xf32>
    %cst_127 = arith.constant 0.797884583 : f32
    %254 = vector.broadcast %cst_127 : f32 to vector<32x512xf32>
    %255 = arith.mulf %254, %253 : vector<32x512xf32>
    %256 = math.tanh %255 : vector<32x512xf32>
    %cst_128 = arith.constant 1.000000e+00 : f32
    %257 = vector.broadcast %cst_128 : f32 to vector<32x512xf32>
    %258 = arith.addf %257, %256 : vector<32x512xf32>
    %259 = arith.mulf %248, %258 : vector<32x512xf32>
    %260 = arith.truncf %259 : vector<32x512xf32> to vector<32x512xbf16>
    %cst_129 = arith.constant dense<0.000000e+00> : vector<32x128xf32>
    %261 = tpu.matmul %260, %100, %cst_129 {dimension_numbers = #tpu.dot_dimension_numbers<[1], [0], [0], [1], [0, 0, 1, 1], [], []>} : vector<32x512xbf16>, vector<512x128xbf16>, vector<32x128xf32> -> vector<32x128xf32>
    %262 = vector.broadcast %102 : vector<1x128xf32> to vector<32x128xf32>
    %263 = arith.addf %261, %262 : vector<32x128xf32>
    %264 = arith.addf %242, %263 : vector<32x128xf32>
    %cst_130 = arith.constant dense<0.000000e+00> : vector<32xf32>
    %265 = vector.multi_reduction <add>, %264, %cst_130 [1] : vector<32x128xf32> to vector<32xf32>
    %266 = vector.shape_cast %265 : vector<32xf32> to vector<32x1xf32>
    %cst_131 = arith.constant 1.280000e+02 : f32
    %267 = vector.broadcast %cst_131 : f32 to vector<32x1xf32>
    %268 = arith.divf %266, %267 : vector<32x1xf32>
    %269 = vector.broadcast %268 : vector<32x1xf32> to vector<32x128xf32>
    %270 = arith.subf %264, %269 : vector<32x128xf32>
    %271 = arith.mulf %270, %270 : vector<32x128xf32>
    %cst_132 = arith.constant dense<0.000000e+00> : vector<32xf32>
    %272 = vector.multi_reduction <add>, %271, %cst_132 [1] : vector<32x128xf32> to vector<32xf32>
    %273 = vector.shape_cast %272 : vector<32xf32> to vector<32x1xf32>
    %cst_133 = arith.constant 1.280000e+02 : f32
    %274 = vector.broadcast %cst_133 : f32 to vector<32x1xf32>
    %275 = arith.divf %273, %274 : vector<32x1xf32>
    %cst_134 = arith.constant 9.99999996E-13 : f32
    %276 = vector.broadcast %cst_134 : f32 to vector<32x1xf32>
    %277 = arith.addf %275, %276 : vector<32x1xf32>
    %278 = math.rsqrt %277 : vector<32x1xf32>
    %279 = vector.broadcast %278 : vector<32x1xf32> to vector<32x128xf32>
    %280 = arith.mulf %270, %279 : vector<32x128xf32>
    %281 = vector.broadcast %104 : vector<1x128xf32> to vector<32x128xf32>
    %282 = arith.mulf %280, %281 : vector<32x128xf32>
    %283 = vector.broadcast %106 : vector<1x128xf32> to vector<32x128xf32>
    %284 = arith.addf %282, %283 : vector<32x128xf32>
    %285 = vector.shape_cast %284 : vector<32x128xf32> to vector<2x16x128xf32>
    %c1 = arith.constant 1 : index
    %c0_135 = arith.constant 0 : index
    %c0_136 = arith.constant 0 : index
    %286 = vector.load %arg14[%c1, %c0_135, %c0_136] : memref<3x128x384xbf16, #tpu.memory_space<vmem>>, vector<1x128x384xbf16>
    %287 = vector.shape_cast %286 : vector<1x128x384xbf16> to vector<128x384xbf16>
    %c1_137 = arith.constant 1 : index
    %c0_138 = arith.constant 0 : index
    %c0_139 = arith.constant 0 : index
    %288 = vector.load %arg15[%c1_137, %c0_138, %c0_139] : memref<3x1x384xf32, #tpu.memory_space<vmem>>, vector<1x1x384xf32>
    %289 = vector.shape_cast %288 : vector<1x1x384xf32> to vector<1x384xf32>
    %c1_140 = arith.constant 1 : index
    %c0_141 = arith.constant 0 : index
    %c0_142 = arith.constant 0 : index
    %290 = vector.load %arg16[%c1_140, %c0_141, %c0_142] : memref<3x128x128xbf16, #tpu.memory_space<vmem>>, vector<1x128x128xbf16>
    %291 = vector.shape_cast %290 : vector<1x128x128xbf16> to vector<128x128xbf16>
    %c1_143 = arith.constant 1 : index
    %c0_144 = arith.constant 0 : index
    %c0_145 = arith.constant 0 : index
    %292 = vector.load %arg17[%c1_143, %c0_144, %c0_145] : memref<3x1x128xf32, #tpu.memory_space<vmem>>, vector<1x1x128xf32>
    %293 = vector.shape_cast %292 : vector<1x1x128xf32> to vector<1x128xf32>
    %c1_146 = arith.constant 1 : index
    %c0_147 = arith.constant 0 : index
    %c0_148 = arith.constant 0 : index
    %294 = vector.load %arg18[%c1_146, %c0_147, %c0_148] : memref<3x1x128xf32, #tpu.memory_space<vmem>>, vector<1x1x128xf32>
    %295 = vector.shape_cast %294 : vector<1x1x128xf32> to vector<1x128xf32>
    %c1_149 = arith.constant 1 : index
    %c0_150 = arith.constant 0 : index
    %c0_151 = arith.constant 0 : index
    %296 = vector.load %arg19[%c1_149, %c0_150, %c0_151] : memref<3x1x128xf32, #tpu.memory_space<vmem>>, vector<1x1x128xf32>
    %297 = vector.shape_cast %296 : vector<1x1x128xf32> to vector<1x128xf32>
    %c1_152 = arith.constant 1 : index
    %c0_153 = arith.constant 0 : index
    %c0_154 = arith.constant 0 : index
    %298 = vector.load %arg20[%c1_152, %c0_153, %c0_154] : memref<3x128x512xbf16, #tpu.memory_space<vmem>>, vector<1x128x512xbf16>
    %299 = vector.shape_cast %298 : vector<1x128x512xbf16> to vector<128x512xbf16>
    %c1_155 = arith.constant 1 : index
    %c0_156 = arith.constant 0 : index
    %c0_157 = arith.constant 0 : index
    %300 = vector.load %arg21[%c1_155, %c0_156, %c0_157] : memref<3x1x512xf32, #tpu.memory_space<vmem>>, vector<1x1x512xf32>
    %301 = vector.shape_cast %300 : vector<1x1x512xf32> to vector<1x512xf32>
    %c1_158 = arith.constant 1 : index
    %c0_159 = arith.constant 0 : index
    %c0_160 = arith.constant 0 : index
    %302 = vector.load %arg22[%c1_158, %c0_159, %c0_160] : memref<3x512x128xbf16, #tpu.memory_space<vmem>>, vector<1x512x128xbf16>
    %303 = vector.shape_cast %302 : vector<1x512x128xbf16> to vector<512x128xbf16>
    %c1_161 = arith.constant 1 : index
    %c0_162 = arith.constant 0 : index
    %c0_163 = arith.constant 0 : index
    %304 = vector.load %arg23[%c1_161, %c0_162, %c0_163] : memref<3x1x128xf32, #tpu.memory_space<vmem>>, vector<1x1x128xf32>
    %305 = vector.shape_cast %304 : vector<1x1x128xf32> to vector<1x128xf32>
    %c1_164 = arith.constant 1 : index
    %c0_165 = arith.constant 0 : index
    %c0_166 = arith.constant 0 : index
    %306 = vector.load %arg24[%c1_164, %c0_165, %c0_166] : memref<3x1x128xf32, #tpu.memory_space<vmem>>, vector<1x1x128xf32>
    %307 = vector.shape_cast %306 : vector<1x1x128xf32> to vector<1x128xf32>
    %c1_167 = arith.constant 1 : index
    %c0_168 = arith.constant 0 : index
    %c0_169 = arith.constant 0 : index
    %308 = vector.load %arg25[%c1_167, %c0_168, %c0_169] : memref<3x1x128xf32, #tpu.memory_space<vmem>>, vector<1x1x128xf32>
    %309 = vector.shape_cast %308 : vector<1x1x128xf32> to vector<1x128xf32>
    %310 = vector.shape_cast %285 : vector<2x16x128xf32> to vector<32x128xf32>
    %311 = arith.truncf %310 : vector<32x128xf32> to vector<32x128xbf16>
    %cst_170 = arith.constant dense<0.000000e+00> : vector<32x384xf32>
    %312 = tpu.matmul %311, %287, %cst_170 {dimension_numbers = #tpu.dot_dimension_numbers<[1], [0], [0], [1], [0, 0, 1, 1], [], []>} : vector<32x128xbf16>, vector<128x384xbf16>, vector<32x384xf32> -> vector<32x384xf32>
    %313 = vector.broadcast %289 : vector<1x384xf32> to vector<32x384xf32>
    %314 = arith.addf %312, %313 : vector<32x384xf32>
    %315 = vector.shape_cast %314 : vector<32x384xf32> to vector<2x16x384xf32>
    %316 = vector.extract_strided_slice %315 {offsets = [0, 0, 0], sizes = [2, 16, 128], strides = [1, 1, 1]} : vector<2x16x384xf32> to vector<2x16x128xf32>
    %317 = vector.extract_strided_slice %315 {offsets = [0, 0, 128], sizes = [2, 16, 128], strides = [1, 1, 1]} : vector<2x16x384xf32> to vector<2x16x128xf32>
    %318 = vector.extract_strided_slice %315 {offsets = [0, 0, 256], sizes = [2, 16, 128], strides = [1, 1, 1]} : vector<2x16x384xf32> to vector<2x16x128xf32>
    %319 = arith.truncf %316 : vector<2x16x128xf32> to vector<2x16x128xbf16>
    %320 = arith.truncf %317 : vector<2x16x128xf32> to vector<2x16x128xbf16>
    %321 = arith.truncf %318 : vector<2x16x128xf32> to vector<2x16x128xbf16>
    %cst_171 = arith.constant 0.000000e+00 : f32
    %322 = vector.broadcast %cst_171 : f32 to vector<32x128xf32>
    %323 = vector.extract_strided_slice %319 {offsets = [0, 0, 0], sizes = [2, 16, 32], strides = [1, 1, 1]} : vector<2x16x128xbf16> to vector<2x16x32xbf16>
    %324 = vector.extract_strided_slice %320 {offsets = [0, 0, 0], sizes = [2, 16, 32], strides = [1, 1, 1]} : vector<2x16x128xbf16> to vector<2x16x32xbf16>
    %cst_172 = arith.constant dense<0.000000e+00> : vector<2x16x16xf32>
    %325 = tpu.matmul %323, %324, %cst_172 {dimension_numbers = #tpu.dot_dimension_numbers<[2], [2], [1], [1], [0, 0, 0, 1, 1, 1], [0], [0]>} : vector<2x16x32xbf16>, vector<2x16x32xbf16>, vector<2x16x16xf32> -> vector<2x16x16xf32>
    %cst_173 = arith.constant 0.176776692 : f32
    %326 = vector.broadcast %cst_173 : f32 to vector<2x16x16xf32>
    %327 = arith.mulf %325, %326 : vector<2x16x16xf32>
    %328 = vector.broadcast %82 : vector<2x1x16xf32> to vector<2x16x16xf32>
    %329 = arith.addf %327, %328 : vector<2x16x16xf32>
    %cst_174 = arith.constant dense<0xFF800000> : vector<2x16xf32>
    %330 = vector.multi_reduction <maximumf>, %329, %cst_174 [2] : vector<2x16x16xf32> to vector<2x16xf32>
    %331 = vector.shape_cast %330 : vector<2x16xf32> to vector<2x16x1xf32>
    %332 = vector.broadcast %331 : vector<2x16x1xf32> to vector<2x16x16xf32>
    %333 = arith.subf %329, %332 : vector<2x16x16xf32>
    %334 = math.exp %333 : vector<2x16x16xf32>
    %cst_175 = arith.constant dense<0.000000e+00> : vector<2x16xf32>
    %335 = vector.multi_reduction <add>, %334, %cst_175 [2] : vector<2x16x16xf32> to vector<2x16xf32>
    %336 = vector.shape_cast %335 : vector<2x16xf32> to vector<2x16x1xf32>
    %337 = tpu.reciprocal %336 {approx = true} : vector<2x16x1xf32> -> vector<2x16x1xf32>
    %338 = vector.broadcast %337 : vector<2x16x1xf32> to vector<2x16x16xf32>
    %339 = arith.mulf %334, %338 : vector<2x16x16xf32>
    %340 = arith.truncf %339 : vector<2x16x16xf32> to vector<2x16x16xbf16>
    %341 = vector.extract_strided_slice %321 {offsets = [0, 0, 0], sizes = [2, 16, 32], strides = [1, 1, 1]} : vector<2x16x128xbf16> to vector<2x16x32xbf16>
    %cst_176 = arith.constant dense<0.000000e+00> : vector<2x16x32xf32>
    %342 = tpu.matmul %340, %341, %cst_176 {dimension_numbers = #tpu.dot_dimension_numbers<[2], [1], [1], [2], [0, 0, 0, 1, 1, 2], [0], [0]>} : vector<2x16x16xbf16>, vector<2x16x32xbf16>, vector<2x16x32xf32> -> vector<2x16x32xf32>
    %343 = vector.shape_cast %342 : vector<2x16x32xf32> to vector<32x32xf32>
    %344 = arith.truncf %343 : vector<32x32xf32> to vector<32x32xbf16>
    %345 = vector.extract_strided_slice %291 {offsets = [0, 0], sizes = [32, 128], strides = [1, 1]} : vector<128x128xbf16> to vector<32x128xbf16>
    %cst_177 = arith.constant dense<0.000000e+00> : vector<32x128xf32>
    %346 = tpu.matmul %344, %345, %cst_177 {dimension_numbers = #tpu.dot_dimension_numbers<[1], [0], [0], [1], [0, 0, 1, 1], [], []>} : vector<32x32xbf16>, vector<32x128xbf16>, vector<32x128xf32> -> vector<32x128xf32>
    %347 = arith.addf %322, %346 : vector<32x128xf32>
    %348 = vector.extract_strided_slice %319 {offsets = [0, 0, 32], sizes = [2, 16, 32], strides = [1, 1, 1]} : vector<2x16x128xbf16> to vector<2x16x32xbf16>
    %349 = vector.extract_strided_slice %320 {offsets = [0, 0, 32], sizes = [2, 16, 32], strides = [1, 1, 1]} : vector<2x16x128xbf16> to vector<2x16x32xbf16>
    %cst_178 = arith.constant dense<0.000000e+00> : vector<2x16x16xf32>
    %350 = tpu.matmul %348, %349, %cst_178 {dimension_numbers = #tpu.dot_dimension_numbers<[2], [2], [1], [1], [0, 0, 0, 1, 1, 1], [0], [0]>} : vector<2x16x32xbf16>, vector<2x16x32xbf16>, vector<2x16x16xf32> -> vector<2x16x16xf32>
    %cst_179 = arith.constant 0.176776692 : f32
    %351 = vector.broadcast %cst_179 : f32 to vector<2x16x16xf32>
    %352 = arith.mulf %350, %351 : vector<2x16x16xf32>
    %353 = vector.broadcast %82 : vector<2x1x16xf32> to vector<2x16x16xf32>
    %354 = arith.addf %352, %353 : vector<2x16x16xf32>
    %cst_180 = arith.constant dense<0xFF800000> : vector<2x16xf32>
    %355 = vector.multi_reduction <maximumf>, %354, %cst_180 [2] : vector<2x16x16xf32> to vector<2x16xf32>
    %356 = vector.shape_cast %355 : vector<2x16xf32> to vector<2x16x1xf32>
    %357 = vector.broadcast %356 : vector<2x16x1xf32> to vector<2x16x16xf32>
    %358 = arith.subf %354, %357 : vector<2x16x16xf32>
    %359 = math.exp %358 : vector<2x16x16xf32>
    %cst_181 = arith.constant dense<0.000000e+00> : vector<2x16xf32>
    %360 = vector.multi_reduction <add>, %359, %cst_181 [2] : vector<2x16x16xf32> to vector<2x16xf32>
    %361 = vector.shape_cast %360 : vector<2x16xf32> to vector<2x16x1xf32>
    %362 = tpu.reciprocal %361 {approx = true} : vector<2x16x1xf32> -> vector<2x16x1xf32>
    %363 = vector.broadcast %362 : vector<2x16x1xf32> to vector<2x16x16xf32>
    %364 = arith.mulf %359, %363 : vector<2x16x16xf32>
    %365 = arith.truncf %364 : vector<2x16x16xf32> to vector<2x16x16xbf16>
    %366 = vector.extract_strided_slice %321 {offsets = [0, 0, 32], sizes = [2, 16, 32], strides = [1, 1, 1]} : vector<2x16x128xbf16> to vector<2x16x32xbf16>
    %cst_182 = arith.constant dense<0.000000e+00> : vector<2x16x32xf32>
    %367 = tpu.matmul %365, %366, %cst_182 {dimension_numbers = #tpu.dot_dimension_numbers<[2], [1], [1], [2], [0, 0, 0, 1, 1, 2], [0], [0]>} : vector<2x16x16xbf16>, vector<2x16x32xbf16>, vector<2x16x32xf32> -> vector<2x16x32xf32>
    %368 = vector.shape_cast %367 : vector<2x16x32xf32> to vector<32x32xf32>
    %369 = arith.truncf %368 : vector<32x32xf32> to vector<32x32xbf16>
    %370 = vector.extract_strided_slice %291 {offsets = [32, 0], sizes = [32, 128], strides = [1, 1]} : vector<128x128xbf16> to vector<32x128xbf16>
    %cst_183 = arith.constant dense<0.000000e+00> : vector<32x128xf32>
    %371 = tpu.matmul %369, %370, %cst_183 {dimension_numbers = #tpu.dot_dimension_numbers<[1], [0], [0], [1], [0, 0, 1, 1], [], []>} : vector<32x32xbf16>, vector<32x128xbf16>, vector<32x128xf32> -> vector<32x128xf32>
    %372 = arith.addf %347, %371 : vector<32x128xf32>
    %373 = vector.extract_strided_slice %319 {offsets = [0, 0, 64], sizes = [2, 16, 32], strides = [1, 1, 1]} : vector<2x16x128xbf16> to vector<2x16x32xbf16>
    %374 = vector.extract_strided_slice %320 {offsets = [0, 0, 64], sizes = [2, 16, 32], strides = [1, 1, 1]} : vector<2x16x128xbf16> to vector<2x16x32xbf16>
    %cst_184 = arith.constant dense<0.000000e+00> : vector<2x16x16xf32>
    %375 = tpu.matmul %373, %374, %cst_184 {dimension_numbers = #tpu.dot_dimension_numbers<[2], [2], [1], [1], [0, 0, 0, 1, 1, 1], [0], [0]>} : vector<2x16x32xbf16>, vector<2x16x32xbf16>, vector<2x16x16xf32> -> vector<2x16x16xf32>
    %cst_185 = arith.constant 0.176776692 : f32
    %376 = vector.broadcast %cst_185 : f32 to vector<2x16x16xf32>
    %377 = arith.mulf %375, %376 : vector<2x16x16xf32>
    %378 = vector.broadcast %82 : vector<2x1x16xf32> to vector<2x16x16xf32>
    %379 = arith.addf %377, %378 : vector<2x16x16xf32>
    %cst_186 = arith.constant dense<0xFF800000> : vector<2x16xf32>
    %380 = vector.multi_reduction <maximumf>, %379, %cst_186 [2] : vector<2x16x16xf32> to vector<2x16xf32>
    %381 = vector.shape_cast %380 : vector<2x16xf32> to vector<2x16x1xf32>
    %382 = vector.broadcast %381 : vector<2x16x1xf32> to vector<2x16x16xf32>
    %383 = arith.subf %379, %382 : vector<2x16x16xf32>
    %384 = math.exp %383 : vector<2x16x16xf32>
    %cst_187 = arith.constant dense<0.000000e+00> : vector<2x16xf32>
    %385 = vector.multi_reduction <add>, %384, %cst_187 [2] : vector<2x16x16xf32> to vector<2x16xf32>
    %386 = vector.shape_cast %385 : vector<2x16xf32> to vector<2x16x1xf32>
    %387 = tpu.reciprocal %386 {approx = true} : vector<2x16x1xf32> -> vector<2x16x1xf32>
    %388 = vector.broadcast %387 : vector<2x16x1xf32> to vector<2x16x16xf32>
    %389 = arith.mulf %384, %388 : vector<2x16x16xf32>
    %390 = arith.truncf %389 : vector<2x16x16xf32> to vector<2x16x16xbf16>
    %391 = vector.extract_strided_slice %321 {offsets = [0, 0, 64], sizes = [2, 16, 32], strides = [1, 1, 1]} : vector<2x16x128xbf16> to vector<2x16x32xbf16>
    %cst_188 = arith.constant dense<0.000000e+00> : vector<2x16x32xf32>
    %392 = tpu.matmul %390, %391, %cst_188 {dimension_numbers = #tpu.dot_dimension_numbers<[2], [1], [1], [2], [0, 0, 0, 1, 1, 2], [0], [0]>} : vector<2x16x16xbf16>, vector<2x16x32xbf16>, vector<2x16x32xf32> -> vector<2x16x32xf32>
    %393 = vector.shape_cast %392 : vector<2x16x32xf32> to vector<32x32xf32>
    %394 = arith.truncf %393 : vector<32x32xf32> to vector<32x32xbf16>
    %395 = vector.extract_strided_slice %291 {offsets = [64, 0], sizes = [32, 128], strides = [1, 1]} : vector<128x128xbf16> to vector<32x128xbf16>
    %cst_189 = arith.constant dense<0.000000e+00> : vector<32x128xf32>
    %396 = tpu.matmul %394, %395, %cst_189 {dimension_numbers = #tpu.dot_dimension_numbers<[1], [0], [0], [1], [0, 0, 1, 1], [], []>} : vector<32x32xbf16>, vector<32x128xbf16>, vector<32x128xf32> -> vector<32x128xf32>
    %397 = arith.addf %372, %396 : vector<32x128xf32>
    %398 = vector.extract_strided_slice %319 {offsets = [0, 0, 96], sizes = [2, 16, 32], strides = [1, 1, 1]} : vector<2x16x128xbf16> to vector<2x16x32xbf16>
    %399 = vector.extract_strided_slice %320 {offsets = [0, 0, 96], sizes = [2, 16, 32], strides = [1, 1, 1]} : vector<2x16x128xbf16> to vector<2x16x32xbf16>
    %cst_190 = arith.constant dense<0.000000e+00> : vector<2x16x16xf32>
    %400 = tpu.matmul %398, %399, %cst_190 {dimension_numbers = #tpu.dot_dimension_numbers<[2], [2], [1], [1], [0, 0, 0, 1, 1, 1], [0], [0]>} : vector<2x16x32xbf16>, vector<2x16x32xbf16>, vector<2x16x16xf32> -> vector<2x16x16xf32>
    %cst_191 = arith.constant 0.176776692 : f32
    %401 = vector.broadcast %cst_191 : f32 to vector<2x16x16xf32>
    %402 = arith.mulf %400, %401 : vector<2x16x16xf32>
    %403 = vector.broadcast %82 : vector<2x1x16xf32> to vector<2x16x16xf32>
    %404 = arith.addf %402, %403 : vector<2x16x16xf32>
    %cst_192 = arith.constant dense<0xFF800000> : vector<2x16xf32>
    %405 = vector.multi_reduction <maximumf>, %404, %cst_192 [2] : vector<2x16x16xf32> to vector<2x16xf32>
    %406 = vector.shape_cast %405 : vector<2x16xf32> to vector<2x16x1xf32>
    %407 = vector.broadcast %406 : vector<2x16x1xf32> to vector<2x16x16xf32>
    %408 = arith.subf %404, %407 : vector<2x16x16xf32>
    %409 = math.exp %408 : vector<2x16x16xf32>
    %cst_193 = arith.constant dense<0.000000e+00> : vector<2x16xf32>
    %410 = vector.multi_reduction <add>, %409, %cst_193 [2] : vector<2x16x16xf32> to vector<2x16xf32>
    %411 = vector.shape_cast %410 : vector<2x16xf32> to vector<2x16x1xf32>
    %412 = tpu.reciprocal %411 {approx = true} : vector<2x16x1xf32> -> vector<2x16x1xf32>
    %413 = vector.broadcast %412 : vector<2x16x1xf32> to vector<2x16x16xf32>
    %414 = arith.mulf %409, %413 : vector<2x16x16xf32>
    %415 = arith.truncf %414 : vector<2x16x16xf32> to vector<2x16x16xbf16>
    %416 = vector.extract_strided_slice %321 {offsets = [0, 0, 96], sizes = [2, 16, 32], strides = [1, 1, 1]} : vector<2x16x128xbf16> to vector<2x16x32xbf16>
    %cst_194 = arith.constant dense<0.000000e+00> : vector<2x16x32xf32>
    %417 = tpu.matmul %415, %416, %cst_194 {dimension_numbers = #tpu.dot_dimension_numbers<[2], [1], [1], [2], [0, 0, 0, 1, 1, 2], [0], [0]>} : vector<2x16x16xbf16>, vector<2x16x32xbf16>, vector<2x16x32xf32> -> vector<2x16x32xf32>
    %418 = vector.shape_cast %417 : vector<2x16x32xf32> to vector<32x32xf32>
    %419 = arith.truncf %418 : vector<32x32xf32> to vector<32x32xbf16>
    %420 = vector.extract_strided_slice %291 {offsets = [96, 0], sizes = [32, 128], strides = [1, 1]} : vector<128x128xbf16> to vector<32x128xbf16>
    %cst_195 = arith.constant dense<0.000000e+00> : vector<32x128xf32>
    %421 = tpu.matmul %419, %420, %cst_195 {dimension_numbers = #tpu.dot_dimension_numbers<[1], [0], [0], [1], [0, 0, 1, 1], [], []>} : vector<32x32xbf16>, vector<32x128xbf16>, vector<32x128xf32> -> vector<32x128xf32>
    %422 = arith.addf %397, %421 : vector<32x128xf32>
    %423 = vector.broadcast %293 : vector<1x128xf32> to vector<32x128xf32>
    %424 = arith.addf %422, %423 : vector<32x128xf32>
    %425 = arith.addf %310, %424 : vector<32x128xf32>
    %cst_196 = arith.constant dense<0.000000e+00> : vector<32xf32>
    %426 = vector.multi_reduction <add>, %425, %cst_196 [1] : vector<32x128xf32> to vector<32xf32>
    %427 = vector.shape_cast %426 : vector<32xf32> to vector<32x1xf32>
    %cst_197 = arith.constant 1.280000e+02 : f32
    %428 = vector.broadcast %cst_197 : f32 to vector<32x1xf32>
    %429 = arith.divf %427, %428 : vector<32x1xf32>
    %430 = vector.broadcast %429 : vector<32x1xf32> to vector<32x128xf32>
    %431 = arith.subf %425, %430 : vector<32x128xf32>
    %432 = arith.mulf %431, %431 : vector<32x128xf32>
    %cst_198 = arith.constant dense<0.000000e+00> : vector<32xf32>
    %433 = vector.multi_reduction <add>, %432, %cst_198 [1] : vector<32x128xf32> to vector<32xf32>
    %434 = vector.shape_cast %433 : vector<32xf32> to vector<32x1xf32>
    %cst_199 = arith.constant 1.280000e+02 : f32
    %435 = vector.broadcast %cst_199 : f32 to vector<32x1xf32>
    %436 = arith.divf %434, %435 : vector<32x1xf32>
    %cst_200 = arith.constant 9.99999996E-13 : f32
    %437 = vector.broadcast %cst_200 : f32 to vector<32x1xf32>
    %438 = arith.addf %436, %437 : vector<32x1xf32>
    %439 = math.rsqrt %438 : vector<32x1xf32>
    %440 = vector.broadcast %439 : vector<32x1xf32> to vector<32x128xf32>
    %441 = arith.mulf %431, %440 : vector<32x128xf32>
    %442 = vector.broadcast %295 : vector<1x128xf32> to vector<32x128xf32>
    %443 = arith.mulf %441, %442 : vector<32x128xf32>
    %444 = vector.broadcast %297 : vector<1x128xf32> to vector<32x128xf32>
    %445 = arith.addf %443, %444 : vector<32x128xf32>
    %446 = arith.truncf %445 : vector<32x128xf32> to vector<32x128xbf16>
    %cst_201 = arith.constant dense<0.000000e+00> : vector<32x512xf32>
    %447 = tpu.matmul %446, %299, %cst_201 {dimension_numbers = #tpu.dot_dimension_numbers<[1], [0], [0], [1], [0, 0, 1, 1], [], []>} : vector<32x128xbf16>, vector<128x512xbf16>, vector<32x512xf32> -> vector<32x512xf32>
    %448 = vector.broadcast %301 : vector<1x512xf32> to vector<32x512xf32>
    %449 = arith.addf %447, %448 : vector<32x512xf32>
    %cst_202 = arith.constant 5.000000e-01 : f32
    %450 = vector.broadcast %cst_202 : f32 to vector<32x512xf32>
    %451 = arith.mulf %450, %449 : vector<32x512xf32>
    %cst_203 = arith.constant 4.471500e-02 : f32
    %452 = vector.broadcast %cst_203 : f32 to vector<32x512xf32>
    %453 = arith.mulf %452, %449 : vector<32x512xf32>
    %454 = arith.mulf %453, %449 : vector<32x512xf32>
    %455 = arith.mulf %454, %449 : vector<32x512xf32>
    %456 = arith.addf %449, %455 : vector<32x512xf32>
    %cst_204 = arith.constant 0.797884583 : f32
    %457 = vector.broadcast %cst_204 : f32 to vector<32x512xf32>
    %458 = arith.mulf %457, %456 : vector<32x512xf32>
    %459 = math.tanh %458 : vector<32x512xf32>
    %cst_205 = arith.constant 1.000000e+00 : f32
    %460 = vector.broadcast %cst_205 : f32 to vector<32x512xf32>
    %461 = arith.addf %460, %459 : vector<32x512xf32>
    %462 = arith.mulf %451, %461 : vector<32x512xf32>
    %463 = arith.truncf %462 : vector<32x512xf32> to vector<32x512xbf16>
    %cst_206 = arith.constant dense<0.000000e+00> : vector<32x128xf32>
    %464 = tpu.matmul %463, %303, %cst_206 {dimension_numbers = #tpu.dot_dimension_numbers<[1], [0], [0], [1], [0, 0, 1, 1], [], []>} : vector<32x512xbf16>, vector<512x128xbf16>, vector<32x128xf32> -> vector<32x128xf32>
    %465 = vector.broadcast %305 : vector<1x128xf32> to vector<32x128xf32>
    %466 = arith.addf %464, %465 : vector<32x128xf32>
    %467 = arith.addf %445, %466 : vector<32x128xf32>
    %cst_207 = arith.constant dense<0.000000e+00> : vector<32xf32>
    %468 = vector.multi_reduction <add>, %467, %cst_207 [1] : vector<32x128xf32> to vector<32xf32>
    %469 = vector.shape_cast %468 : vector<32xf32> to vector<32x1xf32>
    %cst_208 = arith.constant 1.280000e+02 : f32
    %470 = vector.broadcast %cst_208 : f32 to vector<32x1xf32>
    %471 = arith.divf %469, %470 : vector<32x1xf32>
    %472 = vector.broadcast %471 : vector<32x1xf32> to vector<32x128xf32>
    %473 = arith.subf %467, %472 : vector<32x128xf32>
    %474 = arith.mulf %473, %473 : vector<32x128xf32>
    %cst_209 = arith.constant dense<0.000000e+00> : vector<32xf32>
    %475 = vector.multi_reduction <add>, %474, %cst_209 [1] : vector<32x128xf32> to vector<32xf32>
    %476 = vector.shape_cast %475 : vector<32xf32> to vector<32x1xf32>
    %cst_210 = arith.constant 1.280000e+02 : f32
    %477 = vector.broadcast %cst_210 : f32 to vector<32x1xf32>
    %478 = arith.divf %476, %477 : vector<32x1xf32>
    %cst_211 = arith.constant 9.99999996E-13 : f32
    %479 = vector.broadcast %cst_211 : f32 to vector<32x1xf32>
    %480 = arith.addf %478, %479 : vector<32x1xf32>
    %481 = math.rsqrt %480 : vector<32x1xf32>
    %482 = vector.broadcast %481 : vector<32x1xf32> to vector<32x128xf32>
    %483 = arith.mulf %473, %482 : vector<32x128xf32>
    %484 = vector.broadcast %307 : vector<1x128xf32> to vector<32x128xf32>
    %485 = arith.mulf %483, %484 : vector<32x128xf32>
    %486 = vector.broadcast %309 : vector<1x128xf32> to vector<32x128xf32>
    %487 = arith.addf %485, %486 : vector<32x128xf32>
    %488 = vector.shape_cast %487 : vector<32x128xf32> to vector<2x16x128xf32>
    %c2 = arith.constant 2 : index
    %c0_212 = arith.constant 0 : index
    %c0_213 = arith.constant 0 : index
    %489 = vector.load %arg14[%c2, %c0_212, %c0_213] : memref<3x128x384xbf16, #tpu.memory_space<vmem>>, vector<1x128x384xbf16>
    %490 = vector.shape_cast %489 : vector<1x128x384xbf16> to vector<128x384xbf16>
    %c2_214 = arith.constant 2 : index
    %c0_215 = arith.constant 0 : index
    %c0_216 = arith.constant 0 : index
    %491 = vector.load %arg15[%c2_214, %c0_215, %c0_216] : memref<3x1x384xf32, #tpu.memory_space<vmem>>, vector<1x1x384xf32>
    %492 = vector.shape_cast %491 : vector<1x1x384xf32> to vector<1x384xf32>
    %c2_217 = arith.constant 2 : index
    %c0_218 = arith.constant 0 : index
    %c0_219 = arith.constant 0 : index
    %493 = vector.load %arg16[%c2_217, %c0_218, %c0_219] : memref<3x128x128xbf16, #tpu.memory_space<vmem>>, vector<1x128x128xbf16>
    %494 = vector.shape_cast %493 : vector<1x128x128xbf16> to vector<128x128xbf16>
    %c2_220 = arith.constant 2 : index
    %c0_221 = arith.constant 0 : index
    %c0_222 = arith.constant 0 : index
    %495 = vector.load %arg17[%c2_220, %c0_221, %c0_222] : memref<3x1x128xf32, #tpu.memory_space<vmem>>, vector<1x1x128xf32>
    %496 = vector.shape_cast %495 : vector<1x1x128xf32> to vector<1x128xf32>
    %c2_223 = arith.constant 2 : index
    %c0_224 = arith.constant 0 : index
    %c0_225 = arith.constant 0 : index
    %497 = vector.load %arg18[%c2_223, %c0_224, %c0_225] : memref<3x1x128xf32, #tpu.memory_space<vmem>>, vector<1x1x128xf32>
    %498 = vector.shape_cast %497 : vector<1x1x128xf32> to vector<1x128xf32>
    %c2_226 = arith.constant 2 : index
    %c0_227 = arith.constant 0 : index
    %c0_228 = arith.constant 0 : index
    %499 = vector.load %arg19[%c2_226, %c0_227, %c0_228] : memref<3x1x128xf32, #tpu.memory_space<vmem>>, vector<1x1x128xf32>
    %500 = vector.shape_cast %499 : vector<1x1x128xf32> to vector<1x128xf32>
    %c2_229 = arith.constant 2 : index
    %c0_230 = arith.constant 0 : index
    %c0_231 = arith.constant 0 : index
    %501 = vector.load %arg20[%c2_229, %c0_230, %c0_231] : memref<3x128x512xbf16, #tpu.memory_space<vmem>>, vector<1x128x512xbf16>
    %502 = vector.shape_cast %501 : vector<1x128x512xbf16> to vector<128x512xbf16>
    %c2_232 = arith.constant 2 : index
    %c0_233 = arith.constant 0 : index
    %c0_234 = arith.constant 0 : index
    %503 = vector.load %arg21[%c2_232, %c0_233, %c0_234] : memref<3x1x512xf32, #tpu.memory_space<vmem>>, vector<1x1x512xf32>
    %504 = vector.shape_cast %503 : vector<1x1x512xf32> to vector<1x512xf32>
    %c2_235 = arith.constant 2 : index
    %c0_236 = arith.constant 0 : index
    %c0_237 = arith.constant 0 : index
    %505 = vector.load %arg22[%c2_235, %c0_236, %c0_237] : memref<3x512x128xbf16, #tpu.memory_space<vmem>>, vector<1x512x128xbf16>
    %506 = vector.shape_cast %505 : vector<1x512x128xbf16> to vector<512x128xbf16>
    %c2_238 = arith.constant 2 : index
    %c0_239 = arith.constant 0 : index
    %c0_240 = arith.constant 0 : index
    %507 = vector.load %arg23[%c2_238, %c0_239, %c0_240] : memref<3x1x128xf32, #tpu.memory_space<vmem>>, vector<1x1x128xf32>
    %508 = vector.shape_cast %507 : vector<1x1x128xf32> to vector<1x128xf32>
    %c2_241 = arith.constant 2 : index
    %c0_242 = arith.constant 0 : index
    %c0_243 = arith.constant 0 : index
    %509 = vector.load %arg24[%c2_241, %c0_242, %c0_243] : memref<3x1x128xf32, #tpu.memory_space<vmem>>, vector<1x1x128xf32>
    %510 = vector.shape_cast %509 : vector<1x1x128xf32> to vector<1x128xf32>
    %c2_244 = arith.constant 2 : index
    %c0_245 = arith.constant 0 : index
    %c0_246 = arith.constant 0 : index
    %511 = vector.load %arg25[%c2_244, %c0_245, %c0_246] : memref<3x1x128xf32, #tpu.memory_space<vmem>>, vector<1x1x128xf32>
    %512 = vector.shape_cast %511 : vector<1x1x128xf32> to vector<1x128xf32>
    %513 = vector.shape_cast %488 : vector<2x16x128xf32> to vector<32x128xf32>
    %514 = arith.truncf %513 : vector<32x128xf32> to vector<32x128xbf16>
    %cst_247 = arith.constant dense<0.000000e+00> : vector<32x384xf32>
    %515 = tpu.matmul %514, %490, %cst_247 {dimension_numbers = #tpu.dot_dimension_numbers<[1], [0], [0], [1], [0, 0, 1, 1], [], []>} : vector<32x128xbf16>, vector<128x384xbf16>, vector<32x384xf32> -> vector<32x384xf32>
    %516 = vector.broadcast %492 : vector<1x384xf32> to vector<32x384xf32>
    %517 = arith.addf %515, %516 : vector<32x384xf32>
    %518 = vector.shape_cast %517 : vector<32x384xf32> to vector<2x16x384xf32>
    %519 = vector.extract_strided_slice %518 {offsets = [0, 0, 0], sizes = [2, 16, 128], strides = [1, 1, 1]} : vector<2x16x384xf32> to vector<2x16x128xf32>
    %520 = vector.extract_strided_slice %518 {offsets = [0, 0, 128], sizes = [2, 16, 128], strides = [1, 1, 1]} : vector<2x16x384xf32> to vector<2x16x128xf32>
    %521 = vector.extract_strided_slice %518 {offsets = [0, 0, 256], sizes = [2, 16, 128], strides = [1, 1, 1]} : vector<2x16x384xf32> to vector<2x16x128xf32>
    %522 = arith.truncf %519 : vector<2x16x128xf32> to vector<2x16x128xbf16>
    %523 = arith.truncf %520 : vector<2x16x128xf32> to vector<2x16x128xbf16>
    %524 = arith.truncf %521 : vector<2x16x128xf32> to vector<2x16x128xbf16>
    %cst_248 = arith.constant 0.000000e+00 : f32
    %525 = vector.broadcast %cst_248 : f32 to vector<32x128xf32>
    %526 = vector.extract_strided_slice %522 {offsets = [0, 0, 0], sizes = [2, 16, 32], strides = [1, 1, 1]} : vector<2x16x128xbf16> to vector<2x16x32xbf16>
    %527 = vector.extract_strided_slice %523 {offsets = [0, 0, 0], sizes = [2, 16, 32], strides = [1, 1, 1]} : vector<2x16x128xbf16> to vector<2x16x32xbf16>
    %cst_249 = arith.constant dense<0.000000e+00> : vector<2x16x16xf32>
    %528 = tpu.matmul %526, %527, %cst_249 {dimension_numbers = #tpu.dot_dimension_numbers<[2], [2], [1], [1], [0, 0, 0, 1, 1, 1], [0], [0]>} : vector<2x16x32xbf16>, vector<2x16x32xbf16>, vector<2x16x16xf32> -> vector<2x16x16xf32>
    %cst_250 = arith.constant 0.176776692 : f32
    %529 = vector.broadcast %cst_250 : f32 to vector<2x16x16xf32>
    %530 = arith.mulf %528, %529 : vector<2x16x16xf32>
    %531 = vector.broadcast %82 : vector<2x1x16xf32> to vector<2x16x16xf32>
    %532 = arith.addf %530, %531 : vector<2x16x16xf32>
    %cst_251 = arith.constant dense<0xFF800000> : vector<2x16xf32>
    %533 = vector.multi_reduction <maximumf>, %532, %cst_251 [2] : vector<2x16x16xf32> to vector<2x16xf32>
    %534 = vector.shape_cast %533 : vector<2x16xf32> to vector<2x16x1xf32>
    %535 = vector.broadcast %534 : vector<2x16x1xf32> to vector<2x16x16xf32>
    %536 = arith.subf %532, %535 : vector<2x16x16xf32>
    %537 = math.exp %536 : vector<2x16x16xf32>
    %cst_252 = arith.constant dense<0.000000e+00> : vector<2x16xf32>
    %538 = vector.multi_reduction <add>, %537, %cst_252 [2] : vector<2x16x16xf32> to vector<2x16xf32>
    %539 = vector.shape_cast %538 : vector<2x16xf32> to vector<2x16x1xf32>
    %540 = tpu.reciprocal %539 {approx = true} : vector<2x16x1xf32> -> vector<2x16x1xf32>
    %541 = vector.broadcast %540 : vector<2x16x1xf32> to vector<2x16x16xf32>
    %542 = arith.mulf %537, %541 : vector<2x16x16xf32>
    %543 = arith.truncf %542 : vector<2x16x16xf32> to vector<2x16x16xbf16>
    %544 = vector.extract_strided_slice %524 {offsets = [0, 0, 0], sizes = [2, 16, 32], strides = [1, 1, 1]} : vector<2x16x128xbf16> to vector<2x16x32xbf16>
    %cst_253 = arith.constant dense<0.000000e+00> : vector<2x16x32xf32>
    %545 = tpu.matmul %543, %544, %cst_253 {dimension_numbers = #tpu.dot_dimension_numbers<[2], [1], [1], [2], [0, 0, 0, 1, 1, 2], [0], [0]>} : vector<2x16x16xbf16>, vector<2x16x32xbf16>, vector<2x16x32xf32> -> vector<2x16x32xf32>
    %546 = vector.shape_cast %545 : vector<2x16x32xf32> to vector<32x32xf32>
    %547 = arith.truncf %546 : vector<32x32xf32> to vector<32x32xbf16>
    %548 = vector.extract_strided_slice %494 {offsets = [0, 0], sizes = [32, 128], strides = [1, 1]} : vector<128x128xbf16> to vector<32x128xbf16>
    %cst_254 = arith.constant dense<0.000000e+00> : vector<32x128xf32>
    %549 = tpu.matmul %547, %548, %cst_254 {dimension_numbers = #tpu.dot_dimension_numbers<[1], [0], [0], [1], [0, 0, 1, 1], [], []>} : vector<32x32xbf16>, vector<32x128xbf16>, vector<32x128xf32> -> vector<32x128xf32>
    %550 = arith.addf %525, %549 : vector<32x128xf32>
    %551 = vector.extract_strided_slice %522 {offsets = [0, 0, 32], sizes = [2, 16, 32], strides = [1, 1, 1]} : vector<2x16x128xbf16> to vector<2x16x32xbf16>
    %552 = vector.extract_strided_slice %523 {offsets = [0, 0, 32], sizes = [2, 16, 32], strides = [1, 1, 1]} : vector<2x16x128xbf16> to vector<2x16x32xbf16>
    %cst_255 = arith.constant dense<0.000000e+00> : vector<2x16x16xf32>
    %553 = tpu.matmul %551, %552, %cst_255 {dimension_numbers = #tpu.dot_dimension_numbers<[2], [2], [1], [1], [0, 0, 0, 1, 1, 1], [0], [0]>} : vector<2x16x32xbf16>, vector<2x16x32xbf16>, vector<2x16x16xf32> -> vector<2x16x16xf32>
    %cst_256 = arith.constant 0.176776692 : f32
    %554 = vector.broadcast %cst_256 : f32 to vector<2x16x16xf32>
    %555 = arith.mulf %553, %554 : vector<2x16x16xf32>
    %556 = vector.broadcast %82 : vector<2x1x16xf32> to vector<2x16x16xf32>
    %557 = arith.addf %555, %556 : vector<2x16x16xf32>
    %cst_257 = arith.constant dense<0xFF800000> : vector<2x16xf32>
    %558 = vector.multi_reduction <maximumf>, %557, %cst_257 [2] : vector<2x16x16xf32> to vector<2x16xf32>
    %559 = vector.shape_cast %558 : vector<2x16xf32> to vector<2x16x1xf32>
    %560 = vector.broadcast %559 : vector<2x16x1xf32> to vector<2x16x16xf32>
    %561 = arith.subf %557, %560 : vector<2x16x16xf32>
    %562 = math.exp %561 : vector<2x16x16xf32>
    %cst_258 = arith.constant dense<0.000000e+00> : vector<2x16xf32>
    %563 = vector.multi_reduction <add>, %562, %cst_258 [2] : vector<2x16x16xf32> to vector<2x16xf32>
    %564 = vector.shape_cast %563 : vector<2x16xf32> to vector<2x16x1xf32>
    %565 = tpu.reciprocal %564 {approx = true} : vector<2x16x1xf32> -> vector<2x16x1xf32>
    %566 = vector.broadcast %565 : vector<2x16x1xf32> to vector<2x16x16xf32>
    %567 = arith.mulf %562, %566 : vector<2x16x16xf32>
    %568 = arith.truncf %567 : vector<2x16x16xf32> to vector<2x16x16xbf16>
    %569 = vector.extract_strided_slice %524 {offsets = [0, 0, 32], sizes = [2, 16, 32], strides = [1, 1, 1]} : vector<2x16x128xbf16> to vector<2x16x32xbf16>
    %cst_259 = arith.constant dense<0.000000e+00> : vector<2x16x32xf32>
    %570 = tpu.matmul %568, %569, %cst_259 {dimension_numbers = #tpu.dot_dimension_numbers<[2], [1], [1], [2], [0, 0, 0, 1, 1, 2], [0], [0]>} : vector<2x16x16xbf16>, vector<2x16x32xbf16>, vector<2x16x32xf32> -> vector<2x16x32xf32>
    %571 = vector.shape_cast %570 : vector<2x16x32xf32> to vector<32x32xf32>
    %572 = arith.truncf %571 : vector<32x32xf32> to vector<32x32xbf16>
    %573 = vector.extract_strided_slice %494 {offsets = [32, 0], sizes = [32, 128], strides = [1, 1]} : vector<128x128xbf16> to vector<32x128xbf16>
    %cst_260 = arith.constant dense<0.000000e+00> : vector<32x128xf32>
    %574 = tpu.matmul %572, %573, %cst_260 {dimension_numbers = #tpu.dot_dimension_numbers<[1], [0], [0], [1], [0, 0, 1, 1], [], []>} : vector<32x32xbf16>, vector<32x128xbf16>, vector<32x128xf32> -> vector<32x128xf32>
    %575 = arith.addf %550, %574 : vector<32x128xf32>
    %576 = vector.extract_strided_slice %522 {offsets = [0, 0, 64], sizes = [2, 16, 32], strides = [1, 1, 1]} : vector<2x16x128xbf16> to vector<2x16x32xbf16>
    %577 = vector.extract_strided_slice %523 {offsets = [0, 0, 64], sizes = [2, 16, 32], strides = [1, 1, 1]} : vector<2x16x128xbf16> to vector<2x16x32xbf16>
    %cst_261 = arith.constant dense<0.000000e+00> : vector<2x16x16xf32>
    %578 = tpu.matmul %576, %577, %cst_261 {dimension_numbers = #tpu.dot_dimension_numbers<[2], [2], [1], [1], [0, 0, 0, 1, 1, 1], [0], [0]>} : vector<2x16x32xbf16>, vector<2x16x32xbf16>, vector<2x16x16xf32> -> vector<2x16x16xf32>
    %cst_262 = arith.constant 0.176776692 : f32
    %579 = vector.broadcast %cst_262 : f32 to vector<2x16x16xf32>
    %580 = arith.mulf %578, %579 : vector<2x16x16xf32>
    %581 = vector.broadcast %82 : vector<2x1x16xf32> to vector<2x16x16xf32>
    %582 = arith.addf %580, %581 : vector<2x16x16xf32>
    %cst_263 = arith.constant dense<0xFF800000> : vector<2x16xf32>
    %583 = vector.multi_reduction <maximumf>, %582, %cst_263 [2] : vector<2x16x16xf32> to vector<2x16xf32>
    %584 = vector.shape_cast %583 : vector<2x16xf32> to vector<2x16x1xf32>
    %585 = vector.broadcast %584 : vector<2x16x1xf32> to vector<2x16x16xf32>
    %586 = arith.subf %582, %585 : vector<2x16x16xf32>
    %587 = math.exp %586 : vector<2x16x16xf32>
    %cst_264 = arith.constant dense<0.000000e+00> : vector<2x16xf32>
    %588 = vector.multi_reduction <add>, %587, %cst_264 [2] : vector<2x16x16xf32> to vector<2x16xf32>
    %589 = vector.shape_cast %588 : vector<2x16xf32> to vector<2x16x1xf32>
    %590 = tpu.reciprocal %589 {approx = true} : vector<2x16x1xf32> -> vector<2x16x1xf32>
    %591 = vector.broadcast %590 : vector<2x16x1xf32> to vector<2x16x16xf32>
    %592 = arith.mulf %587, %591 : vector<2x16x16xf32>
    %593 = arith.truncf %592 : vector<2x16x16xf32> to vector<2x16x16xbf16>
    %594 = vector.extract_strided_slice %524 {offsets = [0, 0, 64], sizes = [2, 16, 32], strides = [1, 1, 1]} : vector<2x16x128xbf16> to vector<2x16x32xbf16>
    %cst_265 = arith.constant dense<0.000000e+00> : vector<2x16x32xf32>
    %595 = tpu.matmul %593, %594, %cst_265 {dimension_numbers = #tpu.dot_dimension_numbers<[2], [1], [1], [2], [0, 0, 0, 1, 1, 2], [0], [0]>} : vector<2x16x16xbf16>, vector<2x16x32xbf16>, vector<2x16x32xf32> -> vector<2x16x32xf32>
    %596 = vector.shape_cast %595 : vector<2x16x32xf32> to vector<32x32xf32>
    %597 = arith.truncf %596 : vector<32x32xf32> to vector<32x32xbf16>
    %598 = vector.extract_strided_slice %494 {offsets = [64, 0], sizes = [32, 128], strides = [1, 1]} : vector<128x128xbf16> to vector<32x128xbf16>
    %cst_266 = arith.constant dense<0.000000e+00> : vector<32x128xf32>
    %599 = tpu.matmul %597, %598, %cst_266 {dimension_numbers = #tpu.dot_dimension_numbers<[1], [0], [0], [1], [0, 0, 1, 1], [], []>} : vector<32x32xbf16>, vector<32x128xbf16>, vector<32x128xf32> -> vector<32x128xf32>
    %600 = arith.addf %575, %599 : vector<32x128xf32>
    %601 = vector.extract_strided_slice %522 {offsets = [0, 0, 96], sizes = [2, 16, 32], strides = [1, 1, 1]} : vector<2x16x128xbf16> to vector<2x16x32xbf16>
    %602 = vector.extract_strided_slice %523 {offsets = [0, 0, 96], sizes = [2, 16, 32], strides = [1, 1, 1]} : vector<2x16x128xbf16> to vector<2x16x32xbf16>
    %cst_267 = arith.constant dense<0.000000e+00> : vector<2x16x16xf32>
    %603 = tpu.matmul %601, %602, %cst_267 {dimension_numbers = #tpu.dot_dimension_numbers<[2], [2], [1], [1], [0, 0, 0, 1, 1, 1], [0], [0]>} : vector<2x16x32xbf16>, vector<2x16x32xbf16>, vector<2x16x16xf32> -> vector<2x16x16xf32>
    %cst_268 = arith.constant 0.176776692 : f32
    %604 = vector.broadcast %cst_268 : f32 to vector<2x16x16xf32>
    %605 = arith.mulf %603, %604 : vector<2x16x16xf32>
    %606 = vector.broadcast %82 : vector<2x1x16xf32> to vector<2x16x16xf32>
    %607 = arith.addf %605, %606 : vector<2x16x16xf32>
    %cst_269 = arith.constant dense<0xFF800000> : vector<2x16xf32>
    %608 = vector.multi_reduction <maximumf>, %607, %cst_269 [2] : vector<2x16x16xf32> to vector<2x16xf32>
    %609 = vector.shape_cast %608 : vector<2x16xf32> to vector<2x16x1xf32>
    %610 = vector.broadcast %609 : vector<2x16x1xf32> to vector<2x16x16xf32>
    %611 = arith.subf %607, %610 : vector<2x16x16xf32>
    %612 = math.exp %611 : vector<2x16x16xf32>
    %cst_270 = arith.constant dense<0.000000e+00> : vector<2x16xf32>
    %613 = vector.multi_reduction <add>, %612, %cst_270 [2] : vector<2x16x16xf32> to vector<2x16xf32>
    %614 = vector.shape_cast %613 : vector<2x16xf32> to vector<2x16x1xf32>
    %615 = tpu.reciprocal %614 {approx = true} : vector<2x16x1xf32> -> vector<2x16x1xf32>
    %616 = vector.broadcast %615 : vector<2x16x1xf32> to vector<2x16x16xf32>
    %617 = arith.mulf %612, %616 : vector<2x16x16xf32>
    %618 = arith.truncf %617 : vector<2x16x16xf32> to vector<2x16x16xbf16>
    %619 = vector.extract_strided_slice %524 {offsets = [0, 0, 96], sizes = [2, 16, 32], strides = [1, 1, 1]} : vector<2x16x128xbf16> to vector<2x16x32xbf16>
    %cst_271 = arith.constant dense<0.000000e+00> : vector<2x16x32xf32>
    %620 = tpu.matmul %618, %619, %cst_271 {dimension_numbers = #tpu.dot_dimension_numbers<[2], [1], [1], [2], [0, 0, 0, 1, 1, 2], [0], [0]>} : vector<2x16x16xbf16>, vector<2x16x32xbf16>, vector<2x16x32xf32> -> vector<2x16x32xf32>
    %621 = vector.shape_cast %620 : vector<2x16x32xf32> to vector<32x32xf32>
    %622 = arith.truncf %621 : vector<32x32xf32> to vector<32x32xbf16>
    %623 = vector.extract_strided_slice %494 {offsets = [96, 0], sizes = [32, 128], strides = [1, 1]} : vector<128x128xbf16> to vector<32x128xbf16>
    %cst_272 = arith.constant dense<0.000000e+00> : vector<32x128xf32>
    %624 = tpu.matmul %622, %623, %cst_272 {dimension_numbers = #tpu.dot_dimension_numbers<[1], [0], [0], [1], [0, 0, 1, 1], [], []>} : vector<32x32xbf16>, vector<32x128xbf16>, vector<32x128xf32> -> vector<32x128xf32>
    %625 = arith.addf %600, %624 : vector<32x128xf32>
    %626 = vector.broadcast %496 : vector<1x128xf32> to vector<32x128xf32>
    %627 = arith.addf %625, %626 : vector<32x128xf32>
    %628 = arith.addf %513, %627 : vector<32x128xf32>
    %cst_273 = arith.constant dense<0.000000e+00> : vector<32xf32>
    %629 = vector.multi_reduction <add>, %628, %cst_273 [1] : vector<32x128xf32> to vector<32xf32>
    %630 = vector.shape_cast %629 : vector<32xf32> to vector<32x1xf32>
    %cst_274 = arith.constant 1.280000e+02 : f32
    %631 = vector.broadcast %cst_274 : f32 to vector<32x1xf32>
    %632 = arith.divf %630, %631 : vector<32x1xf32>
    %633 = vector.broadcast %632 : vector<32x1xf32> to vector<32x128xf32>
    %634 = arith.subf %628, %633 : vector<32x128xf32>
    %635 = arith.mulf %634, %634 : vector<32x128xf32>
    %cst_275 = arith.constant dense<0.000000e+00> : vector<32xf32>
    %636 = vector.multi_reduction <add>, %635, %cst_275 [1] : vector<32x128xf32> to vector<32xf32>
    %637 = vector.shape_cast %636 : vector<32xf32> to vector<32x1xf32>
    %cst_276 = arith.constant 1.280000e+02 : f32
    %638 = vector.broadcast %cst_276 : f32 to vector<32x1xf32>
    %639 = arith.divf %637, %638 : vector<32x1xf32>
    %cst_277 = arith.constant 9.99999996E-13 : f32
    %640 = vector.broadcast %cst_277 : f32 to vector<32x1xf32>
    %641 = arith.addf %639, %640 : vector<32x1xf32>
    %642 = math.rsqrt %641 : vector<32x1xf32>
    %643 = vector.broadcast %642 : vector<32x1xf32> to vector<32x128xf32>
    %644 = arith.mulf %634, %643 : vector<32x128xf32>
    %645 = vector.broadcast %498 : vector<1x128xf32> to vector<32x128xf32>
    %646 = arith.mulf %644, %645 : vector<32x128xf32>
    %647 = vector.broadcast %500 : vector<1x128xf32> to vector<32x128xf32>
    %648 = arith.addf %646, %647 : vector<32x128xf32>
    %649 = arith.truncf %648 : vector<32x128xf32> to vector<32x128xbf16>
    %cst_278 = arith.constant dense<0.000000e+00> : vector<32x512xf32>
    %650 = tpu.matmul %649, %502, %cst_278 {dimension_numbers = #tpu.dot_dimension_numbers<[1], [0], [0], [1], [0, 0, 1, 1], [], []>} : vector<32x128xbf16>, vector<128x512xbf16>, vector<32x512xf32> -> vector<32x512xf32>
    %651 = vector.broadcast %504 : vector<1x512xf32> to vector<32x512xf32>
    %652 = arith.addf %650, %651 : vector<32x512xf32>
    %cst_279 = arith.constant 5.000000e-01 : f32
    %653 = vector.broadcast %cst_279 : f32 to vector<32x512xf32>
    %654 = arith.mulf %653, %652 : vector<32x512xf32>
    %cst_280 = arith.constant 4.471500e-02 : f32
    %655 = vector.broadcast %cst_280 : f32 to vector<32x512xf32>
    %656 = arith.mulf %655, %652 : vector<32x512xf32>
    %657 = arith.mulf %656, %652 : vector<32x512xf32>
    %658 = arith.mulf %657, %652 : vector<32x512xf32>
    %659 = arith.addf %652, %658 : vector<32x512xf32>
    %cst_281 = arith.constant 0.797884583 : f32
    %660 = vector.broadcast %cst_281 : f32 to vector<32x512xf32>
    %661 = arith.mulf %660, %659 : vector<32x512xf32>
    %662 = math.tanh %661 : vector<32x512xf32>
    %cst_282 = arith.constant 1.000000e+00 : f32
    %663 = vector.broadcast %cst_282 : f32 to vector<32x512xf32>
    %664 = arith.addf %663, %662 : vector<32x512xf32>
    %665 = arith.mulf %654, %664 : vector<32x512xf32>
    %666 = arith.truncf %665 : vector<32x512xf32> to vector<32x512xbf16>
    %cst_283 = arith.constant dense<0.000000e+00> : vector<32x128xf32>
    %667 = tpu.matmul %666, %506, %cst_283 {dimension_numbers = #tpu.dot_dimension_numbers<[1], [0], [0], [1], [0, 0, 1, 1], [], []>} : vector<32x512xbf16>, vector<512x128xbf16>, vector<32x128xf32> -> vector<32x128xf32>
    %668 = vector.broadcast %508 : vector<1x128xf32> to vector<32x128xf32>
    %669 = arith.addf %667, %668 : vector<32x128xf32>
    %670 = arith.addf %648, %669 : vector<32x128xf32>
    %cst_284 = arith.constant dense<0.000000e+00> : vector<32xf32>
    %671 = vector.multi_reduction <add>, %670, %cst_284 [1] : vector<32x128xf32> to vector<32xf32>
    %672 = vector.shape_cast %671 : vector<32xf32> to vector<32x1xf32>
    %cst_285 = arith.constant 1.280000e+02 : f32
    %673 = vector.broadcast %cst_285 : f32 to vector<32x1xf32>
    %674 = arith.divf %672, %673 : vector<32x1xf32>
    %675 = vector.broadcast %674 : vector<32x1xf32> to vector<32x128xf32>
    %676 = arith.subf %670, %675 : vector<32x128xf32>
    %677 = arith.mulf %676, %676 : vector<32x128xf32>
    %cst_286 = arith.constant dense<0.000000e+00> : vector<32xf32>
    %678 = vector.multi_reduction <add>, %677, %cst_286 [1] : vector<32x128xf32> to vector<32xf32>
    %679 = vector.shape_cast %678 : vector<32xf32> to vector<32x1xf32>
    %cst_287 = arith.constant 1.280000e+02 : f32
    %680 = vector.broadcast %cst_287 : f32 to vector<32x1xf32>
    %681 = arith.divf %679, %680 : vector<32x1xf32>
    %cst_288 = arith.constant 9.99999996E-13 : f32
    %682 = vector.broadcast %cst_288 : f32 to vector<32x1xf32>
    %683 = arith.addf %681, %682 : vector<32x1xf32>
    %684 = math.rsqrt %683 : vector<32x1xf32>
    %685 = vector.broadcast %684 : vector<32x1xf32> to vector<32x128xf32>
    %686 = arith.mulf %676, %685 : vector<32x128xf32>
    %687 = vector.broadcast %510 : vector<1x128xf32> to vector<32x128xf32>
    %688 = arith.mulf %686, %687 : vector<32x128xf32>
    %689 = vector.broadcast %512 : vector<1x128xf32> to vector<32x128xf32>
    %690 = arith.addf %688, %689 : vector<32x128xf32>
    %691 = vector.shape_cast %690 : vector<32x128xf32> to vector<2x16x128xf32>
    %c0_289 = arith.constant 0 : index
    %c0_290 = arith.constant 0 : index
    %692 = vector.load %arg26[%c0_289, %c0_290] : memref<128x384xbf16, #tpu.memory_space<vmem>>, vector<128x384xbf16>
    %c0_291 = arith.constant 0 : index
    %c0_292 = arith.constant 0 : index
    %693 = vector.load %arg27[%c0_291, %c0_292] : memref<1x384xf32, #tpu.memory_space<vmem>>, vector<1x384xf32>
    %c0_293 = arith.constant 0 : index
    %c0_294 = arith.constant 0 : index
    %694 = vector.load %arg28[%c0_293, %c0_294] : memref<128x128xbf16, #tpu.memory_space<vmem>>, vector<128x128xbf16>
    %c0_295 = arith.constant 0 : index
    %c0_296 = arith.constant 0 : index
    %695 = vector.load %arg29[%c0_295, %c0_296] : memref<1x128xf32, #tpu.memory_space<vmem>>, vector<1x128xf32>
    %c0_297 = arith.constant 0 : index
    %c0_298 = arith.constant 0 : index
    %696 = vector.load %arg30[%c0_297, %c0_298] : memref<1x128xf32, #tpu.memory_space<vmem>>, vector<1x128xf32>
    %c0_299 = arith.constant 0 : index
    %c0_300 = arith.constant 0 : index
    %697 = vector.load %arg31[%c0_299, %c0_300] : memref<1x128xf32, #tpu.memory_space<vmem>>, vector<1x128xf32>
    %c0_301 = arith.constant 0 : index
    %c0_302 = arith.constant 0 : index
    %698 = vector.load %arg32[%c0_301, %c0_302] : memref<128x128xbf16, #tpu.memory_space<vmem>>, vector<128x128xbf16>
    %c0_303 = arith.constant 0 : index
    %c0_304 = arith.constant 0 : index
    %699 = vector.load %arg33[%c0_303, %c0_304] : memref<1x128xf32, #tpu.memory_space<vmem>>, vector<1x128xf32>
    %c0_305 = arith.constant 0 : index
    %c0_306 = arith.constant 0 : index
    %700 = vector.load %arg34[%c0_305, %c0_306] : memref<128x256xbf16, #tpu.memory_space<vmem>>, vector<128x256xbf16>
    %c0_307 = arith.constant 0 : index
    %c0_308 = arith.constant 0 : index
    %701 = vector.load %arg35[%c0_307, %c0_308] : memref<1x256xf32, #tpu.memory_space<vmem>>, vector<1x256xf32>
    %c0_309 = arith.constant 0 : index
    %c0_310 = arith.constant 0 : index
    %702 = vector.load %arg36[%c0_309, %c0_310] : memref<128x128xbf16, #tpu.memory_space<vmem>>, vector<128x128xbf16>
    %c0_311 = arith.constant 0 : index
    %c0_312 = arith.constant 0 : index
    %703 = vector.load %arg37[%c0_311, %c0_312] : memref<1x128xf32, #tpu.memory_space<vmem>>, vector<1x128xf32>
    %c0_313 = arith.constant 0 : index
    %c0_314 = arith.constant 0 : index
    %704 = vector.load %arg38[%c0_313, %c0_314] : memref<1x128xf32, #tpu.memory_space<vmem>>, vector<1x128xf32>
    %c0_315 = arith.constant 0 : index
    %c0_316 = arith.constant 0 : index
    %705 = vector.load %arg39[%c0_315, %c0_316] : memref<1x128xf32, #tpu.memory_space<vmem>>, vector<1x128xf32>
    %c0_317 = arith.constant 0 : index
    %c0_318 = arith.constant 0 : index
    %706 = vector.load %arg40[%c0_317, %c0_318] : memref<128x512xbf16, #tpu.memory_space<vmem>>, vector<128x512xbf16>
    %c0_319 = arith.constant 0 : index
    %c0_320 = arith.constant 0 : index
    %707 = vector.load %arg41[%c0_319, %c0_320] : memref<1x512xf32, #tpu.memory_space<vmem>>, vector<1x512xf32>
    %c0_321 = arith.constant 0 : index
    %c0_322 = arith.constant 0 : index
    %708 = vector.load %arg42[%c0_321, %c0_322] : memref<512x128xbf16, #tpu.memory_space<vmem>>, vector<512x128xbf16>
    %c0_323 = arith.constant 0 : index
    %c0_324 = arith.constant 0 : index
    %709 = vector.load %arg43[%c0_323, %c0_324] : memref<1x128xf32, #tpu.memory_space<vmem>>, vector<1x128xf32>
    %c0_325 = arith.constant 0 : index
    %c0_326 = arith.constant 0 : index
    %710 = vector.load %arg44[%c0_325, %c0_326] : memref<1x128xf32, #tpu.memory_space<vmem>>, vector<1x128xf32>
    %c0_327 = arith.constant 0 : index
    %c0_328 = arith.constant 0 : index
    %711 = vector.load %arg45[%c0_327, %c0_328] : memref<1x128xf32, #tpu.memory_space<vmem>>, vector<1x128xf32>
    %c0_329 = arith.constant 0 : index
    %c0_330 = arith.constant 0 : index
    %712 = vector.load %arg46[%c0_329, %c0_330] : memref<4x128xf32, #tpu.memory_space<vmem>>, vector<4x128xf32>
    %713 = vector.shape_cast %712 : vector<4x128xf32> to vector<1x4x128xf32>
    %714 = vector.shape_cast %713 : vector<1x4x128xf32> to vector<1x4x128xf32>
    %715 = vector.broadcast %714 : vector<1x4x128xf32> to vector<2x4x128xf32>
    %716 = vector.shape_cast %715 : vector<2x4x128xf32> to vector<8x128xf32>
    %717 = arith.truncf %716 : vector<8x128xf32> to vector<8x128xbf16>
    %cst_331 = arith.constant dense<0.000000e+00> : vector<8x384xf32>
    %718 = tpu.matmul %717, %692, %cst_331 {dimension_numbers = #tpu.dot_dimension_numbers<[1], [0], [0], [1], [0, 0, 1, 1], [], []>} : vector<8x128xbf16>, vector<128x384xbf16>, vector<8x384xf32> -> vector<8x384xf32>
    %719 = vector.broadcast %693 : vector<1x384xf32> to vector<8x384xf32>
    %720 = arith.addf %718, %719 : vector<8x384xf32>
    %721 = vector.shape_cast %720 : vector<8x384xf32> to vector<2x4x384xf32>
    %722 = vector.extract_strided_slice %721 {offsets = [0, 0, 0], sizes = [2, 4, 128], strides = [1, 1, 1]} : vector<2x4x384xf32> to vector<2x4x128xf32>
    %723 = vector.extract_strided_slice %721 {offsets = [0, 0, 128], sizes = [2, 4, 128], strides = [1, 1, 1]} : vector<2x4x384xf32> to vector<2x4x128xf32>
    %724 = vector.extract_strided_slice %721 {offsets = [0, 0, 256], sizes = [2, 4, 128], strides = [1, 1, 1]} : vector<2x4x384xf32> to vector<2x4x128xf32>
    %725 = arith.truncf %722 : vector<2x4x128xf32> to vector<2x4x128xbf16>
    %726 = arith.truncf %723 : vector<2x4x128xf32> to vector<2x4x128xbf16>
    %727 = arith.truncf %724 : vector<2x4x128xf32> to vector<2x4x128xbf16>
    %cst_332 = arith.constant 0.000000e+00 : f32
    %728 = vector.broadcast %cst_332 : f32 to vector<8x128xf32>
    %729 = vector.extract_strided_slice %725 {offsets = [0, 0, 0], sizes = [2, 4, 32], strides = [1, 1, 1]} : vector<2x4x128xbf16> to vector<2x4x32xbf16>
    %730 = vector.extract_strided_slice %726 {offsets = [0, 0, 0], sizes = [2, 4, 32], strides = [1, 1, 1]} : vector<2x4x128xbf16> to vector<2x4x32xbf16>
    %cst_333 = arith.constant dense<0.000000e+00> : vector<2x4x4xf32>
    %731 = tpu.matmul %729, %730, %cst_333 {dimension_numbers = #tpu.dot_dimension_numbers<[2], [2], [1], [1], [0, 0, 0, 1, 1, 1], [0], [0]>} : vector<2x4x32xbf16>, vector<2x4x32xbf16>, vector<2x4x4xf32> -> vector<2x4x4xf32>
    %cst_334 = arith.constant 0.176776692 : f32
    %732 = vector.broadcast %cst_334 : f32 to vector<2x4x4xf32>
    %733 = arith.mulf %731, %732 : vector<2x4x4xf32>
    %cst_335 = arith.constant dense<0xFF800000> : vector<2x4xf32>
    %734 = vector.multi_reduction <maximumf>, %733, %cst_335 [2] : vector<2x4x4xf32> to vector<2x4xf32>
    %735 = vector.shape_cast %734 : vector<2x4xf32> to vector<2x4x1xf32>
    %736 = vector.broadcast %735 : vector<2x4x1xf32> to vector<2x4x4xf32>
    %737 = arith.subf %733, %736 : vector<2x4x4xf32>
    %738 = math.exp %737 : vector<2x4x4xf32>
    %cst_336 = arith.constant dense<0.000000e+00> : vector<2x4xf32>
    %739 = vector.multi_reduction <add>, %738, %cst_336 [2] : vector<2x4x4xf32> to vector<2x4xf32>
    %740 = vector.shape_cast %739 : vector<2x4xf32> to vector<2x4x1xf32>
    %741 = tpu.reciprocal %740 {approx = true} : vector<2x4x1xf32> -> vector<2x4x1xf32>
    %742 = vector.broadcast %741 : vector<2x4x1xf32> to vector<2x4x4xf32>
    %743 = arith.mulf %738, %742 : vector<2x4x4xf32>
    %744 = arith.truncf %743 : vector<2x4x4xf32> to vector<2x4x4xbf16>
    %745 = vector.extract_strided_slice %727 {offsets = [0, 0, 0], sizes = [2, 4, 32], strides = [1, 1, 1]} : vector<2x4x128xbf16> to vector<2x4x32xbf16>
    %cst_337 = arith.constant dense<0.000000e+00> : vector<2x4x32xf32>
    %746 = tpu.matmul %744, %745, %cst_337 {dimension_numbers = #tpu.dot_dimension_numbers<[2], [1], [1], [2], [0, 0, 0, 1, 1, 2], [0], [0]>} : vector<2x4x4xbf16>, vector<2x4x32xbf16>, vector<2x4x32xf32> -> vector<2x4x32xf32>
    %747 = vector.shape_cast %746 : vector<2x4x32xf32> to vector<8x32xf32>
    %748 = arith.truncf %747 : vector<8x32xf32> to vector<8x32xbf16>
    %749 = vector.extract_strided_slice %694 {offsets = [0, 0], sizes = [32, 128], strides = [1, 1]} : vector<128x128xbf16> to vector<32x128xbf16>
    %cst_338 = arith.constant dense<0.000000e+00> : vector<8x128xf32>
    %750 = tpu.matmul %748, %749, %cst_338 {dimension_numbers = #tpu.dot_dimension_numbers<[1], [0], [0], [1], [0, 0, 1, 1], [], []>} : vector<8x32xbf16>, vector<32x128xbf16>, vector<8x128xf32> -> vector<8x128xf32>
    %751 = arith.addf %728, %750 : vector<8x128xf32>
    %752 = vector.extract_strided_slice %725 {offsets = [0, 0, 32], sizes = [2, 4, 32], strides = [1, 1, 1]} : vector<2x4x128xbf16> to vector<2x4x32xbf16>
    %753 = vector.extract_strided_slice %726 {offsets = [0, 0, 32], sizes = [2, 4, 32], strides = [1, 1, 1]} : vector<2x4x128xbf16> to vector<2x4x32xbf16>
    %cst_339 = arith.constant dense<0.000000e+00> : vector<2x4x4xf32>
    %754 = tpu.matmul %752, %753, %cst_339 {dimension_numbers = #tpu.dot_dimension_numbers<[2], [2], [1], [1], [0, 0, 0, 1, 1, 1], [0], [0]>} : vector<2x4x32xbf16>, vector<2x4x32xbf16>, vector<2x4x4xf32> -> vector<2x4x4xf32>
    %cst_340 = arith.constant 0.176776692 : f32
    %755 = vector.broadcast %cst_340 : f32 to vector<2x4x4xf32>
    %756 = arith.mulf %754, %755 : vector<2x4x4xf32>
    %cst_341 = arith.constant dense<0xFF800000> : vector<2x4xf32>
    %757 = vector.multi_reduction <maximumf>, %756, %cst_341 [2] : vector<2x4x4xf32> to vector<2x4xf32>
    %758 = vector.shape_cast %757 : vector<2x4xf32> to vector<2x4x1xf32>
    %759 = vector.broadcast %758 : vector<2x4x1xf32> to vector<2x4x4xf32>
    %760 = arith.subf %756, %759 : vector<2x4x4xf32>
    %761 = math.exp %760 : vector<2x4x4xf32>
    %cst_342 = arith.constant dense<0.000000e+00> : vector<2x4xf32>
    %762 = vector.multi_reduction <add>, %761, %cst_342 [2] : vector<2x4x4xf32> to vector<2x4xf32>
    %763 = vector.shape_cast %762 : vector<2x4xf32> to vector<2x4x1xf32>
    %764 = tpu.reciprocal %763 {approx = true} : vector<2x4x1xf32> -> vector<2x4x1xf32>
    %765 = vector.broadcast %764 : vector<2x4x1xf32> to vector<2x4x4xf32>
    %766 = arith.mulf %761, %765 : vector<2x4x4xf32>
    %767 = arith.truncf %766 : vector<2x4x4xf32> to vector<2x4x4xbf16>
    %768 = vector.extract_strided_slice %727 {offsets = [0, 0, 32], sizes = [2, 4, 32], strides = [1, 1, 1]} : vector<2x4x128xbf16> to vector<2x4x32xbf16>
    %cst_343 = arith.constant dense<0.000000e+00> : vector<2x4x32xf32>
    %769 = tpu.matmul %767, %768, %cst_343 {dimension_numbers = #tpu.dot_dimension_numbers<[2], [1], [1], [2], [0, 0, 0, 1, 1, 2], [0], [0]>} : vector<2x4x4xbf16>, vector<2x4x32xbf16>, vector<2x4x32xf32> -> vector<2x4x32xf32>
    %770 = vector.shape_cast %769 : vector<2x4x32xf32> to vector<8x32xf32>
    %771 = arith.truncf %770 : vector<8x32xf32> to vector<8x32xbf16>
    %772 = vector.extract_strided_slice %694 {offsets = [32, 0], sizes = [32, 128], strides = [1, 1]} : vector<128x128xbf16> to vector<32x128xbf16>
    %cst_344 = arith.constant dense<0.000000e+00> : vector<8x128xf32>
    %773 = tpu.matmul %771, %772, %cst_344 {dimension_numbers = #tpu.dot_dimension_numbers<[1], [0], [0], [1], [0, 0, 1, 1], [], []>} : vector<8x32xbf16>, vector<32x128xbf16>, vector<8x128xf32> -> vector<8x128xf32>
    %774 = arith.addf %751, %773 : vector<8x128xf32>
    %775 = vector.extract_strided_slice %725 {offsets = [0, 0, 64], sizes = [2, 4, 32], strides = [1, 1, 1]} : vector<2x4x128xbf16> to vector<2x4x32xbf16>
    %776 = vector.extract_strided_slice %726 {offsets = [0, 0, 64], sizes = [2, 4, 32], strides = [1, 1, 1]} : vector<2x4x128xbf16> to vector<2x4x32xbf16>
    %cst_345 = arith.constant dense<0.000000e+00> : vector<2x4x4xf32>
    %777 = tpu.matmul %775, %776, %cst_345 {dimension_numbers = #tpu.dot_dimension_numbers<[2], [2], [1], [1], [0, 0, 0, 1, 1, 1], [0], [0]>} : vector<2x4x32xbf16>, vector<2x4x32xbf16>, vector<2x4x4xf32> -> vector<2x4x4xf32>
    %cst_346 = arith.constant 0.176776692 : f32
    %778 = vector.broadcast %cst_346 : f32 to vector<2x4x4xf32>
    %779 = arith.mulf %777, %778 : vector<2x4x4xf32>
    %cst_347 = arith.constant dense<0xFF800000> : vector<2x4xf32>
    %780 = vector.multi_reduction <maximumf>, %779, %cst_347 [2] : vector<2x4x4xf32> to vector<2x4xf32>
    %781 = vector.shape_cast %780 : vector<2x4xf32> to vector<2x4x1xf32>
    %782 = vector.broadcast %781 : vector<2x4x1xf32> to vector<2x4x4xf32>
    %783 = arith.subf %779, %782 : vector<2x4x4xf32>
    %784 = math.exp %783 : vector<2x4x4xf32>
    %cst_348 = arith.constant dense<0.000000e+00> : vector<2x4xf32>
    %785 = vector.multi_reduction <add>, %784, %cst_348 [2] : vector<2x4x4xf32> to vector<2x4xf32>
    %786 = vector.shape_cast %785 : vector<2x4xf32> to vector<2x4x1xf32>
    %787 = tpu.reciprocal %786 {approx = true} : vector<2x4x1xf32> -> vector<2x4x1xf32>
    %788 = vector.broadcast %787 : vector<2x4x1xf32> to vector<2x4x4xf32>
    %789 = arith.mulf %784, %788 : vector<2x4x4xf32>
    %790 = arith.truncf %789 : vector<2x4x4xf32> to vector<2x4x4xbf16>
    %791 = vector.extract_strided_slice %727 {offsets = [0, 0, 64], sizes = [2, 4, 32], strides = [1, 1, 1]} : vector<2x4x128xbf16> to vector<2x4x32xbf16>
    %cst_349 = arith.constant dense<0.000000e+00> : vector<2x4x32xf32>
    %792 = tpu.matmul %790, %791, %cst_349 {dimension_numbers = #tpu.dot_dimension_numbers<[2], [1], [1], [2], [0, 0, 0, 1, 1, 2], [0], [0]>} : vector<2x4x4xbf16>, vector<2x4x32xbf16>, vector<2x4x32xf32> -> vector<2x4x32xf32>
    %793 = vector.shape_cast %792 : vector<2x4x32xf32> to vector<8x32xf32>
    %794 = arith.truncf %793 : vector<8x32xf32> to vector<8x32xbf16>
    %795 = vector.extract_strided_slice %694 {offsets = [64, 0], sizes = [32, 128], strides = [1, 1]} : vector<128x128xbf16> to vector<32x128xbf16>
    %cst_350 = arith.constant dense<0.000000e+00> : vector<8x128xf32>
    %796 = tpu.matmul %794, %795, %cst_350 {dimension_numbers = #tpu.dot_dimension_numbers<[1], [0], [0], [1], [0, 0, 1, 1], [], []>} : vector<8x32xbf16>, vector<32x128xbf16>, vector<8x128xf32> -> vector<8x128xf32>
    %797 = arith.addf %774, %796 : vector<8x128xf32>
    %798 = vector.extract_strided_slice %725 {offsets = [0, 0, 96], sizes = [2, 4, 32], strides = [1, 1, 1]} : vector<2x4x128xbf16> to vector<2x4x32xbf16>
    %799 = vector.extract_strided_slice %726 {offsets = [0, 0, 96], sizes = [2, 4, 32], strides = [1, 1, 1]} : vector<2x4x128xbf16> to vector<2x4x32xbf16>
    %cst_351 = arith.constant dense<0.000000e+00> : vector<2x4x4xf32>
    %800 = tpu.matmul %798, %799, %cst_351 {dimension_numbers = #tpu.dot_dimension_numbers<[2], [2], [1], [1], [0, 0, 0, 1, 1, 1], [0], [0]>} : vector<2x4x32xbf16>, vector<2x4x32xbf16>, vector<2x4x4xf32> -> vector<2x4x4xf32>
    %cst_352 = arith.constant 0.176776692 : f32
    %801 = vector.broadcast %cst_352 : f32 to vector<2x4x4xf32>
    %802 = arith.mulf %800, %801 : vector<2x4x4xf32>
    %cst_353 = arith.constant dense<0xFF800000> : vector<2x4xf32>
    %803 = vector.multi_reduction <maximumf>, %802, %cst_353 [2] : vector<2x4x4xf32> to vector<2x4xf32>
    %804 = vector.shape_cast %803 : vector<2x4xf32> to vector<2x4x1xf32>
    %805 = vector.broadcast %804 : vector<2x4x1xf32> to vector<2x4x4xf32>
    %806 = arith.subf %802, %805 : vector<2x4x4xf32>
    %807 = math.exp %806 : vector<2x4x4xf32>
    %cst_354 = arith.constant dense<0.000000e+00> : vector<2x4xf32>
    %808 = vector.multi_reduction <add>, %807, %cst_354 [2] : vector<2x4x4xf32> to vector<2x4xf32>
    %809 = vector.shape_cast %808 : vector<2x4xf32> to vector<2x4x1xf32>
    %810 = tpu.reciprocal %809 {approx = true} : vector<2x4x1xf32> -> vector<2x4x1xf32>
    %811 = vector.broadcast %810 : vector<2x4x1xf32> to vector<2x4x4xf32>
    %812 = arith.mulf %807, %811 : vector<2x4x4xf32>
    %813 = arith.truncf %812 : vector<2x4x4xf32> to vector<2x4x4xbf16>
    %814 = vector.extract_strided_slice %727 {offsets = [0, 0, 96], sizes = [2, 4, 32], strides = [1, 1, 1]} : vector<2x4x128xbf16> to vector<2x4x32xbf16>
    %cst_355 = arith.constant dense<0.000000e+00> : vector<2x4x32xf32>
    %815 = tpu.matmul %813, %814, %cst_355 {dimension_numbers = #tpu.dot_dimension_numbers<[2], [1], [1], [2], [0, 0, 0, 1, 1, 2], [0], [0]>} : vector<2x4x4xbf16>, vector<2x4x32xbf16>, vector<2x4x32xf32> -> vector<2x4x32xf32>
    %816 = vector.shape_cast %815 : vector<2x4x32xf32> to vector<8x32xf32>
    %817 = arith.truncf %816 : vector<8x32xf32> to vector<8x32xbf16>
    %818 = vector.extract_strided_slice %694 {offsets = [96, 0], sizes = [32, 128], strides = [1, 1]} : vector<128x128xbf16> to vector<32x128xbf16>
    %cst_356 = arith.constant dense<0.000000e+00> : vector<8x128xf32>
    %819 = tpu.matmul %817, %818, %cst_356 {dimension_numbers = #tpu.dot_dimension_numbers<[1], [0], [0], [1], [0, 0, 1, 1], [], []>} : vector<8x32xbf16>, vector<32x128xbf16>, vector<8x128xf32> -> vector<8x128xf32>
    %820 = arith.addf %797, %819 : vector<8x128xf32>
    %821 = vector.broadcast %695 : vector<1x128xf32> to vector<8x128xf32>
    %822 = arith.addf %820, %821 : vector<8x128xf32>
    %823 = arith.addf %716, %822 : vector<8x128xf32>
    %cst_357 = arith.constant dense<0.000000e+00> : vector<8xf32>
    %824 = vector.multi_reduction <add>, %823, %cst_357 [1] : vector<8x128xf32> to vector<8xf32>
    %825 = vector.shape_cast %824 : vector<8xf32> to vector<8x1xf32>
    %cst_358 = arith.constant 1.280000e+02 : f32
    %826 = vector.broadcast %cst_358 : f32 to vector<8x1xf32>
    %827 = arith.divf %825, %826 : vector<8x1xf32>
    %828 = vector.broadcast %827 : vector<8x1xf32> to vector<8x128xf32>
    %829 = arith.subf %823, %828 : vector<8x128xf32>
    %830 = arith.mulf %829, %829 : vector<8x128xf32>
    %cst_359 = arith.constant dense<0.000000e+00> : vector<8xf32>
    %831 = vector.multi_reduction <add>, %830, %cst_359 [1] : vector<8x128xf32> to vector<8xf32>
    %832 = vector.shape_cast %831 : vector<8xf32> to vector<8x1xf32>
    %cst_360 = arith.constant 1.280000e+02 : f32
    %833 = vector.broadcast %cst_360 : f32 to vector<8x1xf32>
    %834 = arith.divf %832, %833 : vector<8x1xf32>
    %cst_361 = arith.constant 9.99999996E-13 : f32
    %835 = vector.broadcast %cst_361 : f32 to vector<8x1xf32>
    %836 = arith.addf %834, %835 : vector<8x1xf32>
    %837 = math.rsqrt %836 : vector<8x1xf32>
    %838 = vector.broadcast %837 : vector<8x1xf32> to vector<8x128xf32>
    %839 = arith.mulf %829, %838 : vector<8x128xf32>
    %840 = vector.broadcast %696 : vector<1x128xf32> to vector<8x128xf32>
    %841 = arith.mulf %839, %840 : vector<8x128xf32>
    %842 = vector.broadcast %697 : vector<1x128xf32> to vector<8x128xf32>
    %843 = arith.addf %841, %842 : vector<8x128xf32>
    %844 = arith.truncf %843 : vector<8x128xf32> to vector<8x128xbf16>
    %cst_362 = arith.constant dense<0.000000e+00> : vector<8x128xf32>
    %845 = tpu.matmul %844, %698, %cst_362 {dimension_numbers = #tpu.dot_dimension_numbers<[1], [0], [0], [1], [0, 0, 1, 1], [], []>} : vector<8x128xbf16>, vector<128x128xbf16>, vector<8x128xf32> -> vector<8x128xf32>
    %846 = vector.broadcast %699 : vector<1x128xf32> to vector<8x128xf32>
    %847 = arith.addf %845, %846 : vector<8x128xf32>
    %848 = vector.shape_cast %691 : vector<2x16x128xf32> to vector<32x128xf32>
    %849 = arith.truncf %848 : vector<32x128xf32> to vector<32x128xbf16>
    %cst_363 = arith.constant dense<0.000000e+00> : vector<32x256xf32>
    %850 = tpu.matmul %849, %700, %cst_363 {dimension_numbers = #tpu.dot_dimension_numbers<[1], [0], [0], [1], [0, 0, 1, 1], [], []>} : vector<32x128xbf16>, vector<128x256xbf16>, vector<32x256xf32> -> vector<32x256xf32>
    %851 = vector.broadcast %701 : vector<1x256xf32> to vector<32x256xf32>
    %852 = arith.addf %850, %851 : vector<32x256xf32>
    %853 = vector.shape_cast %852 : vector<32x256xf32> to vector<2x16x256xf32>
    %854 = vector.shape_cast %847 : vector<8x128xf32> to vector<2x4x128xf32>
    %855 = vector.extract_strided_slice %853 {offsets = [0, 0, 0], sizes = [2, 16, 128], strides = [1, 1, 1]} : vector<2x16x256xf32> to vector<2x16x128xf32>
    %856 = vector.extract_strided_slice %853 {offsets = [0, 0, 128], sizes = [2, 16, 128], strides = [1, 1, 1]} : vector<2x16x256xf32> to vector<2x16x128xf32>
    %857 = arith.truncf %854 : vector<2x4x128xf32> to vector<2x4x128xbf16>
    %858 = arith.truncf %855 : vector<2x16x128xf32> to vector<2x16x128xbf16>
    %859 = arith.truncf %856 : vector<2x16x128xf32> to vector<2x16x128xbf16>
    %cst_364 = arith.constant 0.000000e+00 : f32
    %860 = vector.broadcast %cst_364 : f32 to vector<8x128xf32>
    %861 = vector.extract_strided_slice %857 {offsets = [0, 0, 0], sizes = [2, 4, 32], strides = [1, 1, 1]} : vector<2x4x128xbf16> to vector<2x4x32xbf16>
    %862 = vector.extract_strided_slice %858 {offsets = [0, 0, 0], sizes = [2, 16, 32], strides = [1, 1, 1]} : vector<2x16x128xbf16> to vector<2x16x32xbf16>
    %cst_365 = arith.constant dense<0.000000e+00> : vector<2x4x16xf32>
    %863 = tpu.matmul %861, %862, %cst_365 {dimension_numbers = #tpu.dot_dimension_numbers<[2], [2], [1], [1], [0, 0, 0, 1, 1, 1], [0], [0]>} : vector<2x4x32xbf16>, vector<2x16x32xbf16>, vector<2x4x16xf32> -> vector<2x4x16xf32>
    %cst_366 = arith.constant 0.176776692 : f32
    %864 = vector.broadcast %cst_366 : f32 to vector<2x4x16xf32>
    %865 = arith.mulf %863, %864 : vector<2x4x16xf32>
    %866 = vector.broadcast %82 : vector<2x1x16xf32> to vector<2x4x16xf32>
    %867 = arith.addf %865, %866 : vector<2x4x16xf32>
    %cst_367 = arith.constant dense<0xFF800000> : vector<2x4xf32>
    %868 = vector.multi_reduction <maximumf>, %867, %cst_367 [2] : vector<2x4x16xf32> to vector<2x4xf32>
    %869 = vector.shape_cast %868 : vector<2x4xf32> to vector<2x4x1xf32>
    %870 = vector.broadcast %869 : vector<2x4x1xf32> to vector<2x4x16xf32>
    %871 = arith.subf %867, %870 : vector<2x4x16xf32>
    %872 = math.exp %871 : vector<2x4x16xf32>
    %cst_368 = arith.constant dense<0.000000e+00> : vector<2x4xf32>
    %873 = vector.multi_reduction <add>, %872, %cst_368 [2] : vector<2x4x16xf32> to vector<2x4xf32>
    %874 = vector.shape_cast %873 : vector<2x4xf32> to vector<2x4x1xf32>
    %875 = tpu.reciprocal %874 {approx = true} : vector<2x4x1xf32> -> vector<2x4x1xf32>
    %876 = vector.broadcast %875 : vector<2x4x1xf32> to vector<2x4x16xf32>
    %877 = arith.mulf %872, %876 : vector<2x4x16xf32>
    %878 = arith.truncf %877 : vector<2x4x16xf32> to vector<2x4x16xbf16>
    %879 = vector.extract_strided_slice %859 {offsets = [0, 0, 0], sizes = [2, 16, 32], strides = [1, 1, 1]} : vector<2x16x128xbf16> to vector<2x16x32xbf16>
    %cst_369 = arith.constant dense<0.000000e+00> : vector<2x4x32xf32>
    %880 = tpu.matmul %878, %879, %cst_369 {dimension_numbers = #tpu.dot_dimension_numbers<[2], [1], [1], [2], [0, 0, 0, 1, 1, 2], [0], [0]>} : vector<2x4x16xbf16>, vector<2x16x32xbf16>, vector<2x4x32xf32> -> vector<2x4x32xf32>
    %881 = vector.shape_cast %880 : vector<2x4x32xf32> to vector<8x32xf32>
    %882 = arith.truncf %881 : vector<8x32xf32> to vector<8x32xbf16>
    %883 = vector.extract_strided_slice %702 {offsets = [0, 0], sizes = [32, 128], strides = [1, 1]} : vector<128x128xbf16> to vector<32x128xbf16>
    %cst_370 = arith.constant dense<0.000000e+00> : vector<8x128xf32>
    %884 = tpu.matmul %882, %883, %cst_370 {dimension_numbers = #tpu.dot_dimension_numbers<[1], [0], [0], [1], [0, 0, 1, 1], [], []>} : vector<8x32xbf16>, vector<32x128xbf16>, vector<8x128xf32> -> vector<8x128xf32>
    %885 = arith.addf %860, %884 : vector<8x128xf32>
    %886 = vector.extract_strided_slice %857 {offsets = [0, 0, 32], sizes = [2, 4, 32], strides = [1, 1, 1]} : vector<2x4x128xbf16> to vector<2x4x32xbf16>
    %887 = vector.extract_strided_slice %858 {offsets = [0, 0, 32], sizes = [2, 16, 32], strides = [1, 1, 1]} : vector<2x16x128xbf16> to vector<2x16x32xbf16>
    %cst_371 = arith.constant dense<0.000000e+00> : vector<2x4x16xf32>
    %888 = tpu.matmul %886, %887, %cst_371 {dimension_numbers = #tpu.dot_dimension_numbers<[2], [2], [1], [1], [0, 0, 0, 1, 1, 1], [0], [0]>} : vector<2x4x32xbf16>, vector<2x16x32xbf16>, vector<2x4x16xf32> -> vector<2x4x16xf32>
    %cst_372 = arith.constant 0.176776692 : f32
    %889 = vector.broadcast %cst_372 : f32 to vector<2x4x16xf32>
    %890 = arith.mulf %888, %889 : vector<2x4x16xf32>
    %891 = vector.broadcast %82 : vector<2x1x16xf32> to vector<2x4x16xf32>
    %892 = arith.addf %890, %891 : vector<2x4x16xf32>
    %cst_373 = arith.constant dense<0xFF800000> : vector<2x4xf32>
    %893 = vector.multi_reduction <maximumf>, %892, %cst_373 [2] : vector<2x4x16xf32> to vector<2x4xf32>
    %894 = vector.shape_cast %893 : vector<2x4xf32> to vector<2x4x1xf32>
    %895 = vector.broadcast %894 : vector<2x4x1xf32> to vector<2x4x16xf32>
    %896 = arith.subf %892, %895 : vector<2x4x16xf32>
    %897 = math.exp %896 : vector<2x4x16xf32>
    %cst_374 = arith.constant dense<0.000000e+00> : vector<2x4xf32>
    %898 = vector.multi_reduction <add>, %897, %cst_374 [2] : vector<2x4x16xf32> to vector<2x4xf32>
    %899 = vector.shape_cast %898 : vector<2x4xf32> to vector<2x4x1xf32>
    %900 = tpu.reciprocal %899 {approx = true} : vector<2x4x1xf32> -> vector<2x4x1xf32>
    %901 = vector.broadcast %900 : vector<2x4x1xf32> to vector<2x4x16xf32>
    %902 = arith.mulf %897, %901 : vector<2x4x16xf32>
    %903 = arith.truncf %902 : vector<2x4x16xf32> to vector<2x4x16xbf16>
    %904 = vector.extract_strided_slice %859 {offsets = [0, 0, 32], sizes = [2, 16, 32], strides = [1, 1, 1]} : vector<2x16x128xbf16> to vector<2x16x32xbf16>
    %cst_375 = arith.constant dense<0.000000e+00> : vector<2x4x32xf32>
    %905 = tpu.matmul %903, %904, %cst_375 {dimension_numbers = #tpu.dot_dimension_numbers<[2], [1], [1], [2], [0, 0, 0, 1, 1, 2], [0], [0]>} : vector<2x4x16xbf16>, vector<2x16x32xbf16>, vector<2x4x32xf32> -> vector<2x4x32xf32>
    %906 = vector.shape_cast %905 : vector<2x4x32xf32> to vector<8x32xf32>
    %907 = arith.truncf %906 : vector<8x32xf32> to vector<8x32xbf16>
    %908 = vector.extract_strided_slice %702 {offsets = [32, 0], sizes = [32, 128], strides = [1, 1]} : vector<128x128xbf16> to vector<32x128xbf16>
    %cst_376 = arith.constant dense<0.000000e+00> : vector<8x128xf32>
    %909 = tpu.matmul %907, %908, %cst_376 {dimension_numbers = #tpu.dot_dimension_numbers<[1], [0], [0], [1], [0, 0, 1, 1], [], []>} : vector<8x32xbf16>, vector<32x128xbf16>, vector<8x128xf32> -> vector<8x128xf32>
    %910 = arith.addf %885, %909 : vector<8x128xf32>
    %911 = vector.extract_strided_slice %857 {offsets = [0, 0, 64], sizes = [2, 4, 32], strides = [1, 1, 1]} : vector<2x4x128xbf16> to vector<2x4x32xbf16>
    %912 = vector.extract_strided_slice %858 {offsets = [0, 0, 64], sizes = [2, 16, 32], strides = [1, 1, 1]} : vector<2x16x128xbf16> to vector<2x16x32xbf16>
    %cst_377 = arith.constant dense<0.000000e+00> : vector<2x4x16xf32>
    %913 = tpu.matmul %911, %912, %cst_377 {dimension_numbers = #tpu.dot_dimension_numbers<[2], [2], [1], [1], [0, 0, 0, 1, 1, 1], [0], [0]>} : vector<2x4x32xbf16>, vector<2x16x32xbf16>, vector<2x4x16xf32> -> vector<2x4x16xf32>
    %cst_378 = arith.constant 0.176776692 : f32
    %914 = vector.broadcast %cst_378 : f32 to vector<2x4x16xf32>
    %915 = arith.mulf %913, %914 : vector<2x4x16xf32>
    %916 = vector.broadcast %82 : vector<2x1x16xf32> to vector<2x4x16xf32>
    %917 = arith.addf %915, %916 : vector<2x4x16xf32>
    %cst_379 = arith.constant dense<0xFF800000> : vector<2x4xf32>
    %918 = vector.multi_reduction <maximumf>, %917, %cst_379 [2] : vector<2x4x16xf32> to vector<2x4xf32>
    %919 = vector.shape_cast %918 : vector<2x4xf32> to vector<2x4x1xf32>
    %920 = vector.broadcast %919 : vector<2x4x1xf32> to vector<2x4x16xf32>
    %921 = arith.subf %917, %920 : vector<2x4x16xf32>
    %922 = math.exp %921 : vector<2x4x16xf32>
    %cst_380 = arith.constant dense<0.000000e+00> : vector<2x4xf32>
    %923 = vector.multi_reduction <add>, %922, %cst_380 [2] : vector<2x4x16xf32> to vector<2x4xf32>
    %924 = vector.shape_cast %923 : vector<2x4xf32> to vector<2x4x1xf32>
    %925 = tpu.reciprocal %924 {approx = true} : vector<2x4x1xf32> -> vector<2x4x1xf32>
    %926 = vector.broadcast %925 : vector<2x4x1xf32> to vector<2x4x16xf32>
    %927 = arith.mulf %922, %926 : vector<2x4x16xf32>
    %928 = arith.truncf %927 : vector<2x4x16xf32> to vector<2x4x16xbf16>
    %929 = vector.extract_strided_slice %859 {offsets = [0, 0, 64], sizes = [2, 16, 32], strides = [1, 1, 1]} : vector<2x16x128xbf16> to vector<2x16x32xbf16>
    %cst_381 = arith.constant dense<0.000000e+00> : vector<2x4x32xf32>
    %930 = tpu.matmul %928, %929, %cst_381 {dimension_numbers = #tpu.dot_dimension_numbers<[2], [1], [1], [2], [0, 0, 0, 1, 1, 2], [0], [0]>} : vector<2x4x16xbf16>, vector<2x16x32xbf16>, vector<2x4x32xf32> -> vector<2x4x32xf32>
    %931 = vector.shape_cast %930 : vector<2x4x32xf32> to vector<8x32xf32>
    %932 = arith.truncf %931 : vector<8x32xf32> to vector<8x32xbf16>
    %933 = vector.extract_strided_slice %702 {offsets = [64, 0], sizes = [32, 128], strides = [1, 1]} : vector<128x128xbf16> to vector<32x128xbf16>
    %cst_382 = arith.constant dense<0.000000e+00> : vector<8x128xf32>
    %934 = tpu.matmul %932, %933, %cst_382 {dimension_numbers = #tpu.dot_dimension_numbers<[1], [0], [0], [1], [0, 0, 1, 1], [], []>} : vector<8x32xbf16>, vector<32x128xbf16>, vector<8x128xf32> -> vector<8x128xf32>
    %935 = arith.addf %910, %934 : vector<8x128xf32>
    %936 = vector.extract_strided_slice %857 {offsets = [0, 0, 96], sizes = [2, 4, 32], strides = [1, 1, 1]} : vector<2x4x128xbf16> to vector<2x4x32xbf16>
    %937 = vector.extract_strided_slice %858 {offsets = [0, 0, 96], sizes = [2, 16, 32], strides = [1, 1, 1]} : vector<2x16x128xbf16> to vector<2x16x32xbf16>
    %cst_383 = arith.constant dense<0.000000e+00> : vector<2x4x16xf32>
    %938 = tpu.matmul %936, %937, %cst_383 {dimension_numbers = #tpu.dot_dimension_numbers<[2], [2], [1], [1], [0, 0, 0, 1, 1, 1], [0], [0]>} : vector<2x4x32xbf16>, vector<2x16x32xbf16>, vector<2x4x16xf32> -> vector<2x4x16xf32>
    %cst_384 = arith.constant 0.176776692 : f32
    %939 = vector.broadcast %cst_384 : f32 to vector<2x4x16xf32>
    %940 = arith.mulf %938, %939 : vector<2x4x16xf32>
    %941 = vector.broadcast %82 : vector<2x1x16xf32> to vector<2x4x16xf32>
    %942 = arith.addf %940, %941 : vector<2x4x16xf32>
    %cst_385 = arith.constant dense<0xFF800000> : vector<2x4xf32>
    %943 = vector.multi_reduction <maximumf>, %942, %cst_385 [2] : vector<2x4x16xf32> to vector<2x4xf32>
    %944 = vector.shape_cast %943 : vector<2x4xf32> to vector<2x4x1xf32>
    %945 = vector.broadcast %944 : vector<2x4x1xf32> to vector<2x4x16xf32>
    %946 = arith.subf %942, %945 : vector<2x4x16xf32>
    %947 = math.exp %946 : vector<2x4x16xf32>
    %cst_386 = arith.constant dense<0.000000e+00> : vector<2x4xf32>
    %948 = vector.multi_reduction <add>, %947, %cst_386 [2] : vector<2x4x16xf32> to vector<2x4xf32>
    %949 = vector.shape_cast %948 : vector<2x4xf32> to vector<2x4x1xf32>
    %950 = tpu.reciprocal %949 {approx = true} : vector<2x4x1xf32> -> vector<2x4x1xf32>
    %951 = vector.broadcast %950 : vector<2x4x1xf32> to vector<2x4x16xf32>
    %952 = arith.mulf %947, %951 : vector<2x4x16xf32>
    %953 = arith.truncf %952 : vector<2x4x16xf32> to vector<2x4x16xbf16>
    %954 = vector.extract_strided_slice %859 {offsets = [0, 0, 96], sizes = [2, 16, 32], strides = [1, 1, 1]} : vector<2x16x128xbf16> to vector<2x16x32xbf16>
    %cst_387 = arith.constant dense<0.000000e+00> : vector<2x4x32xf32>
    %955 = tpu.matmul %953, %954, %cst_387 {dimension_numbers = #tpu.dot_dimension_numbers<[2], [1], [1], [2], [0, 0, 0, 1, 1, 2], [0], [0]>} : vector<2x4x16xbf16>, vector<2x16x32xbf16>, vector<2x4x32xf32> -> vector<2x4x32xf32>
    %956 = vector.shape_cast %955 : vector<2x4x32xf32> to vector<8x32xf32>
    %957 = arith.truncf %956 : vector<8x32xf32> to vector<8x32xbf16>
    %958 = vector.extract_strided_slice %702 {offsets = [96, 0], sizes = [32, 128], strides = [1, 1]} : vector<128x128xbf16> to vector<32x128xbf16>
    %cst_388 = arith.constant dense<0.000000e+00> : vector<8x128xf32>
    %959 = tpu.matmul %957, %958, %cst_388 {dimension_numbers = #tpu.dot_dimension_numbers<[1], [0], [0], [1], [0, 0, 1, 1], [], []>} : vector<8x32xbf16>, vector<32x128xbf16>, vector<8x128xf32> -> vector<8x128xf32>
    %960 = arith.addf %935, %959 : vector<8x128xf32>
    %961 = vector.broadcast %703 : vector<1x128xf32> to vector<8x128xf32>
    %962 = arith.addf %960, %961 : vector<8x128xf32>
    %963 = arith.addf %843, %962 : vector<8x128xf32>
    %cst_389 = arith.constant dense<0.000000e+00> : vector<8xf32>
    %964 = vector.multi_reduction <add>, %963, %cst_389 [1] : vector<8x128xf32> to vector<8xf32>
    %965 = vector.shape_cast %964 : vector<8xf32> to vector<8x1xf32>
    %cst_390 = arith.constant 1.280000e+02 : f32
    %966 = vector.broadcast %cst_390 : f32 to vector<8x1xf32>
    %967 = arith.divf %965, %966 : vector<8x1xf32>
    %968 = vector.broadcast %967 : vector<8x1xf32> to vector<8x128xf32>
    %969 = arith.subf %963, %968 : vector<8x128xf32>
    %970 = arith.mulf %969, %969 : vector<8x128xf32>
    %cst_391 = arith.constant dense<0.000000e+00> : vector<8xf32>
    %971 = vector.multi_reduction <add>, %970, %cst_391 [1] : vector<8x128xf32> to vector<8xf32>
    %972 = vector.shape_cast %971 : vector<8xf32> to vector<8x1xf32>
    %cst_392 = arith.constant 1.280000e+02 : f32
    %973 = vector.broadcast %cst_392 : f32 to vector<8x1xf32>
    %974 = arith.divf %972, %973 : vector<8x1xf32>
    %cst_393 = arith.constant 9.99999996E-13 : f32
    %975 = vector.broadcast %cst_393 : f32 to vector<8x1xf32>
    %976 = arith.addf %974, %975 : vector<8x1xf32>
    %977 = math.rsqrt %976 : vector<8x1xf32>
    %978 = vector.broadcast %977 : vector<8x1xf32> to vector<8x128xf32>
    %979 = arith.mulf %969, %978 : vector<8x128xf32>
    %980 = vector.broadcast %704 : vector<1x128xf32> to vector<8x128xf32>
    %981 = arith.mulf %979, %980 : vector<8x128xf32>
    %982 = vector.broadcast %705 : vector<1x128xf32> to vector<8x128xf32>
    %983 = arith.addf %981, %982 : vector<8x128xf32>
    %984 = arith.truncf %983 : vector<8x128xf32> to vector<8x128xbf16>
    %cst_394 = arith.constant dense<0.000000e+00> : vector<8x512xf32>
    %985 = tpu.matmul %984, %706, %cst_394 {dimension_numbers = #tpu.dot_dimension_numbers<[1], [0], [0], [1], [0, 0, 1, 1], [], []>} : vector<8x128xbf16>, vector<128x512xbf16>, vector<8x512xf32> -> vector<8x512xf32>
    %986 = vector.broadcast %707 : vector<1x512xf32> to vector<8x512xf32>
    %987 = arith.addf %985, %986 : vector<8x512xf32>
    %cst_395 = arith.constant 5.000000e-01 : f32
    %988 = vector.broadcast %cst_395 : f32 to vector<8x512xf32>
    %989 = arith.mulf %988, %987 : vector<8x512xf32>
    %cst_396 = arith.constant 4.471500e-02 : f32
    %990 = vector.broadcast %cst_396 : f32 to vector<8x512xf32>
    %991 = arith.mulf %990, %987 : vector<8x512xf32>
    %992 = arith.mulf %991, %987 : vector<8x512xf32>
    %993 = arith.mulf %992, %987 : vector<8x512xf32>
    %994 = arith.addf %987, %993 : vector<8x512xf32>
    %cst_397 = arith.constant 0.797884583 : f32
    %995 = vector.broadcast %cst_397 : f32 to vector<8x512xf32>
    %996 = arith.mulf %995, %994 : vector<8x512xf32>
    %997 = math.tanh %996 : vector<8x512xf32>
    %cst_398 = arith.constant 1.000000e+00 : f32
    %998 = vector.broadcast %cst_398 : f32 to vector<8x512xf32>
    %999 = arith.addf %998, %997 : vector<8x512xf32>
    %1000 = arith.mulf %989, %999 : vector<8x512xf32>
    %1001 = arith.truncf %1000 : vector<8x512xf32> to vector<8x512xbf16>
    %cst_399 = arith.constant dense<0.000000e+00> : vector<8x128xf32>
    %1002 = tpu.matmul %1001, %708, %cst_399 {dimension_numbers = #tpu.dot_dimension_numbers<[1], [0], [0], [1], [0, 0, 1, 1], [], []>} : vector<8x512xbf16>, vector<512x128xbf16>, vector<8x128xf32> -> vector<8x128xf32>
    %1003 = vector.broadcast %709 : vector<1x128xf32> to vector<8x128xf32>
    %1004 = arith.addf %1002, %1003 : vector<8x128xf32>
    %1005 = arith.addf %983, %1004 : vector<8x128xf32>
    %cst_400 = arith.constant dense<0.000000e+00> : vector<8xf32>
    %1006 = vector.multi_reduction <add>, %1005, %cst_400 [1] : vector<8x128xf32> to vector<8xf32>
    %1007 = vector.shape_cast %1006 : vector<8xf32> to vector<8x1xf32>
    %cst_401 = arith.constant 1.280000e+02 : f32
    %1008 = vector.broadcast %cst_401 : f32 to vector<8x1xf32>
    %1009 = arith.divf %1007, %1008 : vector<8x1xf32>
    %1010 = vector.broadcast %1009 : vector<8x1xf32> to vector<8x128xf32>
    %1011 = arith.subf %1005, %1010 : vector<8x128xf32>
    %1012 = arith.mulf %1011, %1011 : vector<8x128xf32>
    %cst_402 = arith.constant dense<0.000000e+00> : vector<8xf32>
    %1013 = vector.multi_reduction <add>, %1012, %cst_402 [1] : vector<8x128xf32> to vector<8xf32>
    %1014 = vector.shape_cast %1013 : vector<8xf32> to vector<8x1xf32>
    %cst_403 = arith.constant 1.280000e+02 : f32
    %1015 = vector.broadcast %cst_403 : f32 to vector<8x1xf32>
    %1016 = arith.divf %1014, %1015 : vector<8x1xf32>
    %cst_404 = arith.constant 9.99999996E-13 : f32
    %1017 = vector.broadcast %cst_404 : f32 to vector<8x1xf32>
    %1018 = arith.addf %1016, %1017 : vector<8x1xf32>
    %1019 = math.rsqrt %1018 : vector<8x1xf32>
    %1020 = vector.broadcast %1019 : vector<8x1xf32> to vector<8x128xf32>
    %1021 = arith.mulf %1011, %1020 : vector<8x128xf32>
    %1022 = vector.broadcast %710 : vector<1x128xf32> to vector<8x128xf32>
    %1023 = arith.mulf %1021, %1022 : vector<8x128xf32>
    %1024 = vector.broadcast %711 : vector<1x128xf32> to vector<8x128xf32>
    %1025 = arith.addf %1023, %1024 : vector<8x128xf32>
    %c0_405 = arith.constant 0 : index
    %c0_406 = arith.constant 0 : index
    %1026 = vector.load %arg47[%c0_405, %c0_406] : memref<128x128xbf16, #tpu.memory_space<vmem>>, vector<128x128xbf16>
    %1027 = arith.truncf %1025 : vector<8x128xf32> to vector<8x128xbf16>
    %cst_407 = arith.constant dense<0.000000e+00> : vector<8x128xf32>
    %1028 = tpu.matmul %1027, %1026, %cst_407 {dimension_numbers = #tpu.dot_dimension_numbers<[1], [0], [0], [1], [0, 0, 1, 1], [], []>} : vector<8x128xbf16>, vector<128x128xbf16>, vector<8x128xf32> -> vector<8x128xf32>
    %c0_408 = arith.constant 0 : index
    %c0_409 = arith.constant 0 : index
    %1029 = vector.load %arg48[%c0_408, %c0_409] : memref<1x128xf32, #tpu.memory_space<vmem>>, vector<1x128xf32>
    %1030 = vector.broadcast %1029 : vector<1x128xf32> to vector<8x128xf32>
    %1031 = arith.addf %1028, %1030 : vector<8x128xf32>
    %c0_410 = arith.constant 0 : index
    %c0_411 = arith.constant 0 : index
    %1032 = vector.load %arg51[%c0_410, %c0_411] : memref<8x128xf32, #tpu.memory_space<vmem>>, vector<8x128xf32>
    tpu.vector_store %arg51[%c0_410, %c0_411], %1031 {strides = array<i32>} : memref<8x128xf32, #tpu.memory_space<vmem>>, vector<8x128xf32>,
    %1033 = vector.shape_cast %1031 : vector<8x128xf32> to vector<2x4x128xf32>
    %cst_412 = arith.constant dense<0.000000e+00> : vector<2x128xf32>
    %1034 = vector.multi_reduction <add>, %1033, %cst_412 [1] : vector<2x4x128xf32> to vector<2x128xf32>
    %cst_413 = arith.constant 4.000000e+00 : f32
    %1035 = vector.broadcast %cst_413 : f32 to vector<2x128xf32>
    %1036 = arith.divf %1034, %1035 : vector<2x128xf32>
    %c0_414 = arith.constant 0 : index
    %c0_415 = arith.constant 0 : index
    %1037 = vector.load %arg52[%c0_414, %c0_415] : memref<2x128xf32, #tpu.memory_space<vmem>>, vector<2x128xf32>
    tpu.vector_store %arg52[%c0_414, %c0_415], %1036 {strides = array<i32>} : memref<2x128xf32, #tpu.memory_space<vmem>>, vector<2x128xf32>,
    %c0_416 = arith.constant 0 : index
    %c0_417 = arith.constant 0 : index
    %1038 = vector.load %arg49[%c0_416, %c0_417] : memref<128x128xbf16, #tpu.memory_space<vmem>>, vector<128x128xbf16>
    %1039 = arith.truncf %1036 : vector<2x128xf32> to vector<2x128xbf16>
    %cst_418 = arith.constant dense<0.000000e+00> : vector<2x128xf32>
    %1040 = tpu.matmul %1039, %1038, %cst_418 {dimension_numbers = #tpu.dot_dimension_numbers<[1], [0], [0], [1], [0, 0, 1, 1], [], []>} : vector<2x128xbf16>, vector<128x128xbf16>, vector<2x128xf32> -> vector<2x128xf32>
    %c0_419 = arith.constant 0 : index
    %c0_420 = arith.constant 0 : index
    %1041 = vector.load %arg50[%c0_419, %c0_420] : memref<1x128xf32, #tpu.memory_space<vmem>>, vector<1x128xf32>
    %1042 = vector.broadcast %1041 : vector<1x128xf32> to vector<2x128xf32>
    %1043 = arith.addf %1040, %1042 : vector<2x128xf32>
    %c0_421 = arith.constant 0 : index
    %c0_422 = arith.constant 0 : index
    %1044 = vector.load %arg53[%c0_421, %c0_422] : memref<2x128xf32, #tpu.memory_space<vmem>>, vector<2x128xf32>
    tpu.vector_store %arg53[%c0_421, %c0_422], %1043 {strides = array<i32>} : memref<2x128xf32, #tpu.memory_space<vmem>>, vector<2x128xf32>,
    return
  }
}

</mosaic_0001>

<bundles_post_ra>
// kernel: transformer_image_v2_forward.1
= control target key start
LH: loop header
LB: loop body
LE: loop exit
PB: predicated region body
PF: predicated region fallthrough
CT: control target
= control target key end

     0   :  { %s15968_s6 = smov 1   ;;  %s15969_s10 = smov 2   ;;  %s18669_s0 = inlined_call_operand.smem [shape: u32[54], index: -1, kind: input, shape index: {}] }
   0x1   :  { %s16040_s5 = sld [smem:[%s18669_s0]]   ;;  %s15970_s14 = smov 3  }
   0x2   :  { %s16045_s9 = sld [smem:[%s18669_s0 + %s15968_s6]]   ;;  %s15971_s18 = smov 4  }
   0x3   :  { %s16050_s13 = sld [smem:[%s18669_s0 + %s15969_s10]]   ;;  %s15972_s22 = smov 5  }
   0x4   :  { %s16055_s17 = sld [smem:[%s18669_s0 + %s15970_s14]]   ;;  %s15973_s26 = smov 6  }
   0x5   :  { %s16060_s21 = sld [smem:[%s18669_s0 + %s15971_s18]]   ;;  %s15974_s30 = smov 7  }
   0x6   :  { %s16065_s25 = sld [smem:[%s18669_s0 + %s15972_s22]]   ;;  %s15975_s4 = smov 8  }
   0x7   :  { %s16070_s29 = sld [smem:[%s18669_s0 + %s15973_s26]]   ;;  %s15976_s10 = smov 9  }
   0x8   :  { %s16075_s3 = sld [smem:[%s18669_s0 + %s15974_s30]]   ;;  %s15977_s15 = smov 10  }
   0x9   :  { %18691 = sst [smem:[#allocation9_spill]] %s16050_s13  ;;  %s15978_s20 = smov 11  }
   0xa   :  { %s16080_s8 = sld [smem:[%s18669_s0 + %s15975_s4]]   ;;  %s15979_s26 = smov 12  }
   0xb   :  { %s16085_s14 = sld [smem:[%s18669_s0 + %s15976_s10]]   ;;  %s15980_s1 = smov 13  }
   0xc   :  { %s16090_s19 = sld [smem:[%s18669_s0 + %s15977_s15]]   ;;  %s15981_s7 = smov 14  }
   0xd   :  { %s16095_s24 = sld [smem:[%s18669_s0 + %s15978_s20]]   ;;  %s15982_s15 = smov 15  }
   0xe   :  { %s16100_s30 = sld [smem:[%s18669_s0 + %s15979_s26]]   ;;  %s15983_s22 = smov 16  }
   0xf   :  { %s16105_s6 = sld [smem:[%s18669_s0 + %s15980_s1]]   ;;  %s15984_s28 = smov 17  }
  0x10   :  { %s16110_s12 = sld [smem:[%s18669_s0 + %s15981_s7]]   ;;  %s15985_s7 = smov 18  }
  0x11   :  { %s16115_s20 = sld [smem:[%s18669_s0 + %s15982_s15]]   ;;  %s15986_s15 = smov 19  }
  0x12   :  { %s16120_s27 = sld [smem:[%s18669_s0 + %s15983_s22]]   ;;  %s15987_s22 = smov 20  }
  0x13   :  { %s16125_s4 = sld [smem:[%s18669_s0 + %s15984_s28]]   ;;  %s15988_s28 = smov 21  }
  0x14   :  { %s16130_s13 = sld [smem:[%s18669_s0 + %s15985_s7]]   ;;  %s15989_s7 = smov 22  }
  0x17   :  { %18692 = sst [smem:[#allocation10_spill]] %s16115_s20 }
  0x18   :  { %18693 = sst [smem:[#allocation11_spill]] %s16120_s27 }
  0x19   :  { %18694 = sst [smem:[#allocation12_spill]] %s16125_s4 }
  0x1a   :  { %18695 = sst [smem:[#allocation13_spill]] %s16130_s13 }
  0x1b   :  { %s16135_s20 = sld [smem:[%s18669_s0 + %s15986_s15]]   ;;  %s15990_s15 = smov 23  }
  0x1c   :  { %s16140_s27 = sld [smem:[%s18669_s0 + %s15987_s22]]   ;;  %s15991_s22 = smov 24  }
  0x1d   :  { %s16145_s4 = sld [smem:[%s18669_s0 + %s15988_s28]]   ;;  %s15992_s28 = smov 25  }
  0x1e   :  { %s16150_s13 = sld [smem:[%s18669_s0 + %s15989_s7]]   ;;  %s15993_s7 = smov 26  }
  0x21   :  { %18696 = sst [smem:[#allocation14_spill]] %s16135_s20 }
  0x22   :  { %18697 = sst [smem:[#allocation15_spill]] %s16140_s27 }
  0x23   :  { %18698 = sst [smem:[#allocation16_spill]] %s16145_s4 }
  0x24   :  { %18699 = sst [smem:[#allocation17_spill]] %s16150_s13 }
  0x25   :  { %s16155_s20 = sld [smem:[%s18669_s0 + %s15990_s15]]   ;;  %s15994_s15 = smov 27  }
  0x26   :  { %s16160_s27 = sld [smem:[%s18669_s0 + %s15991_s22]]   ;;  %s15995_s22 = smov 28  }
  0x27   :  { %s16165_s4 = sld [smem:[%s18669_s0 + %s15992_s28]]   ;;  %s15996_s28 = smov 29  }
  0x28   :  { %s16170_s13 = sld [smem:[%s18669_s0 + %s15993_s7]]   ;;  %s15997_s7 = smov 30  }
  0x2b   :  { %18700 = sst [smem:[#allocation18_spill]] %s16155_s20 }
  0x2c   :  { %18701 = sst [smem:[#allocation19_spill]] %s16160_s27 }
  0x2d   :  { %18702 = sst [smem:[#allocation20_spill]] %s16165_s4 }
  0x2e   :  { %18703 = sst [smem:[#allocation21_spill]] %s16170_s13 }
  0x2f   :  { %s16175_s20 = sld [smem:[%s18669_s0 + %s15994_s15]]   ;;  %s15998_s15 = smov 31  }
  0x30   :  { %s16180_s27 = sld [smem:[%s18669_s0 + %s15995_s22]]   ;;  %s15999_s22 = smov 32  }
  0x31   :  { %s16185_s4 = sld [smem:[%s18669_s0 + %s15996_s28]]   ;;  %s16000_s28 = smov 33  }
  0x32   :  { %s16190_s13 = sld [smem:[%s18669_s0 + %s15997_s7]]   ;;  %s16001_s7 = smov 34  }
  0x35   :  { %18704 = sst [smem:[#allocation22_spill]] %s16175_s20 }
  0x36   :  { %18705 = sst [smem:[#allocation23_spill]] %s16180_s27 }
  0x37   :  { %18706 = sst [smem:[#allocation24_spill]] %s16185_s4 }
  0x38   :  { %18707 = sst [smem:[#allocation25_spill]] %s16190_s13 }
  0x39   :  { %s16195_s20 = sld [smem:[%s18669_s0 + %s15998_s15]]   ;;  %s16002_s15 = smov 35  }
  0x3a   :  { %s16200_s27 = sld [smem:[%s18669_s0 + %s15999_s22]]   ;;  %s16003_s22 = smov 36  }
  0x3b   :  { %s16205_s4 = sld [smem:[%s18669_s0 + %s16000_s28]]   ;;  %s16004_s28 = smov 37  }
  0x3c   :  { %s16210_s13 = sld [smem:[%s18669_s0 + %s16001_s7]]   ;;  %s16005_s7 = smov 38  }
  0x3f   :  { %18708 = sst [smem:[#allocation26_spill]] %s16195_s20 }
  0x40   :  { %18709 = sst [smem:[#allocation27_spill]] %s16200_s27 }
  0x41   :  { %18710 = sst [smem:[#allocation28_spill]] %s16205_s4 }
  0x42   :  { %18711 = sst [smem:[#allocation29_spill]] %s16210_s13 }
  0x43   :  { %s16215_s20 = sld [smem:[%s18669_s0 + %s16002_s15]]   ;;  %s16006_s15 = smov 39  }
  0x44   :  { %s16220_s27 = sld [smem:[%s18669_s0 + %s16003_s22]]   ;;  %s16007_s22 = smov 40  }
  0x45   :  { %s16225_s4 = sld [smem:[%s18669_s0 + %s16004_s28]]   ;;  %s16008_s28 = smov 41  }
  0x46   :  { %s16230_s13 = sld [smem:[%s18669_s0 + %s16005_s7]]   ;;  %s16009_s7 = smov 42  }
  0x49   :  { %18712 = sst [smem:[#allocation30_spill]] %s16215_s20 }
  0x4a   :  { %18713 = sst [smem:[#allocation31_spill]] %s16220_s27 }
  0x4b   :  { %18714 = sst [smem:[#allocation32_spill]] %s16225_s4 }
  0x4c   :  { %18715 = sst [smem:[#allocation33_spill]] %s16230_s13 }
  0x4d   :  { %s16235_s20 = sld [smem:[%s18669_s0 + %s16006_s15]]   ;;  %s16010_s15 = smov 43  }
  0x4e   :  { %s16240_s27 = sld [smem:[%s18669_s0 + %s16007_s22]]   ;;  %s16011_s22 = smov 44  }
  0x4f   :  { %s16245_s4 = sld [smem:[%s18669_s0 + %s16008_s28]]   ;;  %s16012_s28 = smov 45  }
  0x50   :  { %s16250_s13 = sld [smem:[%s18669_s0 + %s16009_s7]]   ;;  %s16013_s7 = smov 46  }
  0x53   :  { %18716 = sst [smem:[#allocation34_spill]] %s16235_s20 }
  0x54   :  { %18717 = sst [smem:[#allocation35_spill]] %s16240_s27 }
  0x55   :  { %18718 = sst [smem:[#allocation36_spill]] %s16245_s4 }
  0x56   :  { %18719 = sst [smem:[#allocation37_spill]] %s16250_s13 }
  0x57   :  { %s16255_s20 = sld [smem:[%s18669_s0 + %s16010_s15]]   ;;  %s16014_s15 = smov 47  }
  0x58   :  { %s16260_s27 = sld [smem:[%s18669_s0 + %s16011_s22]]   ;;  %s16015_s22 = smov 48  }
  0x59   :  { %s16265_s4 = sld [smem:[%s18669_s0 + %s16012_s28]]   ;;  %s16016_s28 = smov 49  }
  0x5a   :  { %s16270_s13 = sld [smem:[%s18669_s0 + %s16013_s7]]   ;;  %s16017_s7 = smov 50  }
  0x5d   :  { %18720 = sst [smem:[#allocation38_spill]] %s16255_s20 }
  0x5e   :  { %18721 = sst [smem:[#allocation39_spill]] %s16260_s27 }
  0x5f   :  { %18722 = sst [smem:[#allocation40_spill]] %s16265_s4 }
  0x60   :  { %18723 = sst [smem:[#allocation41_spill]] %s16270_s13 }
  0x61   :  { %s16275_s20 = sld [smem:[%s18669_s0 + %s16014_s15]]   ;;  %s16018_s15 = smov 51  }
  0x62   :  { %s16280_s27 = sld [smem:[%s18669_s0 + %s16015_s22]]   ;;  %s16019_s22 = smov 52  }
  0x63   :  { %s16285_s4 = sld [smem:[%s18669_s0 + %s16016_s28]]   ;;  %s16020_s28 = smov 53  }
  0x64   :  { %s16290_s13 = sld [smem:[%s18669_s0 + %s16017_s7]]  }
  0x67   :  { %18724 = sst [smem:[#allocation42_spill]] %s16275_s20 }
  0x68   :  { %18725 = sst [smem:[#allocation43_spill]] %s16280_s27 }
  0x69   :  { %18726 = sst [smem:[#allocation44_spill]] %s16285_s4 }
  0x6a   :  { %s16295_s20 = sld [smem:[%s18669_s0 + %s16018_s15]]  }
  0x6b   :  { %s16300_s27 = sld [smem:[%s18669_s0 + %s16019_s22]]  }
  0x6c   :  { %s16305_s4 = sld [smem:[%s18669_s0 + %s16020_s28]]  }
  0x6d   :  { %113 = vsyncpa [#allocation4], 0  ;;  %v14946_v0 = vld [vmem:[%s16065_s25] sm:$0xff]   ;;  %v14947_v1 = vld [vmem:[%s16065_s25 + $0x8] sm:$0xff]   ;;  %vm308_vm0 = vcmask 261120   ;;  %v16021_v27 = vmov 0.0  }
  0x6e   :  { %14028 = vmatprep.subr.bf16.mxu0 %v14946_v0  ;;  %v261_v2 = vld [vmem:[%s16045_s9] sm:$0xff]  ;;  %v262_v3 = vld [vmem:[%s16045_s9 + $0x8] sm:$0xff]  ;;  %v263_v5 = vld [vmem:[%s16045_s9 + $0x10] sm:$0xff]  ;;  %14048 = vmatprep.subr.bf16.mxu1 %v16021_v27  ;;  %682 = vst [vmem:[#allocation2 + $0x8] sm:$0xff] %v16021_v27  ;;  %vm16022_vm1 = vmmov 0   ;;  %vm446_vm2 = vcmask 130048  }
  0x6f   :  { %14029 = vmatpush3.bf16.msra.mxu0 %v14946_v0  ;;  %v281_v4 = vpack.c.bf16 %v262_v3, %v261_v2  ;;  %v264_v6 = vld [vmem:[%s16045_s9 + $0x18] sm:$0xff]  ;;  %v265_v7 = vld [vmem:[%s16045_s9 + $0x20] sm:$0xff]  ;;  %v266_v8 = vld [vmem:[%s16045_s9 + $0x28] sm:$0xff]  ;;  %684 = vst [vmem:[#allocation2 + $0x18] sm:$0xff] %v16021_v27  ;;  %14050 = vmatprep.mubr.msk.bf16.mxu1 %vm16022_vm1, %v16021_v27 }
  0x70   :  { %14030 = vmatprep.subr.bf16.mxu0 %v14947_v1  ;;  %v282_v9 = vpack.c.bf16 %v264_v6, %v263_v5  ;;  %v283_v10 = vpack.c.bf16 %v266_v8, %v265_v7  ;;  %v267_v11 = vld [vmem:[%s16045_s9 + $0x30] sm:$0xff]  ;;  %v268_v12 = vld [vmem:[%s16045_s9 + $0x38] sm:$0xff]  ;;  %v269_v13 = vld [vmem:[%s16045_s9 + $0x40] sm:$0xff] }
  0x71   :  { %14032 = vmatprep.mubr.msk.bf16.mxu0 %vm308_vm0, %v281_v4  ;;  %v270_v14 = vld [vmem:[%s16045_s9 + $0x48] sm:$0xff]  ;;  %v284_v15 = vpack.c.bf16 %v268_v12, %v267_v11  ;;  %v271_v17 = vld [vmem:[%s16045_s9 + $0x50] sm:$0xff]  ;;  %v272_v18 = vld [vmem:[%s16045_s9 + $0x58] sm:$0xff] }
  0x72   :  { %v285_v16 = vpack.c.bf16 %v270_v14, %v269_v13  ;;  %v273_v19 = vld [vmem:[%s16045_s9 + $0x60] sm:$0xff]  ;;  %v274_v20 = vld [vmem:[%s16045_s9 + $0x68] sm:$0xff]  ;;  %v286_v21 = vpack.c.bf16 %v272_v18, %v271_v17  ;;  %v275_v23 = vld [vmem:[%s16045_s9 + $0x70] sm:$0xff] }
  0x73   :  { %14031 = vmatpush3.bf16.msra.mxu0 %v14947_v1  ;;  %v287_v22 = vpack.c.bf16 %v274_v20, %v273_v19  ;;  %v276_v24 = vld [vmem:[%s16045_s9 + $0x78] sm:$0xff]  ;;  %v14948_v26 = vld [vmem:[%s16075_s3] sm:$0xff]  }
  0x74   :  { %v288_v25 = vpack.c.bf16 %v276_v24, %v275_v23  ;;  %14049 = vmatpush3.bf16.msra.mxu1 %v14948_v26  ;;  %v16341_v28 = vld [vmem:[%s16070_s29] ss:$0 sm:$0xff] }
  0x75   :  { %14054 = vmatprep.subr.bf16.mxu1 %v16021_v27 }
  0x76   :  { %14033 = vmatmul.mubr.msk.bf16.vlgmr.msra.gmra.mrb[0].mxu0 %vm308_vm0, %v282_v9 }
  0x77   :  { %14036 = vmatprep.mubr.msk.bf16.mxu0 %vm308_vm0, %v283_v10 }
  0x7e   :  { %14037 = vmatmul.mubr.msk.bf16.gmra.mrb[4].mxu0 %vm308_vm0, %v284_v15 }
  0x7f   :  { %14040 = vmatprep.mubr.msk.bf16.mxu0 %vm308_vm0, %v285_v16 }
  0x86   :  { %14041 = vmatmul.mubr.msk.bf16.gmra.mrb[8].mxu0 %vm308_vm0, %v286_v21 }
  0x87   :  { %14044 = vmatprep.mubr.msk.bf16.mxu0 %vm308_vm0, %v287_v22 }
  0x8e   :  { %14045 = vmatmul.mubr.msk.bf16.gmra.mrb[12].mxu0 %vm308_vm0, %v288_v25 }
 0x149   :  { %v14034_v29 = vpop.f32.mrb[0].mxu0 }
 0x14a   :  { %v367_v30 = vpop.f32.mrb[1].mxu0  ;;  %v376_v31 = vadd.f32 %v14034_v29, %v16341_v28 }
 0x14b   :  { %v368_v32 = vadd.f32 %v16341_v28, %v367_v30  ;;  %v14035_v33 = vpop.f32.mrb[2].mxu0 }
 0x14c   :  { %v379_v34 = vadd.f32 %v14035_v33, %v16341_v28  ;;  %v370_v35 = vpop.f32.mrb[3].mxu0  ;;  %v432_v38 = vmax.f32 %v376_v31, 0.0 }
 0x14d   :  { %v430_v36 = vmax.f32 %v368_v32, 0.0  ;;  %v371_v37 = vadd.f32 %v16341_v28, %v370_v35 }
 0x14e   :  { %v433_v41 = vmax.f32 %v379_v34, 0.0  ;;  %v450_v47 = vsel %vm446_vm2, %v432_v38, 0.0 }
 0x14f   :  { %v431_v39 = vmax.f32 %v371_v37, 0.0  ;;  %v447_v40 = vsel %vm446_vm2, %v430_v36, 0.0 }
 0x150   :  { %v452_v52 = vsel %vm446_vm2, %v433_v41, 0.0 }
 0x151   :  { %v448_v42 = vsel %vm446_vm2, %v431_v39, 0.0  ;;  %v14038_v43 = vpop.f32.mrb[4].mxu0 }
 0x152   :  { %v449_v44 = vadd.f32 %v448_v42, %v447_v40  ;;  %v392_v45 = vadd.f32 %v14038_v43, %v16341_v28  ;;  %v383_v46 = vpop.f32.mrb[5].mxu0 }
 0x153   :  { %v384_v48 = vadd.f32 %v16341_v28, %v383_v46  ;;  %v14039_v49 = vpop.f32.mrb[6].mxu0 }
 0x154   :  { %v451_v50 = vadd.f32 %v450_v47, %v449_v44  ;;  %v386_v51 = vpop.f32.mrb[7].mxu0  ;;  %v395_v54 = vadd.f32 %v14039_v49, %v16341_v28  ;;  %v436_v56 = vmax.f32 %v392_v45, 0.0 }
 0x155   :  { %v434_v53 = vmax.f32 %v384_v48, 0.0  ;;  %v387_v55 = vadd.f32 %v16341_v28, %v386_v51 }
 0x156   :  { %v453_v57 = vadd.f32 %v452_v52, %v451_v50 }
 0x157   :  { %v454_v58 = vsel %vm446_vm2, %v434_v53, 0.0  ;;  %v435_v59 = vmax.f32 %v387_v55, 0.0 }
 0x158   :  { %v455_v60 = vadd.f32 %v454_v58, %v453_v57 }
 0x159   :  { %114 = vsyncpa [#allocation6], 0  ;;  %v437_v61 = vmax.f32 %v395_v54, 0.0  ;;  %v456_v62 = vsel %vm446_vm2, %v435_v59, 0.0  ;;  %v14042_v63 = vpop.f32.mrb[8].mxu0  ;;  %v458_v2 = vsel %vm446_vm2, %v436_v56, 0.0 }
 0x15a   :  { %v457_v0 = vadd.f32 %v456_v62, %v455_v60  ;;  %v399_v1 = vpop.f32.mrb[9].mxu0  ;;  %v408_v3 = vadd.f32 %v14042_v63, %v16341_v28  ;;  %vm507_vm3 = vcmask 1041409   ;;  %v14949_v63 = vld [vmem:[%s16085_s14] sm:$0xff]   ;;  %vm599_vm4 = vcmask 523264   ;;  %s18727_s0 = sld [smem:[#allocation10_spill]]  ;;  %s16025_s9 = smov 96  }
 0x15b   :  { %v400_v4 = vadd.f32 %v16341_v28, %v399_v1  ;;  %v14043_v5 = vpop.f32.mrb[10].mxu0  ;;  %v460_v8 = vsel %vm446_vm2, %v437_v61, 0.0  ;;  %v14950_v1 = vld [vmem:[%s16085_s14 + $0x8] sm:$0xff]   ;;  %vm653_vm5 = vcmask 1041408   ;;  %s16027_s25 = smov 32   ;;  %s18730_s29 = sld [smem:[#allocation12_spill]] }
 0x15c   :  { %v459_v6 = vadd.f32 %v458_v2, %v457_v0  ;;  %v402_v7 = vpop.f32.mrb[11].mxu0  ;;  %v411_v10 = vadd.f32 %v14043_v5, %v16341_v28  ;;  %v440_v13 = vmax.f32 %v408_v3, 0.0  ;;  %v14951_v2 = vld [vmem:[%s16085_s14 + $0x10] sm:$0xff]   ;;  %v14952_v3 = vld [vmem:[%s16085_s14 + $0x18] sm:$0xff]   ;;  %s18731_s3 = sld [smem:[#allocation15_spill]]  ;;  %s18733_s14 = sld [smem:[#allocation14_spill]] }
 0x15d   :  { %v438_v9 = vmax.f32 %v400_v4, 0.0  ;;  %v403_v11 = vadd.f32 %v16341_v28, %v402_v7  ;;  %v12605_v4 = vld [vmem:[%s16080_s8] ss:$0 sm:$0xff]  ;;  %s18732_s8 = sld [smem:[#allocation13_spill]]  ;;  %s18738_s7 = sld [smem:[#allocation20_spill]]  ;;  %vm8999_vm6 = vcmask 27648  }
 0x15e   :  { %v461_v12 = vadd.f32 %v460_v8, %v459_v6  ;;  %v441_v17 = vmax.f32 %v411_v10, 0.0  ;;  %v471_v22 = vsel %vm446_vm2, %v440_v13, 0.0  ;;  %s18740_s10 = sld [smem:[#allocation41_spill]]  ;;  %s18741_s11 = sld [smem:[#allocation22_spill]]  ;;  %vm9024_vm7 = vcmask 31744  }
 0x15f   :  { %v439_v14 = vmax.f32 %v403_v11, 0.0  ;;  %v468_v16 = vsel %vm446_vm2, %v438_v9, 0.0  ;;  %v219_v11 = vld [vmem:[%s16040_s5 + $0x8] sm:$0xff]  ;;  %s18742_s15 = sld [smem:[#allocation23_spill]]  ;;  %s18743_s16 = sld [smem:[#allocation29_spill]]  ;;  %vm10469_vm8 = vcmask 125952  }
 0x160   :  { %v462_v15 = vrot.slane %v461_v12, 4  ;;  %v473_v31 = vsel %vm446_vm2, %v441_v17, 0.0  ;;  %224 = vadd.xlane.f32.xlu1 %v219_v11  ;;  %s18744_s18 = sld [smem:[#allocation24_spill]]  ;;  %s18745_s22 = sld [smem:[#allocation27_spill]]  ;;  %vm12363_vm9 = vcmask 1043456  }
 0x161   :  { %v469_v18 = vsel %vm446_vm2, %v439_v14, 0.0  ;;  %v14046_v19 = vpop.f32.mrb[12].mxu0  ;;  %v12614_v14 = vld [vmem:[%s16095_s24] ss:$0 sm:$0xff]  ;;  %s18735_s24 = sld [smem:[#allocation16_spill]]  ;;  %s18746_s23 = sld [smem:[#allocation25_spill]] }
 0x162   :  { %v470_v20 = vadd.f32 %v469_v18, %v468_v16  ;;  %v415_v21 = vpop.f32.mrb[13].mxu0  ;;  %v424_v23 = vadd.f32 %v14046_v19, %v16341_v28  ;;  %v463_v26 = vadd.f32 %v462_v15, %v461_v12  ;;  %v12608_v12 = vld [vmem:[%s16090_s19] ss:$0 sm:$0xff]  ;;  %s18734_s19 = sld [smem:[#allocation17_spill]]  ;;  %s18747_s26 = sld [smem:[#allocation26_spill]] }
 0x163   :  { %v416_v24 = vadd.f32 %v16341_v28, %v415_v21  ;;  %v14047_v25 = vpop.f32.mrb[14].mxu0  ;;  %v218_v21 = vld [vmem:[%s16040_s5] sm:$0xff]  ;;  %s18728_s5 = sld [smem:[#allocation9_spill]]  ;;  %s18748_s28 = sld [smem:[#allocation30_spill]] }
 0x164   :  { %v472_v29 = vadd.f32 %v471_v22, %v470_v20  ;;  %v418_v30 = vpop.f32.mrb[15].mxu0  ;;  %v427_v33 = vadd.f32 %v14047_v25, %v16341_v28  ;;  %v444_v36 = vmax.f32 %v424_v23, 0.0  ;;  %v464_v39 = vrot.slane %v463_v26, 2  ;;  %s18749_s1 = sld [smem:[#allocation28_spill]]  ;;  %s18750_s2 = sld [smem:[#allocation31_spill]] }
 0x165   :  { %v442_v32 = vmax.f32 %v416_v24, 0.0  ;;  %v419_v34 = vadd.f32 %v16341_v28, %v418_v30 }
 0x166   :  { %v474_v35 = vadd.f32 %v473_v31, %v472_v29  ;;  %v445_v41 = vmax.f32 %v427_v33, 0.0  ;;  %v479_v44 = vsel %vm446_vm2, %v444_v36, 0.0  ;;  %v465_v45 = vadd.f32 %v464_v39, %v463_v26  ;;  %v14956_v39 = vld [vmem:[%s16110_s12 + $0x8] ss:$12 sps:$4 sm:$0xff]  }
 0x167   :  { %v475_v37 = vsel %vm446_vm2, %v442_v32, 0.0  ;;  %v443_v38 = vmax.f32 %v419_v34, 0.0 }
 0x168   :  { %v476_v40 = vadd.f32 %v475_v37, %v474_v35  ;;  %v481_v47 = vsel %vm446_vm2, %v445_v41, 0.0  ;;  %v466_v28 = vrot.slane %v465_v45, 1  ;;  %v14955_v37 = vld [vmem:[%s16110_s12 + $0x4] ss:$12 sps:$4 sm:$0xff]  }
 0x169   :  { %v477_v42 = vsel %vm446_vm2, %v443_v38, 0.0  ;;  %v14953_v38 = vld [vmem:[%s16110_s12] ss:$12 sps:$4 sm:$0xff]   ;;  %1018 = vmatprep.subr.bf16.mxu0 %v14955_v37  ;;  %v14957_v41 = vld [vmem:[%s16110_s12 + $0x18] ss:$12 sps:$4 sm:$0xff]  }
 0x16a   :  { %v478_v43 = vadd.f32 %v477_v42, %v476_v40  ;;  %v467_v52 = vadd.f32 %v466_v28, %v465_v45  ;;  %1019 = vmatpush1.bf16.msra.mxu0 %v14953_v38  ;;  %v14959_v40 = vld [vmem:[%s16110_s12 + $0x1c] ss:$12 sps:$4 sm:$0xff]   ;;  %v14960_v42 = vld [vmem:[%s16110_s12 + $0x20] ss:$12 sps:$4 sm:$0xff]   ;;  %v14964_v45 = vld [vmem:[%s16110_s12 + $0x38] ss:$12 sps:$4 sm:$0xff]  }
 0x16b   :  { %1020 = vmatprep.subr.bf16.mxu0 %v14959_v40  ;;  %v14969_v28 = vld [vmem:[%s16110_s12 + $0x60] ss:$12 sps:$4 sm:$0xff]  }
 0x16c   :  { %v480_v46 = vadd.f32 %v479_v44, %v478_v43  ;;  %v490_v55 = vmul.f32 0.015625, %v467_v52  ;;  %v14963_v43 = vld [vmem:[%s16110_s12 + $0x34] ss:$12 sps:$4 sm:$0xff]   ;;  %v14961_v44 = vld [vmem:[%s16110_s12 + $0x30] ss:$12 sps:$4 sm:$0xff]  }
 0x16d   :  { %v14973_v52 = vld [vmem:[%s16110_s12 + $0x78] ss:$12 sps:$4 sm:$0xff]   ;;  %v752_v37 = vld [vmem:[%s18727_s0] sm:$0x7] }
 0x16e   :  { %v482_v48 = vadd.f32 %v481_v47, %v480_v46  ;;  %v494_v58 = vpack.c.bf16 %v490_v55, %v490_v55  ;;  %1021 = vmatpush1.bf16.msra.mxu0 %v14957_v41  ;;  %v14967_v46 = vld [vmem:[%s16110_s12 + $0x4c] ss:$12 sps:$4 sm:$0xff]   ;;  %v14965_v47 = vld [vmem:[%s16110_s12 + $0x48] ss:$12 sps:$4 sm:$0xff]   ;;  %v14977_v55 = vld [vmem:[%s16110_s12 + $0x90] ss:$12 sps:$4 sm:$0xff]  }
 0x16f   :  { %1022 = vmatprep.subr.bf16.mxu0 %v14963_v43 }
 0x170   :  { %v483_v49 = vrot.slane %v482_v48, 4  ;;  %v505_v60 = vunpack.c.l.b16 %v494_v58  ;;  %v14981_v58 = vld [vmem:[%s16110_s12 + $0xa8] ss:$12 sps:$4 sm:$0xff]  }
 0x172   :  { %v484_v50 = vadd.f32 %v483_v49, %v482_v48  ;;  %1023 = vmatpush1.bf16.msra.mxu0 %v14961_v44  ;;  %v14968_v48 = vld [vmem:[%s16110_s12 + $0x50] ss:$12 sps:$4 sm:$0xff]  }
 0x173   :  { %1024 = vmatprep.subr.bf16.mxu0 %v14967_v46  ;;  %v14971_v49 = vld [vmem:[%s16110_s12 + $0x64] ss:$12 sps:$4 sm:$0xff]  }
 0x174   :  { %v485_v51 = vrot.slane %v484_v50, 2 }
 0x176   :  { %v486_v53 = vadd.f32 %v485_v51, %v484_v50  ;;  %1025 = vmatpush1.bf16.msra.mxu0 %v14965_v47  ;;  %v14972_v50 = vld [vmem:[%s16110_s12 + $0x68] ss:$12 sps:$4 sm:$0xff]  }
 0x177   :  { %1026 = vmatprep.subr.bf16.mxu0 %v14971_v49  ;;  %v14975_v51 = vld [vmem:[%s16110_s12 + $0x7c] ss:$12 sps:$4 sm:$0xff]  }
 0x178   :  { %v487_v54 = vrot.slane %v486_v53, 1 }
 0x17a   :  { %v488_v56 = vadd.f32 %v487_v54, %v486_v53  ;;  %1027 = vmatpush1.bf16.msra.mxu0 %v14969_v28  ;;  %v14976_v53 = vld [vmem:[%s16110_s12 + $0x80] ss:$12 sps:$4 sm:$0xff]  }
 0x17b   :  { %1028 = vmatprep.subr.bf16.mxu0 %v14975_v51  ;;  %v14979_v54 = vld [vmem:[%s16110_s12 + $0x94] ss:$12 sps:$4 sm:$0xff]  }
 0x17c   :  { %v491_v57 = vmul.f32 0.015625, %v488_v56  ;;  %v14980_v56 = vld [vmem:[%s16110_s12 + $0x98] ss:$12 sps:$4 sm:$0xff]  }
 0x17e   :  { %v495_v59 = vpack.c.bf16 %v491_v57, %v491_v57  ;;  %1029 = vmatpush1.bf16.msra.mxu0 %v14973_v52  ;;  %v14983_v57 = vld [vmem:[%s16110_s12 + $0xac] ss:$12 sps:$4 sm:$0xff]  }
 0x17f   :  { %1030 = vmatprep.subr.bf16.mxu0 %v14979_v54 }
 0x180   :  { %v506_v61 = vunpack.c.l.b16 %v495_v59  ;;  %v14984_v59 = vld [vmem:[%s16110_s12 + $0xb0] ss:$12 sps:$4 sm:$0xff]  }
 0x182   :  { %v508_v62 = vsel %vm507_vm3, %v506_v61, %v505_v60  ;;  %1031 = vmatpush1.bf16.msra.mxu0 %v14977_v55  ;;  %v16023_v60 = vmov 0  }
 0x183   :  { %v509_v0 = vpack.c.b16 %v508_v62, %v508_v62  ;;  %1032 = vmatprep.subr.bf16.mxu0 %v14983_v57  ;;  %1050 = vmatprep.mubr.bf16.mxu0 %v16023_v60 }
 0x185   :  { %14051 = vmatmul.mubr.msk.bf16.vlgmr.msra.gmra.mrb[0].mxu1 %vm446_vm2, %v509_v0 }
 0x186   :  { %14055 = vmatpush3.bf16.msra.mxu1 %v14949_v63  ;;  %14062 = vmatprep.mubr.msk.bf16.mxu1 %vm16022_vm1, %v16021_v27 }
 0x187   :  { %14056 = vmatprep.subr.bf16.mxu1 %v16021_v27  ;;  %1033 = vmatpush1.bf16.msra.mxu0 %v14981_v58 }
 0x188   :  { %14086 = vmatprep.subr.bf16.mxu0 %v16021_v27 }
 0x18a   :  { %14057 = vmatpush3.bf16.msra.mxu1 %v14950_v1 }
 0x18b   :  { %14058 = vmatprep.subr.bf16.mxu1 %v16021_v27 }
 0x18e   :  { %14059 = vmatpush3.bf16.msra.mxu1 %v14951_v2 }
 0x18f   :  { %14060 = vmatprep.subr.bf16.mxu1 %v16021_v27 }
 0x192   :  { %14061 = vmatpush3.bf16.msra.mxu1 %v14952_v3 }
 0x193   :  { %14066 = vmatprep.subr.bf16.mxu1 %v14956_v39 }
 0x1ed   :  { %v225_v22 = vpop.xlane.xlu1 %224 }
 0x1ee   :  { %v228_v24 = vmul.f32 0.0078125, %v225_v22  ;;  %v12593_v22 = vld [vmem:[%s16060_s21] ss:$0 sm:$0xff]  ;;  %s18729_s21 = sld [smem:[#allocation11_spill]] }
 0x1f0   :  { %v16394_v30 = vsub.f32 %v219_v11, %v228_v24 }
 0x1f2   :  { %v232_v35 = vmul.f32 %v16394_v30, %v16394_v30 }
 0x258   :  { %v553_v5 = vpop.f32.mrb[0].mxu1 }
 0x259   :  { %v554_v6 = vadd.f32 %v12605_v4, %v553_v5  ;;  %v14052_v7 = vpop.f32.mrb[1].mxu1 }
 0x25a   :  { %v556_v8 = vpop.f32.mrb[2].mxu1 }
 0x25b   :  { %v567_v9 = vpack.c.bf16 %v554_v6, %v554_v6  ;;  %v14053_v10 = vpop.f32.mrb[3].mxu1  ;;  %v16024_v6 = vmov 1966171168   ;;  %v691_v8 = vlaneseq }
 0x25c   :  { %v689_v7 = vunpack.c.l.s4 %v16024_v6 }
 0x25d   :  { %14063 = vmatmul.mubr.msk.bf16.vlgmr.msra.gmra.mrb[4].mxu1 %vm599_vm4, %v567_v9  ;;  %v16432_v10 = vshrl.u32 %v691_v8, 7 }
 0x25e   :  { %14067 = vmatpush3.bf16.msra.mxu1 %v14956_v39  ;;  %v690_v9 = vunpack.c.0.s8 %v689_v7 }
 0x25f   :  { %14068 = vmatprep.subr.bf16.mxu1 %v14960_v42  ;;  %v16452_v38 = vsub.s32 1, %v16432_v10  ;;  %v16455_v39 = vsub.s32 2, %v16432_v10 }
 0x261   :  { %v886_v44 = vrot.slane %v752_v37, %v16455_v39 }
 0x262   :  { %14069 = vmatpush3.bf16.msra.mxu1 %v14960_v42  ;;  %v882_v42 = vrot.slane %v752_v37, %v16452_v38 }
 0x263   :  { %14070 = vmatprep.subr.bf16.mxu1 %v14964_v45 }
 0x266   :  { %14071 = vmatpush3.bf16.msra.mxu1 %v14964_v45 }
 0x267   :  { %14072 = vmatprep.subr.bf16.mxu1 %v14968_v48 }
 0x26a   :  { %14073 = vmatpush3.bf16.msra.mxu1 %v14968_v48 }
 0x26b   :  { %14074 = vmatprep.subr.bf16.mxu1 %v14972_v50 }
 0x26e   :  { %14075 = vmatpush3.bf16.msra.mxu1 %v14972_v50 }
 0x26f   :  { %14076 = vmatprep.subr.bf16.mxu1 %v14976_v53 }
 0x272   :  { %14077 = vmatpush3.bf16.msra.mxu1 %v14976_v53 }
 0x273   :  { %14078 = vmatprep.subr.bf16.mxu1 %v14980_v56 }
 0x276   :  { %14079 = vmatpush3.bf16.msra.mxu1 %v14980_v56 }
 0x277   :  { %14080 = vmatprep.subr.bf16.mxu1 %v14984_v59 }
 0x27a   :  { %14081 = vmatpush3.bf16.msra.mxu1 %v14984_v59 }
 0x27b   :  { %14092 = vmatprep.subr.bf16.mxu1 %v16021_v27 }
 0x330   :  { %v637_v13 = vpop.f32.mrb[4].mxu1 }
 0x331   :  { %v638_v15 = vadd.f32 %v12608_v12, %v637_v13  ;;  %v14064_v16 = vpop.f32.mrb[5].mxu1  ;;  %v12615_v12 = vld [vmem:[%s16100_s30] ss:$0 sm:$0xff]  ;;  %s18736_s30 = sld [smem:[#allocation18_spill]] }
 0x332   :  { %v640_v17 = vpop.f32.mrb[6].mxu1  ;;  %v693_v16 = vsub.s32 %v690_v9, %v16432_v10 }
 0x333   :  { %v14065_v18 = vpop.f32.mrb[7].mxu1  ;;  %v650_v19 = vadd.f32 %v12614_v14, %v638_v15  ;;  %v12616_v14 = vld [vmem:[%s16105_s6] ss:$0 sm:$0xff]  ;;  %s18737_s6 = sld [smem:[#allocation19_spill]] }
 0x334   :  { %v12592_v18 = vld [vmem:[%s16055_s17] ss:$0 sm:$0xff]  ;;  %s16026_s17 = smov 64  }
 0x335   :  { %v654_v20 = vsel %vm653_vm5, %v650_v19, 0.0 }
 0x336   :  { %655 = vadd.xlane.f32.xlu0 %v654_v20 }
 0x33a   :  { %222 = vadd.xlane.f32.xlu0 %v218_v21 }
 0x3c3   :  { %v656_v23 = vpop.xlane.xlu0 %655 }
 0x3c4   :  { %v657_v25 = vmul.f32 0.0078125, %v656_v23 }
 0x3c6   :  { %v16392_v26 = vsub.f32 %v650_v19, %v657_v25 }
 0x3c7   :  { %v223_v29 = vpop.xlane.xlu0 %222 }
 0x3c8   :  { %v227_v31 = vmul.f32 0.0078125, %v223_v29  ;;  %v659_v32 = vmul.f32 %v16392_v26, %v16392_v26 }
 0x3ca   :  { %v660_v33 = vsel %vm653_vm5, %v659_v32, 0.0  ;;  %v16399_v34 = vsub.f32 %v218_v21, %v227_v31 }
 0x3cb   :  { %661 = vadd.xlane.f32.xlu1 %v660_v33 }
 0x3cc   :  { %v231_v36 = vmul.f32 %v16399_v34, %v16399_v34 }
 0x3ce   :  { %233 = vadd.xlane.f32.xlu0 %v231_v36 }
 0x3cf   :  { %235 = vadd.xlane.f32.xlu1 %v232_v35 }
 0x458   :  { %v662_v61 = vpop.xlane.xlu1 %661 }
 0x459   :  { %v663_v62 = vmul.f32 0.0078125, %v662_v61 }
 0x45b   :  { %v664_v63 = vadd.f32 1e-12, %v663_v62  ;;  %v234_v0 = vpop.xlane.xlu0 %233 }
 0x45c   :  { %v237_v1 = vmul.f32 0.0078125, %v234_v0  ;;  %v236_v2 = vpop.xlane.xlu1 %235 }
 0x45d   :  { %15490 = vrsqrt.f32 %v664_v63  ;;  %v238_v3 = vmul.f32 0.0078125, %v236_v2 }
 0x45e   :  { %v239_v4 = vadd.f32 1e-12, %v237_v1 }
 0x45f   :  { %v240_v5 = vadd.f32 1e-12, %v238_v3 }
 0x460   :  { %15492 = vrsqrt.f32 %v239_v4 }
 0x461   :  { %15494 = vrsqrt.f32 %v240_v5 }
 0x467   :  { %v15491_v11 = vpop.eup %15490 }
 0x468   :  { %v666_v13 = vmul.f32 %v15491_v11, %v16392_v26 }
 0x46a   :  { %v15493_v15 = vpop.eup %15492  ;;  %v673_v17 = vmul.f32 %v12615_v12, %v666_v13 }
 0x46b   :  { %v15495_v19 = vpop.eup %15494  ;;  %v243_v20 = vmul.f32 %v15493_v15, %v16399_v34 }
 0x46c   :  { %v680_v21 = vadd.f32 %v12616_v14, %v673_v17  ;;  %v244_v23 = vmul.f32 %v15495_v19, %v16394_v30  ;;  %v16448_v30 = vsub.s32 0, %v16432_v10  ;;  %v16491_v17 = vld [vmem:[%s18728_s5 + $0x1] ss:$0 sm:$0xff] }
 0x46d   :  { %v251_v24 = vmul.f32 %v12592_v18, %v243_v20 }
 0x46e   :  { %v694_v25 = vrot.slane %v680_v21, %v693_v16  ;;  %v252_v29 = vmul.f32 %v12592_v18, %v244_v23  ;;  %v878_v40 = vrot.slane %v752_v37, %v16448_v30 }
 0x46f   :  { %v259_v31 = vadd.f32 %v12593_v22, %v251_v24 }
 0x470   :  { %v695_v32 = vcombine.high %v694_v25, %v694_v25  ;;  %12617 = vst.sshfl [vmem:[#allocation2 + $0x8] sm:$0x1 pattern:$0x73625140] %v694_v25  ;;  %v260_v26 = vadd.f32 %v12593_v22, %v252_v29 }
 0x471   :  { %685 = vst [vmem:[#allocation2] sm:$0xff] %v259_v31 }
 0x472   :  { %12618 = vst.sshfl [vmem:[#allocation2 + $0x18] sm:$0x1 pattern:$0x73625140] %v695_v32  ;;  %686 = vst [vmem:[#allocation2 + $0x10] sm:$0xff] %v260_v26 }
 0x477   :  { %v715_v33 = vld [vmem:[#allocation2 + $0x8] sm:$0xff] }
 0x478   :  { %v872_v35 = vpack.c.bf16 %v715_v33, %v259_v31 }
 0x479   :  { %v717_v36 = vld [vmem:[#allocation2 + $0x18] sm:$0xff] }
 0x47a   :  { %1051 = vmatmul.mubr.bf16.vlgmr.msra.gmra.mrb[16].mxu0 %v872_v35  ;;  %14082 = vmatprep.mubr.bf16.mxu1 %v872_v35  ;;  %v873_v34 = vpack.c.bf16 %v717_v36, %v260_v26 }
 0x47b   :  { %1060 = vmatprep.mubr.bf16.mxu0 %v16023_v60 }
 0x47c   :  { %14083 = vmatmul.mubr.bf16.vlgmr.msra.gmra.mrb[8].mxu1 %v873_v34 }
 0x47d   :  { %14094 = vmatprep.mubr.msk.bf16.mxu1 %vm16022_vm1, %v16021_v27 }
 0x482   :  { %1061 = vmatmul.mubr.bf16.gmra.mrb[20].mxu0 %v873_v34 }
 0x483   :  { %14088 = vmatprep.mubr.msk.bf16.mxu0 %vm16022_vm1, %v16021_v27 }
 0x54d   :  { %v1052_v41 = vpop.f32.mrb[16].mxu0 }
 0x54e   :  { %v1054_v43 = vpop.f32.mrb[17].mxu0  ;;  %v1053_v47 = vadd.f32 %v1052_v41, %v878_v40 }
 0x54f   :  { %v14084_v45 = vpop.f32.mrb[8].mxu1  ;;  %v1056_v46 = vpop.f32.mrb[18].mxu0  ;;  %v1055_v50 = vadd.f32 %v1054_v43, %v882_v42 }
 0x550   :  { %v1057_v48 = vadd.f32 %v1056_v46, %v878_v40  ;;  %v1105_v49 = vpop.f32.mrb[9].mxu1  ;;  %v1058_v28 = vpop.f32.mrb[19].mxu0  ;;  %v1114_v53 = vadd.f32 %v14084_v45, %v886_v44 }
 0x551   :  { %v1059_v51 = vadd.f32 %v1058_v28, %v882_v42  ;;  %v14085_v52 = vpop.f32.mrb[10].mxu1  ;;  %v1106_v57 = vadd.f32 %v1105_v49, %v886_v44 }
 0x552   :  { %v16460_v54 = vpack.c.bf16 %v1057_v48, %v1053_v47  ;;  %v1117_v55 = vadd.f32 %v14085_v52, %v886_v44  ;;  %v1108_v56 = vpop.f32.mrb[11].mxu1 }
 0x553   :  { %v16462_v58 = vpack.c.bf16 %v1059_v51, %v1055_v50  ;;  %v1109_v59 = vadd.f32 %v1108_v56, %v886_v44  ;;  %v16504_v44 = vld [vmem:[%s18728_s5] ss:$0 sm:$0xff] }
 0x554   :  { %v16464_v61 = vpack.c.bf16 %v1117_v55, %v1114_v53 }
 0x555   :  { %v16466_v62 = vpack.c.bf16 %v1109_v59, %v1106_v57  ;;  %v1062_v63 = vpop.f32.mrb[20].mxu0  ;;  %v1130_v0 = vsel %vm308_vm0, %v16462_v58, 0 }
 0x556   :  { %v1064_v1 = vpop.f32.mrb[21].mxu0  ;;  %14087 = vmatpush3.bf16.xpose.msra.mxu0 %v1130_v0  ;;  %v1063_v3 = vadd.f32 %v1062_v63, %v878_v40 }
 0x557   :  { %v1066_v2 = vpop.f32.mrb[22].mxu0  ;;  %14098 = vmatprep.subr.bf16.mxu0 %v16021_v27  ;;  %v1065_v6 = vadd.f32 %v1064_v1, %v882_v42 }
 0x558   :  { %v1067_v4 = vadd.f32 %v1066_v2, %v878_v40  ;;  %v1068_v5 = vpop.f32.mrb[23].mxu0 }
 0x559   :  { %v1069_v7 = vadd.f32 %v1068_v5, %v882_v42 }
 0x55a   :  { %v16471_v8 = vpack.c.bf16 %v1067_v4, %v1063_v3 }
 0x55b   :  { %v16473_v9 = vpack.c.bf16 %v1069_v7, %v1065_v6 }
 0x55d   :  { %14089 = vmatmul.mubr.msk.bf16.vlgmr.msra.gmra.mrb[24].mxu0 %vm308_vm0, %v16460_v54  ;;  %v1177_v11 = vsel %vm308_vm0, %v16473_v9, 0 }
 0x55e   :  { %14093 = vmatpush3.bf16.xpose.msra.mxu1 %v1177_v11  ;;  %14099 = vmatpush3.bf16.msra.mxu0 %v16466_v62 }
 0x55f   :  { %14104 = vmatprep.subr.bf16.mxu1 %v16021_v27  ;;  %14100 = vmatprep.mubr.msk.bf16.mxu0 %vm16022_vm1, %v16021_v27 }
 0x560   :  { %14110 = vmatprep.subr.bf16.mxu0 %v16021_v27 }
 0x565   :  { %14095 = vmatmul.mubr.msk.bf16.vlgmr.msra.gmra.mrb[12].mxu1 %vm308_vm0, %v16471_v8 }
 0x566   :  { %14105 = vmatpush3.bf16.msra.mxu1 %v16464_v61  ;;  %14106 = vmatprep.mubr.msk.bf16.mxu1 %vm16022_vm1, %v16021_v27 }
 0x567   :  { %14116 = vmatprep.subr.bf16.mxu1 %v16021_v27 }
 0x630   :  { %v1166_v12 = vpop.f32.mrb[24].mxu0 }
 0x631   :  { %v14090_v13 = vpop.f32.mrb[25].mxu0  ;;  %v1220_v43 = vmul.f32 0.17677669, %v1166_v12 }
 0x632   :  { %v1169_v14 = vpop.f32.mrb[26].mxu0 }
 0x633   :  { %v14091_v15 = vpop.f32.mrb[27].mxu0  ;;  %v1221_v42 = vmul.f32 0.17677669, %v1169_v14  ;;  %v1236_v46 = vadd.f32 %v16504_v44, %v1220_v43 }
 0x635   :  { %v1237_v45 = vadd.f32 %v16504_v44, %v1221_v42  ;;  %v1240_v48 = vsel %vm446_vm2, %v1236_v46, -inf }
 0x637   :  { %v1243_v47 = vsel %vm446_vm2, %v1237_v45, -inf }
 0x638   :  { %v1213_v16 = vpop.f32.mrb[12].mxu1 }
 0x639   :  { %v1222_v18 = vmul.f32 0.17677669, %v1213_v16  ;;  %v14096_v19 = vpop.f32.mrb[13].mxu1 }
 0x63a   :  { %v1216_v20 = vpop.f32.mrb[14].mxu1 }
 0x63b   :  { %v1223_v21 = vmul.f32 0.17677669, %v1216_v20  ;;  %v14097_v22 = vpop.f32.mrb[15].mxu1  ;;  %v1238_v23 = vadd.f32 %v16491_v17, %v1222_v18 }
 0x63d   :  { %v1246_v24 = vsel %vm446_vm2, %v1238_v23, -inf  ;;  %v1239_v25 = vadd.f32 %v16491_v17, %v1223_v21 }
 0x63e   :  { %1247 = vmax.xlane.f32.xlu0 %v1246_v24 }
 0x63f   :  { %v1249_v29 = vsel %vm446_vm2, %v1239_v25, -inf }
 0x640   :  { %1250 = vmax.xlane.f32.xlu1 %v1249_v29 }
 0x6cb   :  { %v1248_v31 = vpop.xlane.xlu0 %1247 }
 0x6cc   :  { %v1254_v32 = vsub.f32 %v1238_v23, %v1248_v31 }
 0x6cd   :  { %v1251_v26 = vpop.xlane.xlu1 %1250 }
 0x6ce   :  { %v1260_v33 = vmul.f32 1.442695, %v1254_v32  ;;  %v1255_v35 = vsub.f32 %v1239_v25, %v1251_v26 }
 0x6d0   :  { %15496 = vpow2.f32 %v1260_v33  ;;  %v1262_v36 = vmul.f32 1.442695, %v1255_v35 }
 0x6d2   :  { %15498 = vpow2.f32 %v1262_v36 }
 0x6da   :  { %v15497_v34 = vpop.eup %15496 }
 0x6db   :  { %v1270_v37 = vsel %vm446_vm2, %v15497_v34, 0.0 }
 0x6dc   :  { %v15499_v40 = vpop.eup %15498  ;;  %1271 = vadd.xlane.f32.xlu0 %v1270_v37 }
 0x6dd   :  { %v1273_v41 = vsel %vm446_vm2, %v15499_v40, 0.0 }
 0x6de   :  { %1274 = vadd.xlane.f32.xlu1 %v1273_v41 }
 0x6ef   :  { %1430 = vrot.lane.b32.xlu1 %v16471_v8, %s16025_s9 }
 0x6f2   :  { %1433 = vrot.lane.b32.xlu0 %v16473_v9, %s16025_s9 }
 0x711   :  { %1244 = vmax.xlane.f32.xlu0 %v1243_v47 }
 0x713   :  { %1241 = vmax.xlane.f32.xlu1 %v1240_v48 }
 0x769   :  { %v1272_v49 = vpop.xlane.xlu0 %1271 }
 0x76a   :  { %15500 = vrcp.f32 %v1272_v49 }
 0x76b   :  { %v1275_v28 = vpop.xlane.xlu1 %1274 }
 0x76c   :  { %15502 = vrcp.f32 %v1275_v28 }
 0x76d   :  { %v1434_v55 = vpop.permute.xlu0 %1433 }
 0x76e   :  { %v1439_v57 = vsel %vm308_vm0, %v1434_v55, 0 }
 0x76f   :  { %v1431_v59 = vpop.permute.xlu1 %1430 }
 0x774   :  { %v15501_v50 = vpop.eup %15500 }
 0x775   :  { %v1282_v52 = vmul.f32 %v15501_v50, %v15497_v34 }
 0x776   :  { %v15503_v51 = vpop.eup %15502 }
 0x777   :  { %v1283_v53 = vmul.f32 %v15503_v51, %v15499_v40 }
 0x779   :  { %v1285_v56 = vpack.c.bf16 %v1283_v53, %v1282_v52 }
 0x77b   :  { %14107 = vmatmul.mubr.msk.bf16.vlgmr.msra.gmra.mrb[16].mxu1 %vm446_vm2, %v1285_v56 }
 0x77c   :  { %14117 = vmatpush3.bf16.xpose.msra.mxu1 %v1439_v57  ;;  %14118 = vmatprep.mubr.msk.bf16.mxu1 %vm16022_vm1, %v16021_v27 }
 0x77d   :  { %14128 = vmatprep.subr.bf16.mxu1 %v16021_v27 }
 0x783   :  { %14119 = vmatmul.mubr.msk.bf16.vlgmr.msra.gmra.mrb[20].mxu1 %vm308_vm0, %v1431_v59 }
 0x784   :  { %14130 = vmatprep.mubr.msk.bf16.mxu1 %vm16022_vm1, %v16021_v27 }
 0x79e   :  { %v1245_v63 = vpop.xlane.xlu0 %1244 }
 0x79f   :  { %v1253_v0 = vsub.f32 %v1237_v45, %v1245_v63 }
 0x7a0   :  { %v1242_v1 = vpop.xlane.xlu1 %1241 }
 0x7a1   :  { %v1258_v2 = vmul.f32 1.442695, %v1253_v0  ;;  %v1252_v3 = vsub.f32 %v1236_v46, %v1242_v1 }
 0x7a3   :  { %15504 = vpow2.f32 %v1258_v2  ;;  %v1256_v4 = vmul.f32 1.442695, %v1252_v3 }
 0x7a5   :  { %15506 = vpow2.f32 %v1256_v4 }
 0x7ad   :  { %v15505_v5 = vpop.eup %15504 }
 0x7ae   :  { %v1267_v6 = vsel %vm446_vm2, %v15505_v5, 0.0 }
 0x7af   :  { %v15507_v7 = vpop.eup %15506  ;;  %1268 = vadd.xlane.f32.xlu1 %v1267_v6 }
 0x7b0   :  { %v1264_v11 = vsel %vm446_vm2, %v15507_v7, 0.0 }
 0x7b1   :  { %1265 = vadd.xlane.f32.xlu0 %v1264_v11 }
 0x7c0   :  { %1377 = vrot.lane.b32.xlu1 %v16460_v54, %s16025_s9 }
 0x7c7   :  { %1380 = vrot.lane.b32.xlu0 %v16462_v58, %s16025_s9 }
 0x83c   :  { %v1269_v12 = vpop.xlane.xlu1 %1268 }
 0x83d   :  { %15508 = vrcp.f32 %v1269_v12 }
 0x83e   :  { %v1266_v13 = vpop.xlane.xlu0 %1265 }
 0x83f   :  { %15510 = vrcp.f32 %v1266_v13 }
 0x840   :  { %v1378_v31 = vpop.permute.xlu1 %1377 }
 0x842   :  { %v1381_v19 = vpop.permute.xlu0 %1380 }
 0x843   :  { %v1386_v21 = vsel %vm308_vm0, %v1381_v19, 0 }
 0x847   :  { %v15509_v14 = vpop.eup %15508 }
 0x848   :  { %v1281_v16 = vmul.f32 %v15509_v14, %v15505_v5 }
 0x849   :  { %v15511_v15 = vpop.eup %15510 }
 0x84a   :  { %v1280_v18 = vmul.f32 %v15511_v15, %v15507_v7 }
 0x84c   :  { %v1284_v20 = vpack.c.bf16 %v1281_v16, %v1280_v18 }
 0x84e   :  { %14101 = vmatmul.mubr.msk.bf16.vlgmr.msra.gmra.mrb[28].mxu0 %vm446_vm2, %v1284_v20  ;;  %v16526_v22 = vpop.f32.mrb[16].mxu1 }
 0x84f   :  { %14111 = vmatpush3.bf16.xpose.msra.mxu0 %v1386_v21  ;;  %v14108_v23 = vpop.f32.mrb[17].mxu1  ;;  %14112 = vmatprep.mubr.msk.bf16.mxu0 %vm16022_vm1, %v16021_v27 }
 0x850   :  { %v16530_v24 = vpop.f32.mrb[18].mxu1  ;;  %14122 = vmatprep.subr.bf16.mxu0 %v16021_v27 }
 0x851   :  { %v1375_v25 = vpack.c.bf16 %v16530_v24, %v16526_v22  ;;  %v14109_v29 = vpop.f32.mrb[19].mxu1 }
 0x856   :  { %14113 = vmatmul.mubr.msk.bf16.vlgmr.msra.gmra.mrb[32].mxu0 %vm308_vm0, %v1378_v31  ;;  %v1475_v32 = vpop.f32.mrb[20].mxu1 }
 0x857   :  { %v1484_v26 = vmul.f32 0.17677669, %v1475_v32  ;;  %v14120_v33 = vpop.f32.mrb[21].mxu1  ;;  %14124 = vmatprep.mubr.msk.bf16.mxu0 %vm16022_vm1, %v16021_v27 }
 0x858   :  { %v1478_v35 = vpop.f32.mrb[22].mxu1 }
 0x859   :  { %v1485_v36 = vmul.f32 0.17677669, %v1478_v35  ;;  %v14121_v34 = vpop.f32.mrb[23].mxu1  ;;  %v1488_v37 = vadd.f32 %v16491_v17, %v1484_v26 }
 0x85b   :  { %v1496_v40 = vsel %vm446_vm2, %v1488_v37, -inf  ;;  %v1489_v41 = vadd.f32 %v16491_v17, %v1485_v36 }
 0x85c   :  { %1497 = vmax.xlane.f32.xlu1 %v1496_v40 }
 0x85d   :  { %v1499_v42 = vsel %vm446_vm2, %v1489_v41, -inf }
 0x85e   :  { %1500 = vmax.xlane.f32.xlu0 %v1499_v42 }
 0x86d   :  { %1770 = vrot.lane.b32.xlu1 %v16462_v58, %s16026_s17 }
 0x8e9   :  { %v1498_v43 = vpop.xlane.xlu1 %1497 }
 0x8ea   :  { %v1504_v45 = vsub.f32 %v1488_v37, %v1498_v43 }
 0x8eb   :  { %v1501_v46 = vpop.xlane.xlu0 %1500 }
 0x8ec   :  { %v1510_v47 = vmul.f32 1.442695, %v1504_v45  ;;  %v1505_v48 = vsub.f32 %v1489_v41, %v1501_v46 }
 0x8ed   :  { %v1771_v12 = vpop.permute.xlu1 %1770 }
 0x8ee   :  { %15512 = vpow2.f32 %v1510_v47  ;;  %v1512_v49 = vmul.f32 1.442695, %v1505_v48  ;;  %v1776_v29 = vsel %vm308_vm0, %v1771_v12, 0 }
 0x8f0   :  { %15514 = vpow2.f32 %v1512_v49 }
 0x8f8   :  { %v15513_v28 = vpop.eup %15512 }
 0x8f9   :  { %v1520_v50 = vsel %vm446_vm2, %v15513_v28, 0.0 }
 0x8fa   :  { %v15515_v51 = vpop.eup %15514  ;;  %1521 = vadd.xlane.f32.xlu0 %v1520_v50 }
 0x8fb   :  { %v1523_v52 = vsel %vm446_vm2, %v15515_v51, 0.0 }
 0x8fc   :  { %1524 = vadd.xlane.f32.xlu1 %v1523_v52 }
 0x90d   :  { %1768 = vrot.lane.b32.xlu1 %v16460_v54, %s16026_s17 }
 0x910   :  { %1585 = vrot.lane.b32.xlu0 %v16464_v61, %s16025_s9 }
 0x911   :  { %1821 = vrot.lane.b32.xlu1 %v16473_v9, %s16026_s17 }
 0x914   :  { %1819 = vrot.lane.b32.xlu0 %v16471_v8, %s16026_s17 }
 0x921   :  { %v16554_v53 = vpop.f32.mrb[28].mxu0 }
 0x922   :  { %v14102_v55 = vpop.f32.mrb[29].mxu0 }
 0x923   :  { %v16556_v56 = vpop.f32.mrb[30].mxu0 }
 0x924   :  { %v1374_v57 = vpack.c.bf16 %v16556_v56, %v16554_v53  ;;  %v14103_v59 = vpop.f32.mrb[31].mxu0 }
 0x929   :  { %v1422_v63 = vpop.f32.mrb[32].mxu0 }
 0x92a   :  { %v14114_v0 = vpop.f32.mrb[33].mxu0  ;;  %v1482_v2 = vmul.f32 0.17677669, %v1422_v63 }
 0x92b   :  { %v1425_v1 = vpop.f32.mrb[34].mxu0 }
 0x92c   :  { %v1483_v3 = vmul.f32 0.17677669, %v1425_v1  ;;  %v14115_v4 = vpop.f32.mrb[35].mxu0  ;;  %v1486_v6 = vadd.f32 %v16504_v44, %v1482_v2 }
 0x92e   :  { %v1487_v5 = vadd.f32 %v16504_v44, %v1483_v3  ;;  %v1490_v11 = vsel %vm446_vm2, %v1486_v6, -inf }
 0x930   :  { %v1493_v7 = vsel %vm446_vm2, %v1487_v5, -inf }
 0x933   :  { %1494 = vmax.xlane.f32.xlu0 %v1493_v7 }
 0x935   :  { %1491 = vmax.xlane.f32.xlu1 %v1490_v11 }
 0x946   :  { %1537 = vrot.lane.b32.xlu1 %v16466_v62, %s16025_s9 }
 0x987   :  { %v1522_v13 = vpop.xlane.xlu0 %1521 }
 0x988   :  { %15516 = vrcp.f32 %v1522_v13 }
 0x989   :  { %v1525_v14 = vpop.xlane.xlu1 %1524 }
 0x98a   :  { %15518 = vrcp.f32 %v1525_v14 }
 0x98b   :  { %v1586_v15 = vpop.permute.xlu0 %1585 }
 0x98c   :  { %14129 = vmatpush3.bf16.msra.mxu1 %v1586_v15 }
 0x98d   :  { %14150 = vmatprep.subr.bf16.mxu1 %v16021_v27  ;;  %v1769_v23 = vpop.permute.xlu1 %1768 }
 0x98f   :  { %v1820_v26 = vpop.permute.xlu0 %1819 }
 0x991   :  { %v1822_v31 = vpop.permute.xlu1 %1821 }
 0x992   :  { %v15517_v16 = vpop.eup %15516  ;;  %v1827_v32 = vsel %vm308_vm0, %v1822_v31, 0 }
 0x993   :  { %v1532_v19 = vmul.f32 %v15517_v16, %v15513_v28 }
 0x994   :  { %v15519_v18 = vpop.eup %15518 }
 0x995   :  { %v1533_v20 = vmul.f32 %v15519_v18, %v15515_v51 }
 0x997   :  { %v1535_v21 = vpack.c.bf16 %v1533_v20, %v1532_v19 }
 0x999   :  { %14131 = vmatmul.mubr.msk.bf16.vlgmr.msra.gmra.mrb[24].mxu1 %vm446_vm2, %v1535_v21 }
 0x99a   :  { %14151 = vmatpush3.bf16.xpose.msra.mxu1 %v1776_v29  ;;  %14152 = vmatprep.mubr.msk.bf16.mxu1 %vm16022_vm1, %v16021_v27 }
 0x99b   :  { %14156 = vmatprep.subr.bf16.mxu1 %v16021_v27 }
 0x9a1   :  { %14153 = vmatmul.mubr.msk.bf16.vlgmr.msra.gmra.mrb[28].mxu1 %vm308_vm0, %v1769_v23 }
 0x9a2   :  { %14157 = vmatpush3.bf16.xpose.msra.mxu1 %v1827_v32  ;;  %14158 = vmatprep.mubr.msk.bf16.mxu1 %vm16022_vm1, %v16021_v27 }
 0x9a3   :  { %14168 = vmatprep.subr.bf16.mxu1 %v16021_v27 }
 0x9a9   :  { %14159 = vmatmul.mubr.msk.bf16.vlgmr.msra.gmra.mrb[32].mxu1 %vm308_vm0, %v1820_v26  ;;  %v14985_v26 = vld [vmem:[%s18729_s21 + $0x10] sm:$0xff]  }
 0x9aa   :  { %14170 = vmatprep.mubr.msk.bf16.mxu1 %vm16022_vm1, %v16021_v27 }
 0x9c0   :  { %v1495_v33 = vpop.xlane.xlu0 %1494 }
 0x9c1   :  { %v1503_v35 = vsub.f32 %v1487_v5, %v1495_v33  ;;  %v14986_v33 = vld [vmem:[%s18729_s21 + $0x18] sm:$0xff]  }
 0x9c2   :  { %v1492_v36 = vpop.xlane.xlu1 %1491 }
 0x9c3   :  { %v1502_v34 = vsub.f32 %v1486_v6, %v1492_v36  ;;  %v1508_v37 = vmul.f32 1.442695, %v1503_v35  ;;  %v14987_v35 = vld [vmem:[%s18729_s21] sm:$0xff]  }
 0x9c5   :  { %v1506_v40 = vmul.f32 1.442695, %v1502_v34 }
 0x9c6   :  { %v1538_v41 = vpop.permute.xlu1 %1537 }
 0x9c7   :  { %15520 = vpow2.f32 %v1506_v40  ;;  %14123 = vmatpush3.bf16.msra.mxu0 %v1538_v41 }
 0x9c8   :  { %15522 = vpow2.f32 %v1508_v37  ;;  %14134 = vmatprep.subr.bf16.mxu0 %v14985_v26 }
 0x9d1   :  { %v15521_v42 = vpop.eup %15520 }
 0x9d2   :  { %v1514_v43 = vsel %vm446_vm2, %v15521_v42, 0.0  ;;  %v15523_v45 = vpop.eup %15522 }
 0x9d3   :  { %1515 = vadd.xlane.f32.xlu0 %v1514_v43  ;;  %v1517_v46 = vsel %vm446_vm2, %v15523_v45, 0.0 }
 0x9d7   :  { %1518 = vadd.xlane.f32.xlu0 %v1517_v46 }
 0xa60   :  { %v1516_v47 = vpop.xlane.xlu0 %1515 }
 0xa61   :  { %15524 = vrcp.f32 %v1516_v47 }
 0xa64   :  { %v1519_v48 = vpop.xlane.xlu0 %1518 }
 0xa65   :  { %15526 = vrcp.f32 %v1519_v48 }
 0xa6b   :  { %v15525_v28 = vpop.eup %15524 }
 0xa6c   :  { %v16582_v49 = vpop.f32.mrb[24].mxu1  ;;  %v1530_v63 = vmul.f32 %v15525_v28, %v15521_v42 }
 0xa6d   :  { %v14132_v50 = vpop.f32.mrb[25].mxu1 }
 0xa6e   :  { %v16584_v51 = vpop.f32.mrb[26].mxu1 }
 0xa6f   :  { %v15527_v52 = vpop.eup %15526  ;;  %v1633_v55 = vpack.c.bf16 %v16584_v51, %v16582_v49  ;;  %v14133_v59 = vpop.f32.mrb[27].mxu1 }
 0xa70   :  { %v1531_v0 = vmul.f32 %v15527_v52, %v15523_v45 }
 0xa72   :  { %v1534_v1 = vpack.c.bf16 %v1531_v0, %v1530_v63 }
 0xa74   :  { %14125 = vmatmul.mubr.msk.bf16.vlgmr.msra.gmra.mrb[36].mxu0 %vm446_vm2, %v1534_v1  ;;  %v1812_v2 = vpop.f32.mrb[28].mxu1 }
 0xa75   :  { %v1870_v3 = vmul.f32 0.17677669, %v1812_v2  ;;  %v14154_v4 = vpop.f32.mrb[29].mxu1  ;;  %14135 = vmatpush3.bf16.msra.mxu0 %v14985_v26 }
 0xa76   :  { %v1815_v5 = vpop.f32.mrb[30].mxu1  ;;  %14136 = vmatprep.subr.bf16.mxu0 %v14986_v33 }
 0xa77   :  { %v1871_v6 = vmul.f32 0.17677669, %v1815_v5  ;;  %v14155_v7 = vpop.f32.mrb[31].mxu1  ;;  %v1874_v11 = vadd.f32 %v16504_v44, %v1870_v3 }
 0xa79   :  { %v1878_v12 = vsel %vm446_vm2, %v1874_v11, -inf  ;;  %v1875_v13 = vadd.f32 %v16504_v44, %v1871_v6  ;;  %14137 = vmatpush3.bf16.msra.mxu0 %v14986_v33 }
 0xa7a   :  { %1879 = vmax.xlane.f32.xlu0 %v1878_v12  ;;  %14142 = vmatprep.subr.bf16.mxu0 %v14987_v35  ;;  %v14988_v12 = vld [vmem:[%s18729_s21 + $0x8] sm:$0xff]  }
 0xa7b   :  { %v1881_v18 = vsel %vm446_vm2, %v1875_v13, -inf }
 0xa7c   :  { %v1863_v14 = vpop.f32.mrb[32].mxu1 }
 0xa7d   :  { %v1872_v15 = vmul.f32 0.17677669, %v1863_v14  ;;  %v14160_v16 = vpop.f32.mrb[33].mxu1 }
 0xa7e   :  { %v1866_v19 = vpop.f32.mrb[34].mxu1  ;;  %1882 = vmax.xlane.f32.xlu0 %v1881_v18 }
 0xa7f   :  { %v1873_v20 = vmul.f32 0.17677669, %v1866_v19  ;;  %v14161_v21 = vpop.f32.mrb[35].mxu1  ;;  %v1876_v23 = vadd.f32 %v16491_v17, %v1872_v15 }
 0xa81   :  { %v1884_v29 = vsel %vm446_vm2, %v1876_v23, -inf  ;;  %v1877_v31 = vadd.f32 %v16491_v17, %v1873_v20 }
 0xa82   :  { %1885 = vmax.xlane.f32.xlu0 %v1884_v29 }
 0xa83   :  { %v1887_v32 = vsel %vm446_vm2, %v1877_v31, -inf }
 0xa86   :  { %1888 = vmax.xlane.f32.xlu0 %v1887_v32 }
 0xb07   :  { %v1880_v36 = vpop.xlane.xlu0 %1879 }
 0xb08   :  { %v1890_v34 = vsub.f32 %v1874_v11, %v1880_v36 }
 0xb0a   :  { %v1894_v37 = vmul.f32 1.442695, %v1890_v34 }
 0xb0b   :  { %v1883_v40 = vpop.xlane.xlu0 %1882 }
 0xb0c   :  { %15528 = vpow2.f32 %v1894_v37  ;;  %v1891_v41 = vsub.f32 %v1875_v13, %v1883_v40 }
 0xb0e   :  { %v1896_v42 = vmul.f32 1.442695, %v1891_v41 }
 0xb0f   :  { %v1886_v43 = vpop.xlane.xlu0 %1885 }
 0xb10   :  { %15530 = vpow2.f32 %v1896_v42  ;;  %v1892_v45 = vsub.f32 %v1876_v23, %v1886_v43  ;;  %v14990_v23 = vld [vmem:[%s18729_s21 + $0x28] sm:$0xff]  }
 0xb12   :  { %v1898_v46 = vmul.f32 1.442695, %v1892_v45 }
 0xb13   :  { %v1889_v47 = vpop.xlane.xlu0 %1888 }
 0xb14   :  { %15532 = vpow2.f32 %v1898_v46  ;;  %v1893_v48 = vsub.f32 %v1877_v31, %v1889_v47 }
 0xb16   :  { %v15529_v28 = vpop.eup %15528  ;;  %v1900_v50 = vmul.f32 1.442695, %v1893_v48 }
 0xb17   :  { %v1902_v52 = vsel %vm446_vm2, %v15529_v28, 0.0 }
 0xb18   :  { %15534 = vpow2.f32 %v1900_v50  ;;  %1903 = vadd.xlane.f32.xlu1 %v1902_v52 }
 0xb1a   :  { %v15531_v59 = vpop.eup %15530 }
 0xb1b   :  { %v1905_v63 = vsel %vm446_vm2, %v15531_v59, 0.0 }
 0xb1c   :  { %1906 = vadd.xlane.f32.xlu0 %v1905_v63 }
 0xb1e   :  { %v15533_v0 = vpop.eup %15532 }
 0xb1f   :  { %v1908_v1 = vsel %vm446_vm2, %v15533_v0, 0.0 }
 0xb20   :  { %1909 = vadd.xlane.f32.xlu0 %v1908_v1 }
 0xb22   :  { %v15535_v2 = vpop.eup %15534 }
 0xb23   :  { %v1911_v3 = vsel %vm446_vm2, %v15535_v2, 0.0 }
 0xb24   :  { %1912 = vadd.xlane.f32.xlu0 %v1911_v3 }
 0xb29   :  { %1971 = vrot.lane.b32.xlu1 %v16464_v61, %s16026_s17 }
 0xb3a   :  { %1924 = vrot.lane.b32.xlu0 %v16466_v62, %s16026_s17 }
 0xb3e   :  { %2093 = vrot.lane.b32.xlu0 %v16462_v58, %s16027_s25 }
 0xb42   :  { %2144 = vrot.lane.b32.xlu0 %v16473_v9, %s16027_s25 }
 0xb46   :  { %2091 = vrot.lane.b32.xlu0 %v16460_v54, %s16027_s25 }
 0xb47   :  { %v1577_v4 = vpop.f32.mrb[36].mxu0 }
 0xb48   :  { %v14126_v5 = vpop.f32.mrb[37].mxu0 }
 0xb49   :  { %v1580_v6 = vpop.f32.mrb[38].mxu0 }
 0xb4a   :  { %v1632_v7 = vpack.c.bf16 %v1580_v6, %v1577_v4  ;;  %2142 = vrot.lane.b32.xlu0 %v16471_v8, %s16027_s25  ;;  %v14127_v11 = vpop.f32.mrb[39].mxu0 }
 0xb4c   :  { %14138 = vmatprep.mubr.msk.bf16.mxu0 %vm308_vm0, %v1632_v7 }
 0xb4d   :  { %14139 = vmatmul.mubr.msk.bf16.vlgmr.msra.gmra.mrb[40].mxu0 %vm308_vm0, %v1633_v55 }
 0xb4e   :  { %14146 = vmatprep.mubr.msk.bf16.mxu0 %vm308_vm0, %v1374_v57  ;;  %14143 = vmatpush3.bf16.msra.mxu0 %v14987_v35  ;;  %v14989_v57 = vld [vmem:[%s18729_s21 + $0x20] sm:$0xff]  }
 0xb4f   :  { %14144 = vmatprep.subr.bf16.mxu0 %v14988_v12 }
 0xb52   :  { %14145 = vmatpush3.bf16.msra.mxu0 %v14988_v12 }
 0xb53   :  { %14162 = vmatprep.subr.bf16.mxu0 %v16021_v27 }
 0xb59   :  { %14147 = vmatmul.mubr.msk.bf16.vlgmr.msra.gmra.mrb[40].mxu0 %vm308_vm0, %v1375_v25 }
 0xb5a   :  { %14164 = vmatprep.mubr.msk.bf16.mxu0 %vm16022_vm1, %v16021_v27 }
 0xba5   :  { %v1904_v54 = vpop.xlane.xlu1 %1903 }
 0xba6   :  { %15536 = vrcp.f32 %v1904_v54 }
 0xba9   :  { %v1972_v58 = vpop.permute.xlu1 %1971  ;;  %v1907_v8 = vpop.xlane.xlu0 %1906 }
 0xbaa   :  { %15538 = vrcp.f32 %v1907_v8  ;;  %14169 = vmatpush3.bf16.msra.mxu1 %v1972_v58 }
 0xbab   :  { %14182 = vmatprep.subr.bf16.mxu1 %v16021_v27 }
 0xbad   :  { %v1910_v9 = vpop.xlane.xlu0 %1909 }
 0xbae   :  { %15540 = vrcp.f32 %v1910_v9 }
 0xbb0   :  { %v15537_v56 = vpop.eup %15536 }
 0xbb1   :  { %v1913_v53 = vpop.xlane.xlu0 %1912  ;;  %v1918_v24 = vmul.f32 %v15537_v56, %v15529_v28 }
 0xbb2   :  { %15542 = vrcp.f32 %v1913_v53 }
 0xbb4   :  { %v15539_v22 = vpop.eup %15538 }
 0xbb5   :  { %v1919_v25 = vmul.f32 %v15539_v22, %v15531_v59  ;;  %v1925_v49 = vpop.permute.xlu0 %1924 }
 0xbb6   :  { %14163 = vmatpush3.bf16.msra.mxu0 %v1925_v49 }
 0xbb7   :  { %v1922_v51 = vpack.c.bf16 %v1919_v25, %v1918_v24  ;;  %14174 = vmatprep.subr.bf16.mxu0 %v14989_v57 }
 0xbb8   :  { %v15541_v55 = vpop.eup %15540 }
 0xbb9   :  { %14165 = vmatmul.mubr.msk.bf16.vlgmr.msra.gmra.mrb[44].mxu0 %vm446_vm2, %v1922_v51  ;;  %v2094_v14 = vpop.permute.xlu0 %2093  ;;  %v1920_v15 = vmul.f32 %v15541_v55, %v15533_v0 }
 0xbba   :  { %14175 = vmatpush3.bf16.msra.mxu0 %v14989_v57  ;;  %v2099_v19 = vsel %vm308_vm0, %v2094_v14, 0 }
 0xbbb   :  { %14176 = vmatprep.subr.bf16.mxu0 %v14990_v23 }
 0xbbc   :  { %v15543_v13 = vpop.eup %15542 }
 0xbbd   :  { %v1921_v16 = vmul.f32 %v15543_v13, %v15535_v2  ;;  %v2145_v20 = vpop.permute.xlu0 %2144 }
 0xbbe   :  { %14177 = vmatpush3.bf16.msra.mxu0 %v14990_v23  ;;  %v2150_v41 = vsel %vm308_vm0, %v2145_v20, 0 }
 0xbbf   :  { %v1923_v18 = vpack.c.bf16 %v1921_v16, %v1920_v15  ;;  %14188 = vmatprep.subr.bf16.mxu0 %v16021_v27 }
 0xbc1   :  { %14171 = vmatmul.mubr.msk.bf16.vlgmr.msra.gmra.mrb[36].mxu1 %vm446_vm2, %v1923_v18  ;;  %v2092_v21 = vpop.permute.xlu0 %2091 }
 0xbc2   :  { %14183 = vmatpush3.bf16.xpose.msra.mxu1 %v2099_v19  ;;  %14184 = vmatprep.mubr.msk.bf16.mxu1 %vm16022_vm1, %v16021_v27 }
 0xbc3   :  { %14194 = vmatprep.subr.bf16.mxu1 %v16021_v27 }
 0xbc5   :  { %v2143_v50 = vpop.permute.xlu0 %2142 }
 0xbc9   :  { %14185 = vmatmul.mubr.msk.bf16.vlgmr.msra.gmra.mrb[40].mxu1 %vm308_vm0, %v2092_v21 }
 0xbca   :  { %14196 = vmatprep.mubr.msk.bf16.mxu1 %vm16022_vm1, %v16021_v27 }
 0xc8c   :  { %v1964_v29 = vpop.f32.mrb[44].mxu0 }
 0xc8d   :  { %v14166_v31 = vpop.f32.mrb[45].mxu0 }
 0xc8e   :  { %v1967_v32 = vpop.f32.mrb[46].mxu0 }
 0xc8f   :  { %v2018_v26 = vpack.c.bf16 %v1967_v32, %v1964_v29  ;;  %v14167_v33 = vpop.f32.mrb[47].mxu0 }
 0xc91   :  { %14178 = vmatprep.mubr.msk.bf16.mxu0 %vm308_vm0, %v2018_v26 }
 0xc94   :  { %v2011_v35 = vpop.f32.mrb[36].mxu1 }
 0xc95   :  { %v14172_v36 = vpop.f32.mrb[37].mxu1 }
 0xc96   :  { %v2014_v34 = vpop.f32.mrb[38].mxu1 }
 0xc97   :  { %v2019_v37 = vpack.c.bf16 %v2014_v34, %v2011_v35  ;;  %v14173_v40 = vpop.f32.mrb[39].mxu1 }
 0xc99   :  { %14179 = vmatmul.mubr.msk.bf16.vlgmr.msra.gmra.mrb[40].mxu0 %vm308_vm0, %v2019_v37 }
 0xc9a   :  { %14189 = vmatpush3.bf16.xpose.msra.mxu0 %v2150_v41  ;;  %14190 = vmatprep.mubr.msk.bf16.mxu0 %vm16022_vm1, %v16021_v27  ;;  %v14991_v41 = vld [vmem:[%s18729_s21 + $0x30] sm:$0xff]  }
 0xc9b   :  { %14200 = vmatprep.subr.bf16.mxu0 %v16021_v27 }
 0xc9c   :  { %v2135_v42 = vpop.f32.mrb[40].mxu1 }
 0xc9d   :  { %v2193_v43 = vmul.f32 0.17677669, %v2135_v42  ;;  %v14186_v45 = vpop.f32.mrb[41].mxu1  ;;  %v14992_v42 = vld [vmem:[%s18729_s21 + $0x38] sm:$0xff]  }
 0xc9e   :  { %v2138_v46 = vpop.f32.mrb[42].mxu1 }
 0xc9f   :  { %v2194_v47 = vmul.f32 0.17677669, %v2138_v46  ;;  %v14187_v48 = vpop.f32.mrb[43].mxu1  ;;  %v2197_v28 = vadd.f32 %v16504_v44, %v2193_v43 }
 0xca1   :  { %14191 = vmatmul.mubr.msk.bf16.vlgmr.msra.gmra.mrb[48].mxu0 %vm308_vm0, %v2143_v50  ;;  %v2201_v52 = vsel %vm446_vm2, %v2197_v28, -inf  ;;  %v2198_v59 = vadd.f32 %v16504_v44, %v2194_v47 }
 0xca2   :  { %2202 = vmax.xlane.f32.xlu0 %v2201_v52  ;;  %14202 = vmatprep.mubr.msk.bf16.mxu0 %vm16022_vm1, %v16021_v27 }
 0xca3   :  { %v2204_v63 = vsel %vm446_vm2, %v2198_v59, -inf }
 0xca4   :  { %2205 = vmax.xlane.f32.xlu1 %v2204_v63 }
 0xd2f   :  { %v2203_v0 = vpop.xlane.xlu0 %2202 }
 0xd30   :  { %v2213_v1 = vsub.f32 %v2197_v28, %v2203_v0  ;;  %v12677_v0 = vld [vmem:[%s18730_s29] ss:$0 sm:$0xff] }
 0xd31   :  { %v2206_v5 = vpop.xlane.xlu1 %2205 }
 0xd32   :  { %v2217_v2 = vmul.f32 1.442695, %v2213_v1  ;;  %v2214_v6 = vsub.f32 %v2198_v59, %v2206_v5 }
 0xd34   :  { %15544 = vpow2.f32 %v2217_v2  ;;  %v2219_v7 = vmul.f32 1.442695, %v2214_v6 }
 0xd36   :  { %15546 = vpow2.f32 %v2219_v7 }
 0xd3e   :  { %v15545_v3 = vpop.eup %15544 }
 0xd3f   :  { %v2225_v4 = vsel %vm446_vm2, %v15545_v3, 0.0 }
 0xd40   :  { %2226 = vadd.xlane.f32.xlu1 %v2225_v4  ;;  %v15547_v22 = vpop.eup %15546 }
 0xd41   :  { %v2228_v24 = vsel %vm446_vm2, %v15547_v22, 0.0 }
 0xd74   :  { %v2186_v44 = vpop.f32.mrb[48].mxu0 }
 0xd75   :  { %v2195_v11 = vmul.f32 0.17677669, %v2186_v44  ;;  %v14192_v12 = vpop.f32.mrb[49].mxu0  ;;  %v15910_v44 = vld [vmem:[#allocation2] sm:$0xff] }
 0xd76   :  { %v2189_v54 = vpop.f32.mrb[50].mxu0 }
 0xd77   :  { %v2196_v58 = vmul.f32 0.17677669, %v2189_v54  ;;  %v14193_v8 = vpop.f32.mrb[51].mxu0  ;;  %v2199_v9 = vadd.f32 %v16491_v17, %v2195_v11  ;;  %v15911_v54 = vld [vmem:[#allocation2 + $0x8] sm:$0xff] }
 0xd78   :  { %v15912_v8 = vld [vmem:[#allocation2 + $0x10] sm:$0xff] }
 0xd79   :  { %v2207_v53 = vsel %vm446_vm2, %v2199_v9, -inf  ;;  %v2200_v56 = vadd.f32 %v16491_v17, %v2196_v58 }
 0xd7a   :  { %2208 = vmax.xlane.f32.xlu0 %v2207_v53  ;;  %v15913_v53 = vld [vmem:[#allocation2 + $0x18] sm:$0xff] }
 0xd7b   :  { %v2210_v57 = vsel %vm446_vm2, %v2200_v56, -inf }
 0xd7e   :  { %2211 = vmax.xlane.f32.xlu0 %v2210_v57  ;;  %v14993_v57 = vld [vmem:[%s18731_s3] ss:$16 sps:$4 sm:$0xff]  }
 0xd82   :  { %2229 = vadd.xlane.f32.xlu0 %v2228_v24  ;;  %v14996_v24 = vld [vmem:[%s18731_s3 + $0x8] ss:$16 sps:$4 sm:$0xff]  }
 0xdcd   :  { %v2227_v20 = vpop.xlane.xlu1 %2226 }
 0xe07   :  { %v2209_v25 = vpop.xlane.xlu0 %2208 }
 0xe08   :  { %v2215_v49 = vsub.f32 %v2199_v9, %v2209_v25  ;;  %v14998_v25 = vld [vmem:[%s18731_s3 + $0xc] ss:$16 sps:$4 sm:$0xff]  }
 0xe0a   :  { %v2221_v51 = vmul.f32 1.442695, %v2215_v49  ;;  %v15001_v49 = vld [vmem:[%s18731_s3 + $0x24] ss:$16 sps:$4 sm:$0xff]  }
 0xe0b   :  { %v2212_v55 = vpop.xlane.xlu0 %2211 }
 0xe0c   :  { %15548 = vpow2.f32 %v2221_v51  ;;  %v2216_v13 = vsub.f32 %v2200_v56, %v2212_v55  ;;  %v15004_v51 = vld [vmem:[%s18731_s3 + $0x2c] ss:$16 sps:$4 sm:$0xff]   ;;  %v14999_v55 = vld [vmem:[%s18731_s3 + $0x20] ss:$16 sps:$4 sm:$0xff]  }
 0xe0e   :  { %v2223_v14 = vmul.f32 1.442695, %v2216_v13  ;;  %v15002_v13 = vld [vmem:[%s18731_s3 + $0x28] ss:$16 sps:$4 sm:$0xff]  }
 0xe0f   :  { %v2230_v19 = vpop.xlane.xlu0 %2229 }
 0xe10   :  { %15550 = vpow2.f32 %v2223_v14 }
 0xe11   :  { %15552 = vrcp.f32 %v2230_v19 }
 0xe12   :  { %15554 = vrcp.f32 %v2227_v20 }
 0xe16   :  { %v15549_v15 = vpop.eup %15548 }
 0xe17   :  { %v2231_v16 = vsel %vm446_vm2, %v15549_v15, 0.0 }
 0xe18   :  { %2232 = vadd.xlane.f32.xlu1 %v2231_v16 }
 0xe1a   :  { %v15551_v17 = vpop.eup %15550 }
 0xe1b   :  { %v2234_v18 = vsel %vm446_vm2, %v15551_v17, 0.0  ;;  %v15553_v21 = vpop.eup %15552 }
 0xe1c   :  { %2235 = vadd.xlane.f32.xlu0 %v2234_v18  ;;  %v15555_v29 = vpop.eup %15554  ;;  %v2242_v31 = vmul.f32 %v15553_v21, %v15547_v22  ;;  %v14995_v22 = vld [vmem:[%s18731_s3 + $0x4] ss:$16 sps:$4 sm:$0xff]  }
 0xe1d   :  { %v2241_v32 = vmul.f32 %v15555_v29, %v15545_v3 }
 0xe29   :  { %2247 = vrot.lane.b32.xlu1 %v16466_v62, %s16027_s25  ;;  %v2245_v62 = vpack.c.bf16 %v2242_v31, %v2241_v32 }
 0xe32   :  { %2294 = vrot.lane.b32.xlu0 %v16464_v61, %s16027_s25 }
 0xea5   :  { %v2233_v23 = vpop.xlane.xlu1 %2232 }
 0xea6   :  { %15556 = vrcp.f32 %v2233_v23 }
 0xea9   :  { %v2248_v26 = vpop.permute.xlu1 %2247  ;;  %v2236_v33 = vpop.xlane.xlu0 %2235 }
 0xeaa   :  { %15558 = vrcp.f32 %v2236_v33  ;;  %14195 = vmatpush3.bf16.msra.mxu1 %v2248_v26 }
 0xeab   :  { %2675 = vmatprep.subr.bf16.mxu1 %v14995_v22 }
 0xead   :  { %14197 = vmatmul.mubr.msk.bf16.vlgmr.msra.gmra.mrb[44].mxu1 %vm446_vm2, %v2245_v62  ;;  %v2295_v61 = vpop.permute.xlu0 %2294 }
 0xeae   :  { %14201 = vmatpush3.bf16.msra.mxu0 %v2295_v61  ;;  %2707 = vmatprep.mubr.bf16.mxu1 %v16023_v60 }
 0xeaf   :  { %14206 = vmatprep.subr.bf16.mxu0 %v14991_v41  ;;  %2676 = vmatpush1.bf16.msra.mxu1 %v14993_v57 }
 0xeb0   :  { %v15557_v35 = vpop.eup %15556  ;;  %2677 = vmatprep.subr.bf16.mxu1 %v15001_v49 }
 0xeb1   :  { %v2243_v34 = vmul.f32 %v15557_v35, %v15549_v15  ;;  %v15007_v35 = vld [vmem:[%s18731_s3 + $0x44] ss:$16 sps:$4 sm:$0xff]  }
 0xeb3   :  { %2678 = vmatpush1.bf16.msra.mxu1 %v14999_v55 }
 0xeb4   :  { %v15559_v36 = vpop.eup %15558  ;;  %2679 = vmatprep.subr.bf16.mxu1 %v15007_v35  ;;  %v15043_v35 = vld [vmem:[%s18734_s19] sm:$0xff]  }
 0xeb5   :  { %v2244_v37 = vmul.f32 %v15559_v36, %v15551_v17  ;;  %v15010_v36 = vld [vmem:[%s18731_s3 + $0x4c] ss:$16 sps:$4 sm:$0xff]  }
 0xeb7   :  { %v2246_v40 = vpack.c.bf16 %v2244_v37, %v2243_v34  ;;  %v15005_v34 = vld [vmem:[%s18731_s3 + $0x40] ss:$16 sps:$4 sm:$0xff]   ;;  %v15008_v37 = vld [vmem:[%s18731_s3 + $0x48] ss:$16 sps:$4 sm:$0xff]  }
 0xeb8   :  { %2680 = vmatpush1.bf16.msra.mxu1 %v15005_v34  ;;  %v15045_v34 = vld [vmem:[%s18734_s19 + $0x48] sm:$0xff]  }
 0xeb9   :  { %14203 = vmatmul.mubr.msk.bf16.vlgmr.msra.gmra.mrb[52].mxu0 %vm446_vm2, %v2246_v40  ;;  %v15013_v40 = vld [vmem:[%s18731_s3 + $0x64] ss:$16 sps:$4 sm:$0xff]  }
 0xeba   :  { %14207 = vmatpush3.bf16.msra.mxu0 %v14991_v41  ;;  %v15016_v41 = vld [vmem:[%s18731_s3 + $0x6c] ss:$16 sps:$4 sm:$0xff]   ;;  %2681 = vmatprep.subr.bf16.mxu1 %v15013_v40 }
 0xebb   :  { %14208 = vmatprep.subr.bf16.mxu0 %v14992_v42  ;;  %v15047_v40 = vld [vmem:[%s18734_s19 + $0x8] sm:$0xff]  }
 0xebe   :  { %14209 = vmatpush3.bf16.msra.mxu0 %v14992_v42  ;;  %v15011_v42 = vld [vmem:[%s18731_s3 + $0x60] ss:$16 sps:$4 sm:$0xff]  }
 0xebf   :  { %2728 = vmatprep.subr.bf16.mxu0 %v14998_v25  ;;  %2682 = vmatpush1.bf16.msra.mxu1 %v15011_v42  ;;  %v12678_v25 = vld [vmem:[%s18732_s8] ss:$0 sm:$0xff]  ;;  %v15049_v42 = vld [vmem:[%s18734_s19 + $0x50] sm:$0xff]  }
 0xf80   :  { %v2287_v43 = vpop.f32.mrb[44].mxu1 }
 0xf81   :  { %v14198_v45 = vpop.f32.mrb[45].mxu1 }
 0xf82   :  { %v2290_v46 = vpop.f32.mrb[46].mxu1  ;;  %v15019_v45 = vld [vmem:[%s18731_s3 + $0x84] ss:$16 sps:$4 sm:$0xff]  }
 0xf83   :  { %v2341_v47 = vpack.c.bf16 %v2290_v46, %v2287_v43  ;;  %v14199_v48 = vpop.f32.mrb[47].mxu1  ;;  %v15014_v43 = vld [vmem:[%s18731_s3 + $0x68] ss:$16 sps:$4 sm:$0xff]   ;;  %v15022_v46 = vld [vmem:[%s18731_s3 + $0x8c] ss:$16 sps:$4 sm:$0xff]   ;;  %2683 = vmatprep.subr.bf16.mxu1 %v15019_v45  ;;  %v15051_v45 = vld [vmem:[%s18734_s19 + $0x10] sm:$0xff]  }
 0xf84   :  { %v15020_v48 = vld [vmem:[%s18731_s3 + $0x88] ss:$16 sps:$4 sm:$0xff]  }
 0xf85   :  { %14210 = vmatprep.mubr.msk.bf16.mxu0 %vm308_vm0, %v2341_v47  ;;  %v15017_v47 = vld [vmem:[%s18731_s3 + $0x80] ss:$16 sps:$4 sm:$0xff]  }
 0xf86   :  { %2684 = vmatpush1.bf16.msra.mxu1 %v15017_v47  ;;  %v15053_v47 = vld [vmem:[%s18734_s19 + $0x58] sm:$0xff]  }
 0xf8c   :  { %v2334_v28 = vpop.f32.mrb[52].mxu0 }
 0xf8d   :  { %v14204_v50 = vpop.f32.mrb[53].mxu0 }
 0xf8e   :  { %v2337_v52 = vpop.f32.mrb[54].mxu0  ;;  %v15023_v50 = vld [vmem:[%s18731_s3 + $0xa0] ss:$16 sps:$4 sm:$0xff]  }
 0xf8f   :  { %v2342_v59 = vpack.c.bf16 %v2337_v52, %v2334_v28  ;;  %v14205_v63 = vpop.f32.mrb[55].mxu0  ;;  %v15025_v28 = vld [vmem:[%s18731_s3 + $0xa4] ss:$16 sps:$4 sm:$0xff]   ;;  %v15026_v52 = vld [vmem:[%s18731_s3 + $0xa8] ss:$16 sps:$4 sm:$0xff]  }
 0xf90   :  { %2685 = vmatprep.subr.bf16.mxu1 %v15025_v28  ;;  %v15031_v63 = vld [vmem:[%s18731_s3 + $0xc4] ss:$16 sps:$4 sm:$0xff]   ;;  %v15055_v28 = vld [vmem:[%s18734_s19 + $0x18] sm:$0xff]  }
 0xf91   :  { %14211 = vmatmul.mubr.msk.bf16.vlgmr.msra.gmra.mrb[40].mxu0 %vm308_vm0, %v2342_v59  ;;  %v15028_v59 = vld [vmem:[%s18731_s3 + $0xac] ss:$16 sps:$4 sm:$0xff]   ;;  %2686 = vmatpush1.bf16.msra.mxu1 %v15023_v50 }
 0xf92   :  { %2760 = vmatprep.mubr.bf16.mxu0 %v16023_v60  ;;  %2729 = vmatpush1.bf16.msra.mxu0 %v14996_v24  ;;  %v15056_v50 = vld [vmem:[%s18734_s19 + $0x98] sm:$0xff]  }
 0xf93   :  { %2730 = vmatprep.subr.bf16.mxu0 %v15004_v51  ;;  %2687 = vmatprep.subr.bf16.mxu1 %v15031_v63  ;;  %v15059_v63 = vld [vmem:[%s18734_s19 + $0x20] sm:$0xff]  }
 0xf96   :  { %2731 = vmatpush1.bf16.msra.mxu0 %v15002_v13 }
 0xf97   :  { %2732 = vmatprep.subr.bf16.mxu0 %v15010_v36  ;;  %v15044_v36 = vld [vmem:[%s18734_s19 + $0x80] sm:$0xff]  }
 0xf9a   :  { %2733 = vmatpush1.bf16.msra.mxu0 %v15008_v37  ;;  %v15046_v37 = vld [vmem:[%s18734_s19 + $0xc8] sm:$0xff]  }
 0xf9b   :  { %2734 = vmatprep.subr.bf16.mxu0 %v15016_v41  ;;  %v15048_v41 = vld [vmem:[%s18734_s19 + $0x88] sm:$0xff]  }
 0xf9e   :  { %2735 = vmatpush1.bf16.msra.mxu0 %v15014_v43  ;;  %v15050_v43 = vld [vmem:[%s18734_s19 + $0xd0] sm:$0xff]  }
 0xf9f   :  { %2736 = vmatprep.subr.bf16.mxu0 %v15022_v46  ;;  %v15052_v46 = vld [vmem:[%s18734_s19 + $0x90] sm:$0xff]  }
 0xfa2   :  { %2737 = vmatpush1.bf16.msra.mxu0 %v15020_v48  ;;  %v15054_v48 = vld [vmem:[%s18734_s19 + $0xd8] sm:$0xff]  }
 0xfa3   :  { %2738 = vmatprep.subr.bf16.mxu0 %v15028_v59  ;;  %v15058_v59 = vld [vmem:[%s18734_s19 + $0xe0] sm:$0xff]  }
 0xfa6   :  { %2739 = vmatpush1.bf16.msra.mxu0 %v15026_v52  ;;  %v15057_v52 = vld [vmem:[%s18734_s19 + $0x60] sm:$0xff]  }
0x1064   :  { %v14212_v1 = vpop.f32.mrb[40].mxu0 }
0x1065   :  { %v2395_v2 = vpop.f32.mrb[41].mxu0  ;;  %v2422_v6 = vadd.f32 %v14212_v1, %v12677_v0  ;;  %v15029_v1 = vld [vmem:[%s18731_s3 + $0xc0] ss:$16 sps:$4 sm:$0xff]  }
0x1066   :  { %v2420_v3 = vadd.f32 %v12677_v0, %v2395_v2  ;;  %v14213_v4 = vpop.f32.mrb[42].mxu0  ;;  %v15032_v2 = vld [vmem:[%s18731_s3 + $0xc8] ss:$16 sps:$4 sm:$0xff]   ;;  %2688 = vmatpush1.bf16.msra.mxu1 %v15029_v1 }
0x1067   :  { %v2398_v5 = vpop.f32.mrb[43].mxu0  ;;  %v2423_v12 = vadd.f32 %v14213_v4, %v12677_v0  ;;  %v2426_v9 = vadd.f32 %v15912_v8, %v2422_v6  ;;  %v15040_v4 = vld [vmem:[%s18731_s3 + $0xec] ss:$16 sps:$4 sm:$0xff]   ;;  %v15038_v6 = vld [vmem:[%s18731_s3 + $0xe8] ss:$16 sps:$4 sm:$0xff]  }
0x1068   :  { %v2421_v7 = vadd.f32 %v12677_v0, %v2398_v5  ;;  %v2424_v11 = vadd.f32 %v15910_v44, %v2420_v3  ;;  %v15034_v0 = vld [vmem:[%s18731_s3 + $0xcc] ss:$16 sps:$4 sm:$0xff]   ;;  %v15037_v3 = vld [vmem:[%s18731_s3 + $0xe4] ss:$16 sps:$4 sm:$0xff]   ;;  %v15035_v5 = vld [vmem:[%s18731_s3 + $0xe0] ss:$16 sps:$4 sm:$0xff]  }
0x1069   :  { %v2427_v56 = vadd.f32 %v15913_v53, %v2423_v12  ;;  %2740 = vmatprep.subr.bf16.mxu0 %v15034_v0  ;;  %2689 = vmatprep.subr.bf16.mxu1 %v15037_v3  ;;  %v15060_v0 = vld [vmem:[%s18734_s19 + $0xa0] sm:$0xff]   ;;  %v15061_v1 = vld [vmem:[%s18734_s19 + $0x68] sm:$0xff]  }
0x106a   :  { %2428 = vadd.xlane.f32.xlu1 %v2424_v11  ;;  %v2425_v58 = vadd.f32 %v15911_v54, %v2421_v7  ;;  %2741 = vmatpush1.bf16.msra.mxu0 %v15032_v2  ;;  %v15062_v2 = vld [vmem:[%s18734_s19 + $0xe8] sm:$0xff]  }
0x106b   :  { %2742 = vmatprep.subr.bf16.mxu0 %v15040_v4  ;;  %2690 = vmatpush1.bf16.msra.mxu1 %v15035_v5  ;;  %v15063_v3 = vld [vmem:[%s18734_s19 + $0x28] sm:$0xff]   ;;  %v15065_v5 = vld [vmem:[%s18734_s19 + $0x70] sm:$0xff]  }
0x106c   :  { %2430 = vadd.xlane.f32.xlu0 %v2425_v58  ;;  %v15064_v4 = vld [vmem:[%s18734_s19 + $0xa8] sm:$0xff]  }
0x106e   :  { %2432 = vadd.xlane.f32.xlu1 %v2426_v9  ;;  %2743 = vmatpush1.bf16.msra.mxu0 %v15038_v6  ;;  %v15066_v6 = vld [vmem:[%s18734_s19 + $0xf0] sm:$0xff]  }
0x1070   :  { %2434 = vadd.xlane.f32.xlu0 %v2427_v56 }
0x10f7   :  { %v2429_v14 = vpop.xlane.xlu1 %2428 }
0x10f8   :  { %v2436_v15 = vmul.f32 0.0078125, %v2429_v14 }
0x10f9   :  { %v2431_v16 = vpop.xlane.xlu0 %2430 }
0x10fa   :  { %v2437_v17 = vmul.f32 0.0078125, %v2431_v16  ;;  %v16688_v18 = vsub.f32 %v2424_v11, %v2436_v15  ;;  %v12679_v15 = vld [vmem:[%s18733_s14] ss:$0 sm:$0xff] }
0x10fb   :  { %v2433_v19 = vpop.xlane.xlu1 %2432 }
0x10fc   :  { %v2438_v20 = vmul.f32 0.0078125, %v2433_v19  ;;  %v2444_v21 = vmul.f32 %v16688_v18, %v16688_v18  ;;  %v16692_v23 = vsub.f32 %v2425_v58, %v2437_v17 }
0x10fd   :  { %v2435_v29 = vpop.xlane.xlu0 %2434 }
0x10fe   :  { %v2439_v31 = vmul.f32 0.0078125, %v2435_v29  ;;  %2448 = vadd.xlane.f32.xlu1 %v2444_v21  ;;  %v2445_v32 = vmul.f32 %v16692_v23, %v16692_v23  ;;  %v16696_v26 = vsub.f32 %v2426_v9, %v2438_v20 }
0x1100   :  { %2450 = vadd.xlane.f32.xlu0 %v2445_v32  ;;  %v2446_v33 = vmul.f32 %v16696_v26, %v16696_v26  ;;  %v16700_v62 = vsub.f32 %v2427_v56, %v2439_v31 }
0x1102   :  { %2452 = vadd.xlane.f32.xlu1 %v2446_v33  ;;  %v2447_v61 = vmul.f32 %v16700_v62, %v16700_v62 }
0x1104   :  { %2454 = vadd.xlane.f32.xlu0 %v2447_v61  ;;  %v15042_v61 = vld [vmem:[%s18734_s19 + $0xc0] sm:$0xff]  }
0x1105   :  { %13604 = vmatprep.subr.bf16.mxu0 %v15042_v61 }
0x118b   :  { %v2449_v7 = vpop.xlane.xlu1 %2448 }
0x118c   :  { %v2456_v44 = vmul.f32 0.0078125, %v2449_v7  ;;  %v15067_v7 = vld [vmem:[%s18734_s19 + $0x30] sm:$0xff]  }
0x118d   :  { %v2451_v11 = vpop.xlane.xlu0 %2450 }
0x118e   :  { %v2460_v12 = vadd.f32 1e-12, %v2456_v44  ;;  %v2457_v54 = vmul.f32 0.0078125, %v2451_v11  ;;  %v15068_v44 = vld [vmem:[%s18734_s19 + $0xb0] sm:$0xff]   ;;  %v15069_v11 = vld [vmem:[%s18734_s19 + $0x78] sm:$0xff]  }
0x118f   :  { %v2453_v58 = vpop.xlane.xlu1 %2452 }
0x1190   :  { %15560 = vrsqrt.f32 %v2460_v12  ;;  %v2461_v8 = vadd.f32 1e-12, %v2457_v54  ;;  %v2458_v9 = vmul.f32 0.0078125, %v2453_v58  ;;  %v15070_v12 = vld [vmem:[%s18734_s19 + $0xf8] sm:$0xff]  }
0x1191   :  { %v2455_v53 = vpop.xlane.xlu0 %2454  ;;  %v15071_v54 = vld [vmem:[%s18734_s19 + $0x38] sm:$0xff]  }
0x1192   :  { %15562 = vrsqrt.f32 %v2461_v8  ;;  %v2462_v56 = vadd.f32 1e-12, %v2458_v9  ;;  %v2459_v57 = vmul.f32 0.0078125, %v2455_v53  ;;  %v15072_v58 = vld [vmem:[%s18734_s19 + $0xb8] sm:$0xff]   ;;  %v804_v8 = vld [vmem:[%s18735_s24] sm:$0xf] }
0x1193   :  { %v16782_v9 = vrot.slane %v804_v8, %v16448_v30  ;;  %v16785_v53 = vrot.slane %v804_v8, %v16455_v39 }
0x1194   :  { %15564 = vrsqrt.f32 %v2462_v56  ;;  %v2463_v22 = vadd.f32 1e-12, %v2459_v57  ;;  %v16788_v56 = vsub.s32 3, %v16432_v10 }
0x1196   :  { %15566 = vrsqrt.f32 %v2463_v22 }
0x119a   :  { %v15561_v24 = vpop.eup %15560 }
0x119b   :  { %v2468_v49 = vmul.f32 %v15561_v24, %v16688_v18  ;;  %v16791_v24 = vrot.slane %v804_v8, %v16452_v38 }
0x119c   :  { %v15563_v51 = vpop.eup %15562 }
0x119d   :  { %v2469_v55 = vmul.f32 %v15563_v51, %v16692_v23  ;;  %v2478_v13 = vmul.f32 %v12678_v25, %v2468_v49 }
0x119e   :  { %v15565_v14 = vpop.eup %15564 }
0x119f   :  { %v2479_v16 = vmul.f32 %v12678_v25, %v2469_v55  ;;  %v16732_v19 = vadd.f32 %v12679_v15, %v2478_v13  ;;  %v2470_v21 = vmul.f32 %v15565_v14, %v16696_v26  ;;  %v16796_v13 = vrot.slane %v804_v8, %v16788_v56 }
0x11a0   :  { %v15567_v17 = vpop.eup %15566 }
0x11a1   :  { %v16734_v20 = vadd.f32 %v12679_v15, %v2479_v16  ;;  %v2471_v29 = vmul.f32 %v15567_v17, %v16700_v62  ;;  %v2480_v31 = vmul.f32 %v12678_v25, %v2470_v21  ;;  %v15041_v62 = vld [vmem:[%s18734_s19 + $0x40] sm:$0xff]  }
0x11a2   :  { %13576 = vmatprep.subr.bf16.mxu1 %v15041_v62 }
0x11a3   :  { %v2492_v18 = vpack.c.bf16 %v16734_v20, %v16732_v19  ;;  %v2481_v23 = vmul.f32 %v12678_v25, %v2471_v29  ;;  %v16744_v26 = vadd.f32 %v12679_v15, %v2480_v31 }
0x11a5   :  { %2708 = vmatmul.mubr.bf16.vlgmr.msra.gmra.mrb[48].mxu1 %v2492_v18  ;;  %2761 = vmatmul.mubr.bf16.vlgmr.msra.gmra.mrb[56].mxu0 %v2492_v18  ;;  %v16742_v32 = vadd.f32 %v12679_v15, %v2481_v23 }
0x11a6   :  { %2717 = vmatprep.mubr.bf16.mxu1 %v16023_v60  ;;  %2770 = vmatprep.mubr.bf16.mxu0 %v16023_v60 }
0x11a7   :  { %v2493_v33 = vpack.c.bf16 %v16742_v32, %v16744_v26  ;;  %13577 = vmatpush3.bf16.msra.mxu1 %v15043_v35  ;;  %13605 = vmatpush3.bf16.msra.mxu0 %v15044_v36 }
0x11a8   :  { %13578 = vmatprep.subr.bf16.mxu1 %v15045_v34  ;;  %13606 = vmatprep.subr.bf16.mxu0 %v15046_v37 }
0x11ab   :  { %13579 = vmatpush3.bf16.msra.mxu1 %v15047_v40  ;;  %13607 = vmatpush3.bf16.msra.mxu0 %v15048_v41 }
0x11ac   :  { %13580 = vmatprep.subr.bf16.mxu1 %v15049_v42  ;;  %13608 = vmatprep.subr.bf16.mxu0 %v15050_v43 }
0x11ad   :  { %2718 = vmatmul.mubr.bf16.gmra.mrb[52].mxu1 %v2493_v33  ;;  %2771 = vmatmul.mubr.bf16.gmra.mrb[60].mxu0 %v2493_v33 }
0x11af   :  { %13581 = vmatpush3.bf16.msra.mxu1 %v15051_v45  ;;  %13609 = vmatpush3.bf16.msra.mxu0 %v15052_v46 }
0x11b0   :  { %13582 = vmatprep.subr.bf16.mxu1 %v15053_v47  ;;  %13610 = vmatprep.subr.bf16.mxu0 %v15054_v48 }
0x11b3   :  { %13583 = vmatpush3.bf16.msra.mxu1 %v15055_v28  ;;  %13611 = vmatpush3.bf16.msra.mxu0 %v15056_v50 }
0x11b4   :  { %13584 = vmatprep.subr.bf16.mxu1 %v15057_v52  ;;  %13612 = vmatprep.subr.bf16.mxu0 %v15058_v59 }
0x11b7   :  { %13585 = vmatpush3.bf16.msra.mxu1 %v15059_v63  ;;  %13613 = vmatpush3.bf16.msra.mxu0 %v15060_v0 }
0x11b8   :  { %13586 = vmatprep.subr.bf16.mxu1 %v15061_v1  ;;  %13614 = vmatprep.subr.bf16.mxu0 %v15062_v2 }
0x11bb   :  { %13587 = vmatpush3.bf16.msra.mxu1 %v15063_v3  ;;  %13615 = vmatpush3.bf16.msra.mxu0 %v15064_v4 }
0x11bc   :  { %13588 = vmatprep.subr.bf16.mxu1 %v15065_v5  ;;  %13616 = vmatprep.subr.bf16.mxu0 %v15066_v6 }
0x11bf   :  { %13589 = vmatpush3.bf16.msra.mxu1 %v15067_v7  ;;  %13617 = vmatpush3.bf16.msra.mxu0 %v15068_v44 }
0x11c0   :  { %13590 = vmatprep.subr.bf16.mxu1 %v15069_v11  ;;  %13618 = vmatprep.subr.bf16.mxu0 %v15070_v12 }
0x11c3   :  { %13591 = vmatpush3.bf16.msra.mxu1 %v15071_v54  ;;  %13619 = vmatpush3.bf16.msra.mxu0 %v15072_v58 }
0x1278   :  { %v2709_v57 = vpop.f32.mrb[48].mxu1  ;;  %v2762_v22 = vpop.f32.mrb[56].mxu0 }
0x1279   :  { %v2710_v25 = vadd.f32 %v2709_v57, %v16782_v9  ;;  %v2763_v49 = vadd.f32 %v2762_v22, %v16785_v53  ;;  %v2711_v51 = vpop.f32.mrb[49].mxu1  ;;  %v2764_v55 = vpop.f32.mrb[57].mxu0 }
0x127a   :  { %v2713_v14 = vpop.f32.mrb[50].mxu1  ;;  %v2766_v15 = vpop.f32.mrb[58].mxu0  ;;  %v16799_v21 = vadd.f32 %v2711_v51, %v16791_v24  ;;  %v16809_v35 = vadd.f32 %v2764_v55, %v16796_v13 }
0x127b   :  { %v2797_v16 = vmul.f32 0.044715, %v2710_v25  ;;  %v2799_v17 = vmul.f32 0.044715, %v2763_v49  ;;  %v2714_v29 = vadd.f32 %v2713_v14, %v16782_v9  ;;  %v16803_v18 = vadd.f32 %v2766_v15, %v16785_v53  ;;  %v2715_v23 = vpop.f32.mrb[51].mxu1  ;;  %v2768_v31 = vpop.f32.mrb[59].mxu0 }
0x127c   :  { %v16806_v61 = vadd.f32 %v2715_v23, %v16791_v24  ;;  %v16812_v34 = vadd.f32 %v2768_v31, %v16796_v13  ;;  %v16814_v37 = vmul.f32 0.5, %v2710_v25  ;;  %v2798_v43 = vmul.f32 0.044715, %v16799_v21 }
0x127d   :  { %v2813_v33 = vmul.f32 %v2797_v16, %v2710_v25  ;;  %v2815_v62 = vmul.f32 %v2799_v17, %v2763_v49  ;;  %v2801_v36 = vmul.f32 0.044715, %v2714_v29  ;;  %v2803_v42 = vmul.f32 0.044715, %v16803_v18 }
0x127e   :  { %v2802_v46 = vmul.f32 0.044715, %v16806_v61  ;;  %v16819_v50 = vmul.f32 0.5, %v2763_v49  ;;  %v2800_v1 = vmul.f32 0.044715, %v16809_v35  ;;  %v2814_v58 = vmul.f32 %v2798_v43, %v16799_v21 }
0x127f   :  { %v2829_v40 = vmul.f32 %v2813_v33, %v2710_v25  ;;  %v2831_v41 = vmul.f32 %v2815_v62, %v2763_v49  ;;  %v2817_v45 = vmul.f32 %v2801_v36, %v2714_v29  ;;  %v2819_v59 = vmul.f32 %v2803_v42, %v16803_v18 }
0x1280   :  { %v2719_v47 = vpop.f32.mrb[52].mxu1  ;;  %v2772_v48 = vpop.f32.mrb[60].mxu0  ;;  %v2804_v3 = vmul.f32 0.044715, %v16812_v34  ;;  %v2818_v57 = vmul.f32 %v2802_v46, %v16806_v61  ;;  %v2816_v55 = vmul.f32 %v2800_v1, %v16809_v35  ;;  %v2830_v33 = vmul.f32 %v2814_v58, %v16799_v21 }
0x1281   :  { %v2845_v28 = vadd.f32 %v2829_v40, %v2710_v25  ;;  %v2847_v52 = vadd.f32 %v2831_v41, %v2763_v49  ;;  %v2721_v63 = vpop.f32.mrb[53].mxu1  ;;  %v2774_v0 = vpop.f32.mrb[61].mxu0  ;;  %v2833_v2 = vmul.f32 %v2817_v45, %v2714_v29  ;;  %v16825_v4 = vadd.f32 %v2719_v47, %v16782_v9 }
0x1282   :  { %v2723_v5 = vpop.f32.mrb[54].mxu1  ;;  %v2776_v6 = vpop.f32.mrb[62].mxu0  ;;  %v2835_v11 = vmul.f32 %v2819_v59, %v16803_v18  ;;  %v16831_v22 = vadd.f32 %v2772_v48, %v16785_v53  ;;  %v16836_v51 = vadd.f32 %v2721_v63, %v16791_v24  ;;  %v2820_v15 = vmul.f32 %v2804_v3, %v16812_v34 }
0x1283   :  { %v2861_v7 = vmul.f32 0.7978846, %v2845_v28  ;;  %v2863_v44 = vmul.f32 0.7978846, %v2847_v52  ;;  %v2725_v12 = vpop.f32.mrb[55].mxu1  ;;  %v2778_v54 = vpop.f32.mrb[63].mxu0  ;;  %v2849_v8 = vadd.f32 %v2833_v2, %v2714_v29  ;;  %v16842_v23 = vadd.f32 %v2774_v0, %v16796_v13 }
0x1284   :  { %v2851_v25 = vadd.f32 %v2835_v11, %v16803_v18  ;;  %v2805_v49 = vmul.f32 0.044715, %v16825_v4  ;;  %v2806_v17 = vmul.f32 0.044715, %v16836_v51  ;;  %v16845_v31 = vadd.f32 %v2723_v5, %v16782_v9 }
0x1285   :  { %15568 = vtanh.f32 %v2861_v7  ;;  %v2865_v14 = vmul.f32 0.7978846, %v2849_v8  ;;  %v2834_v62 = vmul.f32 %v2818_v57, %v16806_v61  ;;  %v16850_v36 = vadd.f32 %v2776_v6, %v16785_v53 }
0x1286   :  { %15570 = vtanh.f32 %v2863_v44  ;;  %v2867_v16 = vmul.f32 0.7978846, %v2851_v25  ;;  %v2821_v40 = vmul.f32 %v2805_v49, %v16825_v4  ;;  %v2807_v41 = vmul.f32 0.044715, %v16831_v22 }
0x1287   :  { %15572 = vtanh.f32 %v2865_v14  ;;  %v2808_v42 = vmul.f32 0.044715, %v16842_v23  ;;  %v2785_v43 = vmul.f32 0.5, %v2714_v29  ;;  %v2822_v45 = vmul.f32 %v2806_v17, %v16836_v51 }
0x1288   :  { %15574 = vtanh.f32 %v2867_v16  ;;  %v16857_v9 = vadd.f32 %v2725_v12, %v16791_v24  ;;  %v16860_v46 = vadd.f32 %v2778_v54, %v16796_v13  ;;  %v2832_v47 = vmul.f32 %v2816_v55, %v16809_v35 }
0x1289   :  { %v2836_v53 = vmul.f32 %v2820_v15, %v16812_v34  ;;  %v2809_v48 = vmul.f32 0.044715, %v16845_v31  ;;  %v2811_v28 = vmul.f32 0.044715, %v16850_v36  ;;  %v2824_v52 = vmul.f32 %v2808_v42, %v16842_v23 }
0x128a   :  { %v2810_v29 = vmul.f32 0.044715, %v16857_v9  ;;  %v2812_v59 = vmul.f32 0.044715, %v16860_v46  ;;  %v2846_v24 = vadd.f32 %v2830_v33, %v16799_v21  ;;  %v2787_v63 = vmul.f32 0.5, %v16803_v18 }
0x128b   :  { %v2837_v13 = vmul.f32 %v2821_v40, %v16825_v4  ;;  %v2823_v0 = vmul.f32 %v2807_v41, %v16831_v22  ;;  %v2850_v1 = vadd.f32 %v2834_v62, %v16806_v61  ;;  %v2838_v2 = vmul.f32 %v2822_v45, %v16836_v51 }
0x128c   :  { %v2826_v3 = vmul.f32 %v2810_v29, %v16857_v9  ;;  %v2828_v5 = vmul.f32 %v2812_v59, %v16860_v46  ;;  %v2862_v6 = vmul.f32 0.7978846, %v2846_v24  ;;  %v2825_v44 = vmul.f32 %v2809_v48, %v16845_v31 }
0x128d   :  { %v2866_v11 = vmul.f32 0.7978846, %v2850_v1  ;;  %v2848_v12 = vadd.f32 %v2832_v47, %v16809_v35  ;;  %v2852_v18 = vadd.f32 %v2836_v53, %v16812_v34  ;;  %v2840_v58 = vmul.f32 %v2824_v52, %v16842_v23 }
0x128e   :  { %v2827_v8 = vmul.f32 %v2811_v28, %v16850_v36  ;;  %v2842_v57 = vmul.f32 %v2826_v3, %v16857_v9  ;;  %15576 = vtanh.f32 %v2862_v6  ;;  %v2839_v15 = vmul.f32 %v2823_v0, %v16831_v22 }
0x128f   :  { %v15569_v7 = vpop.eup %15568  ;;  %15578 = vtanh.f32 %v2866_v11  ;;  %v2864_v25 = vmul.f32 0.7978846, %v2848_v12  ;;  %v2868_v49 = vmul.f32 0.7978846, %v2852_v18  ;;  %v2844_v16 = vmul.f32 %v2828_v5, %v16860_v46 }
0x1290   :  { %v15571_v54 = vpop.eup %15570  ;;  %v2893_v55 = vadd.f32 1.0, %v15569_v7  ;;  %v2854_v33 = vadd.f32 %v2838_v2, %v16836_v51  ;;  %v2841_v40 = vmul.f32 %v2825_v44, %v16845_v31  ;;  %v2858_v42 = vadd.f32 %v2842_v57, %v16857_v9 }
0x1291   :  { %v15573_v14 = vpop.eup %15572  ;;  %v2895_v17 = vadd.f32 1.0, %v15571_v54  ;;  %15580 = vtanh.f32 %v2864_v25  ;;  %v2843_v45 = vmul.f32 %v2827_v8, %v16850_v36  ;;  %v2856_v29 = vadd.f32 %v2840_v58, %v16842_v23 }
0x1292   :  { %v15575_v62 = vpop.eup %15574  ;;  %v2897_v41 = vadd.f32 1.0, %v15573_v14  ;;  %15582 = vtanh.f32 %v2868_v49  ;;  %v2870_v53 = vmul.f32 0.7978846, %v2854_v33  ;;  %v2909_v48 = vmul.f32 %v2893_v55, %v16814_v37 }
0x1293   :  { %v2899_v47 = vadd.f32 1.0, %v15575_v62  ;;  %v2874_v52 = vmul.f32 0.7978846, %v2858_v42  ;;  %v2911_v59 = vmul.f32 %v2895_v17, %v16819_v50  ;;  %v2860_v0 = vadd.f32 %v2844_v16, %v16860_v46 }
0x1294   :  { %v2913_v28 = vmul.f32 %v2897_v41, %v2785_v43  ;;  %15584 = vtanh.f32 %v2870_v53  ;;  %v2872_v2 = vmul.f32 0.7978846, %v2856_v29  ;;  %v2853_v6 = vadd.f32 %v2837_v13, %v16825_v4 }
0x1295   :  { %v2915_v24 = vmul.f32 %v2899_v47, %v2787_v63  ;;  %15586 = vtanh.f32 %v2874_v52  ;;  %v2876_v5 = vmul.f32 0.7978846, %v2860_v0  ;;  %v2857_v7 = vadd.f32 %v2841_v40, %v16845_v31 }
0x1296   :  { %v2925_v1 = vpack.c.bf16 %v2913_v28, %v2909_v48  ;;  %15588 = vtanh.f32 %v2872_v2  ;;  %v2855_v37 = vadd.f32 %v2839_v15, %v16831_v22  ;;  %v2869_v44 = vmul.f32 0.7978846, %v2853_v6 }
0x1297   :  { %v2927_v3 = vpack.c.bf16 %v2915_v24, %v2911_v59  ;;  %15590 = vtanh.f32 %v2876_v5  ;;  %v2873_v50 = vmul.f32 0.7978846, %v2857_v7  ;;  %v2859_v63 = vadd.f32 %v2843_v45, %v16850_v36 }
0x1298   :  { %v15577_v43 = vpop.eup %15576  ;;  %v2782_v12 = vmul.f32 0.5, %v16799_v21  ;;  %v2871_v54 = vmul.f32 0.7978846, %v2855_v37  ;;  %v2786_v58 = vmul.f32 0.5, %v16806_v61  ;;  %15592 = vtanh.f32 %v2869_v44 }
0x1299   :  { %v15579_v11 = vpop.eup %15578  ;;  %v2894_v18 = vadd.f32 1.0, %v15577_v43  ;;  %v2875_v13 = vmul.f32 0.7978846, %v2859_v63  ;;  %15594 = vtanh.f32 %v2873_v50  ;;  %v2784_v15 = vmul.f32 0.5, %v16809_v35 }
0x129a   :  { %v2898_v8 = vadd.f32 1.0, %v15579_v11  ;;  %15596 = vtanh.f32 %v2871_v54  ;;  %v2788_v16 = vmul.f32 0.5, %v16812_v34  ;;  %v2790_v42 = vmul.f32 0.5, %v16836_v51 }
0x129b   :  { %v15581_v57 = vpop.eup %15580  ;;  %v2910_v49 = vmul.f32 %v2894_v18, %v2782_v12  ;;  %15598 = vtanh.f32 %v2875_v13  ;;  %v2794_v45 = vmul.f32 0.5, %v16857_v9  ;;  %v2792_v29 = vmul.f32 0.5, %v16842_v23 }
0x129c   :  { %v15583_v25 = vpop.eup %15582  ;;  %v2914_v55 = vmul.f32 %v2898_v8, %v2786_v58  ;;  %v2896_v14 = vadd.f32 1.0, %v15581_v57  ;;  %v2796_v59 = vmul.f32 0.5, %v16860_v46  ;;  %v2793_v37 = vmul.f32 0.5, %v16845_v31  ;;  %v12712_v8 = vld [vmem:[%s18736_s30] ss:$0 sm:$0xff] }
0x129d   :  { %v2900_v17 = vadd.f32 1.0, %v15583_v25  ;;  %v2791_v23 = vmul.f32 0.5, %v16831_v22  ;;  %v2795_v11 = vmul.f32 0.5, %v16850_v36 }
0x129e   :  { %v15585_v21 = vpop.eup %15584  ;;  %v2926_v33 = vpack.c.bf16 %v2914_v55, %v2910_v49  ;;  %v2912_v61 = vmul.f32 %v2896_v14, %v2784_v15 }
0x129f   :  { %v15587_v62 = vpop.eup %15586  ;;  %v2916_v40 = vmul.f32 %v2900_v17, %v2788_v16  ;;  %v2902_v41 = vadd.f32 1.0, %v15585_v21 }
0x12a0   :  { %3163 = vmatprep.mubr.bf16.mxu1 %v2926_v33  ;;  %v2906_v47 = vadd.f32 1.0, %v15587_v62  ;;  %v15589_v53 = vpop.eup %15588 }
0x12a1   :  { %v2928_v48 = vpack.c.bf16 %v2916_v40, %v2912_v61  ;;  %3164 = vmatmul.mubr.bf16.vlgmr.msra.gmra.mrb[56].mxu1 %v2925_v1  ;;  %v15591_v35 = vpop.eup %15590  ;;  %v2918_v28 = vmul.f32 %v2902_v41, %v2790_v42  ;;  %v2904_v52 = vadd.f32 1.0, %v15589_v53  ;;  %v2789_v1 = vmul.f32 0.5, %v16825_v4 }
0x12a2   :  { %v2922_v34 = vmul.f32 %v2906_v47, %v2794_v45  ;;  %v2908_v24 = vadd.f32 1.0, %v15591_v35  ;;  %v15593_v0 = vpop.eup %15592 }
0x12a3   :  { %3212 = vmatprep.mubr.bf16.mxu0 %v2928_v48  ;;  %v15595_v51 = vpop.eup %15594  ;;  %v2920_v5 = vmul.f32 %v2904_v52, %v2792_v29  ;;  %v2901_v6 = vadd.f32 1.0, %v15593_v0 }
0x12a4   :  { %3213 = vmatmul.mubr.bf16.vlgmr.msra.gmra.mrb[64].mxu0 %v2927_v3  ;;  %v2930_v2 = vpack.c.bf16 %v2922_v34, %v2918_v28  ;;  %v2924_v9 = vmul.f32 %v2908_v24, %v2796_v59  ;;  %v15597_v7 = vpop.eup %15596  ;;  %v2905_v43 = vadd.f32 1.0, %v15595_v51 }
0x12a5   :  { %v15599_v44 = vpop.eup %15598  ;;  %v2903_v46 = vadd.f32 1.0, %v15597_v7  ;;  %v2917_v63 = vmul.f32 %v2901_v6, %v2789_v1  ;;  %v15075_v6 = vld [vmem:[%s16110_s12 + $0xc4] ss:$12 sps:$4 sm:$0xff]   ;;  %v15078_v7 = vld [vmem:[%s16110_s12 + $0xdc] ss:$12 sps:$4 sm:$0xff]  }
0x12a6   :  { %3171 = vmatprep.mubr.bf16.mxu1 %v2930_v2  ;;  %v2932_v50 = vpack.c.bf16 %v2924_v9, %v2920_v5  ;;  %v2921_v3 = vmul.f32 %v2905_v43, %v2793_v37  ;;  %v2907_v12 = vadd.f32 1.0, %v15599_v44  ;;  %v15073_v9 = vld [vmem:[%s16110_s12 + $0xc0] ss:$12 sps:$4 sm:$0xff]   ;;  %3607 = vmatprep.subr.bf16.mxu1 %v15075_v6  ;;  %v15076_v1 = vld [vmem:[%s16110_s12 + $0xd8] ss:$12 sps:$4 sm:$0xff]  }
0x12a7   :  { %v2919_v54 = vmul.f32 %v2903_v46, %v2791_v23  ;;  %3608 = vmatpush1.bf16.msra.mxu1 %v15073_v9  ;;  %v12746_v6 = vld [vmem:[%s18738_s7] ss:$0 sm:$0xff] }
0x12a8   :  { %3220 = vmatprep.mubr.bf16.mxu0 %v2932_v50  ;;  %v2929_v18 = vpack.c.bf16 %v2921_v3, %v2917_v63  ;;  %v2923_v58 = vmul.f32 %v2907_v12, %v2795_v11  ;;  %3609 = vmatprep.subr.bf16.mxu1 %v15078_v7 }
0x12aa   :  { %3172 = vmatmul.mubr.bf16.gmra.mrb[60].mxu1 %v2929_v18  ;;  %v2931_v4 = vpack.c.bf16 %v2923_v58, %v2919_v54 }
0x12ab   :  { %3639 = vmatprep.mubr.bf16.mxu1 %v16023_v60  ;;  %3610 = vmatpush1.bf16.msra.mxu1 %v15076_v1 }
0x12ac   :  { %3221 = vmatmul.mubr.bf16.gmra.mrb[68].mxu0 %v2931_v4 }
0x1374   :  { %v13592_v31 = vpop.f32.mrb[56].mxu1 }
0x1375   :  { %v13593_v13 = vpop.f32.mrb[57].mxu1 }
0x1376   :  { %v13594_v57 = vadd.f32 %v13593_v13, %v13592_v31  ;;  %v13595_v22 = vpop.f32.mrb[58].mxu1  ;;  %v15081_v31 = vld [vmem:[%s16110_s12 + $0xf4] ss:$12 sps:$4 sm:$0xff]   ;;  %v15079_v13 = vld [vmem:[%s16110_s12 + $0xf0] ss:$12 sps:$4 sm:$0xff]  }
0x1377   :  { %v13620_v25 = vpop.f32.mrb[64].mxu0  ;;  %v13596_v49 = vpop.f32.mrb[59].mxu1  ;;  %3611 = vmatprep.subr.bf16.mxu1 %v15081_v31 }
0x1378   :  { %v3166_v55 = vadd.f32 %v13594_v57, %v12712_v8  ;;  %v13621_v14 = vpop.f32.mrb[65].mxu0  ;;  %v13597_v36 = vadd.f32 %v13596_v49, %v13595_v22  ;;  %3612 = vmatpush1.bf16.msra.mxu1 %v15079_v13  ;;  %v15085_v57 = vld [vmem:[%s16110_s12 + $0x10c] ss:$12 sps:$4 sm:$0xff]  }
0x1379   :  { %v13622_v15 = vadd.f32 %v13621_v14, %v13620_v25  ;;  %v13623_v16 = vpop.f32.mrb[66].mxu0  ;;  %v15086_v22 = vld [vmem:[%s16110_s12 + $0xe0] ss:$12 sps:$4 sm:$0xff]   ;;  %v15083_v25 = vld [vmem:[%s16110_s12 + $0x108] ss:$12 sps:$4 sm:$0xff]   ;;  %3613 = vmatprep.subr.bf16.mxu1 %v15085_v57 }
0x137a   :  { %v3169_v17 = vadd.f32 %v13597_v36, %v12712_v8  ;;  %v13624_v21 = vpop.f32.mrb[67].mxu0  ;;  %v15087_v49 = vld [vmem:[%s16110_s12 + $0x120] ss:$12 sps:$4 sm:$0xff]   ;;  %v15090_v14 = vld [vmem:[%s16110_s12 + $0xf8] ss:$12 sps:$4 sm:$0xff]  }
0x137b   :  { %v3215_v33 = vadd.f32 %v13622_v15, %v3166_v55  ;;  %v13625_v62 = vadd.f32 %v13624_v21, %v13623_v16  ;;  %v15089_v55 = vld [vmem:[%s16110_s12 + $0x124] ss:$12 sps:$4 sm:$0xff]   ;;  %v15093_v36 = vld [vmem:[%s16110_s12 + $0x13c] ss:$12 sps:$4 sm:$0xff]  }
0x137c   :  { %3614 = vmatpush1.bf16.msra.mxu1 %v15083_v25  ;;  %v15094_v15 = vld [vmem:[%s16110_s12 + $0x110] ss:$12 sps:$4 sm:$0xff]   ;;  %v15091_v16 = vld [vmem:[%s16110_s12 + $0x138] ss:$12 sps:$4 sm:$0xff]   ;;  %v15098_v21 = vld [vmem:[%s16110_s12 + $0x128] ss:$12 sps:$4 sm:$0xff]  }
0x137d   :  { %v3218_v61 = vadd.f32 %v13625_v62, %v3169_v17  ;;  %v3229_v40 = vadd.f32 %v3215_v33, %v16732_v19  ;;  %v13598_v41 = vpop.f32.mrb[60].mxu1  ;;  %3615 = vmatprep.subr.bf16.mxu1 %v15089_v55  ;;  %v15097_v17 = vld [vmem:[%s16110_s12 + $0x154] ss:$12 sps:$4 sm:$0xff]   ;;  %v15095_v33 = vld [vmem:[%s16110_s12 + $0x150] ss:$12 sps:$4 sm:$0xff]  }
0x137e   :  { %v13599_v45 = vpop.f32.mrb[61].mxu1  ;;  %v15101_v62 = vld [vmem:[%s16110_s12 + $0x16c] ss:$12 sps:$4 sm:$0xff]  }
0x137f   :  { %3233 = vadd.xlane.f32.xlu1 %v3229_v40  ;;  %v3230_v42 = vadd.f32 %v3218_v61, %v16734_v20  ;;  %v13626_v47 = vpop.f32.mrb[68].mxu0  ;;  %v13600_v53 = vadd.f32 %v13599_v45, %v13598_v41  ;;  %v13601_v48 = vpop.f32.mrb[62].mxu1  ;;  %v15102_v61 = vld [vmem:[%s16110_s12 + $0x140] ss:$12 sps:$4 sm:$0xff]   ;;  %v15103_v41 = vld [vmem:[%s16110_s12 + $0x158] ss:$12 sps:$4 sm:$0xff]  }
0x1380   :  { %v13627_v35 = vpop.f32.mrb[69].mxu0  ;;  %v13602_v28 = vpop.f32.mrb[63].mxu1  ;;  %3616 = vmatpush1.bf16.msra.mxu1 %v15087_v49 }
0x1381   :  { %3235 = vadd.xlane.f32.xlu0 %v3230_v42  ;;  %v3174_v34 = vadd.f32 %v13600_v53, %v12712_v8  ;;  %v13628_v52 = vadd.f32 %v13627_v35, %v13626_v47  ;;  %v13629_v29 = vpop.f32.mrb[70].mxu0  ;;  %v13603_v59 = vadd.f32 %v13602_v28, %v13601_v48  ;;  %3617 = vmatprep.subr.bf16.mxu1 %v15093_v36 }
0x1382   :  { %v13630_v19 = vpop.f32.mrb[71].mxu0 }
0x1383   :  { %v3223_v24 = vadd.f32 %v13628_v52, %v3174_v34  ;;  %v3177_v0 = vadd.f32 %v13603_v59, %v12712_v8  ;;  %v13631_v2 = vadd.f32 %v13630_v19, %v13629_v29  ;;  %v15082_v8 = vld [vmem:[%s16110_s12 + $0xc8] ss:$12 sps:$4 sm:$0xff]  }
0x1384   :  { %14214 = vmatprep.subr.bf16.mxu0 %v15082_v8  ;;  %3618 = vmatpush1.bf16.msra.mxu1 %v15091_v16 }
0x1385   :  { %v3226_v20 = vadd.f32 %v13631_v2, %v3177_v0  ;;  %v3231_v51 = vadd.f32 %v3223_v24, %v16744_v26  ;;  %14215 = vmatpush3.bf16.msra.mxu0 %v15082_v8  ;;  %3619 = vmatprep.subr.bf16.mxu1 %v15097_v17  ;;  %v12745_v0 = vld [vmem:[%s18737_s6] ss:$0 sm:$0xff] }
0x1386   :  { %14216 = vmatprep.subr.bf16.mxu0 %v15086_v22 }
0x1387   :  { %3237 = vadd.xlane.f32.xlu1 %v3231_v51  ;;  %v3232_v5 = vadd.f32 %v3226_v20, %v16742_v32 }
0x1388   :  { %3620 = vmatpush1.bf16.msra.mxu1 %v15095_v33 }
0x1389   :  { %3239 = vadd.xlane.f32.xlu0 %v3232_v5  ;;  %14217 = vmatpush3.bf16.msra.mxu0 %v15086_v22 }
0x138a   :  { %14218 = vmatprep.subr.bf16.mxu0 %v15090_v14  ;;  %3621 = vmatprep.subr.bf16.mxu1 %v15101_v62 }
0x138d   :  { %14219 = vmatpush3.bf16.msra.mxu0 %v15090_v14 }
0x138e   :  { %14220 = vmatprep.subr.bf16.mxu0 %v15094_v15 }
0x1391   :  { %14221 = vmatpush3.bf16.msra.mxu0 %v15094_v15 }
0x1392   :  { %14222 = vmatprep.subr.bf16.mxu0 %v15098_v21 }
0x1395   :  { %14223 = vmatpush3.bf16.msra.mxu0 %v15098_v21 }
0x1396   :  { %14224 = vmatprep.subr.bf16.mxu0 %v15102_v61 }
0x1399   :  { %14225 = vmatpush3.bf16.msra.mxu0 %v15102_v61 }
0x139a   :  { %14226 = vmatprep.subr.bf16.mxu0 %v15103_v41 }
0x139d   :  { %14227 = vmatpush3.bf16.msra.mxu0 %v15103_v41 }
0x140c   :  { %v3234_v37 = vpop.xlane.xlu1 %3233 }
0x140d   :  { %v3241_v43 = vmul.f32 0.0078125, %v3234_v37 }
0x140e   :  { %v3236_v44 = vpop.xlane.xlu0 %3235 }
0x140f   :  { %v3242_v50 = vmul.f32 0.0078125, %v3236_v44  ;;  %v16919_v23 = vsub.f32 %v3229_v40, %v3241_v43  ;;  %v15099_v40 = vld [vmem:[%s16110_s12 + $0x168] ss:$12 sps:$4 sm:$0xff]  }
0x1410   :  { %3622 = vmatpush1.bf16.msra.mxu1 %v15099_v40 }
0x1411   :  { %v3249_v26 = vmul.f32 %v16919_v23, %v16919_v23  ;;  %v16923_v32 = vsub.f32 %v3230_v42, %v3242_v50  ;;  %v15104_v42 = vld [vmem:[%s16110_s12 + $0x170] ss:$12 sps:$4 sm:$0xff]   ;;  %14234 = vmatprep.subr.bf16.mxu1 %v16021_v27 }
0x1412   :  { %14228 = vmatprep.subr.bf16.mxu0 %v15104_v42 }
0x1413   :  { %3253 = vadd.xlane.f32.xlu1 %v3249_v26  ;;  %v3250_v46 = vmul.f32 %v16923_v32, %v16923_v32  ;;  %14229 = vmatpush3.bf16.msra.mxu0 %v15104_v42 }
0x1414   :  { %v3238_v63 = vpop.xlane.xlu1 %3237  ;;  %14240 = vmatprep.subr.bf16.mxu0 %v16021_v27 }
0x1415   :  { %3255 = vadd.xlane.f32.xlu0 %v3250_v46  ;;  %v3243_v3 = vmul.f32 0.0078125, %v3238_v63 }
0x1416   :  { %v3240_v11 = vpop.xlane.xlu0 %3239 }
0x1417   :  { %v3244_v12 = vmul.f32 0.0078125, %v3240_v11  ;;  %v16927_v18 = vsub.f32 %v3231_v51, %v3243_v3 }
0x1419   :  { %v3251_v54 = vmul.f32 %v16927_v18, %v16927_v18  ;;  %v16931_v58 = vsub.f32 %v3232_v5, %v3244_v12  ;;  %v12779_v12 = vld [vmem:[%s18727_s0 + $0x3] sm:$0x7] }
0x141a   :  { %v3475_v36 = vrot.slane %v12779_v12, %v16455_v39 }
0x141b   :  { %3257 = vadd.xlane.f32.xlu1 %v3251_v54  ;;  %v3252_v4 = vmul.f32 %v16931_v58, %v16931_v58 }
0x141d   :  { %3259 = vadd.xlane.f32.xlu0 %v3252_v4 }
0x14a0   :  { %v3254_v45 = vpop.xlane.xlu1 %3253 }
0x14a1   :  { %v3261_v47 = vmul.f32 0.0078125, %v3254_v45 }
0x14a2   :  { %v3256_v53 = vpop.xlane.xlu0 %3255 }
0x14a3   :  { %v3265_v48 = vadd.f32 1e-12, %v3261_v47  ;;  %v3262_v35 = vmul.f32 0.0078125, %v3256_v53 }
0x14a5   :  { %15600 = vrsqrt.f32 %v3265_v48  ;;  %v3266_v28 = vadd.f32 1e-12, %v3262_v35 }
0x14a7   :  { %15602 = vrsqrt.f32 %v3266_v28 }
0x14a8   :  { %v3258_v34 = vpop.xlane.xlu1 %3257 }
0x14a9   :  { %v3263_v52 = vmul.f32 0.0078125, %v3258_v34 }
0x14aa   :  { %v3260_v29 = vpop.xlane.xlu0 %3259 }
0x14ab   :  { %v3267_v59 = vadd.f32 1e-12, %v3263_v52  ;;  %v3264_v19 = vmul.f32 0.0078125, %v3260_v29 }
0x14ad   :  { %15604 = vrsqrt.f32 %v3267_v59  ;;  %v3268_v2 = vadd.f32 1e-12, %v3264_v19 }
0x14af   :  { %v15601_v24 = vpop.eup %15600  ;;  %15606 = vrsqrt.f32 %v3268_v2 }
0x14b0   :  { %v3273_v20 = vmul.f32 %v15601_v24, %v16919_v23 }
0x14b1   :  { %v15603_v51 = vpop.eup %15602 }
0x14b2   :  { %v3283_v5 = vmul.f32 %v12745_v0, %v3273_v20  ;;  %v3274_v9 = vmul.f32 %v15603_v51, %v16923_v32 }
0x14b4   :  { %v3284_v7 = vmul.f32 %v12745_v0, %v3274_v9  ;;  %v16961_v1 = vadd.f32 %v12746_v6, %v3283_v5 }
0x14b6   :  { %v16963_v37 = vadd.f32 %v12746_v6, %v3284_v7 }
0x14b7   :  { %v15605_v44 = vpop.eup %15604 }
0x14b8   :  { %v3461_v43 = vpack.c.bf16 %v16963_v37, %v16961_v1  ;;  %v3275_v50 = vmul.f32 %v15605_v44, %v16927_v18  ;;  %v3467_v18 = vrot.slane %v12779_v12, %v16448_v30  ;;  %v17015_v44 = vld [vmem:[%s18728_s5 + $0x1] ss:$0 sm:$0xff] }
0x14b9   :  { %v15607_v23 = vpop.eup %15606 }
0x14ba   :  { %3640 = vmatmul.mubr.bf16.vlgmr.msra.gmra.mrb[64].mxu1 %v3461_v43  ;;  %14230 = vmatprep.mubr.bf16.mxu0 %v3461_v43  ;;  %v3276_v26 = vmul.f32 %v15607_v23, %v16931_v58  ;;  %v3285_v32 = vmul.f32 %v12745_v0, %v3275_v50  ;;  %v3471_v58 = vrot.slane %v12779_v12, %v16452_v38 }
0x14bb   :  { %3649 = vmatprep.mubr.bf16.mxu1 %v16023_v60 }
0x14bc   :  { %v3286_v46 = vmul.f32 %v12745_v0, %v3276_v26  ;;  %v16970_v63 = vadd.f32 %v12746_v6, %v3285_v32 }
0x14be   :  { %v16972_v3 = vadd.f32 %v12746_v6, %v3286_v46 }
0x14c0   :  { %v3462_v11 = vpack.c.bf16 %v16972_v3, %v16970_v63 }
0x14c2   :  { %3650 = vmatmul.mubr.bf16.gmra.mrb[68].mxu1 %v3462_v11  ;;  %14231 = vmatmul.mubr.bf16.vlgmr.msra.gmra.mrb[72].mxu0 %v3462_v11 }
0x14c3   :  { %14236 = vmatprep.mubr.msk.bf16.mxu1 %vm16022_vm1, %v16021_v27  ;;  %14242 = vmatprep.mubr.msk.bf16.mxu0 %vm16022_vm1, %v16021_v27 }
0x158d   :  { %v3641_v54 = vpop.f32.mrb[64].mxu1 }
0x158e   :  { %v3643_v4 = vpop.f32.mrb[65].mxu1  ;;  %v3642_v8 = vadd.f32 %v3641_v54, %v3467_v18 }
0x158f   :  { %v3645_v31 = vpop.f32.mrb[66].mxu1  ;;  %v3644_v22 = vadd.f32 %v3643_v4, %v3471_v58 }
0x1590   :  { %v3646_v13 = vadd.f32 %v3645_v31, %v3467_v18  ;;  %v3647_v57 = vpop.f32.mrb[67].mxu1 }
0x1591   :  { %v3648_v25 = vadd.f32 %v3647_v57, %v3471_v58 }
0x1592   :  { %v16983_v49 = vpack.c.bf16 %v3646_v13, %v3642_v8 }
0x1593   :  { %v16985_v55 = vpack.c.bf16 %v3648_v25, %v3644_v22  ;;  %v17028_v25 = vld [vmem:[%s18728_s5] ss:$0 sm:$0xff] }
0x1595   :  { %v3719_v14 = vsel %vm308_vm0, %v16985_v55, 0  ;;  %v3651_v15 = vpop.f32.mrb[68].mxu1  ;;  %v14232_v16 = vpop.f32.mrb[72].mxu0 }
0x1596   :  { %14235 = vmatpush3.bf16.xpose.msra.mxu1 %v3719_v14  ;;  %v3653_v17 = vpop.f32.mrb[69].mxu1  ;;  %v3694_v21 = vpop.f32.mrb[73].mxu0  ;;  %v3652_v61 = vadd.f32 %v3651_v15, %v3467_v18  ;;  %v3703_v40 = vadd.f32 %v14232_v16, %v3475_v36 }
0x1597   :  { %14246 = vmatprep.subr.bf16.mxu1 %v16021_v27  ;;  %v3655_v33 = vpop.f32.mrb[70].mxu1  ;;  %v14233_v62 = vpop.f32.mrb[74].mxu0  ;;  %v3654_v53 = vadd.f32 %v3653_v17, %v3471_v58  ;;  %v3695_v48 = vadd.f32 %v3694_v21, %v3475_v36 }
0x1598   :  { %v3656_v41 = vadd.f32 %v3655_v33, %v3467_v18  ;;  %v3706_v42 = vadd.f32 %v14233_v62, %v3475_v36  ;;  %v3657_v45 = vpop.f32.mrb[71].mxu1  ;;  %v3697_v47 = vpop.f32.mrb[75].mxu0 }
0x1599   :  { %v3658_v35 = vadd.f32 %v3657_v45, %v3471_v58  ;;  %v3698_v28 = vadd.f32 %v3697_v47, %v3475_v36 }
0x159a   :  { %v16991_v34 = vpack.c.bf16 %v3656_v41, %v3652_v61  ;;  %v16993_v52 = vpack.c.bf16 %v3706_v42, %v3703_v40 }
0x159b   :  { %v16995_v29 = vpack.c.bf16 %v3658_v35, %v3654_v53  ;;  %v16997_v59 = vpack.c.bf16 %v3698_v28, %v3695_v48 }
0x159d   :  { %14237 = vmatmul.mubr.msk.bf16.vlgmr.msra.gmra.mrb[72].mxu1 %vm308_vm0, %v16983_v49  ;;  %v3766_v19 = vsel %vm308_vm0, %v16995_v29, 0 }
0x159e   :  { %14248 = vmatprep.mubr.msk.bf16.mxu1 %vm16022_vm1, %v16021_v27  ;;  %14247 = vmatpush3.bf16.msra.mxu1 %v16997_v59 }
0x159f   :  { %14241 = vmatpush3.bf16.xpose.msra.mxu0 %v3766_v19  ;;  %14258 = vmatprep.subr.bf16.mxu1 %v16021_v27 }
0x15a0   :  { %14252 = vmatprep.subr.bf16.mxu0 %v16021_v27 }
0x15a6   :  { %14243 = vmatmul.mubr.msk.bf16.vlgmr.msra.gmra.mrb[76].mxu0 %vm308_vm0, %v16991_v34 }
0x15a7   :  { %14253 = vmatpush3.bf16.msra.mxu0 %v16993_v52  ;;  %14254 = vmatprep.mubr.msk.bf16.mxu0 %vm16022_vm1, %v16021_v27 }
0x15a8   :  { %14264 = vmatprep.subr.bf16.mxu0 %v16021_v27 }
0x1670   :  { %v3755_v24 = vpop.f32.mrb[72].mxu1 }
0x1671   :  { %v14238_v0 = vpop.f32.mrb[73].mxu1  ;;  %v3809_v57 = vmul.f32 0.17677669, %v3755_v24 }
0x1672   :  { %v3758_v2 = vpop.f32.mrb[74].mxu1 }
0x1673   :  { %v14239_v20 = vpop.f32.mrb[75].mxu1  ;;  %v3810_v22 = vmul.f32 0.17677669, %v3758_v2  ;;  %v3813_v14 = vadd.f32 %v17028_v25, %v3809_v57 }
0x1675   :  { %v3814_v36 = vadd.f32 %v17028_v25, %v3810_v22  ;;  %v3817_v15 = vsel %vm446_vm2, %v3813_v14, -inf }
0x1677   :  { %v3820_v16 = vsel %vm446_vm2, %v3814_v36, -inf }
0x1679   :  { %v3802_v51 = vpop.f32.mrb[76].mxu0 }
0x167a   :  { %v3811_v5 = vmul.f32 0.17677669, %v3802_v51  ;;  %v14244_v9 = vpop.f32.mrb[77].mxu0 }
0x167b   :  { %v3805_v6 = vpop.f32.mrb[78].mxu0 }
0x167c   :  { %v3812_v7 = vmul.f32 0.17677669, %v3805_v6  ;;  %v14245_v43 = vpop.f32.mrb[79].mxu0  ;;  %v3815_v50 = vadd.f32 %v17015_v44, %v3811_v5 }
0x167e   :  { %v3823_v23 = vsel %vm446_vm2, %v3815_v50, -inf  ;;  %v3816_v26 = vadd.f32 %v17015_v44, %v3812_v7 }
0x167f   :  { %3824 = vmax.xlane.f32.xlu1 %v3823_v23 }
0x1680   :  { %v3826_v32 = vsel %vm446_vm2, %v3816_v26, -inf }
0x1681   :  { %3827 = vmax.xlane.f32.xlu0 %v3826_v32 }
0x170c   :  { %v3825_v46 = vpop.xlane.xlu1 %3824 }
0x170d   :  { %v3831_v11 = vsub.f32 %v3815_v50, %v3825_v46 }
0x170e   :  { %v3828_v12 = vpop.xlane.xlu0 %3827 }
0x170f   :  { %v3837_v18 = vmul.f32 1.442695, %v3831_v11  ;;  %v3832_v54 = vsub.f32 %v3816_v26, %v3828_v12 }
0x1711   :  { %15608 = vpow2.f32 %v3837_v18  ;;  %v3839_v58 = vmul.f32 1.442695, %v3832_v54 }
0x1713   :  { %15610 = vpow2.f32 %v3839_v58 }
0x171b   :  { %v15609_v4 = vpop.eup %15608 }
0x171c   :  { %v3847_v31 = vsel %vm446_vm2, %v15609_v4, 0.0 }
0x171d   :  { %v15611_v8 = vpop.eup %15610  ;;  %3848 = vadd.xlane.f32.xlu1 %v3847_v31 }
0x171e   :  { %v3850_v13 = vsel %vm446_vm2, %v15611_v8, 0.0 }
0x171f   :  { %3851 = vadd.xlane.f32.xlu0 %v3850_v13 }
0x172e   :  { %4010 = vrot.lane.b32.xlu1 %v16995_v29, %s16025_s9 }
0x1735   :  { %4007 = vrot.lane.b32.xlu0 %v16991_v34, %s16025_s9 }
0x1752   :  { %3818 = vmax.xlane.f32.xlu1 %v3817_v15 }
0x1754   :  { %3821 = vmax.xlane.f32.xlu0 %v3820_v16 }
0x17aa   :  { %v3849_v17 = vpop.xlane.xlu1 %3848 }
0x17ab   :  { %15612 = vrcp.f32 %v3849_v17 }
0x17ac   :  { %v3852_v21 = vpop.xlane.xlu0 %3851 }
0x17ad   :  { %15614 = vrcp.f32 %v3852_v21 }
0x17ae   :  { %v4011_v41 = vpop.permute.xlu1 %4010 }
0x17af   :  { %v4016_v45 = vsel %vm308_vm0, %v4011_v41, 0 }
0x17b0   :  { %v4008_v47 = vpop.permute.xlu0 %4007 }
0x17b5   :  { %v15613_v33 = vpop.eup %15612 }
0x17b6   :  { %v3859_v61 = vmul.f32 %v15613_v33, %v15609_v4 }
0x17b7   :  { %v15615_v62 = vpop.eup %15614 }
0x17b8   :  { %v3860_v40 = vmul.f32 %v15615_v62, %v15611_v8 }
0x17ba   :  { %v3862_v42 = vpack.c.bf16 %v3860_v40, %v3859_v61 }
0x17bc   :  { %14255 = vmatmul.mubr.msk.bf16.vlgmr.msra.gmra.mrb[80].mxu0 %vm446_vm2, %v3862_v42 }
0x17bd   :  { %14265 = vmatpush3.bf16.xpose.msra.mxu0 %v4016_v45  ;;  %14266 = vmatprep.mubr.msk.bf16.mxu0 %vm16022_vm1, %v16021_v27 }
0x17be   :  { %14276 = vmatprep.subr.bf16.mxu0 %v16021_v27 }
0x17c4   :  { %14267 = vmatmul.mubr.msk.bf16.vlgmr.msra.gmra.mrb[84].mxu0 %vm308_vm0, %v4008_v47 }
0x17c5   :  { %14278 = vmatprep.mubr.msk.bf16.mxu0 %vm16022_vm1, %v16021_v27 }
0x17df   :  { %v3819_v53 = vpop.xlane.xlu1 %3818 }
0x17e0   :  { %v3829_v48 = vsub.f32 %v3813_v14, %v3819_v53 }
0x17e1   :  { %v3822_v35 = vpop.xlane.xlu0 %3821 }
0x17e2   :  { %v3833_v28 = vmul.f32 1.442695, %v3829_v48  ;;  %v3830_v19 = vsub.f32 %v3814_v36, %v3822_v35 }
0x17e4   :  { %15616 = vpow2.f32 %v3833_v28  ;;  %v3835_v24 = vmul.f32 1.442695, %v3830_v19 }
0x17e6   :  { %15618 = vpow2.f32 %v3835_v24 }
0x17ee   :  { %v15617_v0 = vpop.eup %15616 }
0x17ef   :  { %v3841_v2 = vsel %vm446_vm2, %v15617_v0, 0.0 }
0x17f0   :  { %v15619_v20 = vpop.eup %15618  ;;  %3842 = vadd.xlane.f32.xlu1 %v3841_v2 }
0x17f1   :  { %v3844_v51 = vsel %vm446_vm2, %v15619_v20, 0.0 }
0x17f2   :  { %3845 = vadd.xlane.f32.xlu0 %v3844_v51 }
0x1801   :  { %3957 = vrot.lane.b32.xlu1 %v16985_v55, %s16025_s9 }
0x1808   :  { %3954 = vrot.lane.b32.xlu0 %v16983_v49, %s16025_s9 }
0x187d   :  { %v3843_v5 = vpop.xlane.xlu1 %3842 }
0x187e   :  { %15620 = vrcp.f32 %v3843_v5 }
0x187f   :  { %v3846_v9 = vpop.xlane.xlu0 %3845 }
0x1880   :  { %15622 = vrcp.f32 %v3846_v9 }
0x1881   :  { %v3958_v23 = vpop.permute.xlu1 %3957 }
0x1882   :  { %v3963_v32 = vsel %vm308_vm0, %v3958_v23, 0 }
0x1883   :  { %v3955_v58 = vpop.permute.xlu0 %3954 }
0x1888   :  { %v15621_v6 = vpop.eup %15620 }
0x1889   :  { %v3857_v43 = vmul.f32 %v15621_v6, %v15617_v0 }
0x188a   :  { %v15623_v7 = vpop.eup %15622 }
0x188b   :  { %v3858_v50 = vmul.f32 %v15623_v7, %v15619_v20 }
0x188d   :  { %v3861_v26 = vpack.c.bf16 %v3858_v50, %v3857_v43 }
0x188f   :  { %14249 = vmatmul.mubr.msk.bf16.vlgmr.msra.gmra.mrb[76].mxu1 %vm446_vm2, %v3861_v26  ;;  %v17050_v46 = vpop.f32.mrb[80].mxu0 }
0x1890   :  { %14259 = vmatpush3.bf16.xpose.msra.mxu1 %v3963_v32  ;;  %v14256_v11 = vpop.f32.mrb[81].mxu0  ;;  %14260 = vmatprep.mubr.msk.bf16.mxu1 %vm16022_vm1, %v16021_v27 }
0x1891   :  { %v17054_v12 = vpop.f32.mrb[82].mxu0  ;;  %14270 = vmatprep.subr.bf16.mxu1 %v16021_v27 }
0x1892   :  { %v3952_v18 = vpack.c.bf16 %v17054_v12, %v17050_v46  ;;  %v14257_v54 = vpop.f32.mrb[83].mxu0 }
0x1897   :  { %14261 = vmatmul.mubr.msk.bf16.vlgmr.msra.gmra.mrb[80].mxu1 %vm308_vm0, %v3955_v58  ;;  %v4052_v4 = vpop.f32.mrb[84].mxu0 }
0x1898   :  { %v4061_v31 = vmul.f32 0.17677669, %v4052_v4  ;;  %v14268_v8 = vpop.f32.mrb[85].mxu0  ;;  %14272 = vmatprep.mubr.msk.bf16.mxu1 %vm16022_vm1, %v16021_v27 }
0x1899   :  { %v4055_v13 = vpop.f32.mrb[86].mxu0 }
0x189a   :  { %v4062_v57 = vmul.f32 0.17677669, %v4055_v13  ;;  %v14269_v22 = vpop.f32.mrb[87].mxu0  ;;  %v4065_v14 = vadd.f32 %v17015_v44, %v4061_v31 }
0x189c   :  { %v4073_v36 = vsel %vm446_vm2, %v4065_v14, -inf  ;;  %v4066_v15 = vadd.f32 %v17015_v44, %v4062_v57 }
0x189d   :  { %4074 = vmax.xlane.f32.xlu1 %v4073_v36 }
0x189e   :  { %v4076_v16 = vsel %vm446_vm2, %v4066_v15, -inf }
0x189f   :  { %4077 = vmax.xlane.f32.xlu0 %v4076_v16 }
0x18ae   :  { %4162 = vrot.lane.b32.xlu1 %v16993_v52, %s16025_s9 }
0x192a   :  { %v4075_v17 = vpop.xlane.xlu1 %4074 }
0x192b   :  { %v4081_v21 = vsub.f32 %v4065_v14, %v4075_v17 }
0x192c   :  { %v4078_v33 = vpop.xlane.xlu0 %4077 }
0x192d   :  { %v4087_v62 = vmul.f32 1.442695, %v4081_v21  ;;  %v4082_v61 = vsub.f32 %v4066_v15, %v4078_v33 }
0x192e   :  { %v4163_v40 = vpop.permute.xlu1 %4162 }
0x192f   :  { %15624 = vpow2.f32 %v4087_v62  ;;  %v4089_v41 = vmul.f32 1.442695, %v4082_v61  ;;  %14277 = vmatpush3.bf16.msra.mxu0 %v4163_v40 }
0x1930   :  { %14298 = vmatprep.subr.bf16.mxu0 %v16021_v27 }
0x1931   :  { %15626 = vpow2.f32 %v4089_v41 }
0x1939   :  { %v15625_v42 = vpop.eup %15624 }
0x193a   :  { %v4097_v45 = vsel %vm446_vm2, %v15625_v42, 0.0 }
0x193b   :  { %v15627_v47 = vpop.eup %15626  ;;  %4098 = vadd.xlane.f32.xlu1 %v4097_v45 }
0x193c   :  { %v4100_v53 = vsel %vm446_vm2, %v15627_v47, 0.0 }
0x193d   :  { %4101 = vadd.xlane.f32.xlu0 %v4100_v53 }
0x194c   :  { %4345 = vrot.lane.b32.xlu1 %v16983_v49, %s16026_s17 }
0x1950   :  { %4398 = vrot.lane.b32.xlu1 %v16995_v29, %s16026_s17 }
0x1953   :  { %4347 = vrot.lane.b32.xlu0 %v16985_v55, %s16026_s17 }
0x1957   :  { %4396 = vrot.lane.b32.xlu0 %v16991_v34, %s16026_s17 }
0x1962   :  { %v17079_v48 = vpop.f32.mrb[76].mxu1 }
0x1963   :  { %v14250_v35 = vpop.f32.mrb[77].mxu1 }
0x1964   :  { %v17081_v28 = vpop.f32.mrb[78].mxu1 }
0x1965   :  { %v3951_v19 = vpack.c.bf16 %v17081_v28, %v17079_v48  ;;  %v14251_v24 = vpop.f32.mrb[79].mxu1 }
0x196a   :  { %v3999_v0 = vpop.f32.mrb[80].mxu1 }
0x196b   :  { %v4059_v2 = vmul.f32 0.17677669, %v3999_v0  ;;  %v14262_v20 = vpop.f32.mrb[81].mxu1 }
0x196c   :  { %v4002_v51 = vpop.f32.mrb[82].mxu1 }
0x196d   :  { %v4060_v5 = vmul.f32 0.17677669, %v4002_v51  ;;  %v14263_v9 = vpop.f32.mrb[83].mxu1  ;;  %v4063_v6 = vadd.f32 %v17028_v25, %v4059_v2 }
0x196f   :  { %v4064_v7 = vadd.f32 %v17028_v25, %v4060_v5  ;;  %v4067_v43 = vsel %vm446_vm2, %v4063_v6, -inf }
0x1971   :  { %v4070_v50 = vsel %vm446_vm2, %v4064_v7, -inf }
0x1974   :  { %4068 = vmax.xlane.f32.xlu1 %v4067_v43 }
0x1976   :  { %4071 = vmax.xlane.f32.xlu0 %v4070_v50 }
0x19c8   :  { %v4099_v23 = vpop.xlane.xlu1 %4098 }
0x19c9   :  { %15628 = vrcp.f32 %v4099_v23 }
0x19ca   :  { %v4102_v26 = vpop.xlane.xlu0 %4101 }
0x19cb   :  { %15630 = vrcp.f32 %v4102_v26 }
0x19cc   :  { %v4346_v8 = vpop.permute.xlu1 %4345 }
0x19ce   :  { %v4348_v4 = vpop.permute.xlu0 %4347 }
0x19cf   :  { %v4353_v13 = vsel %vm308_vm0, %v4348_v4, 0 }
0x19d0   :  { %v4399_v57 = vpop.permute.xlu1 %4398 }
0x19d1   :  { %v4404_v22 = vsel %vm308_vm0, %v4399_v57, 0 }
0x19d2   :  { %v4397_v14 = vpop.permute.xlu0 %4396 }
0x19d3   :  { %v15629_v32 = vpop.eup %15628 }
0x19d4   :  { %v4109_v54 = vmul.f32 %v15629_v32, %v15625_v42 }
0x19d5   :  { %v15631_v11 = vpop.eup %15630 }
0x19d6   :  { %v4110_v58 = vmul.f32 %v15631_v11, %v15627_v47 }
0x19d8   :  { %v4112_v31 = vpack.c.bf16 %v4110_v58, %v4109_v54 }
0x19da   :  { %14279 = vmatmul.mubr.msk.bf16.vlgmr.msra.gmra.mrb[88].mxu0 %vm446_vm2, %v4112_v31 }
0x19db   :  { %14299 = vmatpush3.bf16.xpose.msra.mxu0 %v4353_v13  ;;  %14300 = vmatprep.mubr.msk.bf16.mxu0 %vm16022_vm1, %v16021_v27 }
0x19dc   :  { %14304 = vmatprep.subr.bf16.mxu0 %v16021_v27 }
0x19e2   :  { %14301 = vmatmul.mubr.msk.bf16.vlgmr.msra.gmra.mrb[92].mxu0 %vm308_vm0, %v4346_v8 }
0x19e3   :  { %14305 = vmatpush3.bf16.xpose.msra.mxu0 %v4404_v22  ;;  %14306 = vmatprep.mubr.msk.bf16.mxu0 %vm16022_vm1, %v16021_v27 }
0x19e4   :  { %14316 = vmatprep.subr.bf16.mxu0 %v16021_v27 }
0x19ea   :  { %14307 = vmatmul.mubr.msk.bf16.vlgmr.msra.gmra.mrb[96].mxu0 %vm308_vm0, %v4397_v14 }
0x19eb   :  { %14318 = vmatprep.mubr.msk.bf16.mxu0 %vm16022_vm1, %v16021_v27 }
0x1a01   :  { %v4069_v36 = vpop.xlane.xlu1 %4068 }
0x1a02   :  { %v4079_v15 = vsub.f32 %v4063_v6, %v4069_v36 }
0x1a03   :  { %v4072_v16 = vpop.xlane.xlu0 %4071 }
0x1a04   :  { %v4083_v17 = vmul.f32 1.442695, %v4079_v15  ;;  %v4080_v21 = vsub.f32 %v4064_v7, %v4072_v16 }
0x1a06   :  { %15632 = vpow2.f32 %v4083_v17  ;;  %v4085_v33 = vmul.f32 1.442695, %v4080_v21  ;;  %v15105_v21 = vld [vmem:[%s18729_s21 + $0x50] sm:$0xff]  }
0x1a08   :  { %15634 = vpow2.f32 %v4085_v33  ;;  %v15106_v33 = vld [vmem:[%s18729_s21 + $0x58] sm:$0xff]  }
0x1a10   :  { %v15633_v62 = vpop.eup %15632 }
0x1a11   :  { %v4091_v61 = vsel %vm446_vm2, %v15633_v62, 0.0 }
0x1a12   :  { %v15635_v40 = vpop.eup %15634  ;;  %4092 = vadd.xlane.f32.xlu0 %v4091_v61 }
0x1a13   :  { %v4094_v41 = vsel %vm446_vm2, %v15635_v40, 0.0 }
0x1a14   :  { %4095 = vadd.xlane.f32.xlu1 %v4094_v41 }
0x1a28   :  { %4114 = vrot.lane.b32.xlu0 %v16997_v59, %s16025_s9 }
0x1a9f   :  { %v4093_v42 = vpop.xlane.xlu0 %4092 }
0x1aa0   :  { %15636 = vrcp.f32 %v4093_v42 }
0x1aa1   :  { %v4096_v45 = vpop.xlane.xlu1 %4095 }
0x1aa2   :  { %15638 = vrcp.f32 %v4096_v45 }
0x1aa3   :  { %v4115_v47 = vpop.permute.xlu0 %4114 }
0x1aa4   :  { %14271 = vmatpush3.bf16.msra.mxu1 %v4115_v47 }
0x1aa5   :  { %14282 = vmatprep.subr.bf16.mxu1 %v15105_v21 }
0x1aaa   :  { %v15637_v53 = vpop.eup %15636 }
0x1aab   :  { %v4107_v24 = vmul.f32 %v15637_v53, %v15633_v62  ;;  %v15107_v62 = vld [vmem:[%s18729_s21 + $0x40] sm:$0xff]  }
0x1aac   :  { %v15639_v35 = vpop.eup %15638 }
0x1aad   :  { %v4108_v0 = vmul.f32 %v15639_v35, %v15635_v40  ;;  %v17106_v2 = vpop.f32.mrb[88].mxu0 }
0x1aae   :  { %v14280_v20 = vpop.f32.mrb[89].mxu0 }
0x1aaf   :  { %v17108_v51 = vpop.f32.mrb[90].mxu0  ;;  %v4111_v5 = vpack.c.bf16 %v4108_v0, %v4107_v24 }
0x1ab0   :  { %v4210_v9 = vpack.c.bf16 %v17108_v51, %v17106_v2  ;;  %v14281_v6 = vpop.f32.mrb[91].mxu0 }
0x1ab1   :  { %14273 = vmatmul.mubr.msk.bf16.vlgmr.msra.gmra.mrb[84].mxu1 %vm446_vm2, %v4111_v5 }
0x1ab2   :  { %14283 = vmatpush3.bf16.msra.mxu1 %v15105_v21  ;;  %v15110_v21 = vld [vmem:[%s18729_s21 + $0x68] sm:$0xff]  }
0x1ab3   :  { %14284 = vmatprep.subr.bf16.mxu1 %v15106_v33 }
0x1ab5   :  { %v4389_v7 = vpop.f32.mrb[92].mxu0 }
0x1ab6   :  { %v4447_v43 = vmul.f32 0.17677669, %v4389_v7  ;;  %v14302_v50 = vpop.f32.mrb[93].mxu0  ;;  %14285 = vmatpush3.bf16.msra.mxu1 %v15106_v33 }
0x1ab7   :  { %v4392_v23 = vpop.f32.mrb[94].mxu0  ;;  %14290 = vmatprep.subr.bf16.mxu1 %v15107_v62 }
0x1ab8   :  { %v4448_v26 = vmul.f32 0.17677669, %v4392_v23  ;;  %v14303_v32 = vpop.f32.mrb[95].mxu0  ;;  %v4451_v11 = vadd.f32 %v17028_v25, %v4447_v43 }
0x1aba   :  { %v4455_v54 = vsel %vm446_vm2, %v4451_v11, -inf  ;;  %v4452_v58 = vadd.f32 %v17028_v25, %v4448_v26 }
0x1abb   :  { %4456 = vmax.xlane.f32.xlu1 %v4455_v54 }
0x1abc   :  { %v4458_v13 = vsel %vm446_vm2, %v4452_v58, -inf }
0x1abd   :  { %v4440_v4 = vpop.f32.mrb[96].mxu0 }
0x1abe   :  { %v4449_v31 = vmul.f32 0.17677669, %v4440_v4  ;;  %v14308_v8 = vpop.f32.mrb[97].mxu0 }
0x1abf   :  { %4459 = vmax.xlane.f32.xlu1 %v4458_v13  ;;  %v4443_v57 = vpop.f32.mrb[98].mxu0 }
0x1ac0   :  { %v4450_v22 = vmul.f32 0.17677669, %v4443_v57  ;;  %v14309_v14 = vpop.f32.mrb[99].mxu0  ;;  %v4453_v36 = vadd.f32 %v17015_v44, %v4449_v31  ;;  %v15108_v31 = vld [vmem:[%s18729_s21 + $0x48] sm:$0xff]  }
0x1ac2   :  { %v4461_v15 = vsel %vm446_vm2, %v4453_v36, -inf  ;;  %v4454_v16 = vadd.f32 %v17015_v44, %v4450_v22 }
0x1ac3   :  { %4462 = vmax.xlane.f32.xlu1 %v4461_v15 }
0x1ac4   :  { %v4464_v17 = vsel %vm446_vm2, %v4454_v16, -inf }
0x1ac7   :  { %4465 = vmax.xlane.f32.xlu1 %v4464_v17  ;;  %v15109_v17 = vld [vmem:[%s18729_s21 + $0x60] sm:$0xff]  }
0x1b48   :  { %v4457_v61 = vpop.xlane.xlu1 %4456 }
0x1b49   :  { %v4467_v40 = vsub.f32 %v4451_v11, %v4457_v61 }
0x1b4b   :  { %v4471_v41 = vmul.f32 1.442695, %v4467_v40 }
0x1b4c   :  { %v4460_v42 = vpop.xlane.xlu1 %4459 }
0x1b4d   :  { %15640 = vpow2.f32 %v4471_v41  ;;  %v4468_v45 = vsub.f32 %v4452_v58, %v4460_v42 }
0x1b4f   :  { %v4473_v47 = vmul.f32 1.442695, %v4468_v45 }
0x1b50   :  { %v4463_v53 = vpop.xlane.xlu1 %4462 }
0x1b51   :  { %15642 = vpow2.f32 %v4473_v47  ;;  %v4469_v35 = vsub.f32 %v4453_v36, %v4463_v53 }
0x1b53   :  { %v4475_v24 = vmul.f32 1.442695, %v4469_v35 }
0x1b54   :  { %v4466_v50 = vpop.xlane.xlu1 %4465 }
0x1b55   :  { %15644 = vpow2.f32 %v4475_v24  ;;  %v4470_v23 = vsub.f32 %v4454_v16, %v4466_v50 }
0x1b57   :  { %v15641_v0 = vpop.eup %15640  ;;  %v4477_v26 = vmul.f32 1.442695, %v4470_v23 }
0x1b58   :  { %v4479_v20 = vsel %vm446_vm2, %v15641_v0, 0.0 }
0x1b59   :  { %4480 = vadd.xlane.f32.xlu1 %v4479_v20  ;;  %15646 = vpow2.f32 %v4477_v26 }
0x1b5b   :  { %v15643_v5 = vpop.eup %15642 }
0x1b5c   :  { %v4482_v6 = vsel %vm446_vm2, %v15643_v5, 0.0 }
0x1b5d   :  { %4483 = vadd.xlane.f32.xlu1 %v4482_v6 }
0x1b5f   :  { %v15645_v7 = vpop.eup %15644 }
0x1b60   :  { %v4485_v43 = vsel %vm446_vm2, %v15645_v7, 0.0 }
0x1b61   :  { %4486 = vadd.xlane.f32.xlu0 %v4485_v43 }
0x1b6e   :  { %4501 = vrot.lane.b32.xlu1 %v16997_v59, %s16026_s17 }
0x1b77   :  { %4721 = vrot.lane.b32.xlu0 %v16995_v29, %s16027_s25  ;;  %v15647_v29 = vpop.eup %15646 }
0x1b78   :  { %v4488_v8 = vsel %vm446_vm2, %v15647_v29, 0.0 }
0x1b84   :  { %v4154_v32 = vpop.f32.mrb[84].mxu1 }
0x1b85   :  { %v14274_v11 = vpop.f32.mrb[85].mxu1 }
0x1b86   :  { %v4157_v54 = vpop.f32.mrb[86].mxu1 }
0x1b87   :  { %v4209_v58 = vpack.c.bf16 %v4157_v54, %v4154_v32  ;;  %v14275_v4 = vpop.f32.mrb[87].mxu1 }
0x1b89   :  { %14286 = vmatprep.mubr.msk.bf16.mxu1 %vm308_vm0, %v4209_v58 }
0x1b8a   :  { %14287 = vmatmul.mubr.msk.bf16.vlgmr.msra.gmra.mrb[88].mxu1 %vm308_vm0, %v4210_v9 }
0x1b8b   :  { %14294 = vmatprep.mubr.msk.bf16.mxu1 %vm308_vm0, %v3951_v19  ;;  %14291 = vmatpush3.bf16.msra.mxu1 %v15107_v62 }
0x1b8c   :  { %14292 = vmatprep.subr.bf16.mxu1 %v15108_v31 }
0x1b8f   :  { %14293 = vmatpush3.bf16.msra.mxu1 %v15108_v31 }
0x1b90   :  { %14310 = vmatprep.subr.bf16.mxu1 %v16021_v27 }
0x1b92   :  { %4489 = vadd.xlane.f32.xlu1 %v4488_v8 }
0x1b96   :  { %14295 = vmatmul.mubr.msk.bf16.vlgmr.msra.gmra.mrb[88].mxu1 %vm308_vm0, %v3952_v18 }
0x1b97   :  { %14312 = vmatprep.mubr.msk.bf16.mxu1 %vm16022_vm1, %v16021_v27 }
0x1ba3   :  { %4548 = vrot.lane.b32.xlu1 %v16993_v52, %s16026_s17 }
0x1ba7   :  { %4670 = vrot.lane.b32.xlu1 %v16985_v55, %s16027_s25 }
0x1bab   :  { %4668 = vrot.lane.b32.xlu1 %v16983_v49, %s16027_s25 }
0x1baf   :  { %4719 = vrot.lane.b32.xlu1 %v16991_v34, %s16027_s25 }
0x1be6   :  { %v4481_v48 = vpop.xlane.xlu1 %4480 }
0x1be7   :  { %15648 = vrcp.f32 %v4481_v48 }
0x1bea   :  { %v4484_v46 = vpop.xlane.xlu1 %4483 }
0x1beb   :  { %15650 = vrcp.f32 %v4484_v46 }
0x1bee   :  { %v4502_v12 = vpop.permute.xlu1 %4501  ;;  %v4487_v55 = vpop.xlane.xlu0 %4486 }
0x1bef   :  { %14311 = vmatpush3.bf16.msra.mxu1 %v4502_v12  ;;  %15652 = vrcp.f32 %v4487_v55 }
0x1bf0   :  { %14322 = vmatprep.subr.bf16.mxu1 %v15109_v17 }
0x1bf1   :  { %v15649_v18 = vpop.eup %15648 }
0x1bf2   :  { %v4495_v19 = vmul.f32 %v15649_v18, %v15641_v0  ;;  %v4722_v47 = vpop.permute.xlu0 %4721 }
0x1bf3   :  { %v4727_v0 = vsel %vm308_vm0, %v4722_v47, 0 }
0x1bf5   :  { %v15651_v28 = vpop.eup %15650 }
0x1bf6   :  { %v4496_v2 = vmul.f32 %v15651_v28, %v15643_v5 }
0x1bf8   :  { %v4499_v51 = vpack.c.bf16 %v4496_v2, %v4495_v19 }
0x1bf9   :  { %v15653_v34 = vpop.eup %15652 }
0x1bfa   :  { %14313 = vmatmul.mubr.msk.bf16.vlgmr.msra.gmra.mrb[92].mxu1 %vm446_vm2, %v4499_v51  ;;  %v4497_v57 = vmul.f32 %v15653_v34, %v15645_v7 }
0x1bfb   :  { %14323 = vmatpush3.bf16.msra.mxu1 %v15109_v17 }
0x1bfc   :  { %14324 = vmatprep.subr.bf16.mxu1 %v15110_v21 }
0x1bff   :  { %14325 = vmatpush3.bf16.msra.mxu1 %v15110_v21 }
0x1c00   :  { %14336 = vmatprep.subr.bf16.mxu1 %v16021_v27 }
0x1c1f   :  { %v4490_v9 = vpop.xlane.xlu1 %4489 }
0x1c20   :  { %15654 = vrcp.f32 %v4490_v9 }
0x1c23   :  { %v4549_v49 = vpop.permute.xlu1 %4548 }
0x1c24   :  { %14317 = vmatpush3.bf16.msra.mxu0 %v4549_v49 }
0x1c25   :  { %14330 = vmatprep.subr.bf16.mxu0 %v16021_v27 }
0x1c27   :  { %v4671_v14 = vpop.permute.xlu1 %4670 }
0x1c28   :  { %v4676_v15 = vsel %vm308_vm0, %v4671_v14, 0 }
0x1c2a   :  { %v15655_v13 = vpop.eup %15654 }
0x1c2b   :  { %v4498_v22 = vmul.f32 %v15655_v13, %v15647_v29  ;;  %v4669_v16 = vpop.permute.xlu1 %4668 }
0x1c2d   :  { %v4500_v36 = vpack.c.bf16 %v4498_v22, %v4497_v57 }
0x1c2f   :  { %14319 = vmatmul.mubr.msk.bf16.vlgmr.msra.gmra.mrb[100].mxu0 %vm446_vm2, %v4500_v36  ;;  %v4720_v26 = vpop.permute.xlu1 %4719 }
0x1c30   :  { %14331 = vmatpush3.bf16.xpose.msra.mxu0 %v4676_v15  ;;  %14332 = vmatprep.mubr.msk.bf16.mxu0 %vm16022_vm1, %v16021_v27 }
0x1c31   :  { %14342 = vmatprep.subr.bf16.mxu0 %v16021_v27 }
0x1c37   :  { %14333 = vmatmul.mubr.msk.bf16.vlgmr.msra.gmra.mrb[104].mxu0 %vm308_vm0, %v4669_v16 }
0x1c38   :  { %14344 = vmatprep.mubr.msk.bf16.mxu0 %vm16022_vm1, %v16021_v27 }
0x1ccd   :  { %v4541_v33 = vpop.f32.mrb[92].mxu1 }
0x1cce   :  { %v14314_v62 = vpop.f32.mrb[93].mxu1 }
0x1ccf   :  { %v4544_v61 = vpop.f32.mrb[94].mxu1 }
0x1cd0   :  { %v4595_v40 = vpack.c.bf16 %v4544_v61, %v4541_v33  ;;  %v14315_v41 = vpop.f32.mrb[95].mxu1 }
0x1cd2   :  { %14326 = vmatprep.mubr.msk.bf16.mxu1 %vm308_vm0, %v4595_v40 }
0x1d02   :  { %v4588_v42 = vpop.f32.mrb[100].mxu0 }
0x1d03   :  { %v14320_v45 = vpop.f32.mrb[101].mxu0 }
0x1d04   :  { %v4591_v53 = vpop.f32.mrb[102].mxu0 }
0x1d05   :  { %v4596_v35 = vpack.c.bf16 %v4591_v53, %v4588_v42  ;;  %v14321_v24 = vpop.f32.mrb[103].mxu0 }
0x1d07   :  { %14327 = vmatmul.mubr.msk.bf16.vlgmr.msra.gmra.mrb[88].mxu1 %vm308_vm0, %v4596_v35 }
0x1d08   :  { %14337 = vmatpush3.bf16.xpose.msra.mxu1 %v4727_v0  ;;  %14338 = vmatprep.mubr.msk.bf16.mxu1 %vm16022_vm1, %v16021_v27 }
0x1d09   :  { %14348 = vmatprep.subr.bf16.mxu1 %v16021_v27 }
0x1d0a   :  { %v4712_v20 = vpop.f32.mrb[104].mxu0 }
0x1d0b   :  { %v4770_v5 = vmul.f32 0.17677669, %v4712_v20  ;;  %v14334_v6 = vpop.f32.mrb[105].mxu0 }
0x1d0c   :  { %v4715_v7 = vpop.f32.mrb[106].mxu0 }
0x1d0d   :  { %v4774_v43 = vadd.f32 %v17028_v25, %v4770_v5  ;;  %v4771_v50 = vmul.f32 0.17677669, %v4715_v7  ;;  %v14335_v23 = vpop.f32.mrb[107].mxu0 }
0x1d0f   :  { %v4775_v32 = vadd.f32 %v17028_v25, %v4771_v50  ;;  %14339 = vmatmul.mubr.msk.bf16.vlgmr.msra.gmra.mrb[96].mxu1 %vm308_vm0, %v4720_v26  ;;  %v4778_v11 = vsel %vm446_vm2, %v4774_v43, -inf  ;;  %v15112_v50 = vld [vmem:[%s18729_s21 + $0x78] sm:$0xff]  }
0x1d10   :  { %4779 = vmax.xlane.f32.xlu1 %v4778_v11  ;;  %14350 = vmatprep.mubr.msk.bf16.mxu1 %vm16022_vm1, %v16021_v27 }
0x1d11   :  { %v4781_v54 = vsel %vm446_vm2, %v4775_v32, -inf }
0x1d12   :  { %4782 = vmax.xlane.f32.xlu0 %v4781_v54 }
0x1d9d   :  { %v4780_v58 = vpop.xlane.xlu1 %4779 }
0x1d9e   :  { %v4790_v4 = vsub.f32 %v4774_v43, %v4780_v58  ;;  %v15111_v43 = vld [vmem:[%s18729_s21 + $0x70] sm:$0xff]  }
0x1d9f   :  { %v4783_v25 = vpop.xlane.xlu0 %4782 }
0x1da0   :  { %v4794_v31 = vmul.f32 1.442695, %v4790_v4  ;;  %v4791_v48 = vsub.f32 %v4775_v32, %v4783_v25  ;;  %v12955_v25 = vld [vmem:[%s18730_s29 + $0x1] ss:$0 sm:$0xff] }
0x1da2   :  { %15656 = vpow2.f32 %v4794_v31  ;;  %v4796_v46 = vmul.f32 1.442695, %v4791_v48 }
0x1da4   :  { %15658 = vpow2.f32 %v4796_v46 }
0x1dac   :  { %v15657_v29 = vpop.eup %15656 }
0x1dad   :  { %v4802_v8 = vsel %vm446_vm2, %v15657_v29, 0.0 }
0x1dae   :  { %4803 = vadd.xlane.f32.xlu0 %v4802_v8  ;;  %v15659_v13 = vpop.eup %15658 }
0x1daf   :  { %v4805_v57 = vsel %vm446_vm2, %v15659_v13, 0.0 }
0x1de2   :  { %v4763_v12 = vpop.f32.mrb[96].mxu1 }
0x1de3   :  { %v4772_v18 = vmul.f32 0.17677669, %v4763_v12  ;;  %v14340_v28 = vpop.f32.mrb[97].mxu1 }
0x1de4   :  { %v4766_v19 = vpop.f32.mrb[98].mxu1 }
0x1de5   :  { %v4776_v2 = vadd.f32 %v17015_v44, %v4772_v18  ;;  %v4773_v51 = vmul.f32 0.17677669, %v4766_v19  ;;  %v14341_v55 = vpop.f32.mrb[99].mxu1 }
0x1de7   :  { %v4777_v9 = vadd.f32 %v17015_v44, %v4773_v51  ;;  %v4784_v49 = vsel %vm446_vm2, %v4776_v2, -inf }
0x1de8   :  { %4785 = vmax.xlane.f32.xlu1 %v4784_v49 }
0x1de9   :  { %v4787_v34 = vsel %vm446_vm2, %v4777_v9, -inf }
0x1dec   :  { %4788 = vmax.xlane.f32.xlu1 %v4787_v34 }
0x1df0   :  { %4806 = vadd.xlane.f32.xlu1 %v4805_v57  ;;  %v15115_v57 = vld [vmem:[%s18731_s3 + $0x104] ss:$16 sps:$4 sm:$0xff]  }
0x1e3b   :  { %v4804_v40 = vpop.xlane.xlu0 %4803 }
0x1e75   :  { %v4786_v22 = vpop.xlane.xlu1 %4785 }
0x1e76   :  { %v4792_v14 = vsub.f32 %v4776_v2, %v4786_v22  ;;  %v15116_v22 = vld [vmem:[%s18731_s3 + $0x108] ss:$16 sps:$4 sm:$0xff]  }
0x1e78   :  { %v4798_v36 = vmul.f32 1.442695, %v4792_v14  ;;  %v15121_v14 = vld [vmem:[%s18731_s3 + $0x124] ss:$16 sps:$4 sm:$0xff]  }
0x1e79   :  { %v4789_v15 = vpop.xlane.xlu1 %4788 }
0x1e7a   :  { %15660 = vpow2.f32 %v4798_v36  ;;  %v4793_v16 = vsub.f32 %v4777_v9, %v4789_v15  ;;  %v15124_v36 = vld [vmem:[%s18731_s3 + $0x12c] ss:$16 sps:$4 sm:$0xff]   ;;  %v15122_v15 = vld [vmem:[%s18731_s3 + $0x128] ss:$16 sps:$4 sm:$0xff]  }
0x1e7c   :  { %v4800_v17 = vmul.f32 1.442695, %v4793_v16 }
0x1e7d   :  { %v4807_v61 = vpop.xlane.xlu1 %4806 }
0x1e7e   :  { %15662 = vpow2.f32 %v4800_v17 }
0x1e7f   :  { %15664 = vrcp.f32 %v4807_v61 }
0x1e80   :  { %15666 = vrcp.f32 %v4804_v40 }
0x1e84   :  { %v15661_v21 = vpop.eup %15660 }
0x1e85   :  { %v4808_v44 = vsel %vm446_vm2, %v15661_v21, 0.0 }
0x1e86   :  { %4809 = vadd.xlane.f32.xlu0 %v4808_v44 }
0x1e88   :  { %v15663_v33 = vpop.eup %15662 }
0x1e89   :  { %v4811_v62 = vsel %vm446_vm2, %v15663_v33, 0.0  ;;  %v15665_v41 = vpop.eup %15664 }
0x1e8a   :  { %4812 = vadd.xlane.f32.xlu1 %v4811_v62  ;;  %v15667_v45 = vpop.eup %15666  ;;  %v4819_v47 = vmul.f32 %v15665_v41, %v15659_v13  ;;  %v15113_v13 = vld [vmem:[%s18731_s3 + $0x100] ss:$16 sps:$4 sm:$0xff]  }
0x1e8b   :  { %v4818_v53 = vmul.f32 %v15667_v45, %v15657_v29 }
0x1e9b   :  { %4871 = vrot.lane.b32.xlu1 %v16993_v52, %s16027_s25  ;;  %v4822_v52 = vpack.c.bf16 %v4819_v47, %v4818_v53 }
0x1e9c   :  { %4824 = vrot.lane.b32.xlu0 %v16997_v59, %s16027_s25 }
0x1f13   :  { %v4810_v42 = vpop.xlane.xlu0 %4809 }
0x1f14   :  { %15668 = vrcp.f32 %v4810_v42 }
0x1f17   :  { %v4813_v35 = vpop.xlane.xlu1 %4812  ;;  %v4825_v24 = vpop.permute.xlu0 %4824 }
0x1f18   :  { %15670 = vrcp.f32 %v4813_v35  ;;  %14343 = vmatpush3.bf16.msra.mxu0 %v4825_v24  ;;  %v15125_v24 = vld [vmem:[%s18731_s3 + $0x140] ss:$16 sps:$4 sm:$0xff]  }
0x1f19   :  { %5252 = vmatprep.subr.bf16.mxu0 %v15115_v57 }
0x1f1b   :  { %v4872_v0 = vpop.permute.xlu1 %4871  ;;  %14345 = vmatmul.mubr.msk.bf16.vlgmr.msra.gmra.mrb[108].mxu0 %vm446_vm2, %v4822_v52  ;;  %v15127_v52 = vld [vmem:[%s18731_s3 + $0x144] ss:$16 sps:$4 sm:$0xff]  }
0x1f1c   :  { %14349 = vmatpush3.bf16.msra.mxu1 %v4872_v0  ;;  %5284 = vmatprep.mubr.bf16.mxu0 %v16023_v60  ;;  %v15128_v0 = vld [vmem:[%s18731_s3 + $0x148] ss:$16 sps:$4 sm:$0xff]  }
0x1f1d   :  { %14354 = vmatprep.subr.bf16.mxu1 %v15111_v43  ;;  %5253 = vmatpush1.bf16.msra.mxu0 %v15113_v13 }
0x1f1e   :  { %v15669_v59 = vpop.eup %15668  ;;  %5254 = vmatprep.subr.bf16.mxu0 %v15121_v14  ;;  %v12956_v14 = vld [vmem:[%s18732_s8 + $0x1] ss:$0 sm:$0xff] }
0x1f1f   :  { %v4820_v5 = vmul.f32 %v15669_v59, %v15661_v21  ;;  %v15130_v59 = vld [vmem:[%s18731_s3 + $0x14c] ss:$16 sps:$4 sm:$0xff]  }
0x1f22   :  { %v15671_v20 = vpop.eup %15670 }
0x1f23   :  { %v4821_v6 = vmul.f32 %v15671_v20, %v15663_v33  ;;  %v15133_v20 = vld [vmem:[%s18731_s3 + $0x164] ss:$16 sps:$4 sm:$0xff]  }
0x1f25   :  { %v4823_v7 = vpack.c.bf16 %v4821_v6, %v4820_v5  ;;  %v15131_v5 = vld [vmem:[%s18731_s3 + $0x160] ss:$16 sps:$4 sm:$0xff]   ;;  %v15136_v6 = vld [vmem:[%s18731_s3 + $0x16c] ss:$16 sps:$4 sm:$0xff]  }
0x1f27   :  { %14351 = vmatmul.mubr.msk.bf16.vlgmr.msra.gmra.mrb[100].mxu1 %vm446_vm2, %v4823_v7  ;;  %v15134_v7 = vld [vmem:[%s18731_s3 + $0x168] ss:$16 sps:$4 sm:$0xff]  }
0x1f28   :  { %14355 = vmatpush3.bf16.msra.mxu1 %v15111_v43  ;;  %v15137_v43 = vld [vmem:[%s18731_s3 + $0x180] ss:$16 sps:$4 sm:$0xff]  }
0x1f29   :  { %14356 = vmatprep.subr.bf16.mxu1 %v15112_v50 }
0x1f2c   :  { %14357 = vmatpush3.bf16.msra.mxu1 %v15112_v50  ;;  %v15139_v50 = vld [vmem:[%s18731_s3 + $0x184] ss:$16 sps:$4 sm:$0xff]  }
0x1fee   :  { %v4864_v23 = vpop.f32.mrb[108].mxu0 }
0x1fef   :  { %v14346_v26 = vpop.f32.mrb[109].mxu0 }
0x1ff0   :  { %v4867_v32 = vpop.f32.mrb[110].mxu0  ;;  %v15142_v26 = vld [vmem:[%s18731_s3 + $0x18c] ss:$16 sps:$4 sm:$0xff]  }
0x1ff1   :  { %v4918_v11 = vpack.c.bf16 %v4867_v32, %v4864_v23  ;;  %v14347_v54 = vpop.f32.mrb[111].mxu0  ;;  %v15140_v23 = vld [vmem:[%s18731_s3 + $0x188] ss:$16 sps:$4 sm:$0xff]   ;;  %v15145_v32 = vld [vmem:[%s18731_s3 + $0x1a4] ss:$16 sps:$4 sm:$0xff]  }
0x1ff2   :  { %v15143_v54 = vld [vmem:[%s18731_s3 + $0x1a0] ss:$16 sps:$4 sm:$0xff]  }
0x1ff3   :  { %14358 = vmatprep.mubr.msk.bf16.mxu1 %vm308_vm0, %v4918_v11  ;;  %v15148_v11 = vld [vmem:[%s18731_s3 + $0x1ac] ss:$16 sps:$4 sm:$0xff]  }
0x1ffa   :  { %v4911_v58 = vpop.f32.mrb[100].mxu1 }
0x1ffb   :  { %v14352_v4 = vpop.f32.mrb[101].mxu1 }
0x1ffc   :  { %v4914_v31 = vpop.f32.mrb[102].mxu1  ;;  %v15151_v4 = vld [vmem:[%s18731_s3 + $0x1c4] ss:$16 sps:$4 sm:$0xff]  }
0x1ffd   :  { %v4919_v29 = vpack.c.bf16 %v4914_v31, %v4911_v58  ;;  %v14353_v8 = vpop.f32.mrb[103].mxu1  ;;  %v15146_v58 = vld [vmem:[%s18731_s3 + $0x1a8] ss:$16 sps:$4 sm:$0xff]   ;;  %v15154_v31 = vld [vmem:[%s18731_s3 + $0x1cc] ss:$16 sps:$4 sm:$0xff]  }
0x1ffe   :  { %v15152_v8 = vld [vmem:[%s18731_s3 + $0x1c8] ss:$16 sps:$4 sm:$0xff]  }
0x1fff   :  { %14359 = vmatmul.mubr.msk.bf16.vlgmr.msra.gmra.mrb[88].mxu1 %vm308_vm0, %v4919_v29  ;;  %v15149_v29 = vld [vmem:[%s18731_s3 + $0x1c0] ss:$16 sps:$4 sm:$0xff]  }
0x2000   :  { %5337 = vmatprep.mubr.bf16.mxu1 %v16023_v60 }
0x20d2   :  { %v14360_v48 = vpop.f32.mrb[88].mxu1 }
0x20d3   :  { %v4972_v46 = vpop.f32.mrb[89].mxu1  ;;  %v4999_v55 = vadd.f32 %v14360_v48, %v12955_v25  ;;  %v15160_v48 = vld [vmem:[%s18731_s3 + $0x1ec] ss:$16 sps:$4 sm:$0xff]  }
0x20d4   :  { %v4997_v12 = vadd.f32 %v12955_v25, %v4972_v46  ;;  %v14361_v18 = vpop.f32.mrb[90].mxu1  ;;  %v15155_v46 = vld [vmem:[%s18731_s3 + $0x1e0] ss:$16 sps:$4 sm:$0xff]  }
0x20d5   :  { %v4975_v28 = vpop.f32.mrb[91].mxu1  ;;  %v5000_v2 = vadd.f32 %v14361_v18, %v12955_v25  ;;  %v5003_v34 = vadd.f32 %v4999_v55, %v16970_v63 }
0x20d6   :  { %v5001_v19 = vadd.f32 %v4997_v12, %v16961_v1  ;;  %v4998_v51 = vadd.f32 %v12955_v25, %v4975_v28  ;;  %v15118_v1 = vld [vmem:[%s18731_s3 + $0x10c] ss:$16 sps:$4 sm:$0xff]   ;;  %v15157_v25 = vld [vmem:[%s18731_s3 + $0x1e4] ss:$16 sps:$4 sm:$0xff]   ;;  %v15158_v12 = vld [vmem:[%s18731_s3 + $0x1e8] ss:$16 sps:$4 sm:$0xff]  }
0x20d7   :  { %v5004_v49 = vadd.f32 %v5000_v2, %v16972_v3  ;;  %5305 = vmatprep.subr.bf16.mxu1 %v15118_v1 }
0x20d8   :  { %v5002_v9 = vadd.f32 %v4998_v51, %v16963_v37  ;;  %5005 = vadd.xlane.f32.xlu1 %v5001_v19  ;;  %v15119_v37 = vld [vmem:[%s18731_s3 + $0x120] ss:$16 sps:$4 sm:$0xff]   ;;  %5306 = vmatpush1.bf16.msra.mxu1 %v15116_v22 }
0x20d9   :  { %5307 = vmatprep.subr.bf16.mxu1 %v15124_v36  ;;  %5255 = vmatpush1.bf16.msra.mxu0 %v15119_v37 }
0x20da   :  { %5007 = vadd.xlane.f32.xlu0 %v5002_v9  ;;  %5256 = vmatprep.subr.bf16.mxu0 %v15127_v52  ;;  %v15163_v52 = vld [vmem:[%s18734_s19 + $0x100] sm:$0xff]  }
0x20dc   :  { %5011 = vadd.xlane.f32.xlu1 %v5004_v49  ;;  %5308 = vmatpush1.bf16.msra.mxu1 %v15122_v15 }
0x20dd   :  { %5309 = vmatprep.subr.bf16.mxu1 %v15130_v59  ;;  %5257 = vmatpush1.bf16.msra.mxu0 %v15125_v24  ;;  %v15162_v24 = vld [vmem:[%s18734_s19 + $0x1c0] sm:$0xff]   ;;  %v15165_v59 = vld [vmem:[%s18734_s19 + $0x148] sm:$0xff]  }
0x20de   :  { %5009 = vadd.xlane.f32.xlu0 %v5003_v34  ;;  %5258 = vmatprep.subr.bf16.mxu0 %v15133_v20  ;;  %v15166_v20 = vld [vmem:[%s18734_s19 + $0x1c8] sm:$0xff]  }
0x20e0   :  { %5310 = vmatpush1.bf16.msra.mxu1 %v15128_v0  ;;  %v15164_v0 = vld [vmem:[%s18734_s19 + $0x180] sm:$0xff]  }
0x20e1   :  { %5311 = vmatprep.subr.bf16.mxu1 %v15136_v6  ;;  %5259 = vmatpush1.bf16.msra.mxu0 %v15131_v5  ;;  %v15167_v5 = vld [vmem:[%s18734_s19 + $0x108] sm:$0xff]  }
0x20e2   :  { %5260 = vmatprep.subr.bf16.mxu0 %v15139_v50  ;;  %v15168_v6 = vld [vmem:[%s18734_s19 + $0x188] sm:$0xff]   ;;  %v15171_v50 = vld [vmem:[%s18734_s19 + $0x110] sm:$0xff]  }
0x20e4   :  { %5312 = vmatpush1.bf16.msra.mxu1 %v15134_v7  ;;  %v15169_v7 = vld [vmem:[%s18734_s19 + $0x150] sm:$0xff]  }
0x20e5   :  { %5313 = vmatprep.subr.bf16.mxu1 %v15142_v26  ;;  %5261 = vmatpush1.bf16.msra.mxu0 %v15137_v43  ;;  %v15170_v43 = vld [vmem:[%s18734_s19 + $0x1d0] sm:$0xff]   ;;  %v15173_v26 = vld [vmem:[%s18734_s19 + $0x158] sm:$0xff]  }
0x20e6   :  { %5262 = vmatprep.subr.bf16.mxu0 %v15145_v32  ;;  %v15174_v32 = vld [vmem:[%s18734_s19 + $0x1d8] sm:$0xff]  }
0x20e8   :  { %5314 = vmatpush1.bf16.msra.mxu1 %v15140_v23  ;;  %v15172_v23 = vld [vmem:[%s18734_s19 + $0x190] sm:$0xff]  }
0x20e9   :  { %5315 = vmatprep.subr.bf16.mxu1 %v15148_v11  ;;  %5263 = vmatpush1.bf16.msra.mxu0 %v15143_v54  ;;  %v15175_v11 = vld [vmem:[%s18734_s19 + $0x118] sm:$0xff]  }
0x20ea   :  { %5264 = vmatprep.subr.bf16.mxu0 %v15151_v4  ;;  %v15176_v54 = vld [vmem:[%s18734_s19 + $0x198] sm:$0xff]   ;;  %v15178_v4 = vld [vmem:[%s18734_s19 + $0x1e0] sm:$0xff]  }
0x20ec   :  { %5316 = vmatpush1.bf16.msra.mxu1 %v15146_v58  ;;  %v15177_v58 = vld [vmem:[%s18734_s19 + $0x160] sm:$0xff]  }
0x20ed   :  { %5317 = vmatprep.subr.bf16.mxu1 %v15154_v31  ;;  %5265 = vmatpush1.bf16.msra.mxu0 %v15149_v29  ;;  %v15179_v31 = vld [vmem:[%s18734_s19 + $0x120] sm:$0xff]  }
0x20ee   :  { %5266 = vmatprep.subr.bf16.mxu0 %v15157_v25  ;;  %v15180_v29 = vld [vmem:[%s18734_s19 + $0x1a0] sm:$0xff]   ;;  %v15182_v25 = vld [vmem:[%s18734_s19 + $0x1e8] sm:$0xff]  }
0x20f0   :  { %5318 = vmatpush1.bf16.msra.mxu1 %v15152_v8  ;;  %v15181_v8 = vld [vmem:[%s18734_s19 + $0x168] sm:$0xff]  }
0x20f1   :  { %5319 = vmatprep.subr.bf16.mxu1 %v15160_v48  ;;  %5267 = vmatpush1.bf16.msra.mxu0 %v15155_v46  ;;  %v15183_v48 = vld [vmem:[%s18734_s19 + $0x128] sm:$0xff]  }
0x20f2   :  { %v15184_v46 = vld [vmem:[%s18734_s19 + $0x1a8] sm:$0xff]  }
0x20f4   :  { %5320 = vmatpush1.bf16.msra.mxu1 %v15158_v12  ;;  %v15185_v12 = vld [vmem:[%s18734_s19 + $0x170] sm:$0xff]  }
0x20f5   :  { %13718 = vmatprep.subr.bf16.mxu1 %v15162_v24 }
0x2165   :  { %v5006_v3 = vpop.xlane.xlu1 %5005 }
0x2166   :  { %v5013_v63 = vmul.f32 0.0078125, %v5006_v3 }
0x2167   :  { %v5008_v16 = vpop.xlane.xlu0 %5007 }
0x2168   :  { %v17216_v17 = vsub.f32 %v5001_v19, %v5013_v63  ;;  %v5014_v21 = vmul.f32 0.0078125, %v5008_v16  ;;  %v12957_v63 = vld [vmem:[%s18733_s14 + $0x1] ss:$0 sm:$0xff] }
0x2169   :  { %v5012_v44 = vpop.xlane.xlu1 %5011 }
0x216a   :  { %v17218_v33 = vsub.f32 %v5002_v9, %v5014_v21  ;;  %v5016_v62 = vmul.f32 0.0078125, %v5012_v44  ;;  %v5021_v61 = vmul.f32 %v17216_v17, %v17216_v17 }
0x216b   :  { %v5010_v40 = vpop.xlane.xlu0 %5009 }
0x216c   :  { %v17222_v41 = vsub.f32 %v5004_v49, %v5016_v62  ;;  %v5015_v42 = vmul.f32 0.0078125, %v5010_v40  ;;  %5025 = vadd.xlane.f32.xlu0 %v5021_v61  ;;  %v5022_v45 = vmul.f32 %v17218_v33, %v17218_v33 }
0x216e   :  { %v17226_v47 = vsub.f32 %v5003_v34, %v5015_v42  ;;  %5027 = vadd.xlane.f32.xlu1 %v5022_v45  ;;  %v5024_v53 = vmul.f32 %v17222_v41, %v17222_v41 }
0x2170   :  { %v5023_v35 = vmul.f32 %v17226_v47, %v17226_v47 }
0x2172   :  { %5031 = vadd.xlane.f32.xlu1 %v5024_v53  ;;  %5029 = vadd.xlane.f32.xlu0 %v5023_v35  ;;  %v15161_v35 = vld [vmem:[%s18734_s19 + $0x140] sm:$0xff]  }
0x2173   :  { %13690 = vmatprep.subr.bf16.mxu0 %v15161_v35 }
0x21f9   :  { %v5026_v18 = vpop.xlane.xlu0 %5025 }
0x21fa   :  { %v5033_v28 = vmul.f32 0.0078125, %v5026_v18  ;;  %v15186_v18 = vld [vmem:[%s18734_s19 + $0x1f0] sm:$0xff]  }
0x21fb   :  { %v5028_v19 = vpop.xlane.xlu1 %5027 }
0x21fc   :  { %v5037_v2 = vadd.f32 1e-12, %v5033_v28  ;;  %v5034_v51 = vmul.f32 0.0078125, %v5028_v19  ;;  %v15187_v28 = vld [vmem:[%s18734_s19 + $0x130] sm:$0xff]  }
0x21fd   :  { %v15188_v19 = vld [vmem:[%s18734_s19 + $0x1b0] sm:$0xff]  }
0x21fe   :  { %15672 = vrsqrt.f32 %v5037_v2  ;;  %v5038_v55 = vadd.f32 1e-12, %v5034_v51  ;;  %v15189_v2 = vld [vmem:[%s18734_s19 + $0x178] sm:$0xff]  }
0x21ff   :  { %v5032_v9 = vpop.xlane.xlu1 %5031  ;;  %v5030_v49 = vpop.xlane.xlu0 %5029  ;;  %v15190_v51 = vld [vmem:[%s18734_s19 + $0x1f8] sm:$0xff]  }
0x2200   :  { %15674 = vrsqrt.f32 %v5038_v55  ;;  %v5036_v34 = vmul.f32 0.0078125, %v5032_v9  ;;  %v5035_v13 = vmul.f32 0.0078125, %v5030_v49  ;;  %v15191_v55 = vld [vmem:[%s18734_s19 + $0x138] sm:$0xff]   ;;  %v12831_v49 = vld [vmem:[%s18735_s24 + $0x4] sm:$0xf] }
0x2201   :  { %v15192_v9 = vld [vmem:[%s18734_s19 + $0x1b8] sm:$0xff]  }
0x2202   :  { %v5040_v57 = vadd.f32 1e-12, %v5036_v34  ;;  %v5039_v22 = vadd.f32 1e-12, %v5035_v13  ;;  %v17310_v34 = vrot.slane %v12831_v49, %v16448_v30  ;;  %v17313_v13 = vrot.slane %v12831_v49, %v16455_v39 }
0x2204   :  { %15676 = vrsqrt.f32 %v5040_v57 }
0x2205   :  { %15678 = vrsqrt.f32 %v5039_v22 }
0x2208   :  { %v15673_v1 = vpop.eup %15672 }
0x2209   :  { %v5045_v36 = vmul.f32 %v15673_v1, %v17216_v17  ;;  %v17316_v1 = vrot.slane %v12831_v49, %v16452_v38 }
0x220a   :  { %v15675_v37 = vpop.eup %15674 }
0x220b   :  { %v5046_v15 = vmul.f32 %v15675_v37, %v17218_v33  ;;  %v5055_v3 = vmul.f32 %v12956_v14, %v5045_v36 }
0x220d   :  { %v5056_v16 = vmul.f32 %v12956_v14, %v5046_v15  ;;  %v17260_v62 = vadd.f32 %v12957_v63, %v5055_v3  ;;  %v17321_v3 = vrot.slane %v12831_v49, %v16788_v56 }
0x220e   :  { %v15677_v21 = vpop.eup %15676 }
0x220f   :  { %v15679_v44 = vpop.eup %15678  ;;  %v17262_v61 = vadd.f32 %v12957_v63, %v5056_v16  ;;  %v5048_v40 = vmul.f32 %v15677_v21, %v17222_v41 }
0x2210   :  { %v5047_v42 = vmul.f32 %v15679_v44, %v17226_v47 }
0x2211   :  { %v5069_v17 = vpack.c.bf16 %v17262_v61, %v17260_v62  ;;  %v5058_v33 = vmul.f32 %v12956_v14, %v5048_v40 }
0x2212   :  { %v5057_v45 = vmul.f32 %v12956_v14, %v5047_v42 }
0x2213   :  { %5285 = vmatmul.mubr.bf16.vlgmr.msra.gmra.mrb[112].mxu0 %v5069_v17  ;;  %5338 = vmatmul.mubr.bf16.vlgmr.msra.gmra.mrb[104].mxu1 %v5069_v17  ;;  %v17272_v41 = vadd.f32 %v12957_v63, %v5058_v33 }
0x2214   :  { %5294 = vmatprep.mubr.bf16.mxu0 %v16023_v60  ;;  %5347 = vmatprep.mubr.bf16.mxu1 %v16023_v60  ;;  %v17270_v53 = vadd.f32 %v12957_v63, %v5057_v45 }
0x2215   :  { %13691 = vmatpush3.bf16.msra.mxu0 %v15163_v52  ;;  %13719 = vmatpush3.bf16.msra.mxu1 %v15164_v0 }
0x2216   :  { %v5070_v47 = vpack.c.bf16 %v17272_v41, %v17270_v53  ;;  %13692 = vmatprep.subr.bf16.mxu0 %v15165_v59  ;;  %13720 = vmatprep.subr.bf16.mxu1 %v15166_v20 }
0x2219   :  { %13693 = vmatpush3.bf16.msra.mxu0 %v15167_v5  ;;  %13721 = vmatpush3.bf16.msra.mxu1 %v15168_v6 }
0x221a   :  { %13694 = vmatprep.subr.bf16.mxu0 %v15169_v7  ;;  %13722 = vmatprep.subr.bf16.mxu1 %v15170_v43 }
0x221b   :  { %5295 = vmatmul.mubr.bf16.gmra.mrb[116].mxu0 %v5070_v47  ;;  %5348 = vmatmul.mubr.bf16.gmra.mrb[108].mxu1 %v5070_v47 }
0x221d   :  { %13695 = vmatpush3.bf16.msra.mxu0 %v15171_v50  ;;  %13723 = vmatpush3.bf16.msra.mxu1 %v15172_v23 }
0x221e   :  { %13696 = vmatprep.subr.bf16.mxu0 %v15173_v26  ;;  %13724 = vmatprep.subr.bf16.mxu1 %v15174_v32 }
0x2221   :  { %13697 = vmatpush3.bf16.msra.mxu0 %v15175_v11  ;;  %13725 = vmatpush3.bf16.msra.mxu1 %v15176_v54 }
0x2222   :  { %13698 = vmatprep.subr.bf16.mxu0 %v15177_v58  ;;  %13726 = vmatprep.subr.bf16.mxu1 %v15178_v4 }
0x2225   :  { %13699 = vmatpush3.bf16.msra.mxu0 %v15179_v31  ;;  %13727 = vmatpush3.bf16.msra.mxu1 %v15180_v29 }
0x2226   :  { %13700 = vmatprep.subr.bf16.mxu0 %v15181_v8  ;;  %13728 = vmatprep.subr.bf16.mxu1 %v15182_v25 }
0x2229   :  { %13701 = vmatpush3.bf16.msra.mxu0 %v15183_v48  ;;  %13729 = vmatpush3.bf16.msra.mxu1 %v15184_v46 }
0x222a   :  { %13702 = vmatprep.subr.bf16.mxu0 %v15185_v12  ;;  %13730 = vmatprep.subr.bf16.mxu1 %v15186_v18 }
0x222d   :  { %13703 = vmatpush3.bf16.msra.mxu0 %v15187_v28  ;;  %13731 = vmatpush3.bf16.msra.mxu1 %v15188_v19 }
0x222e   :  { %13704 = vmatprep.subr.bf16.mxu0 %v15189_v2  ;;  %13732 = vmatprep.subr.bf16.mxu1 %v15190_v51 }
0x2231   :  { %13705 = vmatpush3.bf16.msra.mxu0 %v15191_v55  ;;  %13733 = vmatpush3.bf16.msra.mxu1 %v15192_v9 }
0x22e6   :  { %v5286_v57 = vpop.f32.mrb[112].mxu0  ;;  %v5339_v22 = vpop.f32.mrb[104].mxu1 }
0x22e7   :  { %v5287_v14 = vadd.f32 %v5286_v57, %v17310_v34  ;;  %v5340_v36 = vadd.f32 %v5339_v22, %v17313_v13  ;;  %v5288_v37 = vpop.f32.mrb[113].mxu0  ;;  %v5341_v15 = vpop.f32.mrb[105].mxu1 }
0x22e8   :  { %v5290_v63 = vpop.f32.mrb[114].mxu0  ;;  %v5343_v16 = vpop.f32.mrb[106].mxu1  ;;  %v17324_v40 = vadd.f32 %v5288_v37, %v17316_v1  ;;  %v17334_v52 = vadd.f32 %v5341_v15, %v17321_v3 }
0x22e9   :  { %v5374_v21 = vmul.f32 0.044715, %v5287_v14  ;;  %v5376_v44 = vmul.f32 0.044715, %v5340_v36  ;;  %v5291_v42 = vadd.f32 %v5290_v63, %v17310_v34  ;;  %v17328_v17 = vadd.f32 %v5343_v16, %v17313_v13  ;;  %v5292_v33 = vpop.f32.mrb[115].mxu0  ;;  %v5345_v45 = vpop.f32.mrb[107].mxu1 }
0x22ea   :  { %v17331_v24 = vadd.f32 %v5292_v33, %v17316_v1  ;;  %v17337_v59 = vadd.f32 %v5345_v45, %v17321_v3  ;;  %v17339_v20 = vmul.f32 0.5, %v5287_v14  ;;  %v5375_v43 = vmul.f32 0.044715, %v17324_v40 }
0x22eb   :  { %v5390_v47 = vmul.f32 %v5374_v21, %v5287_v14  ;;  %v5392_v35 = vmul.f32 %v5376_v44, %v5340_v36  ;;  %v5378_v0 = vmul.f32 0.044715, %v5291_v42  ;;  %v5380_v7 = vmul.f32 0.044715, %v17328_v17 }
0x22ec   :  { %v5379_v23 = vmul.f32 0.044715, %v17331_v24  ;;  %v17344_v54 = vmul.f32 0.5, %v5340_v36  ;;  %v5377_v8 = vmul.f32 0.044715, %v17334_v52  ;;  %v5391_v9 = vmul.f32 %v5375_v43, %v17324_v40 }
0x22ed   :  { %v5406_v5 = vmul.f32 %v5390_v47, %v5287_v14  ;;  %v5408_v6 = vmul.f32 %v5392_v35, %v5340_v36  ;;  %v5394_v50 = vmul.f32 %v5378_v0, %v5291_v42  ;;  %v5396_v4 = vmul.f32 %v5380_v7, %v17328_v17 }
0x22ee   :  { %v5296_v26 = vpop.f32.mrb[116].mxu0  ;;  %v5349_v32 = vpop.f32.mrb[108].mxu1  ;;  %v5381_v48 = vmul.f32 0.044715, %v17337_v59  ;;  %v5395_v57 = vmul.f32 %v5379_v23, %v17331_v24  ;;  %v5393_v15 = vmul.f32 %v5377_v8, %v17334_v52  ;;  %v5407_v47 = vmul.f32 %v5391_v9, %v17324_v40 }
0x22ef   :  { %v5422_v11 = vadd.f32 %v5406_v5, %v5287_v14  ;;  %v5424_v58 = vadd.f32 %v5408_v6, %v5340_v36  ;;  %v5298_v31 = vpop.f32.mrb[117].mxu0  ;;  %v5351_v29 = vpop.f32.mrb[109].mxu1  ;;  %v5410_v25 = vmul.f32 %v5394_v50, %v5291_v42  ;;  %v17350_v46 = vadd.f32 %v5296_v26, %v17310_v34 }
0x22f0   :  { %v5300_v12 = vpop.f32.mrb[118].mxu0  ;;  %v5353_v18 = vpop.f32.mrb[110].mxu1  ;;  %v5412_v2 = vmul.f32 %v5396_v4, %v17328_v17  ;;  %v17356_v22 = vadd.f32 %v5349_v32, %v17313_v13  ;;  %v17361_v37 = vadd.f32 %v5298_v31, %v17316_v1  ;;  %v5397_v16 = vmul.f32 %v5381_v48, %v17337_v59 }
0x22f1   :  { %v5438_v28 = vmul.f32 0.7978846, %v5422_v11  ;;  %v5440_v19 = vmul.f32 0.7978846, %v5424_v58  ;;  %v5302_v51 = vpop.f32.mrb[119].mxu0  ;;  %v5355_v55 = vpop.f32.mrb[111].mxu1  ;;  %v5426_v49 = vadd.f32 %v5410_v25, %v5291_v42  ;;  %v17367_v33 = vadd.f32 %v5351_v29, %v17321_v3 }
0x22f2   :  { %v5428_v14 = vadd.f32 %v5412_v2, %v17328_v17  ;;  %v5382_v36 = vmul.f32 0.044715, %v17350_v46  ;;  %v5383_v44 = vmul.f32 0.044715, %v17361_v37  ;;  %v17370_v45 = vadd.f32 %v5300_v12, %v17310_v34 }
0x22f3   :  { %15680 = vtanh.f32 %v5438_v28  ;;  %v5442_v63 = vmul.f32 0.7978846, %v5426_v49  ;;  %v5411_v35 = vmul.f32 %v5395_v57, %v17331_v24  ;;  %v17375_v0 = vadd.f32 %v5353_v18, %v17313_v13 }
0x22f4   :  { %15682 = vtanh.f32 %v5440_v19  ;;  %v5444_v21 = vmul.f32 0.7978846, %v5428_v14  ;;  %v5398_v5 = vmul.f32 %v5382_v36, %v17350_v46  ;;  %v5384_v6 = vmul.f32 0.044715, %v17356_v22 }
0x22f5   :  { %15684 = vtanh.f32 %v5442_v63  ;;  %v5385_v7 = vmul.f32 0.044715, %v17367_v33  ;;  %v5362_v43 = vmul.f32 0.5, %v5291_v42  ;;  %v5399_v50 = vmul.f32 %v5383_v44, %v17361_v37 }
0x22f6   :  { %15686 = vtanh.f32 %v5444_v21  ;;  %v17382_v34 = vadd.f32 %v5302_v51, %v17316_v1  ;;  %v17385_v23 = vadd.f32 %v5355_v55, %v17321_v3  ;;  %v5409_v26 = vmul.f32 %v5393_v15, %v17334_v52 }
0x22f7   :  { %v5413_v13 = vmul.f32 %v5397_v16, %v17337_v59  ;;  %v5386_v32 = vmul.f32 0.044715, %v17370_v45  ;;  %v5388_v11 = vmul.f32 0.044715, %v17375_v0  ;;  %v5401_v58 = vmul.f32 %v5385_v7, %v17367_v33 }
0x22f8   :  { %v5387_v42 = vmul.f32 0.044715, %v17382_v34  ;;  %v5389_v4 = vmul.f32 0.044715, %v17385_v23  ;;  %v5423_v1 = vadd.f32 %v5407_v47, %v17324_v40  ;;  %v5364_v31 = vmul.f32 0.5, %v17328_v17 }
0x22f9   :  { %v5414_v3 = vmul.f32 %v5398_v5, %v17350_v46  ;;  %v5400_v29 = vmul.f32 %v5384_v6, %v17356_v22  ;;  %v5427_v8 = vadd.f32 %v5411_v35, %v17331_v24  ;;  %v5415_v25 = vmul.f32 %v5399_v50, %v17361_v37 }
0x22fa   :  { %v5403_v48 = vmul.f32 %v5387_v42, %v17382_v34  ;;  %v5405_v12 = vmul.f32 %v5389_v4, %v17385_v23  ;;  %v5439_v18 = vmul.f32 0.7978846, %v5423_v1  ;;  %v5402_v19 = vmul.f32 %v5386_v32, %v17370_v45 }
0x22fb   :  { %v5443_v2 = vmul.f32 0.7978846, %v5427_v8  ;;  %v5425_v51 = vadd.f32 %v5409_v26, %v17334_v52  ;;  %v5429_v17 = vadd.f32 %v5413_v13, %v17337_v59  ;;  %v5417_v9 = vmul.f32 %v5401_v58, %v17367_v33 }
0x22fc   :  { %v5404_v49 = vmul.f32 %v5388_v11, %v17375_v0  ;;  %v5419_v57 = vmul.f32 %v5403_v48, %v17382_v34  ;;  %15688 = vtanh.f32 %v5439_v18  ;;  %v5416_v16 = vmul.f32 %v5400_v29, %v17356_v22 }
0x22fd   :  { %v15681_v28 = vpop.eup %15680  ;;  %15690 = vtanh.f32 %v5443_v2  ;;  %v5441_v14 = vmul.f32 0.7978846, %v5425_v51  ;;  %v5445_v36 = vmul.f32 0.7978846, %v5429_v17  ;;  %v5421_v21 = vmul.f32 %v5405_v12, %v17385_v23 }
0x22fe   :  { %v15683_v55 = vpop.eup %15682  ;;  %v5470_v15 = vadd.f32 1.0, %v15681_v28  ;;  %v5431_v47 = vadd.f32 %v5415_v25, %v17361_v37  ;;  %v5418_v5 = vmul.f32 %v5402_v19, %v17370_v45  ;;  %v5435_v7 = vadd.f32 %v5419_v57, %v17382_v34 }
0x22ff   :  { %v15685_v63 = vpop.eup %15684  ;;  %v5472_v44 = vadd.f32 1.0, %v15683_v55  ;;  %15692 = vtanh.f32 %v5441_v14  ;;  %v5420_v50 = vmul.f32 %v5404_v49, %v17375_v0  ;;  %v5433_v42 = vadd.f32 %v5417_v9, %v17367_v33 }
0x2300   :  { %v15687_v35 = vpop.eup %15686  ;;  %v5474_v6 = vadd.f32 1.0, %v15685_v63  ;;  %15694 = vtanh.f32 %v5445_v36  ;;  %v5447_v13 = vmul.f32 0.7978846, %v5431_v47  ;;  %v5486_v32 = vmul.f32 %v5470_v15, %v17339_v20 }
0x2301   :  { %v5476_v26 = vadd.f32 1.0, %v15687_v35  ;;  %v5451_v58 = vmul.f32 0.7978846, %v5435_v7  ;;  %v5488_v4 = vmul.f32 %v5472_v44, %v17344_v54  ;;  %v5437_v29 = vadd.f32 %v5421_v21, %v17385_v23 }
0x2302   :  { %v5490_v11 = vmul.f32 %v5474_v6, %v5362_v43  ;;  %15696 = vtanh.f32 %v5447_v13  ;;  %v5449_v25 = vmul.f32 0.7978846, %v5433_v42  ;;  %v5430_v18 = vadd.f32 %v5414_v3, %v17350_v46 }
0x2303   :  { %v5492_v1 = vmul.f32 %v5476_v26, %v5364_v31  ;;  %15698 = vtanh.f32 %v5451_v58  ;;  %v5453_v12 = vmul.f32 0.7978846, %v5437_v29  ;;  %v5434_v28 = vadd.f32 %v5418_v5, %v17370_v45 }
0x2304   :  { %v5502_v8 = vpack.c.bf16 %v5490_v11, %v5486_v32  ;;  %15700 = vtanh.f32 %v5449_v25  ;;  %v5432_v20 = vadd.f32 %v5416_v16, %v17356_v22  ;;  %v5446_v19 = vmul.f32 0.7978846, %v5430_v18 }
0x2305   :  { %v5504_v48 = vpack.c.bf16 %v5492_v1, %v5488_v4  ;;  %15702 = vtanh.f32 %v5453_v12  ;;  %v5450_v54 = vmul.f32 0.7978846, %v5434_v28  ;;  %v5436_v31 = vadd.f32 %v5420_v50, %v17375_v0 }
0x2306   :  { %v15689_v43 = vpop.eup %15688  ;;  %v5359_v51 = vmul.f32 0.5, %v17324_v40  ;;  %v5448_v55 = vmul.f32 0.7978846, %v5432_v20  ;;  %v5363_v9 = vmul.f32 0.5, %v17331_v24  ;;  %15704 = vtanh.f32 %v5446_v19 }
0x2307   :  { %v15691_v2 = vpop.eup %15690  ;;  %v5471_v17 = vadd.f32 1.0, %v15689_v43  ;;  %v5452_v3 = vmul.f32 0.7978846, %v5436_v31  ;;  %15706 = vtanh.f32 %v5450_v54  ;;  %v5361_v16 = vmul.f32 0.5, %v17334_v52 }
0x2308   :  { %v5475_v49 = vadd.f32 1.0, %v15691_v2  ;;  %15708 = vtanh.f32 %v5448_v55  ;;  %v5365_v21 = vmul.f32 0.5, %v17337_v59  ;;  %v5367_v7 = vmul.f32 0.5, %v17361_v37 }
0x2309   :  { %v15693_v57 = vpop.eup %15692  ;;  %v5487_v36 = vmul.f32 %v5471_v17, %v5359_v51  ;;  %15710 = vtanh.f32 %v5452_v3  ;;  %v5371_v50 = vmul.f32 0.5, %v17382_v34  ;;  %v5369_v42 = vmul.f32 0.5, %v17367_v33 }
0x230a   :  { %v15695_v14 = vpop.eup %15694  ;;  %v5491_v15 = vmul.f32 %v5475_v49, %v5363_v9  ;;  %v5473_v63 = vadd.f32 1.0, %v15693_v57  ;;  %v5373_v4 = vmul.f32 0.5, %v17385_v23  ;;  %v5370_v20 = vmul.f32 0.5, %v17370_v45  ;;  %v12990_v49 = vld [vmem:[%s18736_s30 + $0x1] ss:$0 sm:$0xff] }
0x230b   :  { %v5477_v44 = vadd.f32 1.0, %v15695_v14  ;;  %v5368_v33 = vmul.f32 0.5, %v17356_v22  ;;  %v5372_v2 = vmul.f32 0.5, %v17375_v0 }
0x230c   :  { %v15697_v40 = vpop.eup %15696  ;;  %v5503_v47 = vpack.c.bf16 %v5491_v15, %v5487_v36  ;;  %v5489_v24 = vmul.f32 %v5473_v63, %v5361_v16 }
0x230d   :  { %v15699_v35 = vpop.eup %15698  ;;  %v5493_v5 = vmul.f32 %v5477_v44, %v5365_v21  ;;  %v5479_v6 = vadd.f32 1.0, %v15697_v40 }
0x230e   :  { %5740 = vmatprep.mubr.bf16.mxu0 %v5503_v47  ;;  %v5483_v26 = vadd.f32 1.0, %v15699_v35  ;;  %v15701_v13 = vpop.eup %15700 }
0x230f   :  { %v5505_v32 = vpack.c.bf16 %v5493_v5, %v5489_v24  ;;  %5741 = vmatmul.mubr.bf16.vlgmr.msra.gmra.mrb[120].mxu0 %v5502_v8  ;;  %v15703_v52 = vpop.eup %15702  ;;  %v5495_v11 = vmul.f32 %v5479_v6, %v5367_v7  ;;  %v5481_v58 = vadd.f32 1.0, %v15701_v13  ;;  %v5366_v8 = vmul.f32 0.5, %v17350_v46 }
0x2310   :  { %v5499_v59 = vmul.f32 %v5483_v26, %v5371_v50  ;;  %v5485_v1 = vadd.f32 1.0, %v15703_v52  ;;  %v15705_v29 = vpop.eup %15704 }
0x2311   :  { %5789 = vmatprep.mubr.bf16.mxu1 %v5505_v32  ;;  %v15707_v37 = vpop.eup %15706  ;;  %v5497_v12 = vmul.f32 %v5481_v58, %v5369_v42  ;;  %v5478_v18 = vadd.f32 1.0, %v15705_v29 }
0x2312   :  { %5790 = vmatmul.mubr.bf16.vlgmr.msra.gmra.mrb[112].mxu1 %v5504_v48  ;;  %v5507_v25 = vpack.c.bf16 %v5499_v59, %v5495_v11  ;;  %v5501_v34 = vmul.f32 %v5485_v1, %v5373_v4  ;;  %v15709_v28 = vpop.eup %15708  ;;  %v5482_v43 = vadd.f32 1.0, %v15707_v37 }
0x2313   :  { %v15711_v19 = vpop.eup %15710  ;;  %v5480_v23 = vadd.f32 1.0, %v15709_v28  ;;  %v5494_v31 = vmul.f32 %v5478_v18, %v5366_v8  ;;  %v15195_v18 = vld [vmem:[%s16110_s12 + $0x184] ss:$12 sps:$4 sm:$0xff]   ;;  %v15198_v28 = vld [vmem:[%s16110_s12 + $0x19c] ss:$12 sps:$4 sm:$0xff]  }
0x2314   :  { %5748 = vmatprep.mubr.bf16.mxu0 %v5507_v25  ;;  %v5509_v54 = vpack.c.bf16 %v5501_v34, %v5497_v12  ;;  %v5498_v48 = vmul.f32 %v5482_v43, %v5370_v20  ;;  %v5484_v51 = vadd.f32 1.0, %v15711_v19  ;;  %v15193_v34 = vld [vmem:[%s16110_s12 + $0x180] ss:$12 sps:$4 sm:$0xff]   ;;  %6184 = vmatprep.subr.bf16.mxu0 %v15195_v18  ;;  %v15196_v8 = vld [vmem:[%s16110_s12 + $0x198] ss:$12 sps:$4 sm:$0xff]  }
0x2315   :  { %v5496_v55 = vmul.f32 %v5480_v23, %v5368_v33  ;;  %6185 = vmatpush1.bf16.msra.mxu0 %v15193_v34  ;;  %v13024_v18 = vld [vmem:[%s18738_s7 + $0x1] ss:$0 sm:$0xff] }
0x2316   :  { %5797 = vmatprep.mubr.bf16.mxu1 %v5509_v54  ;;  %v5506_v17 = vpack.c.bf16 %v5498_v48, %v5494_v31  ;;  %v5500_v9 = vmul.f32 %v5484_v51, %v5372_v2  ;;  %6186 = vmatprep.subr.bf16.mxu0 %v15198_v28 }
0x2318   :  { %5749 = vmatmul.mubr.bf16.gmra.mrb[124].mxu0 %v5506_v17  ;;  %v5508_v46 = vpack.c.bf16 %v5500_v9, %v5496_v55 }
0x2319   :  { %6216 = vmatprep.mubr.bf16.mxu0 %v16023_v60  ;;  %6187 = vmatpush1.bf16.msra.mxu0 %v15196_v8 }
0x231a   :  { %5798 = vmatmul.mubr.bf16.gmra.mrb[116].mxu1 %v5508_v46 }
0x23e2   :  { %v13706_v45 = vpop.f32.mrb[120].mxu0 }
0x23e3   :  { %v13707_v3 = vpop.f32.mrb[121].mxu0 }
0x23e4   :  { %v13708_v57 = vadd.f32 %v13707_v3, %v13706_v45  ;;  %v13709_v22 = vpop.f32.mrb[122].mxu0  ;;  %v15201_v45 = vld [vmem:[%s16110_s12 + $0x1b4] ss:$12 sps:$4 sm:$0xff]   ;;  %v15199_v3 = vld [vmem:[%s16110_s12 + $0x1b0] ss:$12 sps:$4 sm:$0xff]  }
0x23e5   :  { %v13734_v14 = vpop.f32.mrb[112].mxu1  ;;  %v13710_v36 = vpop.f32.mrb[123].mxu0  ;;  %6188 = vmatprep.subr.bf16.mxu0 %v15201_v45 }
0x23e6   :  { %v5743_v15 = vadd.f32 %v13708_v57, %v12990_v49  ;;  %v13735_v63 = vpop.f32.mrb[113].mxu1  ;;  %v13711_v0 = vadd.f32 %v13710_v36, %v13709_v22  ;;  %6189 = vmatpush1.bf16.msra.mxu0 %v15199_v3  ;;  %v15205_v57 = vld [vmem:[%s16110_s12 + $0x1cc] ss:$12 sps:$4 sm:$0xff]  }
0x23e7   :  { %v13736_v16 = vadd.f32 %v13735_v63, %v13734_v14  ;;  %v13737_v21 = vpop.f32.mrb[114].mxu1  ;;  %v15206_v22 = vld [vmem:[%s16110_s12 + $0x1a0] ss:$12 sps:$4 sm:$0xff]   ;;  %v15203_v14 = vld [vmem:[%s16110_s12 + $0x1c8] ss:$12 sps:$4 sm:$0xff]   ;;  %6190 = vmatprep.subr.bf16.mxu0 %v15205_v57 }
0x23e8   :  { %v5746_v44 = vadd.f32 %v13711_v0, %v12990_v49  ;;  %v13738_v40 = vpop.f32.mrb[115].mxu1  ;;  %v15207_v36 = vld [vmem:[%s16110_s12 + $0x1e0] ss:$12 sps:$4 sm:$0xff]   ;;  %v15210_v63 = vld [vmem:[%s16110_s12 + $0x1b8] ss:$12 sps:$4 sm:$0xff]  }
0x23e9   :  { %v5792_v47 = vadd.f32 %v13736_v16, %v5743_v15  ;;  %v13739_v35 = vadd.f32 %v13738_v40, %v13737_v21  ;;  %v15209_v15 = vld [vmem:[%s16110_s12 + $0x1e4] ss:$12 sps:$4 sm:$0xff]   ;;  %v15213_v0 = vld [vmem:[%s16110_s12 + $0x1fc] ss:$12 sps:$4 sm:$0xff]  }
0x23ea   :  { %6191 = vmatpush1.bf16.msra.mxu0 %v15203_v14  ;;  %v15214_v16 = vld [vmem:[%s16110_s12 + $0x1d0] ss:$12 sps:$4 sm:$0xff]   ;;  %v15211_v21 = vld [vmem:[%s16110_s12 + $0x1f8] ss:$12 sps:$4 sm:$0xff]   ;;  %v15218_v40 = vld [vmem:[%s16110_s12 + $0x1e8] ss:$12 sps:$4 sm:$0xff]  }
0x23eb   :  { %v5795_v24 = vadd.f32 %v13739_v35, %v5746_v44  ;;  %v5806_v5 = vadd.f32 %v5792_v47, %v17260_v62  ;;  %v13712_v6 = vpop.f32.mrb[124].mxu0  ;;  %6192 = vmatprep.subr.bf16.mxu0 %v15209_v15  ;;  %v15217_v44 = vld [vmem:[%s16110_s12 + $0x214] ss:$12 sps:$4 sm:$0xff]   ;;  %v15215_v47 = vld [vmem:[%s16110_s12 + $0x210] ss:$12 sps:$4 sm:$0xff]  }
0x23ec   :  { %v13713_v50 = vpop.f32.mrb[125].mxu0  ;;  %v15221_v35 = vld [vmem:[%s16110_s12 + $0x22c] ss:$12 sps:$4 sm:$0xff]  }
0x23ed   :  { %5810 = vadd.xlane.f32.xlu0 %v5806_v5  ;;  %v5807_v7 = vadd.f32 %v5795_v24, %v17262_v61  ;;  %v13740_v26 = vpop.f32.mrb[116].mxu1  ;;  %v13714_v13 = vadd.f32 %v13713_v50, %v13712_v6  ;;  %v13715_v32 = vpop.f32.mrb[126].mxu0  ;;  %v15222_v24 = vld [vmem:[%s16110_s12 + $0x200] ss:$12 sps:$4 sm:$0xff]   ;;  %v15223_v6 = vld [vmem:[%s16110_s12 + $0x218] ss:$12 sps:$4 sm:$0xff]  }
0x23ee   :  { %v13741_v52 = vpop.f32.mrb[117].mxu1  ;;  %v13716_v11 = vpop.f32.mrb[127].mxu0  ;;  %6193 = vmatpush1.bf16.msra.mxu0 %v15207_v36 }
0x23ef   :  { %5812 = vadd.xlane.f32.xlu1 %v5807_v7  ;;  %v5751_v59 = vadd.f32 %v13714_v13, %v12990_v49  ;;  %v13742_v58 = vadd.f32 %v13741_v52, %v13740_v26  ;;  %v13743_v42 = vpop.f32.mrb[118].mxu1  ;;  %v13717_v4 = vadd.f32 %v13716_v11, %v13715_v32  ;;  %6194 = vmatprep.subr.bf16.mxu0 %v15213_v0 }
0x23f0   :  { %v13744_v62 = vpop.f32.mrb[119].mxu1 }
0x23f1   :  { %v5800_v1 = vadd.f32 %v13742_v58, %v5751_v59  ;;  %v5754_v29 = vadd.f32 %v13717_v4, %v12990_v49  ;;  %v13745_v25 = vadd.f32 %v13744_v62, %v13743_v42  ;;  %v15202_v49 = vld [vmem:[%s16110_s12 + $0x188] ss:$12 sps:$4 sm:$0xff]  }
0x23f2   :  { %14362 = vmatprep.subr.bf16.mxu1 %v15202_v49  ;;  %6195 = vmatpush1.bf16.msra.mxu0 %v15211_v21 }
0x23f3   :  { %v5803_v61 = vadd.f32 %v13745_v25, %v5754_v29  ;;  %v5808_v37 = vadd.f32 %v5800_v1, %v17270_v53  ;;  %14363 = vmatpush3.bf16.msra.mxu1 %v15202_v49  ;;  %6196 = vmatprep.subr.bf16.mxu0 %v15217_v44  ;;  %v13023_v29 = vld [vmem:[%s18737_s6 + $0x1] ss:$0 sm:$0xff] }
0x23f4   :  { %14364 = vmatprep.subr.bf16.mxu1 %v15206_v22 }
0x23f5   :  { %5814 = vadd.xlane.f32.xlu0 %v5808_v37  ;;  %v5809_v12 = vadd.f32 %v5803_v61, %v17272_v41 }
0x23f6   :  { %6197 = vmatpush1.bf16.msra.mxu0 %v15215_v47 }
0x23f7   :  { %5816 = vadd.xlane.f32.xlu1 %v5809_v12  ;;  %14365 = vmatpush3.bf16.msra.mxu1 %v15206_v22 }
0x23f8   :  { %14366 = vmatprep.subr.bf16.mxu1 %v15210_v63  ;;  %6198 = vmatprep.subr.bf16.mxu0 %v15221_v35 }
0x23fb   :  { %14367 = vmatpush3.bf16.msra.mxu1 %v15210_v63 }
0x23fc   :  { %14368 = vmatprep.subr.bf16.mxu1 %v15214_v16 }
0x23ff   :  { %14369 = vmatpush3.bf16.msra.mxu1 %v15214_v16 }
0x2400   :  { %14370 = vmatprep.subr.bf16.mxu1 %v15218_v40 }
0x2403   :  { %14371 = vmatpush3.bf16.msra.mxu1 %v15218_v40 }
0x2404   :  { %14372 = vmatprep.subr.bf16.mxu1 %v15222_v24 }
0x2407   :  { %14373 = vmatpush3.bf16.msra.mxu1 %v15222_v24 }
0x2408   :  { %14374 = vmatprep.subr.bf16.mxu1 %v15223_v6 }
0x240b   :  { %14375 = vmatpush3.bf16.msra.mxu1 %v15223_v6 }
0x247a   :  { %v5811_v20 = vpop.xlane.xlu0 %5810 }
0x247b   :  { %v5818_v43 = vmul.f32 0.0078125, %v5811_v20 }
0x247c   :  { %v5813_v19 = vpop.xlane.xlu1 %5812 }
0x247d   :  { %v17444_v54 = vsub.f32 %v5806_v5, %v5818_v43  ;;  %v5819_v33 = vmul.f32 0.0078125, %v5813_v19  ;;  %v15219_v5 = vld [vmem:[%s16110_s12 + $0x228] ss:$12 sps:$4 sm:$0xff]  }
0x247e   :  { %6199 = vmatpush1.bf16.msra.mxu0 %v15219_v5 }
0x247f   :  { %v17446_v53 = vsub.f32 %v5807_v7, %v5819_v33  ;;  %v5826_v41 = vmul.f32 %v17444_v54, %v17444_v54  ;;  %v15224_v7 = vld [vmem:[%s16110_s12 + $0x230] ss:$12 sps:$4 sm:$0xff]   ;;  %14382 = vmatprep.subr.bf16.mxu0 %v16021_v27  ;;  %s18739_s12 = sld [smem:[#allocation21_spill]] }
0x2480   :  { %14376 = vmatprep.subr.bf16.mxu1 %v15224_v7 }
0x2481   :  { %5830 = vadd.xlane.f32.xlu0 %v5826_v41  ;;  %v5827_v23 = vmul.f32 %v17446_v53, %v17446_v53  ;;  %14377 = vmatpush3.bf16.msra.mxu1 %v15224_v7 }
0x2482   :  { %v5815_v31 = vpop.xlane.xlu0 %5814  ;;  %14388 = vmatprep.subr.bf16.mxu1 %v16021_v27 }
0x2483   :  { %5832 = vadd.xlane.f32.xlu1 %v5827_v23  ;;  %v5820_v48 = vmul.f32 0.0078125, %v5815_v31 }
0x2484   :  { %v5817_v2 = vpop.xlane.xlu1 %5816 }
0x2485   :  { %v17452_v51 = vsub.f32 %v5808_v37, %v5820_v48  ;;  %v5821_v17 = vmul.f32 0.0078125, %v5817_v2 }
0x2487   :  { %v17454_v55 = vsub.f32 %v5809_v12, %v5821_v17  ;;  %v5828_v9 = vmul.f32 %v17452_v51, %v17452_v51 }
0x2489   :  { %5834 = vadd.xlane.f32.xlu0 %v5828_v9  ;;  %v5829_v46 = vmul.f32 %v17454_v55, %v17454_v55 }
0x248b   :  { %5836 = vadd.xlane.f32.xlu1 %v5829_v46 }
0x250e   :  { %v5831_v50 = vpop.xlane.xlu0 %5830 }
0x250f   :  { %v5838_v26 = vmul.f32 0.0078125, %v5831_v50 }
0x2510   :  { %v5833_v13 = vpop.xlane.xlu1 %5832 }
0x2511   :  { %v5842_v32 = vadd.f32 1e-12, %v5838_v26  ;;  %v5839_v52 = vmul.f32 0.0078125, %v5833_v13 }
0x2513   :  { %15712 = vrsqrt.f32 %v5842_v32  ;;  %v5843_v11 = vadd.f32 1e-12, %v5839_v52 }
0x2515   :  { %15714 = vrsqrt.f32 %v5843_v11 }
0x2516   :  { %v5835_v59 = vpop.xlane.xlu0 %5834 }
0x2517   :  { %v5840_v58 = vmul.f32 0.0078125, %v5835_v59 }
0x2518   :  { %v5837_v42 = vpop.xlane.xlu1 %5836 }
0x2519   :  { %v5844_v4 = vadd.f32 1e-12, %v5840_v58  ;;  %v5841_v62 = vmul.f32 0.0078125, %v5837_v42 }
0x251b   :  { %15716 = vrsqrt.f32 %v5844_v4  ;;  %v5845_v25 = vadd.f32 1e-12, %v5841_v62 }
0x251d   :  { %v15713_v1 = vpop.eup %15712  ;;  %15718 = vrsqrt.f32 %v5845_v25 }
0x251e   :  { %v5850_v61 = vmul.f32 %v15713_v1, %v17444_v54 }
0x251f   :  { %v15715_v37 = vpop.eup %15714 }
0x2520   :  { %v5860_v12 = vmul.f32 %v13023_v29, %v5850_v61  ;;  %v5851_v34 = vmul.f32 %v15715_v37, %v17446_v53 }
0x2522   :  { %v5861_v28 = vmul.f32 %v13023_v29, %v5851_v34  ;;  %v17486_v8 = vadd.f32 %v13024_v18, %v5860_v12 }
0x2524   :  { %v17488_v20 = vadd.f32 %v13024_v18, %v5861_v28  ;;  %v17540_v28 = vld [vmem:[%s18728_s5 + $0x1] ss:$0 sm:$0xff] }
0x2525   :  { %v15717_v19 = vpop.eup %15716 }
0x2526   :  { %v6038_v43 = vpack.c.bf16 %v17488_v20, %v17486_v8  ;;  %v5852_v54 = vmul.f32 %v15717_v19, %v17452_v51  ;;  %v13057_v51 = vld [vmem:[%s18727_s0 + $0x6] sm:$0x7]  ;;  %s18751_s0 = sld [smem:[#allocation32_spill]] }
0x2527   :  { %v15719_v33 = vpop.eup %15718  ;;  %v6044_v17 = vrot.slane %v13057_v51, %v16448_v30  ;;  %v6048_v9 = vrot.slane %v13057_v51, %v16452_v38  ;;  %v6052_v0 = vrot.slane %v13057_v51, %v16455_v39 }
0x2528   :  { %6217 = vmatmul.mubr.bf16.vlgmr.msra.gmra.mrb[128].mxu0 %v6038_v43  ;;  %14378 = vmatprep.mubr.bf16.mxu1 %v6038_v43  ;;  %v5853_v53 = vmul.f32 %v15719_v33, %v17454_v55  ;;  %v5862_v41 = vmul.f32 %v13023_v29, %v5852_v54 }
0x2529   :  { %6226 = vmatprep.mubr.bf16.mxu0 %v16023_v60 }
0x252a   :  { %v5863_v23 = vmul.f32 %v13023_v29, %v5853_v53  ;;  %v17495_v31 = vadd.f32 %v13024_v18, %v5862_v41 }
0x252c   :  { %v17497_v48 = vadd.f32 %v13024_v18, %v5863_v23 }
0x252e   :  { %v6039_v2 = vpack.c.bf16 %v17497_v48, %v17495_v31 }
0x2530   :  { %6227 = vmatmul.mubr.bf16.gmra.mrb[132].mxu0 %v6039_v2  ;;  %14379 = vmatmul.mubr.bf16.vlgmr.msra.gmra.mrb[120].mxu1 %v6039_v2 }
0x2531   :  { %14384 = vmatprep.mubr.msk.bf16.mxu0 %vm16022_vm1, %v16021_v27  ;;  %14390 = vmatprep.mubr.msk.bf16.mxu1 %vm16022_vm1, %v16021_v27 }
0x25fb   :  { %v6218_v55 = vpop.f32.mrb[128].mxu0 }
0x25fc   :  { %v6220_v46 = vpop.f32.mrb[129].mxu0  ;;  %v6219_v49 = vadd.f32 %v6218_v55, %v6044_v17 }
0x25fd   :  { %v6222_v45 = vpop.f32.mrb[130].mxu0  ;;  %v6221_v22 = vadd.f32 %v6220_v46, %v6048_v9 }
0x25fe   :  { %v6223_v3 = vadd.f32 %v6222_v45, %v6044_v17  ;;  %v6224_v57 = vpop.f32.mrb[131].mxu0 }
0x25ff   :  { %v6225_v14 = vadd.f32 %v6224_v57, %v6048_v9 }
0x2600   :  { %v17508_v36 = vpack.c.bf16 %v6223_v3, %v6219_v49 }
0x2601   :  { %v17510_v15 = vpack.c.bf16 %v6225_v14, %v6221_v22  ;;  %v17553_v14 = vld [vmem:[%s18728_s5] ss:$0 sm:$0xff] }
0x2603   :  { %v6296_v63 = vsel %vm308_vm0, %v17510_v15, 0  ;;  %v6228_v16 = vpop.f32.mrb[132].mxu0  ;;  %v14380_v21 = vpop.f32.mrb[120].mxu1 }
0x2604   :  { %14383 = vmatpush3.bf16.xpose.msra.mxu0 %v6296_v63  ;;  %v6230_v44 = vpop.f32.mrb[133].mxu0  ;;  %v6271_v40 = vpop.f32.mrb[121].mxu1  ;;  %v6229_v24 = vadd.f32 %v6228_v16, %v6044_v17  ;;  %v6280_v5 = vadd.f32 %v14380_v21, %v6052_v0 }
0x2605   :  { %14394 = vmatprep.subr.bf16.mxu0 %v16021_v27  ;;  %v6232_v47 = vpop.f32.mrb[134].mxu0  ;;  %v14381_v35 = vpop.f32.mrb[122].mxu1  ;;  %v6231_v13 = vadd.f32 %v6230_v44, %v6048_v9  ;;  %v6272_v32 = vadd.f32 %v6271_v40, %v6052_v0 }
0x2606   :  { %v6233_v6 = vadd.f32 %v6232_v47, %v6044_v17  ;;  %v6283_v7 = vadd.f32 %v14381_v35, %v6052_v0  ;;  %v6234_v50 = vpop.f32.mrb[135].mxu0  ;;  %v6274_v26 = vpop.f32.mrb[123].mxu1 }
0x2607   :  { %v6235_v52 = vadd.f32 %v6234_v50, %v6048_v9  ;;  %v6275_v11 = vadd.f32 %v6274_v26, %v6052_v0 }
0x2608   :  { %v17516_v59 = vpack.c.bf16 %v6233_v6, %v6229_v24  ;;  %v17518_v58 = vpack.c.bf16 %v6283_v7, %v6280_v5 }
0x2609   :  { %v17520_v42 = vpack.c.bf16 %v6235_v52, %v6231_v13  ;;  %v17522_v4 = vpack.c.bf16 %v6275_v11, %v6272_v32 }
0x260b   :  { %14385 = vmatmul.mubr.msk.bf16.vlgmr.msra.gmra.mrb[136].mxu0 %vm308_vm0, %v17508_v36  ;;  %v6343_v62 = vsel %vm308_vm0, %v17520_v42, 0 }
0x260c   :  { %14396 = vmatprep.mubr.msk.bf16.mxu0 %vm16022_vm1, %v16021_v27  ;;  %14395 = vmatpush3.bf16.msra.mxu0 %v17522_v4 }
0x260d   :  { %14389 = vmatpush3.bf16.xpose.msra.mxu1 %v6343_v62  ;;  %14406 = vmatprep.subr.bf16.mxu0 %v16021_v27 }
0x260e   :  { %14400 = vmatprep.subr.bf16.mxu1 %v16021_v27 }
0x2614   :  { %14391 = vmatmul.mubr.msk.bf16.vlgmr.msra.gmra.mrb[124].mxu1 %vm308_vm0, %v17516_v59 }
0x2615   :  { %14401 = vmatpush3.bf16.msra.mxu1 %v17518_v58  ;;  %14402 = vmatprep.mubr.msk.bf16.mxu1 %vm16022_vm1, %v16021_v27 }
0x2616   :  { %14412 = vmatprep.subr.bf16.mxu1 %v16021_v27 }
0x26de   :  { %v6332_v1 = vpop.f32.mrb[136].mxu0 }
0x26df   :  { %v14386_v29 = vpop.f32.mrb[137].mxu0  ;;  %v6386_v22 = vmul.f32 0.17677669, %v6332_v1 }
0x26e0   :  { %v6335_v25 = vpop.f32.mrb[138].mxu0 }
0x26e1   :  { %v14387_v61 = vpop.f32.mrb[139].mxu0  ;;  %v6387_v57 = vmul.f32 0.17677669, %v6335_v25  ;;  %v6390_v0 = vadd.f32 %v17553_v14, %v6386_v22 }
0x26e3   :  { %v6391_v63 = vadd.f32 %v17553_v14, %v6387_v57  ;;  %v6394_v21 = vsel %vm446_vm2, %v6390_v0, -inf }
0x26e5   :  { %v6397_v16 = vsel %vm446_vm2, %v6391_v63, -inf }
0x26e7   :  { %v6379_v37 = vpop.f32.mrb[124].mxu1 }
0x26e8   :  { %v6388_v12 = vmul.f32 0.17677669, %v6379_v37  ;;  %v14392_v34 = vpop.f32.mrb[125].mxu1 }
0x26e9   :  { %v6382_v18 = vpop.f32.mrb[126].mxu1 }
0x26ea   :  { %v6392_v43 = vadd.f32 %v17540_v28, %v6388_v12  ;;  %v6389_v19 = vmul.f32 0.17677669, %v6382_v18  ;;  %v14393_v54 = vpop.f32.mrb[127].mxu1 }
0x26ec   :  { %v6393_v33 = vadd.f32 %v17540_v28, %v6389_v19  ;;  %v6400_v53 = vsel %vm446_vm2, %v6392_v43, -inf }
0x26ed   :  { %6401 = vmax.xlane.f32.xlu0 %v6400_v53 }
0x26ee   :  { %v6403_v41 = vsel %vm446_vm2, %v6393_v33, -inf }
0x26ef   :  { %6404 = vmax.xlane.f32.xlu1 %v6403_v41 }
0x277a   :  { %v6402_v23 = vpop.xlane.xlu0 %6401 }
0x277b   :  { %v6408_v2 = vsub.f32 %v6392_v43, %v6402_v23 }
0x277c   :  { %v6405_v51 = vpop.xlane.xlu1 %6404 }
0x277d   :  { %v6414_v17 = vmul.f32 1.442695, %v6408_v2  ;;  %v6409_v55 = vsub.f32 %v6393_v33, %v6405_v51 }
0x277f   :  { %15720 = vpow2.f32 %v6414_v17  ;;  %v6416_v9 = vmul.f32 1.442695, %v6409_v55 }
0x2781   :  { %15722 = vpow2.f32 %v6416_v9 }
0x2789   :  { %v15721_v46 = vpop.eup %15720 }
0x278a   :  { %v6424_v45 = vsel %vm446_vm2, %v15721_v46, 0.0 }
0x278b   :  { %v15723_v49 = vpop.eup %15722  ;;  %6425 = vadd.xlane.f32.xlu0 %v6424_v45 }
0x278c   :  { %v6427_v3 = vsel %vm446_vm2, %v15723_v49, 0.0 }
0x278d   :  { %6428 = vadd.xlane.f32.xlu1 %v6427_v3 }
0x279e   :  { %6584 = vrot.lane.b32.xlu1 %v17516_v59, %s16025_s9 }
0x27a1   :  { %6587 = vrot.lane.b32.xlu0 %v17520_v42, %s16025_s9 }
0x27c0   :  { %6398 = vmax.xlane.f32.xlu0 %v6397_v16 }
0x27c2   :  { %6395 = vmax.xlane.f32.xlu1 %v6394_v21 }
0x2818   :  { %v6426_v44 = vpop.xlane.xlu0 %6425 }
0x2819   :  { %15724 = vrcp.f32 %v6426_v44 }
0x281a   :  { %v6429_v40 = vpop.xlane.xlu1 %6428 }
0x281b   :  { %15726 = vrcp.f32 %v6429_v40 }
0x281c   :  { %v6588_v6 = vpop.permute.xlu0 %6587 }
0x281d   :  { %v6593_v50 = vsel %vm308_vm0, %v6588_v6, 0 }
0x281e   :  { %v6585_v26 = vpop.permute.xlu1 %6584 }
0x2823   :  { %v15725_v47 = vpop.eup %15724 }
0x2824   :  { %v6436_v24 = vmul.f32 %v15725_v47, %v15721_v46 }
0x2825   :  { %v15727_v35 = vpop.eup %15726 }
0x2826   :  { %v6437_v5 = vmul.f32 %v15727_v35, %v15723_v49 }
0x2828   :  { %v6439_v7 = vpack.c.bf16 %v6437_v5, %v6436_v24 }
0x282a   :  { %14403 = vmatmul.mubr.msk.bf16.vlgmr.msra.gmra.mrb[128].mxu1 %vm446_vm2, %v6439_v7 }
0x282b   :  { %14413 = vmatpush3.bf16.xpose.msra.mxu1 %v6593_v50  ;;  %14414 = vmatprep.mubr.msk.bf16.mxu1 %vm16022_vm1, %v16021_v27 }
0x282c   :  { %14424 = vmatprep.subr.bf16.mxu1 %v16021_v27 }
0x2832   :  { %14415 = vmatmul.mubr.msk.bf16.vlgmr.msra.gmra.mrb[132].mxu1 %vm308_vm0, %v6585_v26 }
0x2833   :  { %14426 = vmatprep.mubr.msk.bf16.mxu1 %vm16022_vm1, %v16021_v27 }
0x284d   :  { %v6399_v13 = vpop.xlane.xlu0 %6398 }
0x284e   :  { %v6407_v32 = vsub.f32 %v6391_v63, %v6399_v13 }
0x284f   :  { %v6396_v52 = vpop.xlane.xlu1 %6395 }
0x2850   :  { %v6412_v11 = vmul.f32 1.442695, %v6407_v32  ;;  %v6406_v62 = vsub.f32 %v6390_v0, %v6396_v52 }
0x2852   :  { %15728 = vpow2.f32 %v6412_v11  ;;  %v6410_v1 = vmul.f32 1.442695, %v6406_v62 }
0x2854   :  { %15730 = vpow2.f32 %v6410_v1 }
0x285c   :  { %v15729_v29 = vpop.eup %15728 }
0x285d   :  { %v6421_v25 = vsel %vm446_vm2, %v15729_v29, 0.0 }
0x285e   :  { %v15731_v61 = vpop.eup %15730  ;;  %6422 = vadd.xlane.f32.xlu1 %v6421_v25 }
0x285f   :  { %v6418_v37 = vsel %vm446_vm2, %v15731_v61, 0.0 }
0x2860   :  { %6419 = vadd.xlane.f32.xlu0 %v6418_v37 }
0x286f   :  { %6531 = vrot.lane.b32.xlu1 %v17508_v36, %s16025_s9 }
0x2876   :  { %6534 = vrot.lane.b32.xlu0 %v17510_v15, %s16025_s9 }
0x28eb   :  { %v6423_v12 = vpop.xlane.xlu1 %6422 }
0x28ec   :  { %15732 = vrcp.f32 %v6423_v12 }
0x28ed   :  { %v6420_v34 = vpop.xlane.xlu0 %6419 }
0x28ee   :  { %15734 = vrcp.f32 %v6420_v34 }
0x28ef   :  { %v6532_v9 = vpop.permute.xlu1 %6531 }
0x28f1   :  { %v6535_v33 = vpop.permute.xlu0 %6534 }
0x28f2   :  { %v6540_v41 = vsel %vm308_vm0, %v6535_v33, 0 }
0x28f6   :  { %v15733_v18 = vpop.eup %15732 }
0x28f7   :  { %v6435_v19 = vmul.f32 %v15733_v18, %v15729_v29 }
0x28f8   :  { %v15735_v43 = vpop.eup %15734 }
0x28f9   :  { %v6434_v54 = vmul.f32 %v15735_v43, %v15731_v61 }
0x28fb   :  { %v6438_v53 = vpack.c.bf16 %v6435_v19, %v6434_v54 }
0x28fd   :  { %14397 = vmatmul.mubr.msk.bf16.vlgmr.msra.gmra.mrb[140].mxu0 %vm446_vm2, %v6438_v53  ;;  %v17575_v23 = vpop.f32.mrb[128].mxu1 }
0x28fe   :  { %14407 = vmatpush3.bf16.xpose.msra.mxu0 %v6540_v41  ;;  %v14404_v2 = vpop.f32.mrb[129].mxu1  ;;  %14408 = vmatprep.mubr.msk.bf16.mxu0 %vm16022_vm1, %v16021_v27 }
0x28ff   :  { %v17579_v51 = vpop.f32.mrb[130].mxu1  ;;  %14418 = vmatprep.subr.bf16.mxu0 %v16021_v27 }
0x2900   :  { %v6529_v17 = vpack.c.bf16 %v17579_v51, %v17575_v23  ;;  %v14405_v55 = vpop.f32.mrb[131].mxu1 }
0x2905   :  { %14409 = vmatmul.mubr.msk.bf16.vlgmr.msra.gmra.mrb[144].mxu0 %vm308_vm0, %v6532_v9  ;;  %v6629_v46 = vpop.f32.mrb[132].mxu1 }
0x2906   :  { %v6638_v45 = vmul.f32 0.17677669, %v6629_v46  ;;  %v14416_v49 = vpop.f32.mrb[133].mxu1  ;;  %14420 = vmatprep.mubr.msk.bf16.mxu0 %vm16022_vm1, %v16021_v27 }
0x2907   :  { %v6632_v3 = vpop.f32.mrb[134].mxu1 }
0x2908   :  { %v6642_v57 = vadd.f32 %v17540_v28, %v6638_v45  ;;  %v6639_v22 = vmul.f32 0.17677669, %v6632_v3  ;;  %v14417_v63 = vpop.f32.mrb[135].mxu1 }
0x290a   :  { %v6643_v0 = vadd.f32 %v17540_v28, %v6639_v22  ;;  %v6650_v16 = vsel %vm446_vm2, %v6642_v57, -inf }
0x290b   :  { %6651 = vmax.xlane.f32.xlu1 %v6650_v16 }
0x290c   :  { %v6653_v21 = vsel %vm446_vm2, %v6643_v0, -inf }
0x290d   :  { %6654 = vmax.xlane.f32.xlu0 %v6653_v21 }
0x291c   :  { %6924 = vrot.lane.b32.xlu1 %v17510_v15, %s16026_s17 }
0x2998   :  { %v6652_v44 = vpop.xlane.xlu1 %6651 }
0x2999   :  { %v6658_v40 = vsub.f32 %v6642_v57, %v6652_v44 }
0x299a   :  { %v6655_v47 = vpop.xlane.xlu0 %6654 }
0x299b   :  { %v6664_v35 = vmul.f32 1.442695, %v6658_v40  ;;  %v6659_v24 = vsub.f32 %v6643_v0, %v6655_v47 }
0x299c   :  { %v6925_v54 = vpop.permute.xlu1 %6924 }
0x299d   :  { %15736 = vpow2.f32 %v6664_v35  ;;  %v6666_v5 = vmul.f32 1.442695, %v6659_v24  ;;  %v6930_v3 = vsel %vm308_vm0, %v6925_v54, 0 }
0x299f   :  { %15738 = vpow2.f32 %v6666_v5 }
0x29a7   :  { %v15737_v6 = vpop.eup %15736 }
0x29a8   :  { %v6674_v7 = vsel %vm446_vm2, %v15737_v6, 0.0 }
0x29a9   :  { %v15739_v50 = vpop.eup %15738  ;;  %6675 = vadd.xlane.f32.xlu0 %v6674_v7 }
0x29aa   :  { %v6677_v26 = vsel %vm446_vm2, %v15739_v50, 0.0 }
0x29ab   :  { %6678 = vadd.xlane.f32.xlu1 %v6677_v26 }
0x29bc   :  { %6922 = vrot.lane.b32.xlu1 %v17508_v36, %s16026_s17 }
0x29bf   :  { %6739 = vrot.lane.b32.xlu0 %v17518_v58, %s16025_s9 }
0x29c0   :  { %6975 = vrot.lane.b32.xlu1 %v17520_v42, %s16026_s17 }
0x29c3   :  { %6973 = vrot.lane.b32.xlu0 %v17516_v59, %s16026_s17 }
0x29d0   :  { %v17603_v13 = vpop.f32.mrb[140].mxu0 }
0x29d1   :  { %v14398_v32 = vpop.f32.mrb[141].mxu0 }
0x29d2   :  { %v17605_v52 = vpop.f32.mrb[142].mxu0 }
0x29d3   :  { %v6528_v11 = vpack.c.bf16 %v17605_v52, %v17603_v13  ;;  %v14399_v62 = vpop.f32.mrb[143].mxu0 }
0x29d8   :  { %v6576_v1 = vpop.f32.mrb[144].mxu0 }
0x29d9   :  { %v14410_v29 = vpop.f32.mrb[145].mxu0  ;;  %v6636_v61 = vmul.f32 0.17677669, %v6576_v1 }
0x29da   :  { %v6579_v25 = vpop.f32.mrb[146].mxu0 }
0x29db   :  { %v6637_v37 = vmul.f32 0.17677669, %v6579_v25  ;;  %v14411_v12 = vpop.f32.mrb[147].mxu0  ;;  %v6640_v18 = vadd.f32 %v17553_v14, %v6636_v61 }
0x29dd   :  { %v6641_v34 = vadd.f32 %v17553_v14, %v6637_v37  ;;  %v6644_v19 = vsel %vm446_vm2, %v6640_v18, -inf }
0x29df   :  { %v6647_v43 = vsel %vm446_vm2, %v6641_v34, -inf }
0x29e2   :  { %6648 = vmax.xlane.f32.xlu0 %v6647_v43 }
0x29e4   :  { %6645 = vmax.xlane.f32.xlu1 %v6644_v19 }
0x29f5   :  { %6691 = vrot.lane.b32.xlu1 %v17522_v4, %s16025_s9 }
0x2a36   :  { %v6676_v33 = vpop.xlane.xlu0 %6675 }
0x2a37   :  { %15740 = vrcp.f32 %v6676_v33 }
0x2a38   :  { %v6679_v53 = vpop.xlane.xlu1 %6678 }
0x2a39   :  { %15742 = vrcp.f32 %v6679_v53 }
0x2a3a   :  { %v6740_v41 = vpop.permute.xlu0 %6739 }
0x2a3b   :  { %14425 = vmatpush3.bf16.msra.mxu1 %v6740_v41 }
0x2a3c   :  { %14446 = vmatprep.subr.bf16.mxu1 %v16021_v27  ;;  %v6923_v49 = vpop.permute.xlu1 %6922 }
0x2a3e   :  { %v6974_v63 = vpop.permute.xlu0 %6973 }
0x2a40   :  { %v6976_v57 = vpop.permute.xlu1 %6975 }
0x2a41   :  { %v15741_v2 = vpop.eup %15740  ;;  %v6981_v22 = vsel %vm308_vm0, %v6976_v57, 0 }
0x2a42   :  { %v6686_v9 = vmul.f32 %v15741_v2, %v15737_v6 }
0x2a43   :  { %v15743_v55 = vpop.eup %15742 }
0x2a44   :  { %v6687_v46 = vmul.f32 %v15743_v55, %v15739_v50 }
0x2a46   :  { %v6689_v45 = vpack.c.bf16 %v6687_v46, %v6686_v9 }
0x2a48   :  { %14427 = vmatmul.mubr.msk.bf16.vlgmr.msra.gmra.mrb[136].mxu1 %vm446_vm2, %v6689_v45 }
0x2a49   :  { %14447 = vmatpush3.bf16.xpose.msra.mxu1 %v6930_v3  ;;  %14448 = vmatprep.mubr.msk.bf16.mxu1 %vm16022_vm1, %v16021_v27 }
0x2a4a   :  { %14452 = vmatprep.subr.bf16.mxu1 %v16021_v27 }
0x2a50   :  { %14449 = vmatmul.mubr.msk.bf16.vlgmr.msra.gmra.mrb[140].mxu1 %vm308_vm0, %v6923_v49 }
0x2a51   :  { %14453 = vmatpush3.bf16.xpose.msra.mxu1 %v6981_v22  ;;  %14454 = vmatprep.mubr.msk.bf16.mxu1 %vm16022_vm1, %v16021_v27 }
0x2a52   :  { %14464 = vmatprep.subr.bf16.mxu1 %v16021_v27 }
0x2a58   :  { %14455 = vmatmul.mubr.msk.bf16.vlgmr.msra.gmra.mrb[144].mxu1 %vm308_vm0, %v6974_v63 }
0x2a59   :  { %14466 = vmatprep.mubr.msk.bf16.mxu1 %vm16022_vm1, %v16021_v27 }
0x2a6f   :  { %v6649_v0 = vpop.xlane.xlu0 %6648 }
0x2a70   :  { %v6657_v16 = vsub.f32 %v6641_v34, %v6649_v0 }
0x2a71   :  { %v6646_v21 = vpop.xlane.xlu1 %6645 }
0x2a72   :  { %v6656_v44 = vsub.f32 %v6640_v18, %v6646_v21  ;;  %v6662_v40 = vmul.f32 1.442695, %v6657_v16 }
0x2a74   :  { %v6660_v47 = vmul.f32 1.442695, %v6656_v44 }
0x2a75   :  { %v6692_v35 = vpop.permute.xlu1 %6691 }
0x2a76   :  { %15744 = vpow2.f32 %v6660_v47  ;;  %14419 = vmatpush3.bf16.msra.mxu0 %v6692_v35  ;;  %v15226_v47 = vld [vmem:[%s18729_s21 + $0x98] sm:$0xff]   ;;  %v15227_v35 = vld [vmem:[%s18729_s21 + $0x80] sm:$0xff]  }
0x2a77   :  { %15746 = vpow2.f32 %v6662_v40  ;;  %v15225_v40 = vld [vmem:[%s18729_s21 + $0x90] sm:$0xff]  }
0x2a78   :  { %14430 = vmatprep.subr.bf16.mxu0 %v15225_v40 }
0x2a80   :  { %v15745_v24 = vpop.eup %15744 }
0x2a81   :  { %v6668_v5 = vsel %vm446_vm2, %v15745_v24, 0.0  ;;  %v15747_v6 = vpop.eup %15746 }
0x2a82   :  { %6669 = vadd.xlane.f32.xlu0 %v6668_v5  ;;  %v6671_v7 = vsel %vm446_vm2, %v15747_v6, 0.0 }
0x2a86   :  { %6672 = vadd.xlane.f32.xlu0 %v6671_v7 }
0x2b0f   :  { %v6670_v50 = vpop.xlane.xlu0 %6669 }
0x2b10   :  { %15748 = vrcp.f32 %v6670_v50 }
0x2b13   :  { %v6673_v26 = vpop.xlane.xlu0 %6672 }
0x2b14   :  { %15750 = vrcp.f32 %v6673_v26 }
0x2b1a   :  { %v15749_v62 = vpop.eup %15748 }
0x2b1b   :  { %v17631_v32 = vpop.f32.mrb[136].mxu1  ;;  %v6684_v12 = vmul.f32 %v15749_v62, %v15745_v24 }
0x2b1c   :  { %v14428_v1 = vpop.f32.mrb[137].mxu1 }
0x2b1d   :  { %v17633_v29 = vpop.f32.mrb[138].mxu1 }
0x2b1e   :  { %v15751_v25 = vpop.eup %15750  ;;  %v6787_v61 = vpack.c.bf16 %v17633_v29, %v17631_v32  ;;  %v14429_v37 = vpop.f32.mrb[139].mxu1 }
0x2b1f   :  { %v6685_v34 = vmul.f32 %v15751_v25, %v15747_v6 }
0x2b21   :  { %v6688_v18 = vpack.c.bf16 %v6685_v34, %v6684_v12 }
0x2b23   :  { %14421 = vmatmul.mubr.msk.bf16.vlgmr.msra.gmra.mrb[148].mxu0 %vm446_vm2, %v6688_v18  ;;  %v6966_v43 = vpop.f32.mrb[140].mxu1 }
0x2b24   :  { %v7024_v19 = vmul.f32 0.17677669, %v6966_v43  ;;  %v14450_v54 = vpop.f32.mrb[141].mxu1  ;;  %14431 = vmatpush3.bf16.msra.mxu0 %v15225_v40 }
0x2b25   :  { %v6969_v33 = vpop.f32.mrb[142].mxu1  ;;  %14432 = vmatprep.subr.bf16.mxu0 %v15226_v47 }
0x2b26   :  { %v7028_v53 = vadd.f32 %v17553_v14, %v7024_v19  ;;  %v7025_v41 = vmul.f32 0.17677669, %v6969_v33  ;;  %v14451_v2 = vpop.f32.mrb[143].mxu1 }
0x2b28   :  { %v7029_v55 = vadd.f32 %v17553_v14, %v7025_v41  ;;  %v7032_v9 = vsel %vm446_vm2, %v7028_v53, -inf  ;;  %14433 = vmatpush3.bf16.msra.mxu0 %v15226_v47  ;;  %v15230_v47 = vld [vmem:[%s18729_s21 + $0xa8] sm:$0xff]  }
0x2b29   :  { %7033 = vmax.xlane.f32.xlu0 %v7032_v9  ;;  %14438 = vmatprep.subr.bf16.mxu0 %v15227_v35 }
0x2b2a   :  { %v7035_v3 = vsel %vm446_vm2, %v7029_v55, -inf }
0x2b2b   :  { %v7017_v46 = vpop.f32.mrb[144].mxu1 }
0x2b2c   :  { %v7026_v45 = vmul.f32 0.17677669, %v7017_v46  ;;  %v14456_v49 = vpop.f32.mrb[145].mxu1 }
0x2b2d   :  { %7036 = vmax.xlane.f32.xlu0 %v7035_v3  ;;  %v7020_v57 = vpop.f32.mrb[146].mxu1  ;;  %v15228_v3 = vld [vmem:[%s18729_s21 + $0x88] sm:$0xff]  }
0x2b2e   :  { %v7030_v22 = vadd.f32 %v17540_v28, %v7026_v45  ;;  %v7027_v63 = vmul.f32 0.17677669, %v7020_v57  ;;  %v14457_v0 = vpop.f32.mrb[147].mxu1 }
0x2b30   :  { %v7031_v16 = vadd.f32 %v17540_v28, %v7027_v63  ;;  %v7038_v21 = vsel %vm446_vm2, %v7030_v22, -inf }
0x2b31   :  { %7039 = vmax.xlane.f32.xlu0 %v7038_v21 }
0x2b32   :  { %v7041_v44 = vsel %vm446_vm2, %v7031_v16, -inf }
0x2b35   :  { %7042 = vmax.xlane.f32.xlu0 %v7041_v44 }
0x2bb6   :  { %v7034_v24 = vpop.xlane.xlu0 %7033 }
0x2bb7   :  { %v7044_v5 = vsub.f32 %v7028_v53, %v7034_v24 }
0x2bb9   :  { %v7048_v6 = vmul.f32 1.442695, %v7044_v5 }
0x2bba   :  { %v7037_v7 = vpop.xlane.xlu0 %7036 }
0x2bbb   :  { %15752 = vpow2.f32 %v7048_v6  ;;  %v7045_v50 = vsub.f32 %v7029_v55, %v7037_v7 }
0x2bbd   :  { %v7050_v26 = vmul.f32 1.442695, %v7045_v50 }
0x2bbe   :  { %v7040_v62 = vpop.xlane.xlu0 %7039 }
0x2bbf   :  { %15754 = vpow2.f32 %v7050_v26  ;;  %v7046_v1 = vsub.f32 %v7030_v22, %v7040_v62 }
0x2bc1   :  { %v7052_v25 = vmul.f32 1.442695, %v7046_v1 }
0x2bc2   :  { %v7043_v37 = vpop.xlane.xlu0 %7042 }
0x2bc3   :  { %15756 = vpow2.f32 %v7052_v25  ;;  %v7047_v12 = vsub.f32 %v7031_v16, %v7043_v37 }
0x2bc5   :  { %v15753_v34 = vpop.eup %15752  ;;  %v7054_v18 = vmul.f32 1.442695, %v7047_v12 }
0x2bc6   :  { %v7056_v43 = vsel %vm446_vm2, %v15753_v34, 0.0 }
0x2bc7   :  { %15758 = vpow2.f32 %v7054_v18  ;;  %7057 = vadd.xlane.f32.xlu1 %v7056_v43 }
0x2bc9   :  { %v15755_v19 = vpop.eup %15754 }
0x2bca   :  { %v7059_v54 = vsel %vm446_vm2, %v15755_v19, 0.0 }
0x2bcb   :  { %7060 = vadd.xlane.f32.xlu0 %v7059_v54 }
0x2bcd   :  { %v15757_v33 = vpop.eup %15756 }
0x2bce   :  { %v7062_v53 = vsel %vm446_vm2, %v15757_v33, 0.0 }
0x2bcf   :  { %7063 = vadd.xlane.f32.xlu0 %v7062_v53 }
0x2bd1   :  { %v15759_v41 = vpop.eup %15758 }
0x2bd2   :  { %v7065_v2 = vsel %vm446_vm2, %v15759_v41, 0.0 }
0x2bd3   :  { %7066 = vadd.xlane.f32.xlu0 %v7065_v2 }
0x2bd8   :  { %7125 = vrot.lane.b32.xlu1 %v17518_v58, %s16026_s17 }
0x2be9   :  { %7078 = vrot.lane.b32.xlu0 %v17522_v4, %s16026_s17 }
0x2bed   :  { %7247 = vrot.lane.b32.xlu0 %v17510_v15, %s16027_s25 }
0x2bf1   :  { %7298 = vrot.lane.b32.xlu0 %v17520_v42, %s16027_s25 }
0x2bf5   :  { %7245 = vrot.lane.b32.xlu0 %v17508_v36, %s16027_s25 }
0x2bf6   :  { %v6731_v55 = vpop.f32.mrb[148].mxu0 }
0x2bf7   :  { %v14422_v9 = vpop.f32.mrb[149].mxu0 }
0x2bf8   :  { %v6734_v46 = vpop.f32.mrb[150].mxu0 }
0x2bf9   :  { %v6786_v45 = vpack.c.bf16 %v6734_v46, %v6731_v55  ;;  %v14423_v49 = vpop.f32.mrb[151].mxu0  ;;  %7296 = vrot.lane.b32.xlu0 %v17516_v59, %s16027_s25 }
0x2bfb   :  { %14434 = vmatprep.mubr.msk.bf16.mxu0 %vm308_vm0, %v6786_v45 }
0x2bfc   :  { %14435 = vmatmul.mubr.msk.bf16.vlgmr.msra.gmra.mrb[152].mxu0 %vm308_vm0, %v6787_v61 }
0x2bfd   :  { %14442 = vmatprep.mubr.msk.bf16.mxu0 %vm308_vm0, %v6528_v11  ;;  %14439 = vmatpush3.bf16.msra.mxu0 %v15227_v35  ;;  %v15229_v11 = vld [vmem:[%s18729_s21 + $0xa0] sm:$0xff]  }
0x2bfe   :  { %14440 = vmatprep.subr.bf16.mxu0 %v15228_v3 }
0x2c01   :  { %14441 = vmatpush3.bf16.msra.mxu0 %v15228_v3 }
0x2c02   :  { %14458 = vmatprep.subr.bf16.mxu0 %v16021_v27 }
0x2c08   :  { %14443 = vmatmul.mubr.msk.bf16.vlgmr.msra.gmra.mrb[152].mxu0 %vm308_vm0, %v6529_v17 }
0x2c09   :  { %14460 = vmatprep.mubr.msk.bf16.mxu0 %vm16022_vm1, %v16021_v27 }
0x2c54   :  { %v7058_v36 = vpop.xlane.xlu1 %7057 }
0x2c55   :  { %15760 = vrcp.f32 %v7058_v36 }
0x2c58   :  { %v7126_v15 = vpop.permute.xlu1 %7125  ;;  %v7061_v59 = vpop.xlane.xlu0 %7060 }
0x2c59   :  { %15762 = vrcp.f32 %v7061_v59  ;;  %14465 = vmatpush3.bf16.msra.mxu1 %v7126_v15 }
0x2c5a   :  { %14478 = vmatprep.subr.bf16.mxu1 %v16021_v27 }
0x2c5c   :  { %v7064_v42 = vpop.xlane.xlu0 %7063 }
0x2c5d   :  { %15764 = vrcp.f32 %v7064_v42 }
0x2c5f   :  { %v15761_v52 = vpop.eup %15760 }
0x2c60   :  { %v7067_v13 = vpop.xlane.xlu0 %7066  ;;  %v7072_v51 = vmul.f32 %v15761_v52, %v15753_v34 }
0x2c61   :  { %15766 = vrcp.f32 %v7067_v13 }
0x2c63   :  { %v15763_v23 = vpop.eup %15762 }
0x2c64   :  { %v7073_v17 = vmul.f32 %v15763_v23, %v15755_v19  ;;  %v7079_v32 = vpop.permute.xlu0 %7078 }
0x2c65   :  { %14459 = vmatpush3.bf16.msra.mxu0 %v7079_v32 }
0x2c66   :  { %v7076_v29 = vpack.c.bf16 %v7073_v17, %v7072_v51  ;;  %14470 = vmatprep.subr.bf16.mxu0 %v15229_v11 }
0x2c67   :  { %v15765_v61 = vpop.eup %15764 }
0x2c68   :  { %14461 = vmatmul.mubr.msk.bf16.vlgmr.msra.gmra.mrb[156].mxu0 %vm446_vm2, %v7076_v29  ;;  %v7248_v22 = vpop.permute.xlu0 %7247  ;;  %v7074_v63 = vmul.f32 %v15765_v61, %v15757_v33 }
0x2c69   :  { %14471 = vmatpush3.bf16.msra.mxu0 %v15229_v11  ;;  %v7253_v21 = vsel %vm308_vm0, %v7248_v22, 0 }
0x2c6a   :  { %14472 = vmatprep.subr.bf16.mxu0 %v15230_v47 }
0x2c6b   :  { %v15767_v57 = vpop.eup %15766 }
0x2c6c   :  { %v7075_v0 = vmul.f32 %v15767_v57, %v15759_v41  ;;  %v7299_v44 = vpop.permute.xlu0 %7298 }
0x2c6d   :  { %14473 = vmatpush3.bf16.msra.mxu0 %v15230_v47  ;;  %v7304_v37 = vsel %vm308_vm0, %v7299_v44, 0 }
0x2c6e   :  { %v7077_v16 = vpack.c.bf16 %v7075_v0, %v7074_v63  ;;  %14484 = vmatprep.subr.bf16.mxu0 %v16021_v27 }
0x2c70   :  { %14467 = vmatmul.mubr.msk.bf16.vlgmr.msra.gmra.mrb[148].mxu1 %vm446_vm2, %v7077_v16  ;;  %v7246_v40 = vpop.permute.xlu0 %7245 }
0x2c71   :  { %14479 = vmatpush3.bf16.xpose.msra.mxu1 %v7253_v21  ;;  %14480 = vmatprep.mubr.msk.bf16.mxu1 %vm16022_vm1, %v16021_v27 }
0x2c72   :  { %14490 = vmatprep.subr.bf16.mxu1 %v16021_v27 }
0x2c74   :  { %v7297_v53 = vpop.permute.xlu0 %7296 }
0x2c78   :  { %14481 = vmatmul.mubr.msk.bf16.vlgmr.msra.gmra.mrb[152].mxu1 %vm308_vm0, %v7246_v40 }
0x2c79   :  { %14492 = vmatprep.mubr.msk.bf16.mxu1 %vm16022_vm1, %v16021_v27 }
0x2d3b   :  { %v7118_v35 = vpop.f32.mrb[156].mxu0 }
0x2d3c   :  { %v14462_v24 = vpop.f32.mrb[157].mxu0 }
0x2d3d   :  { %v7121_v5 = vpop.f32.mrb[158].mxu0 }
0x2d3e   :  { %v7172_v6 = vpack.c.bf16 %v7121_v5, %v7118_v35  ;;  %v14463_v7 = vpop.f32.mrb[159].mxu0 }
0x2d40   :  { %14474 = vmatprep.mubr.msk.bf16.mxu0 %vm308_vm0, %v7172_v6 }
0x2d43   :  { %v7165_v50 = vpop.f32.mrb[148].mxu1 }
0x2d44   :  { %v14468_v26 = vpop.f32.mrb[149].mxu1 }
0x2d45   :  { %v7168_v62 = vpop.f32.mrb[150].mxu1 }
0x2d46   :  { %v7173_v1 = vpack.c.bf16 %v7168_v62, %v7165_v50  ;;  %v14469_v25 = vpop.f32.mrb[151].mxu1 }
0x2d48   :  { %14475 = vmatmul.mubr.msk.bf16.vlgmr.msra.gmra.mrb[152].mxu0 %vm308_vm0, %v7173_v1 }
0x2d49   :  { %14485 = vmatpush3.bf16.xpose.msra.mxu0 %v7304_v37  ;;  %14486 = vmatprep.mubr.msk.bf16.mxu0 %vm16022_vm1, %v16021_v27 }
0x2d4a   :  { %14496 = vmatprep.subr.bf16.mxu0 %v16021_v27 }
0x2d4b   :  { %v7289_v12 = vpop.f32.mrb[152].mxu1 }
0x2d4c   :  { %v7347_v34 = vmul.f32 0.17677669, %v7289_v12  ;;  %v14482_v18 = vpop.f32.mrb[153].mxu1 }
0x2d4d   :  { %v7292_v43 = vpop.f32.mrb[154].mxu1 }
0x2d4e   :  { %v7351_v19 = vadd.f32 %v17553_v14, %v7347_v34  ;;  %v7348_v54 = vmul.f32 0.17677669, %v7292_v43  ;;  %v14483_v33 = vpop.f32.mrb[155].mxu1 }
0x2d50   :  { %v7352_v41 = vadd.f32 %v17553_v14, %v7348_v54  ;;  %14487 = vmatmul.mubr.msk.bf16.vlgmr.msra.gmra.mrb[160].mxu0 %vm308_vm0, %v7297_v53  ;;  %v7355_v2 = vsel %vm446_vm2, %v7351_v19, -inf  ;;  %v15232_v54 = vld [vmem:[%s18729_s21 + $0xb8] sm:$0xff]  }
0x2d51   :  { %7356 = vmax.xlane.f32.xlu0 %v7355_v2  ;;  %14498 = vmatprep.mubr.msk.bf16.mxu0 %vm16022_vm1, %v16021_v27 }
0x2d52   :  { %v7358_v55 = vsel %vm446_vm2, %v7352_v41, -inf }
0x2d53   :  { %7359 = vmax.xlane.f32.xlu1 %v7358_v55 }
0x2dde   :  { %v7357_v9 = vpop.xlane.xlu0 %7356 }
0x2ddf   :  { %v7367_v46 = vsub.f32 %v7351_v19, %v7357_v9  ;;  %v15231_v19 = vld [vmem:[%s18729_s21 + $0xb0] sm:$0xff]   ;;  %s18755_s21 = sld [smem:[#allocation37_spill]] }
0x2de0   :  { %v7360_v14 = vpop.xlane.xlu1 %7359 }
0x2de1   :  { %v7371_v45 = vmul.f32 1.442695, %v7367_v46  ;;  %v7368_v36 = vsub.f32 %v7352_v41, %v7360_v14  ;;  %v13233_v14 = vld [vmem:[%s18730_s29 + $0x2] ss:$0 sm:$0xff]  ;;  %s18757_s29 = sld [smem:[#allocation38_spill]] }
0x2de3   :  { %15768 = vpow2.f32 %v7371_v45  ;;  %v7373_v15 = vmul.f32 1.442695, %v7368_v36 }
0x2de5   :  { %15770 = vpow2.f32 %v7373_v15 }
0x2ded   :  { %v15769_v49 = vpop.eup %15768 }
0x2dee   :  { %v7379_v3 = vsel %vm446_vm2, %v15769_v49, 0.0 }
0x2def   :  { %7380 = vadd.xlane.f32.xlu1 %v7379_v3  ;;  %v15771_v61 = vpop.eup %15770 }
0x2df0   :  { %v7382_v57 = vsel %vm446_vm2, %v15771_v61, 0.0 }
0x2e23   :  { %v7340_v59 = vpop.f32.mrb[160].mxu0 }
0x2e24   :  { %v7349_v42 = vmul.f32 0.17677669, %v7340_v59  ;;  %v14488_v13 = vpop.f32.mrb[161].mxu0 }
0x2e25   :  { %v7343_v52 = vpop.f32.mrb[162].mxu0 }
0x2e26   :  { %v7353_v11 = vadd.f32 %v17540_v28, %v7349_v42  ;;  %v7350_v23 = vmul.f32 0.17677669, %v7343_v52  ;;  %v14489_v51 = vpop.f32.mrb[163].mxu0 }
0x2e28   :  { %v7354_v17 = vadd.f32 %v17540_v28, %v7350_v23  ;;  %v7361_v32 = vsel %vm446_vm2, %v7353_v11, -inf }
0x2e29   :  { %7362 = vmax.xlane.f32.xlu0 %v7361_v32 }
0x2e2a   :  { %v7364_v29 = vsel %vm446_vm2, %v7354_v17, -inf }
0x2e2d   :  { %7365 = vmax.xlane.f32.xlu0 %v7364_v29 }
0x2e31   :  { %7383 = vadd.xlane.f32.xlu0 %v7382_v57  ;;  %v15235_v57 = vld [vmem:[%s18731_s3 + $0x204] ss:$16 sps:$4 sm:$0xff]  }
0x2e7c   :  { %v7381_v5 = vpop.xlane.xlu1 %7380 }
0x2eb6   :  { %v7363_v22 = vpop.xlane.xlu0 %7362 }
0x2eb7   :  { %v7369_v63 = vsub.f32 %v7353_v11, %v7363_v22  ;;  %v15236_v22 = vld [vmem:[%s18731_s3 + $0x208] ss:$16 sps:$4 sm:$0xff]  }
0x2eb9   :  { %v7375_v0 = vmul.f32 1.442695, %v7369_v63  ;;  %v15238_v63 = vld [vmem:[%s18731_s3 + $0x20c] ss:$16 sps:$4 sm:$0xff]  }
0x2eba   :  { %v7366_v16 = vpop.xlane.xlu0 %7365 }
0x2ebb   :  { %15772 = vpow2.f32 %v7375_v0  ;;  %v7370_v21 = vsub.f32 %v7354_v17, %v7366_v16  ;;  %v15244_v0 = vld [vmem:[%s18731_s3 + $0x22c] ss:$16 sps:$4 sm:$0xff]   ;;  %v15242_v16 = vld [vmem:[%s18731_s3 + $0x228] ss:$16 sps:$4 sm:$0xff]  }
0x2ebd   :  { %v7377_v44 = vmul.f32 1.442695, %v7370_v21 }
0x2ebe   :  { %v7384_v24 = vpop.xlane.xlu0 %7383 }
0x2ebf   :  { %15774 = vpow2.f32 %v7377_v44 }
0x2ec0   :  { %15776 = vrcp.f32 %v7384_v24 }
0x2ec1   :  { %15778 = vrcp.f32 %v7381_v5 }
0x2ec5   :  { %v15773_v40 = vpop.eup %15772 }
0x2ec6   :  { %v7385_v28 = vsel %vm446_vm2, %v15773_v40, 0.0 }
0x2ec7   :  { %7386 = vadd.xlane.f32.xlu1 %v7385_v28 }
0x2ec9   :  { %v15775_v47 = vpop.eup %15774 }
0x2eca   :  { %v7388_v35 = vsel %vm446_vm2, %v15775_v47, 0.0  ;;  %v15777_v6 = vpop.eup %15776 }
0x2ecb   :  { %7389 = vadd.xlane.f32.xlu0 %v7388_v35  ;;  %v15779_v50 = vpop.eup %15778  ;;  %v7396_v26 = vmul.f32 %v15777_v6, %v15771_v61  ;;  %v15233_v61 = vld [vmem:[%s18731_s3 + $0x200] ss:$16 sps:$4 sm:$0xff]  }
0x2ecc   :  { %v7395_v62 = vmul.f32 %v15779_v50, %v15769_v49 }
0x2ed8   :  { %7401 = vrot.lane.b32.xlu1 %v17522_v4, %s16027_s25  ;;  %v7399_v4 = vpack.c.bf16 %v7396_v26, %v7395_v62 }
0x2ee1   :  { %7448 = vrot.lane.b32.xlu0 %v17518_v58, %s16027_s25 }
0x2f54   :  { %v7387_v7 = vpop.xlane.xlu1 %7386 }
0x2f55   :  { %15780 = vrcp.f32 %v7387_v7 }
0x2f58   :  { %v7390_v1 = vpop.xlane.xlu0 %7389  ;;  %v7402_v25 = vpop.permute.xlu1 %7401 }
0x2f59   :  { %15782 = vrcp.f32 %v7390_v1  ;;  %14491 = vmatpush3.bf16.msra.mxu1 %v7402_v25  ;;  %v15247_v25 = vld [vmem:[%s18731_s3 + $0x244] ss:$16 sps:$4 sm:$0xff]  }
0x2f5a   :  { %7829 = vmatprep.subr.bf16.mxu1 %v15235_v57 }
0x2f5c   :  { %v7449_v37 = vpop.permute.xlu0 %7448  ;;  %14493 = vmatmul.mubr.msk.bf16.vlgmr.msra.gmra.mrb[156].mxu1 %vm446_vm2, %v7399_v4  ;;  %v15250_v4 = vld [vmem:[%s18731_s3 + $0x24c] ss:$16 sps:$4 sm:$0xff]  }
0x2f5d   :  { %14497 = vmatpush3.bf16.msra.mxu0 %v7449_v37  ;;  %7861 = vmatprep.mubr.bf16.mxu1 %v16023_v60  ;;  %v15245_v37 = vld [vmem:[%s18731_s3 + $0x240] ss:$16 sps:$4 sm:$0xff]  }
0x2f5e   :  { %14502 = vmatprep.subr.bf16.mxu0 %v15231_v19  ;;  %7830 = vmatpush1.bf16.msra.mxu1 %v15233_v61 }
0x2f5f   :  { %v15781_v58 = vpop.eup %15780 }
0x2f60   :  { %v7397_v34 = vmul.f32 %v15781_v58, %v15773_v40  ;;  %v15248_v58 = vld [vmem:[%s18731_s3 + $0x248] ss:$16 sps:$4 sm:$0xff]  }
0x2f63   :  { %v15783_v12 = vpop.eup %15782 }
0x2f64   :  { %v7398_v18 = vmul.f32 %v15783_v12, %v15775_v47  ;;  %v15253_v12 = vld [vmem:[%s18731_s3 + $0x264] ss:$16 sps:$4 sm:$0xff]  }
0x2f66   :  { %v7400_v43 = vpack.c.bf16 %v7398_v18, %v7397_v34  ;;  %v15256_v34 = vld [vmem:[%s18731_s3 + $0x26c] ss:$16 sps:$4 sm:$0xff]   ;;  %v15251_v18 = vld [vmem:[%s18731_s3 + $0x260] ss:$16 sps:$4 sm:$0xff]  }
0x2f68   :  { %14499 = vmatmul.mubr.msk.bf16.vlgmr.msra.gmra.mrb[164].mxu0 %vm446_vm2, %v7400_v43  ;;  %v15254_v43 = vld [vmem:[%s18731_s3 + $0x268] ss:$16 sps:$4 sm:$0xff]  }
0x2f69   :  { %14503 = vmatpush3.bf16.msra.mxu0 %v15231_v19  ;;  %v15257_v19 = vld [vmem:[%s18731_s3 + $0x280] ss:$16 sps:$4 sm:$0xff]  }
0x2f6a   :  { %14504 = vmatprep.subr.bf16.mxu0 %v15232_v54 }
0x2f6d   :  { %14505 = vmatpush3.bf16.msra.mxu0 %v15232_v54  ;;  %v15259_v54 = vld [vmem:[%s18731_s3 + $0x284] ss:$16 sps:$4 sm:$0xff]  }
0x2f6e   :  { %7882 = vmatprep.subr.bf16.mxu0 %v15238_v63 }
0x302f   :  { %v7441_v33 = vpop.f32.mrb[156].mxu1 }
0x3030   :  { %v14494_v53 = vpop.f32.mrb[157].mxu1 }
0x3031   :  { %v7444_v41 = vpop.f32.mrb[158].mxu1  ;;  %v15262_v53 = vld [vmem:[%s18731_s3 + $0x28c] ss:$16 sps:$4 sm:$0xff]  }
0x3032   :  { %v7495_v2 = vpack.c.bf16 %v7444_v41, %v7441_v33  ;;  %v14495_v55 = vpop.f32.mrb[159].mxu1  ;;  %v15260_v33 = vld [vmem:[%s18731_s3 + $0x288] ss:$16 sps:$4 sm:$0xff]   ;;  %v15265_v41 = vld [vmem:[%s18731_s3 + $0x2a4] ss:$16 sps:$4 sm:$0xff]  }
0x3033   :  { %v15263_v55 = vld [vmem:[%s18731_s3 + $0x2a0] ss:$16 sps:$4 sm:$0xff]  }
0x3034   :  { %14506 = vmatprep.mubr.msk.bf16.mxu0 %vm308_vm0, %v7495_v2  ;;  %v15268_v2 = vld [vmem:[%s18731_s3 + $0x2ac] ss:$16 sps:$4 sm:$0xff]  }
0x303b   :  { %v7488_v9 = vpop.f32.mrb[164].mxu0 }
0x303c   :  { %v14500_v46 = vpop.f32.mrb[165].mxu0 }
0x303d   :  { %v7491_v45 = vpop.f32.mrb[166].mxu0  ;;  %v15271_v46 = vld [vmem:[%s18731_s3 + $0x2c4] ss:$16 sps:$4 sm:$0xff]  }
0x303e   :  { %v7496_v49 = vpack.c.bf16 %v7491_v45, %v7488_v9  ;;  %v14501_v3 = vpop.f32.mrb[167].mxu0  ;;  %v15266_v9 = vld [vmem:[%s18731_s3 + $0x2a8] ss:$16 sps:$4 sm:$0xff]   ;;  %v15274_v45 = vld [vmem:[%s18731_s3 + $0x2cc] ss:$16 sps:$4 sm:$0xff]  }
0x303f   :  { %v15272_v3 = vld [vmem:[%s18731_s3 + $0x2c8] ss:$16 sps:$4 sm:$0xff]  }
0x3040   :  { %14507 = vmatmul.mubr.msk.bf16.vlgmr.msra.gmra.mrb[152].mxu0 %vm308_vm0, %v7496_v49  ;;  %v15269_v49 = vld [vmem:[%s18731_s3 + $0x2c0] ss:$16 sps:$4 sm:$0xff]  }
0x3041   :  { %7914 = vmatprep.mubr.bf16.mxu0 %v16023_v60  ;;  %7883 = vmatpush1.bf16.msra.mxu0 %v15236_v22 }
0x3042   :  { %7884 = vmatprep.subr.bf16.mxu0 %v15244_v0 }
0x3045   :  { %7885 = vmatpush1.bf16.msra.mxu0 %v15242_v16 }
0x3046   :  { %7886 = vmatprep.subr.bf16.mxu0 %v15250_v4  ;;  %v15283_v4 = vld [vmem:[%s18734_s19 + $0x2c0] sm:$0xff]  }
0x3049   :  { %7887 = vmatpush1.bf16.msra.mxu0 %v15248_v58  ;;  %v15285_v58 = vld [vmem:[%s18734_s19 + $0x248] sm:$0xff]  }
0x304a   :  { %7888 = vmatprep.subr.bf16.mxu0 %v15256_v34  ;;  %v15287_v34 = vld [vmem:[%s18734_s19 + $0x2c8] sm:$0xff]  }
0x304d   :  { %7889 = vmatpush1.bf16.msra.mxu0 %v15254_v43  ;;  %v15289_v43 = vld [vmem:[%s18734_s19 + $0x250] sm:$0xff]  }
0x304e   :  { %7890 = vmatprep.subr.bf16.mxu0 %v15262_v53  ;;  %v15293_v53 = vld [vmem:[%s18734_s19 + $0x258] sm:$0xff]  }
0x3051   :  { %7891 = vmatpush1.bf16.msra.mxu0 %v15260_v33  ;;  %v15292_v33 = vld [vmem:[%s18734_s19 + $0x290] sm:$0xff]  }
0x3052   :  { %7892 = vmatprep.subr.bf16.mxu0 %v15268_v2  ;;  %v15295_v2 = vld [vmem:[%s18734_s19 + $0x2d8] sm:$0xff]  }
0x3055   :  { %7893 = vmatpush1.bf16.msra.mxu0 %v15266_v9  ;;  %v15297_v9 = vld [vmem:[%s18734_s19 + $0x260] sm:$0xff]  }
0x3056   :  { %7894 = vmatprep.subr.bf16.mxu0 %v15274_v45  ;;  %v15299_v45 = vld [vmem:[%s18734_s19 + $0x2e0] sm:$0xff]  }
0x3059   :  { %7895 = vmatpush1.bf16.msra.mxu0 %v15272_v3  ;;  %v15301_v3 = vld [vmem:[%s18734_s19 + $0x268] sm:$0xff]  }
0x3113   :  { %v14508_v36 = vpop.f32.mrb[152].mxu0 }
0x3114   :  { %v7549_v15 = vpop.f32.mrb[153].mxu0  ;;  %v7576_v52 = vadd.f32 %v14508_v36, %v13233_v14  ;;  %v15280_v36 = vld [vmem:[%s18731_s3 + $0x2ec] ss:$16 sps:$4 sm:$0xff]  }
0x3115   :  { %v7574_v59 = vadd.f32 %v13233_v14, %v7549_v15  ;;  %v14509_v42 = vpop.f32.mrb[154].mxu0  ;;  %v15275_v15 = vld [vmem:[%s18731_s3 + $0x2e0] ss:$16 sps:$4 sm:$0xff]   ;;  %7896 = vmatprep.subr.bf16.mxu0 %v15280_v36  ;;  %v15302_v36 = vld [vmem:[%s18734_s19 + $0x228] sm:$0xff]  }
0x3116   :  { %v7552_v13 = vpop.f32.mrb[155].mxu0  ;;  %v7577_v51 = vadd.f32 %v14509_v42, %v13233_v14  ;;  %v7580_v32 = vadd.f32 %v7576_v52, %v17495_v31 }
0x3117   :  { %v7578_v11 = vadd.f32 %v7574_v59, %v17486_v8  ;;  %v7575_v23 = vadd.f32 %v13233_v14, %v7552_v13  ;;  %v15241_v8 = vld [vmem:[%s18731_s3 + $0x224] ss:$16 sps:$4 sm:$0xff]   ;;  %v15278_v59 = vld [vmem:[%s18731_s3 + $0x2e8] ss:$16 sps:$4 sm:$0xff]  }
0x3118   :  { %v7581_v29 = vadd.f32 %v7577_v51, %v17497_v48  ;;  %7831 = vmatprep.subr.bf16.mxu1 %v15241_v8  ;;  %v15277_v14 = vld [vmem:[%s18731_s3 + $0x2e4] ss:$16 sps:$4 sm:$0xff]   ;;  %7897 = vmatpush1.bf16.msra.mxu0 %v15278_v59  ;;  %v13234_v8 = vld [vmem:[%s18732_s8 + $0x2] ss:$0 sm:$0xff]  ;;  %s18759_s8 = sld [smem:[#allocation44_spill]] }
0x3119   :  { %v7579_v17 = vadd.f32 %v7575_v23, %v17488_v20  ;;  %7582 = vadd.xlane.f32.xlu1 %v7578_v11  ;;  %v15239_v20 = vld [vmem:[%s18731_s3 + $0x220] ss:$16 sps:$4 sm:$0xff]   ;;  %13832 = vmatprep.subr.bf16.mxu0 %v15283_v4  ;;  %s18758_s3 = sld [smem:[#allocation42_spill]] }
0x311a   :  { %7832 = vmatpush1.bf16.msra.mxu1 %v15239_v20  ;;  %v15305_v59 = vld [vmem:[%s18734_s19 + $0x270] sm:$0xff]  }
0x311b   :  { %7584 = vadd.xlane.f32.xlu0 %v7579_v17  ;;  %7833 = vmatprep.subr.bf16.mxu1 %v15247_v25  ;;  %v15282_v25 = vld [vmem:[%s18734_s19 + $0x200] sm:$0xff]  }
0x311d   :  { %7586 = vadd.xlane.f32.xlu1 %v7580_v32 }
0x311e   :  { %7834 = vmatpush1.bf16.msra.mxu1 %v15245_v37  ;;  %v15284_v37 = vld [vmem:[%s18734_s19 + $0x280] sm:$0xff]  }
0x311f   :  { %7588 = vadd.xlane.f32.xlu0 %v7581_v29  ;;  %7835 = vmatprep.subr.bf16.mxu1 %v15253_v12  ;;  %v15286_v12 = vld [vmem:[%s18734_s19 + $0x208] sm:$0xff]  }
0x3122   :  { %7836 = vmatpush1.bf16.msra.mxu1 %v15251_v18  ;;  %v15288_v18 = vld [vmem:[%s18734_s19 + $0x288] sm:$0xff]  }
0x3123   :  { %7837 = vmatprep.subr.bf16.mxu1 %v15259_v54  ;;  %v15291_v54 = vld [vmem:[%s18734_s19 + $0x2d0] sm:$0xff]  }
0x3126   :  { %7838 = vmatpush1.bf16.msra.mxu1 %v15257_v19  ;;  %v15290_v19 = vld [vmem:[%s18734_s19 + $0x210] sm:$0xff]  }
0x3127   :  { %7839 = vmatprep.subr.bf16.mxu1 %v15265_v41  ;;  %v15294_v41 = vld [vmem:[%s18734_s19 + $0x218] sm:$0xff]  }
0x312a   :  { %7840 = vmatpush1.bf16.msra.mxu1 %v15263_v55  ;;  %v15296_v55 = vld [vmem:[%s18734_s19 + $0x298] sm:$0xff]  }
0x312b   :  { %7841 = vmatprep.subr.bf16.mxu1 %v15271_v46  ;;  %v15298_v46 = vld [vmem:[%s18734_s19 + $0x220] sm:$0xff]  }
0x312e   :  { %7842 = vmatpush1.bf16.msra.mxu1 %v15269_v49  ;;  %v15300_v49 = vld [vmem:[%s18734_s19 + $0x2a0] sm:$0xff]  }
0x312f   :  { %7843 = vmatprep.subr.bf16.mxu1 %v15277_v14  ;;  %v15303_v14 = vld [vmem:[%s18734_s19 + $0x2e8] sm:$0xff]  }
0x3132   :  { %7844 = vmatpush1.bf16.msra.mxu1 %v15275_v15  ;;  %v15304_v15 = vld [vmem:[%s18734_s19 + $0x2a8] sm:$0xff]  }
0x31a6   :  { %v7583_v31 = vpop.xlane.xlu1 %7582 }
0x31a7   :  { %v7590_v48 = vmul.f32 0.0078125, %v7583_v31 }
0x31a8   :  { %v7585_v21 = vpop.xlane.xlu0 %7584 }
0x31a9   :  { %v17741_v44 = vsub.f32 %v7578_v11, %v7590_v48  ;;  %v7591_v40 = vmul.f32 0.0078125, %v7585_v21  ;;  %v13235_v21 = vld [vmem:[%s18733_s14 + $0x2] ss:$0 sm:$0xff]  ;;  %s18760_s14 = sld [smem:[#allocation39_spill]] }
0x31aa   :  { %v7587_v28 = vpop.xlane.xlu1 %7586 }
0x31ab   :  { %v17743_v47 = vsub.f32 %v7579_v17, %v7591_v40  ;;  %v7592_v35 = vmul.f32 0.0078125, %v7587_v28  ;;  %v7598_v24 = vmul.f32 %v17741_v44, %v17741_v44 }
0x31ac   :  { %v7589_v5 = vpop.xlane.xlu0 %7588 }
0x31ad   :  { %v17747_v6 = vsub.f32 %v7580_v32, %v7592_v35  ;;  %v7593_v7 = vmul.f32 0.0078125, %v7589_v5  ;;  %7602 = vadd.xlane.f32.xlu1 %v7598_v24  ;;  %v7599_v50 = vmul.f32 %v17743_v47, %v17743_v47 }
0x31af   :  { %v17751_v26 = vsub.f32 %v7581_v29, %v7593_v7  ;;  %7604 = vadd.xlane.f32.xlu0 %v7599_v50  ;;  %v7600_v62 = vmul.f32 %v17747_v6, %v17747_v6 }
0x31b1   :  { %7606 = vadd.xlane.f32.xlu1 %v7600_v62  ;;  %v7601_v1 = vmul.f32 %v17751_v26, %v17751_v26 }
0x31b3   :  { %7608 = vadd.xlane.f32.xlu0 %v7601_v1  ;;  %v15281_v1 = vld [vmem:[%s18734_s19 + $0x240] sm:$0xff]  }
0x31b4   :  { %13804 = vmatprep.subr.bf16.mxu1 %v15281_v1 }
0x323a   :  { %v7603_v42 = vpop.xlane.xlu1 %7602 }
0x323b   :  { %v7610_v13 = vmul.f32 0.0078125, %v7603_v42  ;;  %v15307_v42 = vld [vmem:[%s18734_s19 + $0x2f0] sm:$0xff]  }
0x323c   :  { %v7605_v52 = vpop.xlane.xlu0 %7604 }
0x323d   :  { %v7614_v11 = vadd.f32 1e-12, %v7610_v13  ;;  %v7611_v23 = vmul.f32 0.0078125, %v7605_v52  ;;  %v15306_v13 = vld [vmem:[%s18734_s19 + $0x230] sm:$0xff]  }
0x323e   :  { %v7607_v51 = vpop.xlane.xlu1 %7606  ;;  %v15308_v52 = vld [vmem:[%s18734_s19 + $0x2b0] sm:$0xff]  }
0x323f   :  { %15784 = vrsqrt.f32 %v7614_v11  ;;  %v7615_v17 = vadd.f32 1e-12, %v7611_v23  ;;  %v7612_v32 = vmul.f32 0.0078125, %v7607_v51  ;;  %v15309_v11 = vld [vmem:[%s18734_s19 + $0x278] sm:$0xff]  }
0x3240   :  { %v7609_v29 = vpop.xlane.xlu0 %7608  ;;  %v15311_v23 = vld [vmem:[%s18734_s19 + $0x2f8] sm:$0xff]  }
0x3241   :  { %15786 = vrsqrt.f32 %v7615_v17  ;;  %v7616_v61 = vadd.f32 1e-12, %v7612_v32  ;;  %v7613_v57 = vmul.f32 0.0078125, %v7609_v29  ;;  %v15310_v51 = vld [vmem:[%s18734_s19 + $0x238] sm:$0xff]   ;;  %v15315_v32 = vld [vmem:[%s18739_s12 + $0x4] ss:$12 sps:$4 sm:$0xff]  }
0x3242   :  { %v15312_v17 = vld [vmem:[%s18734_s19 + $0x2b8] sm:$0xff]   ;;  %v13109_v29 = vld [vmem:[%s18735_s24 + $0x8] sm:$0xf]  ;;  %s18761_s19 = sld [smem:[#allocation40_spill]]  ;;  %s18762_s24 = sld [smem:[#allocation43_spill]] }
0x3243   :  { %15788 = vrsqrt.f32 %v7616_v61  ;;  %v7617_v22 = vadd.f32 1e-12, %v7613_v57  ;;  %v17837_v61 = vrot.slane %v13109_v29, %v16448_v30  ;;  %v17840_v57 = vrot.slane %v13109_v29, %v16455_v39 }
0x3245   :  { %15790 = vrsqrt.f32 %v7617_v22 }
0x3249   :  { %v15785_v63 = vpop.eup %15784 }
0x324a   :  { %v7622_v0 = vmul.f32 %v15785_v63, %v17741_v44 }
0x324b   :  { %v15787_v20 = vpop.eup %15786 }
0x324c   :  { %v7623_v16 = vmul.f32 %v15787_v20, %v17743_v47  ;;  %v7632_v31 = vmul.f32 %v13234_v8, %v7622_v0 }
0x324d   :  { %v15789_v48 = vpop.eup %15788 }
0x324e   :  { %v7633_v40 = vmul.f32 %v13234_v8, %v7623_v16  ;;  %v17785_v35 = vadd.f32 %v13235_v21, %v7632_v31  ;;  %v7624_v5 = vmul.f32 %v15789_v48, %v17747_v6  ;;  %v17848_v48 = vrot.slane %v13109_v29, %v16788_v56 }
0x324f   :  { %v15791_v28 = vpop.eup %15790 }
0x3250   :  { %v17787_v24 = vadd.f32 %v13235_v21, %v7633_v40  ;;  %v7625_v7 = vmul.f32 %v15791_v28, %v17751_v26  ;;  %v7634_v50 = vmul.f32 %v13234_v8, %v7624_v5 }
0x3252   :  { %v7646_v44 = vpack.c.bf16 %v17787_v24, %v17785_v35  ;;  %v7635_v47 = vmul.f32 %v13234_v8, %v7625_v7  ;;  %v17797_v6 = vadd.f32 %v13235_v21, %v7634_v50  ;;  %v17843_v8 = vrot.slane %v13109_v29, %v16452_v38 }
0x3254   :  { %7862 = vmatmul.mubr.bf16.vlgmr.msra.gmra.mrb[160].mxu1 %v7646_v44  ;;  %7915 = vmatmul.mubr.bf16.vlgmr.msra.gmra.mrb[168].mxu0 %v7646_v44  ;;  %v17795_v62 = vadd.f32 %v13235_v21, %v7635_v47 }
0x3255   :  { %7871 = vmatprep.mubr.bf16.mxu1 %v16023_v60  ;;  %7924 = vmatprep.mubr.bf16.mxu0 %v16023_v60 }
0x3256   :  { %v7647_v26 = vpack.c.bf16 %v17795_v62, %v17797_v6  ;;  %13805 = vmatpush3.bf16.msra.mxu1 %v15282_v25  ;;  %13833 = vmatpush3.bf16.msra.mxu0 %v15284_v37 }
0x3257   :  { %13806 = vmatprep.subr.bf16.mxu1 %v15285_v58  ;;  %13834 = vmatprep.subr.bf16.mxu0 %v15287_v34 }
0x325a   :  { %13807 = vmatpush3.bf16.msra.mxu1 %v15286_v12  ;;  %13835 = vmatpush3.bf16.msra.mxu0 %v15288_v18 }
0x325b   :  { %13808 = vmatprep.subr.bf16.mxu1 %v15289_v43  ;;  %13836 = vmatprep.subr.bf16.mxu0 %v15291_v54 }
0x325c   :  { %7872 = vmatmul.mubr.bf16.gmra.mrb[164].mxu1 %v7647_v26  ;;  %7925 = vmatmul.mubr.bf16.gmra.mrb[172].mxu0 %v7647_v26 }
0x325e   :  { %13809 = vmatpush3.bf16.msra.mxu1 %v15290_v19  ;;  %13837 = vmatpush3.bf16.msra.mxu0 %v15292_v33 }
0x325f   :  { %13810 = vmatprep.subr.bf16.mxu1 %v15293_v53  ;;  %13838 = vmatprep.subr.bf16.mxu0 %v15295_v2 }
0x3262   :  { %13811 = vmatpush3.bf16.msra.mxu1 %v15294_v41  ;;  %13839 = vmatpush3.bf16.msra.mxu0 %v15296_v55 }
0x3263   :  { %13812 = vmatprep.subr.bf16.mxu1 %v15297_v9  ;;  %13840 = vmatprep.subr.bf16.mxu0 %v15299_v45 }
0x3266   :  { %13813 = vmatpush3.bf16.msra.mxu1 %v15298_v46  ;;  %13841 = vmatpush3.bf16.msra.mxu0 %v15300_v49 }
0x3267   :  { %13814 = vmatprep.subr.bf16.mxu1 %v15301_v3  ;;  %13842 = vmatprep.subr.bf16.mxu0 %v15303_v14 }
0x326a   :  { %13815 = vmatpush3.bf16.msra.mxu1 %v15302_v36  ;;  %13843 = vmatpush3.bf16.msra.mxu0 %v15304_v15 }
0x326b   :  { %13816 = vmatprep.subr.bf16.mxu1 %v15305_v59  ;;  %13844 = vmatprep.subr.bf16.mxu0 %v15307_v42 }
0x326e   :  { %13817 = vmatpush3.bf16.msra.mxu1 %v15306_v13  ;;  %13845 = vmatpush3.bf16.msra.mxu0 %v15308_v52 }
0x326f   :  { %13818 = vmatprep.subr.bf16.mxu1 %v15309_v11  ;;  %13846 = vmatprep.subr.bf16.mxu0 %v15311_v23 }
0x3272   :  { %13819 = vmatpush3.bf16.msra.mxu1 %v15310_v51  ;;  %13847 = vmatpush3.bf16.msra.mxu0 %v15312_v17 }
0x3273   :  { %14510 = vmatprep.subr.bf16.mxu0 %v16021_v27  ;;  %8805 = vmatprep.subr.bf16.mxu1 %v15315_v32 }
0x3327   :  { %v7863_v22 = vpop.f32.mrb[160].mxu1  ;;  %v7916_v63 = vpop.f32.mrb[168].mxu0 }
0x3328   :  { %v7864_v0 = vadd.f32 %v7863_v22, %v17837_v61  ;;  %v7917_v20 = vadd.f32 %v7916_v63, %v17840_v57  ;;  %v7865_v16 = vpop.f32.mrb[161].mxu1  ;;  %v7918_v31 = vpop.f32.mrb[169].mxu0 }
0x3329   :  { %v7867_v21 = vpop.f32.mrb[162].mxu1  ;;  %v7920_v40 = vpop.f32.mrb[170].mxu0  ;;  %v17851_v7 = vadd.f32 %v7865_v16, %v17843_v8  ;;  %v17861_v37 = vadd.f32 %v7918_v31, %v17848_v48 }
0x332a   :  { %v7951_v28 = vmul.f32 0.044715, %v7864_v0  ;;  %v7953_v5 = vmul.f32 0.044715, %v7917_v20  ;;  %v7868_v44 = vadd.f32 %v7867_v21, %v17837_v61  ;;  %v17855_v47 = vadd.f32 %v7920_v40, %v17840_v57  ;;  %v7869_v50 = vpop.f32.mrb[163].mxu1  ;;  %v7922_v26 = vpop.f32.mrb[171].mxu0 }
0x332b   :  { %v17858_v4 = vadd.f32 %v7869_v50, %v17843_v8  ;;  %v17864_v12 = vadd.f32 %v7922_v26, %v17848_v48  ;;  %v17866_v34 = vmul.f32 0.5, %v7864_v0  ;;  %v7952_v54 = vmul.f32 0.044715, %v17851_v7 }
0x332c   :  { %v7967_v1 = vmul.f32 %v7951_v28, %v7864_v0  ;;  %v7969_v25 = vmul.f32 %v7953_v5, %v7917_v20  ;;  %v7955_v58 = vmul.f32 0.044715, %v7868_v44  ;;  %v7957_v19 = vmul.f32 0.044715, %v17855_v47 }
0x332d   :  { %v7956_v53 = vmul.f32 0.044715, %v17858_v4  ;;  %v17871_v9 = vmul.f32 0.5, %v7917_v20  ;;  %v7954_v14 = vmul.f32 0.044715, %v17861_v37  ;;  %v7968_v32 = vmul.f32 %v7952_v54, %v17851_v7 }
0x332e   :  { %v7983_v18 = vmul.f32 %v7967_v1, %v7864_v0  ;;  %v7985_v43 = vmul.f32 %v7969_v25, %v7917_v20  ;;  %v7971_v33 = vmul.f32 %v7955_v58, %v7868_v44  ;;  %v7973_v45 = vmul.f32 %v7957_v19, %v17855_v47 }
0x332f   :  { %v7873_v41 = vpop.f32.mrb[164].mxu1  ;;  %v7926_v2 = vpop.f32.mrb[172].mxu0  ;;  %v7958_v15 = vmul.f32 0.044715, %v17864_v12  ;;  %v7972_v22 = vmul.f32 %v7956_v53, %v17858_v4  ;;  %v7970_v31 = vmul.f32 %v7954_v14, %v17861_v37  ;;  %v7984_v1 = vmul.f32 %v7968_v32, %v17851_v7 }
0x3330   :  { %v7999_v55 = vadd.f32 %v7983_v18, %v7864_v0  ;;  %v8001_v46 = vadd.f32 %v7985_v43, %v7917_v20  ;;  %v7875_v49 = vpop.f32.mrb[165].mxu1  ;;  %v7928_v3 = vpop.f32.mrb[173].mxu0  ;;  %v7987_v36 = vmul.f32 %v7971_v33, %v7868_v44  ;;  %v17877_v59 = vadd.f32 %v7873_v41, %v17837_v61 }
0x3331   :  { %v7877_v42 = vpop.f32.mrb[166].mxu1  ;;  %v7930_v13 = vpop.f32.mrb[174].mxu0  ;;  %v7989_v23 = vmul.f32 %v7973_v45, %v17855_v47  ;;  %v17883_v63 = vadd.f32 %v7926_v2, %v17840_v57  ;;  %v17888_v16 = vadd.f32 %v7875_v49, %v17843_v8  ;;  %v7974_v40 = vmul.f32 %v7958_v15, %v17864_v12 }
0x3332   :  { %v8015_v52 = vmul.f32 0.7978846, %v7999_v55  ;;  %v8017_v11 = vmul.f32 0.7978846, %v8001_v46  ;;  %v7879_v51 = vpop.f32.mrb[167].mxu1  ;;  %v7932_v17 = vpop.f32.mrb[175].mxu0  ;;  %v8003_v29 = vadd.f32 %v7987_v36, %v7868_v44  ;;  %v17894_v50 = vadd.f32 %v7928_v3, %v17848_v48 }
0x3333   :  { %v8005_v0 = vadd.f32 %v7989_v23, %v17855_v47  ;;  %v7959_v20 = vmul.f32 0.044715, %v17877_v59  ;;  %v7960_v5 = vmul.f32 0.044715, %v17888_v16  ;;  %v17897_v26 = vadd.f32 %v7877_v42, %v17837_v61 }
0x3334   :  { %15792 = vtanh.f32 %v8015_v52  ;;  %v8019_v21 = vmul.f32 0.7978846, %v8003_v29  ;;  %v7988_v25 = vmul.f32 %v7972_v22, %v17858_v4  ;;  %v17902_v58 = vadd.f32 %v7930_v13, %v17840_v57 }
0x3335   :  { %15794 = vtanh.f32 %v8017_v11  ;;  %v8021_v28 = vmul.f32 0.7978846, %v8005_v0  ;;  %v7975_v18 = vmul.f32 %v7959_v20, %v17877_v59  ;;  %v7961_v43 = vmul.f32 0.044715, %v17883_v63 }
0x3336   :  { %15796 = vtanh.f32 %v8019_v21  ;;  %v7962_v19 = vmul.f32 0.044715, %v17894_v50  ;;  %v7939_v54 = vmul.f32 0.5, %v7868_v44  ;;  %v7976_v33 = vmul.f32 %v7960_v5, %v17888_v16 }
0x3337   :  { %15798 = vtanh.f32 %v8021_v28  ;;  %v17909_v61 = vadd.f32 %v7879_v51, %v17843_v8  ;;  %v17912_v53 = vadd.f32 %v7932_v17, %v17848_v48  ;;  %v7986_v41 = vmul.f32 %v7970_v31, %v17861_v37 }
0x3338   :  { %v7990_v57 = vmul.f32 %v7974_v40, %v17864_v12  ;;  %v7963_v2 = vmul.f32 0.044715, %v17897_v26  ;;  %v7965_v55 = vmul.f32 0.044715, %v17902_v58  ;;  %v7978_v46 = vmul.f32 %v7962_v19, %v17894_v50 }
0x3339   :  { %v7964_v44 = vmul.f32 0.044715, %v17909_v61  ;;  %v7966_v45 = vmul.f32 0.044715, %v17912_v53  ;;  %v8000_v8 = vadd.f32 %v7984_v1, %v17851_v7  ;;  %v7941_v49 = vmul.f32 0.5, %v17855_v47 }
0x333a   :  { %v7991_v48 = vmul.f32 %v7975_v18, %v17877_v59  ;;  %v7977_v3 = vmul.f32 %v7961_v43, %v17883_v63  ;;  %v8004_v14 = vadd.f32 %v7988_v25, %v17858_v4  ;;  %v7992_v36 = vmul.f32 %v7976_v33, %v17888_v16 }
0x333b   :  { %v7980_v15 = vmul.f32 %v7964_v44, %v17909_v61  ;;  %v7982_v42 = vmul.f32 %v7966_v45, %v17912_v53  ;;  %v8016_v13 = vmul.f32 0.7978846, %v8000_v8  ;;  %v7979_v11 = vmul.f32 %v7963_v2, %v17897_v26 }
0x333c   :  { %v8020_v23 = vmul.f32 0.7978846, %v8004_v14  ;;  %v8002_v51 = vadd.f32 %v7986_v41, %v17861_v37  ;;  %v8006_v47 = vadd.f32 %v7990_v57, %v17864_v12  ;;  %v7994_v32 = vmul.f32 %v7978_v46, %v17894_v50 }
0x333d   :  { %v7981_v29 = vmul.f32 %v7965_v55, %v17902_v58  ;;  %v7996_v22 = vmul.f32 %v7980_v15, %v17909_v61  ;;  %15800 = vtanh.f32 %v8016_v13  ;;  %v7993_v40 = vmul.f32 %v7977_v3, %v17883_v63 }
0x333e   :  { %v15793_v52 = vpop.eup %15792  ;;  %15802 = vtanh.f32 %v8020_v23  ;;  %v8018_v0 = vmul.f32 0.7978846, %v8002_v51  ;;  %v8022_v20 = vmul.f32 0.7978846, %v8006_v47  ;;  %v7998_v28 = vmul.f32 %v7982_v42, %v17912_v53 }
0x333f   :  { %v15795_v17 = vpop.eup %15794  ;;  %v8047_v31 = vadd.f32 1.0, %v15793_v52  ;;  %v8008_v1 = vadd.f32 %v7992_v36, %v17888_v16  ;;  %v7995_v18 = vmul.f32 %v7979_v11, %v17897_v26  ;;  %v8012_v19 = vadd.f32 %v7996_v22, %v17909_v61 }
0x3340   :  { %v15797_v21 = vpop.eup %15796  ;;  %v8049_v5 = vadd.f32 1.0, %v15795_v17  ;;  %15804 = vtanh.f32 %v8018_v0  ;;  %v7997_v33 = vmul.f32 %v7981_v29, %v17902_v58  ;;  %v8010_v44 = vadd.f32 %v7994_v32, %v17894_v50 }
0x3341   :  { %v15799_v25 = vpop.eup %15798  ;;  %v8051_v43 = vadd.f32 1.0, %v15797_v21  ;;  %15806 = vtanh.f32 %v8022_v20  ;;  %v8024_v57 = vmul.f32 0.7978846, %v8008_v1  ;;  %v8063_v2 = vmul.f32 %v8047_v31, %v17866_v34  ;;  %v15313_v1 = vld [vmem:[%s18739_s12] ss:$12 sps:$4 sm:$0xff]  }
0x3342   :  { %v8053_v41 = vadd.f32 1.0, %v15799_v25  ;;  %v8028_v46 = vmul.f32 0.7978846, %v8012_v19  ;;  %v17944_v45 = vmul.f32 %v8049_v5, %v17871_v9  ;;  %v8014_v3 = vadd.f32 %v7998_v28, %v17912_v53  ;;  %v15318_v19 = vld [vmem:[%s18739_s12 + $0x1c] ss:$12 sps:$4 sm:$0xff]  }
0x3343   :  { %v8067_v55 = vmul.f32 %v8051_v43, %v7939_v54  ;;  %15808 = vtanh.f32 %v8024_v57  ;;  %v8026_v36 = vmul.f32 0.7978846, %v8010_v44  ;;  %v8007_v34 = vadd.f32 %v7991_v48, %v17877_v59 }
0x3344   :  { %v17946_v8 = vmul.f32 %v8053_v41, %v7941_v49  ;;  %15810 = vtanh.f32 %v8028_v46  ;;  %v8030_v42 = vmul.f32 0.7978846, %v8014_v3  ;;  %v8011_v54 = vadd.f32 %v7995_v18, %v17897_v26  ;;  %v15316_v46 = vld [vmem:[%s18739_s12 + $0x18] ss:$12 sps:$4 sm:$0xff]  }
0x3345   :  { %v8079_v14 = vpack.c.bf16 %v8067_v55, %v8063_v2  ;;  %15812 = vtanh.f32 %v8026_v36  ;;  %v8009_v9 = vadd.f32 %v7993_v40, %v17883_v63  ;;  %v8023_v49 = vmul.f32 0.7978846, %v8007_v34 }
0x3346   :  { %v8081_v15 = vpack.c.bf16 %v17946_v8, %v17944_v45  ;;  %15814 = vtanh.f32 %v8030_v42  ;;  %v8027_v52 = vmul.f32 0.7978846, %v8011_v54  ;;  %v8013_v11 = vadd.f32 %v7997_v33, %v17902_v58 }
0x3347   :  { %v15801_v13 = vpop.eup %15800  ;;  %v7936_v51 = vmul.f32 0.5, %v17851_v7  ;;  %v8025_v17 = vmul.f32 0.7978846, %v8009_v9  ;;  %v7940_v32 = vmul.f32 0.5, %v17858_v4  ;;  %15816 = vtanh.f32 %v8023_v49 }
0x3348   :  { %v15803_v23 = vpop.eup %15802  ;;  %v8048_v47 = vadd.f32 1.0, %v15801_v13  ;;  %v8029_v48 = vmul.f32 0.7978846, %v8013_v11  ;;  %15818 = vtanh.f32 %v8027_v52  ;;  %v7938_v40 = vmul.f32 0.5, %v17861_v37  ;;  %v15319_v52 = vld [vmem:[%s18739_s12 + $0x30] ss:$12 sps:$4 sm:$0xff]  }
0x3349   :  { %v8052_v29 = vadd.f32 1.0, %v15803_v23  ;;  %15820 = vtanh.f32 %v8025_v17  ;;  %v7942_v7 = vmul.f32 0.5, %v17864_v12  ;;  %v7944_v41 = vmul.f32 0.5, %v17888_v16  ;;  %v15324_v17 = vld [vmem:[%s18739_s12 + $0x4c] ss:$12 sps:$4 sm:$0xff]  }
0x334a   :  { %v15805_v22 = vpop.eup %15804  ;;  %v8064_v20 = vmul.f32 %v8048_v47, %v7936_v51  ;;  %15822 = vtanh.f32 %v8029_v48  ;;  %v7948_v57 = vmul.f32 0.5, %v17909_v61  ;;  %v7946_v3 = vmul.f32 0.5, %v17894_v50  ;;  %v15321_v61 = vld [vmem:[%s18739_s12 + $0x34] ss:$12 sps:$4 sm:$0xff]  }
0x334b   :  { %v15807_v0 = vpop.eup %15806  ;;  %v8068_v31 = vmul.f32 %v8052_v29, %v7940_v32  ;;  %v8050_v21 = vadd.f32 1.0, %v15805_v22  ;;  %v7950_v16 = vmul.f32 0.5, %v17912_v53  ;;  %v7943_v11 = vmul.f32 0.5, %v17877_v59 }
0x334c   :  { %v8054_v28 = vadd.f32 1.0, %v15807_v0  ;;  %v7947_v50 = vmul.f32 0.5, %v17897_v26  ;;  %v7949_v48 = vmul.f32 0.5, %v17902_v58  ;;  %v15325_v58 = vld [vmem:[%s18739_s12 + $0x60] ss:$12 sps:$4 sm:$0xff]  }
0x334d   :  { %v15809_v5 = vpop.eup %15808  ;;  %v8080_v4 = vpack.c.bf16 %v8068_v31, %v8064_v20  ;;  %v8066_v18 = vmul.f32 %v8050_v21, %v7938_v40  ;;  %v15322_v20 = vld [vmem:[%s18739_s12 + $0x48] ss:$12 sps:$4 sm:$0xff]   ;;  %v15328_v40 = vld [vmem:[%s18739_s12 + $0x78] ss:$12 sps:$4 sm:$0xff]  }
0x334e   :  { %v15811_v25 = vpop.eup %15810  ;;  %v8070_v43 = vmul.f32 %v8054_v28, %v7942_v7  ;;  %v8056_v33 = vadd.f32 1.0, %v15809_v5  ;;  %v15330_v21 = vld [vmem:[%s18739_s12 + $0x7c] ss:$12 sps:$4 sm:$0xff]   ;;  %v15333_v7 = vld [vmem:[%s18739_s12 + $0x94] ss:$12 sps:$4 sm:$0xff]  }
0x334f   :  { %8317 = vmatprep.mubr.bf16.mxu1 %v8080_v4  ;;  %v8060_v37 = vadd.f32 1.0, %v15811_v25  ;;  %v15813_v2 = vpop.eup %15812  ;;  %v15331_v28 = vld [vmem:[%s18739_s12 + $0x90] ss:$12 sps:$4 sm:$0xff]   ;;  %v17984_v5 = vld [vmem:[%s18740_s10] sm:$0xf] }
0x3350   :  { %v8082_v12 = vpack.c.bf16 %v8070_v43, %v8066_v18  ;;  %8318 = vmatmul.mubr.bf16.vlgmr.msra.gmra.mrb[168].mxu1 %v8079_v14  ;;  %v15815_v55 = vpop.eup %15814  ;;  %v8072_v44 = vmul.f32 %v8056_v33, %v7944_v41  ;;  %v8058_v8 = vadd.f32 1.0, %v15813_v2  ;;  %v15336_v4 = vld [vmem:[%s18739_s12 + $0xac] ss:$12 sps:$4 sm:$0xff]   ;;  %v15334_v25 = vld [vmem:[%s18739_s12 + $0xa8] ss:$12 sps:$4 sm:$0xff]  }
0x3351   :  { %8806 = vmatpush1.bf16.msra.mxu1 %v15313_v1  ;;  %v8076_v45 = vmul.f32 %v8060_v37, %v7948_v57  ;;  %v8062_v36 = vadd.f32 1.0, %v15815_v55  ;;  %v15817_v42 = vpop.eup %15816  ;;  %v8658_v1 = vcombine.low %v17984_v5, %v17984_v5 }
0x3352   :  { %8366 = vmatprep.mubr.bf16.mxu0 %v8082_v12  ;;  %8807 = vmatprep.subr.bf16.mxu1 %v15318_v19  ;;  %v15819_v54 = vpop.eup %15818  ;;  %v8074_v14 = vmul.f32 %v8058_v8, %v7946_v3  ;;  %v8055_v13 = vadd.f32 1.0, %v15817_v42  ;;  %v13268_v19 = vld [vmem:[%s18736_s30 + $0x2] ss:$0 sm:$0xff]  ;;  %s16030_s30 = smov [#allocation3]  }
0x3353   :  { %8367 = vmatmul.mubr.bf16.vlgmr.msra.gmra.mrb[176].mxu0 %v8081_v15  ;;  %v8084_v34 = vpack.c.bf16 %v8076_v45, %v8072_v44  ;;  %v8078_v9 = vmul.f32 %v8062_v36, %v7950_v16  ;;  %v15821_v49 = vpop.eup %15820  ;;  %v8059_v23 = vadd.f32 1.0, %v15819_v54  ;;  %v7945_v15 = vmul.f32 0.5, %v17883_v63  ;;  %v15327_v63 = vld [vmem:[%s18739_s12 + $0x64] ss:$12 sps:$4 sm:$0xff]  }
0x3354   :  { %v15823_v53 = vpop.eup %15822  ;;  %v8057_v47 = vadd.f32 1.0, %v15821_v49  ;;  %v8071_v32 = vmul.f32 %v8055_v13, %v7943_v11  ;;  %v17990_v18 = vpack.c.bf16 %v8658_v1, %v8658_v1 }
0x3355   :  { %8808 = vmatpush1.bf16.msra.mxu1 %v15316_v46  ;;  %8325 = vmatprep.mubr.bf16.mxu1 %v8084_v34  ;;  %v8086_v51 = vpack.c.bf16 %v8078_v9, %v8074_v14  ;;  %v8075_v29 = vmul.f32 %v8059_v23, %v7947_v50  ;;  %v8061_v22 = vadd.f32 1.0, %v15823_v53 }
0x3356   :  { %8809 = vmatprep.subr.bf16.mxu1 %v15321_v61  ;;  %v8073_v26 = vmul.f32 %v8057_v47, %v7945_v15 }
0x3357   :  { %8374 = vmatprep.mubr.bf16.mxu0 %v8086_v51  ;;  %v8083_v59 = vpack.c.bf16 %v8075_v29, %v8071_v32  ;;  %v8077_v0 = vmul.f32 %v8061_v22, %v7949_v48  ;;  %v18006_v32 = vld [vmem:[%s18741_s11] sm:$0x7] }
0x3358   :  { %v8665_v29 = vrot.slane %v18006_v32, %v16448_v30  ;;  %v8669_v48 = vrot.slane %v18006_v32, %v16452_v38 }
0x3359   :  { %8810 = vmatpush1.bf16.msra.mxu1 %v15319_v52  ;;  %v8085_v31 = vpack.c.bf16 %v8077_v0, %v8073_v26 }
0x335a   :  { %8811 = vmatprep.subr.bf16.mxu1 %v15324_v17  ;;  %8326 = vmatmul.mubr.bf16.gmra.mrb[172].mxu1 %v8083_v59 }
0x335b   :  { %8837 = vmatprep.mubr.bf16.mxu1 %v16023_v60  ;;  %8375 = vmatmul.mubr.bf16.gmra.mrb[180].mxu0 %v8085_v31 }
0x335c   :  { %14526 = vmatprep.mubr.msk.bf16.mxu0 %vm16022_vm1, %v16021_v27 }
0x335d   :  { %8812 = vmatpush1.bf16.msra.mxu1 %v15322_v20 }
0x335e   :  { %8813 = vmatprep.subr.bf16.mxu1 %v15327_v63 }
0x3361   :  { %8814 = vmatpush1.bf16.msra.mxu1 %v15325_v58 }
0x3362   :  { %8815 = vmatprep.subr.bf16.mxu1 %v15330_v21 }
0x3365   :  { %8816 = vmatpush1.bf16.msra.mxu1 %v15328_v40 }
0x3366   :  { %8817 = vmatprep.subr.bf16.mxu1 %v15333_v7 }
0x3369   :  { %8818 = vmatpush1.bf16.msra.mxu1 %v15331_v28 }
0x336a   :  { %8819 = vmatprep.subr.bf16.mxu1 %v15336_v4 }
0x336d   :  { %8820 = vmatpush1.bf16.msra.mxu1 %v15334_v25 }
0x336e   :  { %14530 = vmatprep.subr.bf16.mxu1 %v16021_v27 }
0x3370   :  { %8838 = vmatmul.mubr.bf16.vlgmr.msra.gmra.mrb[176].mxu1 %v17990_v18 }
0x3371   :  { %14532 = vmatprep.mubr.msk.bf16.mxu1 %vm16022_vm1, %v16021_v27 }
0x3423   :  { %v13820_v43 = vpop.f32.mrb[168].mxu1 }
0x3424   :  { %v13821_v33 = vpop.f32.mrb[169].mxu1 }
0x3425   :  { %v13822_v41 = vadd.f32 %v13821_v33, %v13820_v43  ;;  %v13823_v57 = vpop.f32.mrb[170].mxu1  ;;  %v15339_v33 = vld [vmem:[%s18739_s12 + $0x20] ss:$12 sps:$4 sm:$0xff]  }
0x3426   :  { %v13848_v37 = vpop.f32.mrb[176].mxu0  ;;  %v13824_v2 = vpop.f32.mrb[171].mxu1 }
0x3427   :  { %v8320_v12 = vadd.f32 %v13822_v41, %v13268_v19  ;;  %v13849_v55 = vpop.f32.mrb[177].mxu0  ;;  %v13825_v46 = vadd.f32 %v13824_v2, %v13823_v57  ;;  %v15340_v41 = vld [vmem:[%s18739_s12 + $0x38] ss:$12 sps:$4 sm:$0xff]   ;;  %v15341_v57 = vld [vmem:[%s18739_s12 + $0x50] ss:$12 sps:$4 sm:$0xff]  }
0x3428   :  { %v13850_v44 = vadd.f32 %v13849_v55, %v13848_v37  ;;  %v13851_v45 = vpop.f32.mrb[178].mxu0  ;;  %v15342_v37 = vld [vmem:[%s18739_s12 + $0x68] ss:$12 sps:$4 sm:$0xff]   ;;  %v15343_v2 = vld [vmem:[%s18739_s12 + $0x80] ss:$12 sps:$4 sm:$0xff]  }
0x3429   :  { %v8323_v8 = vadd.f32 %v13825_v46, %v13268_v19  ;;  %v13852_v3 = vpop.f32.mrb[179].mxu0  ;;  %v15345_v55 = vld [vmem:[%s18739_s12 + $0xb0] ss:$12 sps:$4 sm:$0xff]  }
0x342a   :  { %v17997_v16 = vadd.f32 %v13850_v44, %v8320_v12  ;;  %v13853_v36 = vadd.f32 %v13852_v3, %v13851_v45  ;;  %v15344_v12 = vld [vmem:[%s18739_s12 + $0x98] ss:$12 sps:$4 sm:$0xff]  }
0x342c   :  { %v17999_v61 = vadd.f32 %v13853_v36, %v8323_v8 }
0x342d   :  { %v13826_v42 = vpop.f32.mrb[172].mxu1 }
0x342e   :  { %v13827_v34 = vpop.f32.mrb[173].mxu1  ;;  %v13854_v54 = vpop.f32.mrb[180].mxu0 }
0x342f   :  { %v13828_v14 = vadd.f32 %v13827_v34, %v13826_v42  ;;  %v13829_v9 = vpop.f32.mrb[174].mxu1  ;;  %v13855_v13 = vpop.f32.mrb[181].mxu0 }
0x3430   :  { %v13830_v49 = vpop.f32.mrb[175].mxu1  ;;  %v13856_v11 = vadd.f32 %v13855_v13, %v13854_v54  ;;  %v13857_v50 = vpop.f32.mrb[182].mxu0 }
0x3431   :  { %v8328_v52 = vadd.f32 %v13828_v14, %v13268_v19  ;;  %v13831_v23 = vadd.f32 %v13830_v49, %v13829_v9  ;;  %v13858_v53 = vpop.f32.mrb[183].mxu0 }
0x3432   :  { %v13859_v47 = vadd.f32 %v13858_v53, %v13857_v50 }
0x3433   :  { %v18001_v51 = vadd.f32 %v13856_v11, %v8328_v52  ;;  %v8331_v15 = vadd.f32 %v13831_v23, %v13268_v19  ;;  %v15338_v19 = vld [vmem:[%s18739_s12 + $0x8] ss:$12 sps:$4 sm:$0xff]  }
0x3434   :  { %14511 = vmatpush3.bf16.msra.mxu0 %v15338_v19 }
0x3435   :  { %v18003_v17 = vadd.f32 %v13859_v47, %v8331_v15  ;;  %14512 = vmatprep.subr.bf16.mxu0 %v16021_v27 }
0x3438   :  { %14513 = vmatpush3.bf16.msra.mxu0 %v15339_v33 }
0x3439   :  { %14514 = vmatprep.subr.bf16.mxu0 %v16021_v27 }
0x343c   :  { %14515 = vmatpush3.bf16.msra.mxu0 %v15340_v41 }
0x343d   :  { %14516 = vmatprep.subr.bf16.mxu0 %v16021_v27 }
0x3440   :  { %14517 = vmatpush3.bf16.msra.mxu0 %v15341_v57 }
0x3441   :  { %14518 = vmatprep.subr.bf16.mxu0 %v16021_v27 }
0x3443   :  { %v8839_v22 = vpop.f32.mrb[176].mxu1 }
0x3444   :  { %v8840_v59 = vadd.f32 %v8839_v22, %v8665_v29  ;;  %v8841_v26 = vpop.f32.mrb[177].mxu1  ;;  %14519 = vmatpush3.bf16.msra.mxu0 %v15342_v37 }
0x3445   :  { %v8842_v0 = vadd.f32 %v8841_v26, %v8669_v48  ;;  %v8843_v20 = vpop.f32.mrb[178].mxu1  ;;  %14520 = vmatprep.subr.bf16.mxu0 %v16021_v27  ;;  %v8673_v48 = vrot.slane %v18006_v32, %v16455_v39 }
0x3446   :  { %v8844_v63 = vpop.f32.mrb[179].mxu1 }
0x3447   :  { %v8889_v31 = vcombine.low %v8840_v59, %v8842_v0  ;;  %v8890_v58 = vcombine.high %v8840_v59, %v8842_v0  ;;  %v13327_v21 = vcombine.low %v8842_v0, %v8842_v0  ;;  %v13328_v7 = vcombine.high %v8842_v0, %v8842_v0 }
0x3448   :  { %14521 = vmatpush3.bf16.msra.mxu0 %v15343_v2 }
0x3449   :  { %v18012_v40 = vpack.c.bf16 %v13327_v21, %v13327_v21  ;;  %v18017_v4 = vpack.c.bf16 %v13328_v7, %v13328_v7  ;;  %v18019_v1 = vpack.c.bf16 %v8889_v31, %v8889_v31  ;;  %v18028_v43 = vpack.c.bf16 %v8890_v58, %v8890_v58  ;;  %14522 = vmatprep.subr.bf16.mxu0 %v16021_v27 }
0x344b   :  { %v8909_v28 = vsel %vm308_vm0, %v18012_v40, 0  ;;  %v8955_v25 = vsel %vm308_vm0, %v18017_v4, 0 }
0x344c   :  { %14531 = vmatpush3.bf16.xpose.msra.mxu1 %v8909_v28  ;;  %14523 = vmatpush3.bf16.msra.mxu0 %v15344_v12 }
0x344d   :  { %14536 = vmatprep.subr.bf16.mxu1 %v16021_v27  ;;  %14524 = vmatprep.subr.bf16.mxu0 %v16021_v27 }
0x3450   :  { %14525 = vmatpush3.bf16.msra.mxu0 %v15345_v55 }
0x3451   :  { %14542 = vmatprep.subr.bf16.mxu0 %v16021_v27 }
0x3453   :  { %14533 = vmatmul.mubr.msk.bf16.vlgmr.msra.gmra.mrb[180].mxu1 %vm308_vm0, %v18019_v1  ;;  %14527 = vmatmul.mubr.bf16.vlgmr.msra.gmra.mrb[184].mxu0 %v17990_v18 }
0x3454   :  { %14537 = vmatpush3.bf16.xpose.msra.mxu1 %v8955_v25  ;;  %14538 = vmatprep.mubr.msk.bf16.mxu1 %vm16022_vm1, %v16021_v27 }
0x3455   :  { %14548 = vmatprep.subr.bf16.mxu1 %v16021_v27  ;;  %14544 = vmatprep.mubr.msk.bf16.mxu0 %vm16022_vm1, %v16021_v27 }
0x345b   :  { %14539 = vmatmul.mubr.msk.bf16.vlgmr.msra.gmra.mrb[184].mxu1 %vm308_vm0, %v18028_v43 }
0x345c   :  { %14550 = vmatprep.mubr.msk.bf16.mxu1 %vm16022_vm1, %v16021_v27 }
0x3526   :  { %v8945_v46 = vpop.f32.mrb[180].mxu1  ;;  %v8880_v22 = vpop.f32.mrb[184].mxu0 }
0x3527   :  { %v8997_v44 = vmul.f32 0.17677669, %v8945_v46  ;;  %v14534_v45 = vpop.f32.mrb[181].mxu1  ;;  %v14528_v59 = vpop.f32.mrb[185].mxu0  ;;  %v8881_v26 = vadd.f32 %v8880_v22, %v8673_v48 }
0x3528   :  { %v8948_v8 = vpop.f32.mrb[182].mxu1  ;;  %v8883_v0 = vpop.f32.mrb[186].mxu0 }
0x3529   :  { %v14535_v3 = vpop.f32.mrb[183].mxu1  ;;  %v9000_v36 = vsel %vm8999_vm6, %v8997_v44, -inf  ;;  %v14529_v20 = vpop.f32.mrb[187].mxu0  ;;  %v8891_v63 = vcombine.high %v8881_v26, %v8881_v26  ;;  %v18065_v31 = vpack.c.bf16 %v8881_v26, %v8881_v26 }
0x352a   :  { %9001 = vmax.xlane.f32.xlu1 %v9000_v36 }
0x352b   :  { %v18069_v58 = vpack.c.bf16 %v8891_v63, %v8891_v63  ;;  %v9029_v21 = vsel %vm653_vm5, %v18065_v31, 0 }
0x352c   :  { %14543 = vmatpush3.bf16.msra.mxu0 %v9029_v21 }
0x352d   :  { %v9075_v32 = vsel %vm653_vm5, %v18069_v58, 0  ;;  %14554 = vmatprep.subr.bf16.mxu0 %v16021_v27 }
0x352e   :  { %v8991_v42 = vpop.f32.mrb[184].mxu1  ;;  %14549 = vmatpush3.bf16.msra.mxu1 %v9075_v32 }
0x352f   :  { %v8998_v34 = vmul.f32 0.17677669, %v8991_v42  ;;  %v14540_v54 = vpop.f32.mrb[185].mxu1  ;;  %14560 = vmatprep.subr.bf16.mxu1 %v16021_v27 }
0x3530   :  { %v8994_v14 = vpop.f32.mrb[186].mxu1 }
0x3531   :  { %v14541_v9 = vpop.f32.mrb[187].mxu1  ;;  %v9003_v13 = vsel %vm8999_vm6, %v8998_v34, -inf }
0x3532   :  { %9004 = vmax.xlane.f32.xlu0 %v9003_v13 }
0x353b   :  { %9126 = vrot.lane.b32.xlu1 %v18012_v40, %s16025_s9 }
0x35b7   :  { %v9002_v18 = vpop.xlane.xlu1 %9001 }
0x35b8   :  { %v9006_v49 = vsub.f32 %v8997_v44, %v9002_v18 }
0x35ba   :  { %v9008_v52 = vmul.f32 1.442695, %v9006_v49 }
0x35bb   :  { %v9127_v7 = vpop.permute.xlu1 %9126 }
0x35bc   :  { %15824 = vpow2.f32 %v9008_v52  ;;  %v9132_v57 = vsel %vm308_vm0, %v9127_v7, 0 }
0x35bf   :  { %v9005_v11 = vpop.xlane.xlu0 %9004 }
0x35c0   :  { %v9007_v50 = vsub.f32 %v8998_v34, %v9005_v11 }
0x35c2   :  { %v9010_v23 = vmul.f32 1.442695, %v9007_v50 }
0x35c4   :  { %15826 = vpow2.f32 %v9010_v23 }
0x35c6   :  { %v15825_v53 = vpop.eup %15824 }
0x35c7   :  { %v9012_v15 = vsel %vm8999_vm6, %v15825_v53, 0.0 }
0x35c8   :  { %9013 = vadd.xlane.f32.xlu1 %v9012_v15 }
0x35ce   :  { %v15827_v47 = vpop.eup %15826 }
0x35cf   :  { %v9015_v29 = vsel %vm8999_vm6, %v15827_v47, 0.0 }
0x35d0   :  { %9016 = vadd.xlane.f32.xlu0 %v9015_v29 }
0x35d9   :  { %9123 = vrot.lane.b32.xlu1 %v18019_v1, %s16025_s9 }
0x35dd   :  { %9175 = vrot.lane.b32.xlu1 %v18028_v43, %s16025_s9 }
0x35e6   :  { %9178 = vrot.lane.b32.xlu0 %v18017_v4, %s16025_s9 }
0x3655   :  { %v9014_v28 = vpop.xlane.xlu1 %9013 }
0x3656   :  { %15828 = vrcp.f32 %v9014_v28 }
0x3659   :  { %v9124_v46 = vpop.permute.xlu1 %9123 }
0x365d   :  { %v9017_v25 = vpop.xlane.xlu0 %9016  ;;  %v9176_v45 = vpop.permute.xlu1 %9175 }
0x365e   :  { %15830 = vrcp.f32 %v9017_v25 }
0x3660   :  { %v15829_v19 = vpop.eup %15828 }
0x3661   :  { %v9020_v33 = vmul.f32 %v15829_v19, %v15825_v53  ;;  %v9179_v12 = vpop.permute.xlu0 %9178 }
0x3662   :  { %v9184_v44 = vsel %vm308_vm0, %v9179_v12, 0 }
0x3663   :  { %v9022_v41 = vpack.c.bf16 %v9020_v33, %v9020_v33 }
0x3665   :  { %14545 = vmatmul.mubr.msk.bf16.vlgmr.msra.gmra.mrb[188].mxu0 %vm9024_vm7, %v9022_v41 }
0x3666   :  { %14555 = vmatpush3.bf16.xpose.msra.mxu0 %v9132_v57  ;;  %14556 = vmatprep.mubr.msk.bf16.mxu0 %vm16022_vm1, %v16021_v27 }
0x3667   :  { %14566 = vmatprep.subr.bf16.mxu0 %v16021_v27 }
0x3668   :  { %v15831_v37 = vpop.eup %15830 }
0x3669   :  { %v9021_v2 = vmul.f32 %v15831_v37, %v15827_v47 }
0x366b   :  { %v9023_v55 = vpack.c.bf16 %v9021_v2, %v9021_v2 }
0x366d   :  { %14551 = vmatmul.mubr.msk.bf16.vlgmr.msra.gmra.mrb[188].mxu1 %vm9024_vm7, %v9023_v55  ;;  %14557 = vmatmul.mubr.msk.bf16.vlgmr.msra.gmra.mrb[192].mxu0 %vm308_vm0, %v9124_v46 }
0x366e   :  { %14561 = vmatpush3.bf16.xpose.msra.mxu1 %v9184_v44  ;;  %14562 = vmatprep.mubr.msk.bf16.mxu1 %vm16022_vm1, %v16021_v27 }
0x366f   :  { %14572 = vmatprep.subr.bf16.mxu1 %v16021_v27  ;;  %14568 = vmatprep.mubr.msk.bf16.mxu0 %vm16022_vm1, %v16021_v27 }
0x3675   :  { %14563 = vmatmul.mubr.msk.bf16.vlgmr.msra.gmra.mrb[192].mxu1 %vm308_vm0, %v9176_v45 }
0x3676   :  { %14574 = vmatprep.mubr.msk.bf16.mxu1 %vm16022_vm1, %v16021_v27 }
0x3738   :  { %v9065_v8 = vpop.f32.mrb[188].mxu0 }
0x3739   :  { %v14546_v3 = vpop.f32.mrb[189].mxu0 }
0x373a   :  { %v9068_v36 = vpop.f32.mrb[190].mxu0 }
0x373b   :  { %v14547_v42 = vpop.f32.mrb[191].mxu0  ;;  %v15347_v36 = vld [vmem:[%s18742_s15 + $0x8] sm:$0xff]  }
0x3740   :  { %v9111_v34 = vpop.f32.mrb[188].mxu1  ;;  %v9168_v54 = vpop.f32.mrb[192].mxu0 }
0x3741   :  { %v18093_v14 = vcombine.low %v9065_v8, %v9111_v34  ;;  %v9226_v9 = vmul.f32 0.17677669, %v9168_v54  ;;  %v14552_v13 = vpop.f32.mrb[189].mxu1  ;;  %v14558_v18 = vpop.f32.mrb[193].mxu0  ;;  %v15346_v8 = vld [vmem:[%s18742_s15] sm:$0xff]  }
0x3742   :  { %v9114_v49 = vpop.f32.mrb[190].mxu1  ;;  %v9171_v52 = vpop.f32.mrb[194].mxu0  ;;  %v15349_v18 = vld [vmem:[%s18742_s15 + $0x18] sm:$0xff]  }
0x3743   :  { %v14553_v11 = vpop.f32.mrb[191].mxu1  ;;  %v14559_v50 = vpop.f32.mrb[195].mxu0  ;;  %v9228_v23 = vsel %vm8999_vm6, %v9226_v9, -inf  ;;  %v9121_v34 = vpack.c.bf16 %v18093_v14, %v18093_v14  ;;  %v15348_v14 = vld [vmem:[%s18742_s15 + $0x10] sm:$0xff]  }
0x3744   :  { %9229 = vmax.xlane.f32.xlu0 %v9228_v23 }
0x3748   :  { %v9220_v53 = vpop.f32.mrb[192].mxu1 }
0x3749   :  { %v9227_v15 = vmul.f32 0.17677669, %v9220_v53  ;;  %v14564_v47 = vpop.f32.mrb[193].mxu1 }
0x374a   :  { %v9223_v29 = vpop.f32.mrb[194].mxu1 }
0x374b   :  { %v14565_v48 = vpop.f32.mrb[195].mxu1  ;;  %v9231_v22 = vsel %vm8999_vm6, %v9227_v15, -inf }
0x374c   :  { %9232 = vmax.xlane.f32.xlu1 %v9231_v22 }
0x375d   :  { %9253 = vrot.lane.b32.xlu1 %v18065_v31, %s16025_s9 }
0x3761   :  { %9467 = vrot.lane.b32.xlu1 %v18012_v40, %s16026_s17 }
0x3765   :  { %9517 = vrot.lane.b32.xlu1 %v18017_v4, %s16026_s17 }
0x3769   :  { %9515 = vrot.lane.b32.xlu1 %v18028_v43, %s16026_s17 }
0x37d1   :  { %v9230_v59 = vpop.xlane.xlu0 %9229 }
0x37d2   :  { %v9234_v26 = vsub.f32 %v9226_v9, %v9230_v59 }
0x37d4   :  { %v9236_v0 = vmul.f32 1.442695, %v9234_v26 }
0x37d6   :  { %15832 = vpow2.f32 %v9236_v0 }
0x37d9   :  { %v9233_v20 = vpop.xlane.xlu1 %9232 }
0x37da   :  { %v9235_v63 = vsub.f32 %v9227_v15, %v9233_v20 }
0x37dc   :  { %v9238_v21 = vmul.f32 1.442695, %v9235_v63 }
0x37dd   :  { %v9254_v32 = vpop.permute.xlu1 %9253 }
0x37de   :  { %15834 = vpow2.f32 %v9238_v21  ;;  %v9259_v7 = vsel %vm653_vm5, %v9254_v32, 0 }
0x37df   :  { %14567 = vmatpush3.bf16.msra.mxu0 %v9259_v7 }
0x37e0   :  { %v15833_v28 = vpop.eup %15832  ;;  %14578 = vmatprep.subr.bf16.mxu0 %v16021_v27 }
0x37e1   :  { %v9240_v25 = vsel %vm8999_vm6, %v15833_v28, 0.0  ;;  %v9468_v42 = vpop.permute.xlu1 %9467 }
0x37e2   :  { %9241 = vadd.xlane.f32.xlu0 %v9240_v25  ;;  %v9473_v22 = vsel %vm308_vm0, %v9468_v42, 0 }
0x37e5   :  { %v9518_v54 = vpop.permute.xlu1 %9517 }
0x37e6   :  { %v9523_v9 = vsel %vm308_vm0, %v9518_v54, 0 }
0x37e8   :  { %v15835_v19 = vpop.eup %15834 }
0x37e9   :  { %v9243_v33 = vsel %vm8999_vm6, %v15835_v19, 0.0  ;;  %v9516_v13 = vpop.permute.xlu1 %9515 }
0x37ea   :  { %9244 = vadd.xlane.f32.xlu0 %v9243_v33 }
0x3800   :  { %9302 = vrot.lane.b32.xlu0 %v18069_v58, %s16025_s9 }
0x3804   :  { %9465 = vrot.lane.b32.xlu0 %v18019_v1, %s16026_s17 }
0x386f   :  { %v9242_v41 = vpop.xlane.xlu0 %9241 }
0x3870   :  { %15836 = vrcp.f32 %v9242_v41 }
0x3877   :  { %v9245_v57 = vpop.xlane.xlu0 %9244 }
0x3878   :  { %15838 = vrcp.f32 %v9245_v57 }
0x387a   :  { %v15837_v37 = vpop.eup %15836 }
0x387b   :  { %v9248_v2 = vmul.f32 %v15837_v37, %v15833_v28  ;;  %v9303_v12 = vpop.permute.xlu0 %9302 }
0x387c   :  { %v9308_v55 = vsel %vm653_vm5, %v9303_v12, 0 }
0x387d   :  { %14573 = vmatpush3.bf16.msra.mxu1 %v9308_v55  ;;  %v9250_v46 = vpack.c.bf16 %v9248_v2, %v9248_v2 }
0x387e   :  { %14586 = vmatprep.subr.bf16.mxu1 %v16021_v27 }
0x387f   :  { %14569 = vmatmul.mubr.msk.bf16.vlgmr.msra.gmra.mrb[196].mxu0 %vm9024_vm7, %v9250_v46  ;;  %v9466_v63 = vpop.permute.xlu0 %9465 }
0x3880   :  { %14582 = vmatprep.mubr.msk.bf16.mxu0 %vm16022_vm1, %v16021_v27  ;;  %14579 = vmatpush3.bf16.msra.mxu0 %v15348_v14 }
0x3881   :  { %14580 = vmatprep.subr.bf16.mxu0 %v16021_v27 }
0x3882   :  { %v15839_v44 = vpop.eup %15838 }
0x3883   :  { %v9249_v45 = vmul.f32 %v15839_v44, %v15835_v19 }
0x3884   :  { %14581 = vmatpush3.bf16.msra.mxu0 %v15349_v18 }
0x3885   :  { %v9251_v3 = vpack.c.bf16 %v9249_v45, %v9249_v45  ;;  %14594 = vmatprep.subr.bf16.mxu0 %v16021_v27 }
0x3887   :  { %14575 = vmatmul.mubr.msk.bf16.vlgmr.msra.gmra.mrb[196].mxu1 %vm9024_vm7, %v9251_v3 }
0x3888   :  { %14587 = vmatpush3.bf16.msra.mxu1 %v15346_v8  ;;  %14590 = vmatprep.mubr.msk.bf16.mxu1 %vm16022_vm1, %v16021_v27 }
0x3889   :  { %14588 = vmatprep.subr.bf16.mxu1 %v16021_v27 }
0x388c   :  { %14589 = vmatpush3.bf16.msra.mxu1 %v15347_v36 }
0x388d   :  { %14600 = vmatprep.subr.bf16.mxu1 %v16021_v27 }
0x388f   :  { %14591 = vmatmul.mubr.msk.bf16.vlgmr.msra.gmra.mrb[200].mxu1 %vm308_vm0, %v9121_v34 }
0x3890   :  { %14602 = vmatprep.mubr.msk.bf16.mxu1 %vm16022_vm1, %v16021_v27 }
0x3895   :  { %14601 = vmatpush3.bf16.xpose.msra.mxu1 %v9523_v9 }
0x3896   :  { %14612 = vmatprep.subr.bf16.mxu1 %v16021_v27 }
0x389c   :  { %14603 = vmatmul.mubr.msk.bf16.vlgmr.msra.gmra.mrb[204].mxu1 %vm308_vm0, %v9516_v13 }
0x389d   :  { %14614 = vmatprep.mubr.msk.bf16.mxu1 %vm16022_vm1, %v16021_v27 }
0x3952   :  { %v9295_v49 = vpop.f32.mrb[196].mxu0 }
0x3953   :  { %v14570_v52 = vpop.f32.mrb[197].mxu0 }
0x3954   :  { %v9298_v11 = vpop.f32.mrb[198].mxu0 }
0x3955   :  { %v14571_v50 = vpop.f32.mrb[199].mxu0 }
0x395a   :  { %v9344_v23 = vpop.f32.mrb[196].mxu1 }
0x395b   :  { %v9352_v53 = vcombine.low %v9295_v49, %v9344_v23  ;;  %v14576_v15 = vpop.f32.mrb[197].mxu1 }
0x395c   :  { %v9347_v47 = vpop.f32.mrb[198].mxu1 }
0x395d   :  { %v9354_v29 = vpack.c.bf16 %v9352_v53, %v9352_v53  ;;  %v14577_v48 = vpop.f32.mrb[199].mxu1 }
0x395e   :  { %v15350_v48 = vld [vmem:[%s18742_s15 + $0x20] sm:$0xff]  }
0x395f   :  { %14583 = vmatmul.mubr.msk.bf16.vlgmr.msra.gmra.mrb[200].mxu0 %vm308_vm0, %v9354_v29 }
0x3960   :  { %14595 = vmatpush3.bf16.xpose.msra.mxu0 %v9473_v22  ;;  %14596 = vmatprep.mubr.msk.bf16.mxu0 %vm16022_vm1, %v16021_v27 }
0x3961   :  { %14606 = vmatprep.subr.bf16.mxu0 %v16021_v27 }
0x3962   :  { %v9459_v59 = vpop.f32.mrb[200].mxu1 }
0x3963   :  { %v14592_v26 = vpop.f32.mrb[201].mxu1 }
0x3964   :  { %v9462_v0 = vpop.f32.mrb[202].mxu1 }
0x3965   :  { %v14593_v20 = vpop.f32.mrb[203].mxu1  ;;  %v15351_v0 = vld [vmem:[%s18742_s15 + $0x28] sm:$0xff]  }
0x3967   :  { %14597 = vmatmul.mubr.msk.bf16.vlgmr.msra.gmra.mrb[204].mxu0 %vm308_vm0, %v9466_v63 }
0x3968   :  { %14608 = vmatprep.mubr.msk.bf16.mxu0 %vm16022_vm1, %v16021_v27 }
0x396f   :  { %v9559_v21 = vpop.f32.mrb[204].mxu1 }
0x3970   :  { %v9566_v32 = vmul.f32 0.17677669, %v9559_v21  ;;  %v14604_v7 = vpop.f32.mrb[205].mxu1 }
0x3971   :  { %v9562_v28 = vpop.f32.mrb[206].mxu1 }
0x3972   :  { %v14605_v25 = vpop.f32.mrb[207].mxu1  ;;  %v9570_v19 = vsel %vm8999_vm6, %v9566_v32, -inf }
0x3973   :  { %9571 = vmax.xlane.f32.xlu1 %v9570_v19 }
0x3984   :  { %9591 = vrot.lane.b32.xlu1 %v18065_v31, %s16026_s17 }
0x3988   :  { %9750 = vrot.lane.b32.xlu1 %v18012_v40, %s16027_s25 }
0x398c   :  { %9800 = vrot.lane.b32.xlu1 %v18017_v4, %s16027_s25 }
0x3990   :  { %9798 = vrot.lane.b32.xlu1 %v18028_v43, %s16027_s25 }
0x3a00   :  { %v9572_v33 = vpop.xlane.xlu1 %9571 }
0x3a01   :  { %v9574_v37 = vsub.f32 %v9566_v32, %v9572_v33 }
0x3a03   :  { %v9577_v2 = vmul.f32 1.442695, %v9574_v37 }
0x3a04   :  { %v9592_v41 = vpop.permute.xlu1 %9591 }
0x3a05   :  { %v9597_v57 = vsel %vm653_vm5, %v9592_v41, 0  ;;  %15840 = vpow2.f32 %v9577_v2 }
0x3a06   :  { %14607 = vmatpush3.bf16.msra.mxu0 %v9597_v57 }
0x3a07   :  { %14618 = vmatprep.subr.bf16.mxu0 %v16021_v27 }
0x3a08   :  { %v9751_v47 = vpop.permute.xlu1 %9750 }
0x3a09   :  { %v9756_v22 = vsel %vm308_vm0, %v9751_v47, 0 }
0x3a0c   :  { %v9801_v19 = vpop.permute.xlu1 %9800 }
0x3a0d   :  { %v9806_v37 = vsel %vm308_vm0, %v9801_v19, 0 }
0x3a0f   :  { %v15841_v42 = vpop.eup %15840 }
0x3a10   :  { %v9582_v34 = vsel %vm8999_vm6, %v15841_v42, 0.0 }
0x3a32   :  { %v9404_v12 = vpop.f32.mrb[200].mxu0 }
0x3a33   :  { %v18158_v55 = vadd.f32 %v9459_v59, %v9404_v12  ;;  %v14584_v46 = vpop.f32.mrb[201].mxu0 }
0x3a34   :  { %v9407_v40 = vpop.f32.mrb[202].mxu0 }
0x3a35   :  { %v14585_v44 = vpop.f32.mrb[203].mxu0 }
0x3a3a   :  { %v9509_v4 = vpop.f32.mrb[204].mxu0 }
0x3a3b   :  { %v9565_v45 = vmul.f32 0.17677669, %v9509_v4  ;;  %v14598_v8 = vpop.f32.mrb[205].mxu0 }
0x3a3c   :  { %v9512_v43 = vpop.f32.mrb[206].mxu0 }
0x3a3d   :  { %v14599_v3 = vpop.f32.mrb[207].mxu0  ;;  %v9567_v36 = vsel %vm8999_vm6, %v9565_v45, -inf }
0x3a3e   :  { %9568 = vmax.xlane.f32.xlu0 %v9567_v36 }
0x3a42   :  { %9583 = vadd.xlane.f32.xlu0 %v9582_v34 }
0x3acb   :  { %v9569_v54 = vpop.xlane.xlu0 %9568 }
0x3acc   :  { %v9573_v9 = vsub.f32 %v9565_v45, %v9569_v54  ;;  %v9799_v45 = vpop.permute.xlu1 %9798 }
0x3ace   :  { %v9575_v13 = vmul.f32 1.442695, %v9573_v9 }
0x3acf   :  { %v9584_v49 = vpop.xlane.xlu0 %9583 }
0x3ad0   :  { %15842 = vpow2.f32 %v9575_v13 }
0x3ad1   :  { %15844 = vrcp.f32 %v9584_v49 }
0x3ada   :  { %v15843_v14 = vpop.eup %15842 }
0x3adb   :  { %v9579_v18 = vsel %vm8999_vm6, %v15843_v14, 0.0  ;;  %v15845_v52 = vpop.eup %15844 }
0x3adc   :  { %9580 = vadd.xlane.f32.xlu0 %v9579_v18  ;;  %v9588_v50 = vmul.f32 %v15845_v52, %v15841_v42 }
0x3ade   :  { %v9590_v15 = vpack.c.bf16 %v9588_v50, %v9588_v50 }
0x3af2   :  { %9639 = vrot.lane.b32.xlu0 %v18069_v58, %s16026_s17 }
0x3af6   :  { %9748 = vrot.lane.b32.xlu0 %v18019_v1, %s16027_s25 }
0x3b69   :  { %v9581_v11 = vpop.xlane.xlu0 %9580 }
0x3b6a   :  { %15846 = vrcp.f32 %v9581_v11 }
0x3b6d   :  { %v9640_v23 = vpop.permute.xlu0 %9639 }
0x3b6e   :  { %v9645_v53 = vsel %vm653_vm5, %v9640_v23, 0 }
0x3b6f   :  { %14613 = vmatpush3.bf16.msra.mxu1 %v9645_v53  ;;  %v8383_v53 = vadd.f32 %v17997_v16, %v17785_v35 }
0x3b70   :  { %14626 = vmatprep.subr.bf16.mxu1 %v16021_v27 }
0x3b71   :  { %v9749_v26 = vpop.permute.xlu0 %9748 }
0x3b72   :  { %14615 = vmatmul.mubr.msk.bf16.vlgmr.msra.gmra.mrb[208].mxu1 %vm9024_vm7, %v9590_v15 }
0x3b73   :  { %14628 = vmatprep.mubr.msk.bf16.mxu1 %vm16022_vm1, %v16021_v27 }
0x3b74   :  { %v15847_v1 = vpop.eup %15846 }
0x3b75   :  { %v9587_v29 = vmul.f32 %v15847_v1, %v15843_v14 }
0x3b77   :  { %v9589_v59 = vpack.c.bf16 %v9587_v29, %v9587_v29 }
0x3b78   :  { %14627 = vmatpush3.bf16.xpose.msra.mxu1 %v9756_v22 }
0x3b79   :  { %14609 = vmatmul.mubr.msk.bf16.vlgmr.msra.gmra.mrb[208].mxu0 %vm9024_vm7, %v9589_v59  ;;  %14638 = vmatprep.subr.bf16.mxu1 %v16021_v27 }
0x3b7a   :  { %14619 = vmatpush3.bf16.msra.mxu0 %v15350_v48  ;;  %14622 = vmatprep.mubr.msk.bf16.mxu0 %vm16022_vm1, %v16021_v27 }
0x3b7b   :  { %14620 = vmatprep.subr.bf16.mxu0 %v16021_v27 }
0x3b7e   :  { %14621 = vmatpush3.bf16.msra.mxu0 %v15351_v0 }
0x3b7f   :  { %14629 = vmatmul.mubr.msk.bf16.vlgmr.msra.gmra.mrb[212].mxu1 %vm308_vm0, %v9749_v26  ;;  %14632 = vmatprep.subr.bf16.mxu0 %v16021_v27 }
0x3b80   :  { %14640 = vmatprep.mubr.msk.bf16.mxu1 %vm16022_vm1, %v16021_v27 }
0x3c45   :  { %v9681_v20 = vpop.f32.mrb[208].mxu1 }
0x3c46   :  { %v14616_v63 = vpop.f32.mrb[209].mxu1 }
0x3c47   :  { %v9684_v21 = vpop.f32.mrb[210].mxu1 }
0x3c48   :  { %v14617_v32 = vpop.f32.mrb[211].mxu1  ;;  %v8385_v21 = vadd.f32 %v18001_v51, %v17797_v6 }
0x3c4c   :  { %v9633_v7 = vpop.f32.mrb[208].mxu0 }
0x3c4d   :  { %v9689_v28 = vcombine.low %v9633_v7, %v9681_v20  ;;  %v14610_v25 = vpop.f32.mrb[209].mxu0  ;;  %v8384_v20 = vadd.f32 %v17999_v61, %v17787_v24  ;;  %v15352_v7 = vld [vmem:[%s18742_s15 + $0x30] sm:$0xff]  }
0x3c4e   :  { %v9636_v33 = vpop.f32.mrb[210].mxu0 }
0x3c4f   :  { %v9691_v41 = vpack.c.bf16 %v9689_v28, %v9689_v28  ;;  %v14611_v57 = vpop.f32.mrb[211].mxu0 }
0x3c50   :  { %v15353_v57 = vld [vmem:[%s18742_s15 + $0x38] sm:$0xff]  }
0x3c51   :  { %14623 = vmatmul.mubr.msk.bf16.vlgmr.msra.gmra.mrb[212].mxu0 %vm308_vm0, %v9691_v41 }
0x3c52   :  { %14633 = vmatpush3.bf16.xpose.msra.mxu0 %v9806_v37  ;;  %v9792_v2 = vpop.f32.mrb[212].mxu1  ;;  %14634 = vmatprep.mubr.msk.bf16.mxu0 %vm16022_vm1, %v16021_v27 }
0x3c53   :  { %v9848_v12 = vmul.f32 0.17677669, %v9792_v2  ;;  %v14630_v46 = vpop.f32.mrb[213].mxu1  ;;  %14644 = vmatprep.subr.bf16.mxu0 %v16021_v27 }
0x3c54   :  { %v9795_v40 = vpop.f32.mrb[214].mxu1 }
0x3c55   :  { %v14631_v44 = vpop.f32.mrb[215].mxu1  ;;  %v9850_v4 = vsel %vm8999_vm6, %v9848_v12, -inf }
0x3c56   :  { %9851 = vmax.xlane.f32.xlu0 %v9850_v4  ;;  %v15354_v4 = vld [vmem:[%s18743_s16] ss:$8 sps:$4 sm:$0xff]  }
0x3c59   :  { %14635 = vmatmul.mubr.msk.bf16.vlgmr.msra.gmra.mrb[216].mxu0 %vm308_vm0, %v9799_v45  ;;  %v15356_v45 = vld [vmem:[%s18743_s16 + $0x4] ss:$8 sps:$4 sm:$0xff]  }
0x3c5a   :  { %14646 = vmatprep.mubr.msk.bf16.mxu0 %vm16022_vm1, %v16021_v27 }
0x3ce3   :  { %v9852_v8 = vpop.xlane.xlu0 %9851 }
0x3ce4   :  { %v9856_v43 = vsub.f32 %v9848_v12, %v9852_v8  ;;  %v13357_v8 = vld [vmem:[%s18744_s18] ss:$0 sm:$0xff] }
0x3ce6   :  { %v9858_v3 = vmul.f32 1.442695, %v9856_v43 }
0x3ce8   :  { %15848 = vpow2.f32 %v9858_v3 }
0x3cf2   :  { %v15849_v36 = vpop.eup %15848 }
0x3cf3   :  { %v9862_v42 = vsel %vm8999_vm6, %v15849_v36, 0.0 }
0x3cf4   :  { %9863 = vadd.xlane.f32.xlu0 %v9862_v42 }
0x3d24   :  { %v9741_v34 = vpop.f32.mrb[212].mxu0 }
0x3d25   :  { %v18195_v54 = vadd.f32 %v9741_v34, %v18158_v55  ;;  %v14624_v9 = vpop.f32.mrb[213].mxu0 }
0x3d26   :  { %v9744_v13 = vpop.f32.mrb[214].mxu0 }
0x3d27   :  { %v14625_v14 = vpop.f32.mrb[215].mxu0 }
0x3d2c   :  { %v9842_v18 = vpop.f32.mrb[216].mxu0 }
0x3d2d   :  { %v9849_v49 = vmul.f32 0.17677669, %v9842_v18  ;;  %v14636_v52 = vpop.f32.mrb[217].mxu0 }
0x3d2e   :  { %v9845_v11 = vpop.f32.mrb[218].mxu0 }
0x3d2f   :  { %v14637_v50 = vpop.f32.mrb[219].mxu0  ;;  %v9853_v23 = vsel %vm8999_vm6, %v9849_v49, -inf }
0x3d30   :  { %9854 = vmax.xlane.f32.xlu1 %v9853_v23 }
0x3d41   :  { %9874 = vrot.lane.b32.xlu1 %v18065_v31, %s16027_s25 }
0x3d65   :  { %8387 = vadd.xlane.f32.xlu1 %v8383_v53 }
0x3d81   :  { %v9864_v55 = vpop.xlane.xlu0 %9863 }
0x3d82   :  { %15850 = vrcp.f32 %v9864_v55 }
0x3d8c   :  { %v15851_v15 = vpop.eup %15850 }
0x3d8d   :  { %v9870_v29 = vmul.f32 %v15851_v15, %v15849_v36 }
0x3d8f   :  { %v9872_v26 = vpack.c.bf16 %v9870_v29, %v9870_v29  ;;  %v15365_v29 = vld [vmem:[%s18743_s16 + $0x34] ss:$8 sps:$4 sm:$0xff]  }
0x3dbd   :  { %v9855_v1 = vpop.xlane.xlu1 %9854 }
0x3dbe   :  { %v9857_v47 = vsub.f32 %v9849_v49, %v9855_v1  ;;  %v15357_v1 = vld [vmem:[%s18743_s16 + $0x10] ss:$8 sps:$4 sm:$0xff]  }
0x3dc0   :  { %v9860_v48 = vmul.f32 1.442695, %v9857_v47  ;;  %v15359_v47 = vld [vmem:[%s18743_s16 + $0x14] ss:$8 sps:$4 sm:$0xff]  }
0x3dc1   :  { %v9875_v22 = vpop.permute.xlu1 %9874 }
0x3dc2   :  { %15852 = vpow2.f32 %v9860_v48  ;;  %v9880_v59 = vsel %vm653_vm5, %v9875_v22, 0  ;;  %v15363_v48 = vld [vmem:[%s18743_s16 + $0x30] ss:$8 sps:$4 sm:$0xff]   ;;  %v15368_v22 = vld [vmem:[%s18743_s16 + $0x44] ss:$8 sps:$4 sm:$0xff]  }
0x3dc3   :  { %14639 = vmatpush3.bf16.msra.mxu1 %v9880_v59  ;;  %v15366_v59 = vld [vmem:[%s18743_s16 + $0x40] ss:$8 sps:$4 sm:$0xff]  }
0x3dc4   :  { %14650 = vmatprep.subr.bf16.mxu1 %v16021_v27 }
0x3dc6   :  { %14641 = vmatmul.mubr.msk.bf16.vlgmr.msra.gmra.mrb[216].mxu1 %vm9024_vm7, %v9872_v26  ;;  %v15371_v26 = vld [vmem:[%s18743_s16 + $0x54] ss:$8 sps:$4 sm:$0xff]  }
0x3dc7   :  { %14654 = vmatprep.mubr.msk.bf16.mxu1 %vm16022_vm1, %v16021_v27  ;;  %14651 = vmatpush3.bf16.msra.mxu1 %v15352_v7 }
0x3dc8   :  { %14652 = vmatprep.subr.bf16.mxu1 %v16021_v27 }
0x3dcb   :  { %14653 = vmatpush3.bf16.msra.mxu1 %v15353_v57 }
0x3dcc   :  { %v15853_v35 = vpop.eup %15852  ;;  %10311 = vmatprep.subr.bf16.mxu1 %v15356_v45 }
0x3dcd   :  { %v9865_v16 = vsel %vm8999_vm6, %v15853_v35, 0.0 }
0x3dce   :  { %9866 = vadd.xlane.f32.xlu0 %v9865_v16  ;;  %v15374_v16 = vld [vmem:[%s18743_s16 + $0x64] ss:$8 sps:$4 sm:$0xff]  }
0x3de4   :  { %9922 = vrot.lane.b32.xlu0 %v18069_v58, %s16027_s25 }
0x3df2   :  { %v8388_v31 = vpop.xlane.xlu1 %8387 }
0x3df3   :  { %v8395_v0 = vmul.f32 0.0078125, %v8388_v31  ;;  %v15378_v31 = vld [vmem:[%s18745_s22] sm:$0xff]  }
0x3df5   :  { %v18212_v63 = vsub.f32 %v8383_v53, %v8395_v0  ;;  %v8386_v53 = vadd.f32 %v18003_v17, %v17795_v62  ;;  %v15362_v62 = vld [vmem:[%s18743_s16 + $0x24] ss:$8 sps:$4 sm:$0xff]   ;;  %v15360_v17 = vld [vmem:[%s18743_s16 + $0x20] ss:$8 sps:$4 sm:$0xff]  }
0x3df6   :  { %v15372_v0 = vld [vmem:[%s18743_s16 + $0x60] ss:$8 sps:$4 sm:$0xff]  }
0x3df7   :  { %v8403_v32 = vmul.f32 %v18212_v63, %v18212_v63 }
0x3e03   :  { %8389 = vadd.xlane.f32.xlu0 %v8384_v20 }
0x3e07   :  { %8391 = vadd.xlane.f32.xlu0 %v8385_v21 }
0x3e0b   :  { %8407 = vadd.xlane.f32.xlu0 %v8403_v32  ;;  %v16028_v32 = vmov 839922192  }
0x3e0c   :  { %v10052_v7 = vunpack.c.l.s4 %v16028_v32  ;;  %v13359_v32 = vld [vmem:[%s18747_s26] ss:$0 sm:$0xff] }
0x3e5b   :  { %v9867_v58 = vpop.xlane.xlu0 %9866 }
0x3e5c   :  { %15854 = vrcp.f32 %v9867_v58  ;;  %v16029_v58 = vmov 1985246804  }
0x3e5f   :  { %v9923_v28 = vpop.permute.xlu0 %9922 }
0x3e60   :  { %v9928_v24 = vsel %vm653_vm5, %v9923_v28, 0  ;;  %v10059_v28 = vunpack.c.l.s4 %v16029_v58 }
0x3e61   :  { %14645 = vmatpush3.bf16.msra.mxu0 %v9928_v24  ;;  %v10053_v24 = vunpack.c.0.s8 %v10052_v7 }
0x3e62   :  { %14658 = vmatprep.subr.bf16.mxu0 %v16021_v27 }
0x3e66   :  { %v15855_v61 = vpop.eup %15854 }
0x3e67   :  { %v9871_v6 = vmul.f32 %v15855_v61, %v15853_v35  ;;  %v15369_v35 = vld [vmem:[%s18743_s16 + $0x50] ss:$8 sps:$4 sm:$0xff]   ;;  %v10060_v61 = vunpack.c.0.s8 %v10059_v28 }
0x3e69   :  { %v9873_v51 = vpack.c.bf16 %v9871_v6, %v9871_v6 }
0x3e6b   :  { %14647 = vmatmul.mubr.msk.bf16.vlgmr.msra.gmra.mrb[220].mxu0 %vm9024_vm7, %v9873_v51 }
0x3e6c   :  { %14674 = vmatprep.mubr.msk.bf16.mxu0 %vm16022_vm1, %v16021_v27  ;;  %14659 = vmatpush3.bf16.msra.mxu0 %v15378_v31 }
0x3e6d   :  { %14660 = vmatprep.subr.bf16.mxu0 %v16021_v27 }
0x3e90   :  { %v8390_v13 = vpop.xlane.xlu0 %8389 }
0x3e91   :  { %v8396_v52 = vmul.f32 0.0078125, %v8390_v13  ;;  %v13301_v13 = vld [vmem:[%s18737_s6 + $0x2] ss:$0 sm:$0xff]  ;;  %s12513_s6 = sshll.u32 %s16030_s30, 4  ;;  %s12514_s6 = int_to_ptr.vmem [resolvable:$true] %s12513_s6 }
0x3e92   :  { %s15920_s10 = scalar_lea.vmem %s12514_s6, 128  ;;  %p15925_p1 = scmp.lt.s32.totalorder %s12514_s6, %s12514_s6 }
0x3e93   :  { %v18240_v50 = vsub.f32 %v8384_v20, %v8396_v52  ;;  %v15377_v20 = vld [vmem:[%s18743_s16 + $0x74] ss:$8 sps:$4 sm:$0xff]   ;;  %v13302_v52 = vld [vmem:[%s18738_s7 + $0x2] ss:$0 sm:$0xff]  ;;  %s16031_s7 = smov [#allocation5]   ;;  %p15921_p0 = scmp.ne.s32.totalorder %s12514_s6, %s15920_s10 }
0x3e94   :  { %s12523_s12 = sshll.u32 %s16031_s7, 4  ;;  %p15926_p2 = scmp.lt.s32.totalorder %s15920_s10, %s15920_s10  ;;  %s12524_s12 = int_to_ptr.vmem [resolvable:$true] %s12523_s12 }
0x3e96   :  { %p15927_p3 = por %p15926_p2, %p15925_p1 }
0x3e98   :  { %p15928_p4 = pnand %p15927_p3, %p15921_p0 }
0x3e99   :  { %v9916_v25 = vpop.f32.mrb[216].mxu1 }
0x3e9a   :  { %v14642_v19 = vpop.f32.mrb[217].mxu1 }
0x3e9b   :  { %v9919_v33 = vpop.f32.mrb[218].mxu1  ;;  %v18271_v19 = vsub.s32 %v10060_v61, %v16432_v10 }
0x3e9c   :  { %v14643_v41 = vpop.f32.mrb[219].mxu1 }
0x3f3e   :  { %v9964_v37 = vpop.f32.mrb[220].mxu0 }
0x3f3f   :  { %v9972_v2 = vcombine.low %v9916_v25, %v9964_v37  ;;  %v14648_v12 = vpop.f32.mrb[221].mxu0  ;;  %v18268_v25 = vsub.s32 %v10053_v24, %v16432_v10 }
0x3f40   :  { %v9967_v46 = vpop.f32.mrb[222].mxu0 }
0x3f41   :  { %v9974_v40 = vpack.c.bf16 %v9972_v2, %v9972_v2  ;;  %v14649_v44 = vpop.f32.mrb[223].mxu0 }
0x3f43   :  { %14655 = vmatmul.mubr.msk.bf16.vlgmr.msra.gmra.mrb[220].mxu1 %vm308_vm0, %v9974_v40 }
0x3f44   :  { %10343 = vmatprep.mubr.bf16.mxu1 %v16023_v60  ;;  %10312 = vmatpush1.bf16.msra.mxu1 %v15354_v4 }
0x3f45   :  { %10313 = vmatprep.subr.bf16.mxu1 %v15359_v47  ;;  %v15384_v47 = vld [vmem:[%s18745_s22 + $0x30] sm:$0xff]  }
0x3f48   :  { %10314 = vmatpush1.bf16.msra.mxu1 %v15357_v1  ;;  %v15383_v1 = vld [vmem:[%s18745_s22 + $0x28] sm:$0xff]  }
0x3f49   :  { %10315 = vmatprep.subr.bf16.mxu1 %v15362_v62  ;;  %v15385_v62 = vld [vmem:[%s18745_s22 + $0x38] sm:$0xff]  }
0x3f4c   :  { %10316 = vmatpush1.bf16.msra.mxu1 %v15360_v17 }
0x3f4d   :  { %10317 = vmatprep.subr.bf16.mxu1 %v15365_v29 }
0x3f50   :  { %10318 = vmatpush1.bf16.msra.mxu1 %v15363_v48 }
0x3f51   :  { %10319 = vmatprep.subr.bf16.mxu1 %v15368_v22 }
0x3f54   :  { %10320 = vmatpush1.bf16.msra.mxu1 %v15366_v59 }
0x3f55   :  { %10321 = vmatprep.subr.bf16.mxu1 %v15371_v26 }
0x3f58   :  { %10322 = vmatpush1.bf16.msra.mxu1 %v15369_v35 }
0x3f59   :  { %10323 = vmatprep.subr.bf16.mxu1 %v15374_v16 }
0x3f5c   :  { %10324 = vmatpush1.bf16.msra.mxu1 %v15372_v0 }
0x3f5d   :  { %10325 = vmatprep.subr.bf16.mxu1 %v15377_v20  ;;  %v13358_v20 = vld [vmem:[%s18746_s23] ss:$0 sm:$0xff] }
0x3f5e   :  { %v10105_v28 = vcombine.high %v13358_v20, %v13358_v20 }
0x4016   :  { %v10024_v43 = vpop.f32.mrb[220].mxu1 }
0x4017   :  { %v10030_v3 = vadd.f32 %v10024_v43, %v18195_v54  ;;  %v14656_v36 = vpop.f32.mrb[221].mxu1  ;;  %v8392_v54 = vpop.xlane.xlu0 %8391 }
0x4018   :  { %v10027_v42 = vpop.f32.mrb[222].mxu1  ;;  %v8397_v23 = vmul.f32 0.0078125, %v8392_v54 }
0x4019   :  { %v10037_v34 = vadd.f32 %v13357_v8, %v10030_v3  ;;  %v14657_v9 = vpop.f32.mrb[223].mxu1 }
0x401a   :  { %v18244_v55 = vsub.f32 %v8385_v21, %v8397_v23  ;;  %v15375_v21 = vld [vmem:[%s18743_s16 + $0x70] ss:$8 sps:$4 sm:$0xff]  }
0x401b   :  { %v10039_v14 = vcombine.high %v10037_v34, %v10037_v34  ;;  %v18233_v18 = vadd.f32 %v10037_v34, %v17984_v5  ;;  %10326 = vmatpush1.bf16.msra.mxu1 %v15375_v21  ;;  %v8408_v6 = vpop.xlane.xlu0 %8407 }
0x401c   :  { %v8405_v15 = vmul.f32 %v18244_v55, %v18244_v55  ;;  %14690 = vmatprep.subr.bf16.mxu1 %v16021_v27  ;;  %v8415_v51 = vmul.f32 0.0078125, %v8408_v6 }
0x401d   :  { %v18236_v49 = vadd.f32 %v10039_v14, %v17984_v5  ;;  %v8404_v5 = vmul.f32 %v18240_v50, %v18240_v50 }
0x401e   :  { %v8419_v57 = vadd.f32 1e-12, %v8415_v51  ;;  %v10115_v51 = vcombine.high %v13359_v32, %v13359_v32 }
0x401f   :  { %v10045_v11 = vcombine.low %v18233_v18, %v18236_v49 }
0x4020   :  { %15856 = vrsqrt.f32 %v8419_v57 }
0x4021   :  { %10047 = vadd.xlane.f32.xlu1 %v10045_v11 }
0x4025   :  { %8393 = vadd.xlane.f32.xlu1 %v8386_v53 }
0x4029   :  { %8409 = vadd.xlane.f32.xlu1 %v8404_v5  ;;  %v15379_v5 = vld [vmem:[%s18745_s22 + $0x8] sm:$0xff]  }
0x402a   :  { %v15857_v34 = vpop.eup %15856  ;;  %14661 = vmatpush3.bf16.msra.mxu0 %v15379_v5 }
0x402b   :  { %v8427_v9 = vmul.f32 %v15857_v34, %v18212_v63  ;;  %14662 = vmatprep.subr.bf16.mxu0 %v16021_v27  ;;  %v15380_v63 = vld [vmem:[%s18745_s22 + $0x10] sm:$0xff]  }
0x402d   :  { %8411 = vadd.xlane.f32.xlu1 %v8405_v15  ;;  %v15382_v15 = vld [vmem:[%s18745_s22 + $0x20] sm:$0xff]  }
0x402e   :  { %14663 = vmatpush3.bf16.msra.mxu0 %v15380_v63 }
0x402f   :  { %14664 = vmatprep.subr.bf16.mxu0 %v16021_v27 }
0x40ae   :  { %v10048_v33 = vpop.xlane.xlu1 %10047 }
0x40af   :  { %v10049_v41 = vmul.f32 0.0078125, %v10048_v33 }
0x40b1   :  { %v10057_v37 = vrot.slane %v10049_v41, %v18268_v25  ;;  %v10064_v2 = vrot.slane %v10049_v41, %v18271_v19 }
0x40b2   :  { %v8394_v12 = vpop.xlane.xlu1 %8393 }
0x40b3   :  { %v18276_v46 = vsub.f32 %v18233_v18, %v10057_v37  ;;  %v18279_v40 = vsub.f32 %v18236_v49, %v10064_v2  ;;  %v8398_v44 = vmul.f32 0.0078125, %v8394_v12  ;;  %v8437_v49 = vmul.f32 %v13301_v13, %v8427_v9 }
0x40b5   :  { %v10069_v10 = vmul.f32 %v18276_v46, %v18276_v46  ;;  %v10070_v4 = vmul.f32 %v18279_v40, %v18279_v40  ;;  %v18285_v8 = vsub.f32 %v8386_v53, %v8398_v44  ;;  %v8447_v54 = vadd.f32 %v13302_v52, %v8437_v49 }
0x40b6   :  { %v8410_v45 = vpop.xlane.xlu1 %8409 }
0x40b7   :  { %v8416_v43 = vmul.f32 0.0078125, %v8410_v45  ;;  %v10073_v3 = vcombine.low %v10069_v10, %v10070_v4  ;;  %v8406_v42 = vmul.f32 %v18285_v8, %v18285_v8 }
0x40b9   :  { %v8420_v36 = vadd.f32 1e-12, %v8416_v43  ;;  %10075 = vadd.xlane.f32.xlu0 %v10073_v3 }
0x40ba   :  { %v8412_v17 = vpop.xlane.xlu1 %8411 }
0x40bb   :  { %15858 = vrsqrt.f32 %v8420_v36  ;;  %v8417_v29 = vmul.f32 0.0078125, %v8412_v17 }
0x40bd   :  { %8413 = vadd.xlane.f32.xlu0 %v8406_v42  ;;  %v8421_v48 = vadd.f32 1e-12, %v8417_v29 }
0x40bf   :  { %15860 = vrsqrt.f32 %v8421_v48 }
0x40c5   :  { %v15859_v14 = vpop.eup %15858 }
0x40c6   :  { %v8428_v18 = vmul.f32 %v15859_v14, %v18240_v50  ;;  %v15381_v50 = vld [vmem:[%s18745_s22 + $0x18] sm:$0xff]  }
0x40c7   :  { %14665 = vmatpush3.bf16.msra.mxu0 %v15381_v50 }
0x40c8   :  { %v8438_v11 = vmul.f32 %v13301_v13, %v8428_v18  ;;  %14666 = vmatprep.subr.bf16.mxu0 %v16021_v27 }
0x40c9   :  { %v15861_v0 = vpop.eup %15860 }
0x40ca   :  { %v8448_v23 = vadd.f32 %v13302_v52, %v8438_v11  ;;  %v8429_v24 = vmul.f32 %v15861_v0, %v18244_v55 }
0x40cb   :  { %14667 = vmatpush3.bf16.msra.mxu0 %v15382_v15 }
0x40cc   :  { %v10218_v53 = vpack.c.bf16 %v8448_v23, %v8447_v54  ;;  %14668 = vmatprep.subr.bf16.mxu0 %v16021_v27  ;;  %v8439_v2 = vmul.f32 %v13301_v13, %v8429_v24  ;;  %v13360_v23 = vld [vmem:[%s18749_s1] ss:$0 sm:$0xff] }
0x40ce   :  { %10344 = vmatmul.mubr.bf16.vlgmr.msra.gmra.mrb[224].mxu1 %v10218_v53  ;;  %v8449_v4 = vadd.f32 %v13302_v52, %v8439_v2 }
0x40cf   :  { %10353 = vmatprep.mubr.bf16.mxu1 %v16023_v60  ;;  %14669 = vmatpush3.bf16.msra.mxu0 %v15383_v1 }
0x40d0   :  { %14670 = vmatprep.subr.bf16.mxu0 %v16021_v27 }
0x40d3   :  { %14671 = vmatpush3.bf16.msra.mxu0 %v15384_v47 }
0x40d4   :  { %14672 = vmatprep.subr.bf16.mxu0 %v16021_v27 }
0x40d7   :  { %14673 = vmatpush3.bf16.msra.mxu0 %v15385_v62 }
0x40d8   :  { %14678 = vmatprep.subr.bf16.mxu0 %v16021_v27 }
0x4146   :  { %v10076_v22 = vpop.xlane.xlu0 %10075 }
0x4147   :  { %v10077_v59 = vmul.f32 0.0078125, %v10076_v22 }
0x4149   :  { %v10078_v26 = vadd.f32 1e-12, %v10077_v59 }
0x414a   :  { %v8414_v35 = vpop.xlane.xlu0 %8413 }
0x414b   :  { %15862 = vrsqrt.f32 %v10078_v26  ;;  %v8418_v16 = vmul.f32 0.0078125, %v8414_v35 }
0x414d   :  { %v8422_v31 = vadd.f32 1e-12, %v8418_v16 }
0x414f   :  { %15864 = vrsqrt.f32 %v8422_v31 }
0x4155   :  { %v15863_v21 = vpop.eup %15862 }
0x4156   :  { %v10087_v7 = vrot.slane %v15863_v21, %v18268_v25  ;;  %v10094_v58 = vrot.slane %v15863_v21, %v18271_v19 }
0x4158   :  { %v10097_v61 = vmul.f32 %v10087_v7, %v18276_v46  ;;  %v10098_v6 = vmul.f32 %v10094_v58, %v18279_v40 }
0x4159   :  { %v15865_v33 = vpop.eup %15864 }
0x415a   :  { %v10107_v41 = vmul.f32 %v13358_v20, %v10097_v61  ;;  %v10108_v57 = vmul.f32 %v10105_v28, %v10098_v6  ;;  %v8430_v37 = vmul.f32 %v15865_v33, %v18285_v8  ;;  %v8536_v8 = vld [vmem:[%s18748_s28] sm:$0x3] }
0x415b   :  { %v10224_v43 = vrot.slane %v8536_v8, %v16448_v30  ;;  %v10228_v36 = vrot.slane %v8536_v8, %v16452_v38  ;;  %v18361_v28 = vld [vmem:[%s18728_s5] ss:$0 sm:$0xff] }
0x415c   :  { %v18316_v12 = vadd.f32 %v13359_v32, %v10107_v41  ;;  %v18318_v44 = vadd.f32 %v10115_v51, %v10108_v57  ;;  %v8440_v10 = vmul.f32 %v13301_v13, %v8430_v37  ;;  %v18366_v37 = vld [vmem:[%s18728_s5 + $0x1] ss:$0 sm:$0xff]  ;;  %s18752_s5 = sld [smem:[#allocation35_spill]] }
0x415e   :  { %v10121_v55 = vcombine.low %v18316_v12, %v18318_v44  ;;  %v8450_v46 = vadd.f32 %v13302_v52, %v8440_v10 }
0x4160   :  { %v10123_v45 = vpack.c.bf16 %v10121_v55, %v10121_v55  ;;  %v10219_v40 = vpack.c.bf16 %v8450_v46, %v8449_v4 }
0x4162   :  { %14675 = vmatmul.mubr.bf16.vlgmr.msra.gmra.mrb[224].mxu0 %v10123_v45  ;;  %10354 = vmatmul.mubr.bf16.gmra.mrb[228].mxu1 %v10219_v40 }
0x4163   :  { %14680 = vmatprep.mubr.msk.bf16.mxu0 %vm16022_vm1, %v16021_v27  ;;  %14692 = vmatprep.mubr.msk.bf16.mxu1 %vm16022_vm1, %v16021_v27 }
0x41a1   :  { %v10345_v3 = vpop.f32.mrb[224].mxu1 }
0x41a2   :  { %v10347_v42 = vpop.f32.mrb[225].mxu1  ;;  %v10346_v9 = vadd.f32 %v10345_v3, %v10224_v43 }
0x41a3   :  { %v10349_v34 = vpop.f32.mrb[226].mxu1  ;;  %v10348_v18 = vadd.f32 %v10347_v42, %v10228_v36 }
0x41a4   :  { %v10350_v13 = vadd.f32 %v10349_v34, %v10224_v43  ;;  %v10351_v14 = vpop.f32.mrb[227].mxu1 }
0x41a5   :  { %v10352_v49 = vadd.f32 %v10351_v14, %v10228_v36 }
0x41a6   :  { %v18329_v52 = vpack.c.bf16 %v10350_v13, %v10346_v9 }
0x41a7   :  { %v18331_v11 = vpack.c.bf16 %v10352_v49, %v10348_v18 }
0x41a8   :  { %v10377_v54 = vsel %vm308_vm0, %v18329_v52, 0 }
0x41a9   :  { %14679 = vmatpush3.bf16.xpose.msra.mxu0 %v10377_v54  ;;  %14691 = vmatpush3.bf16.msra.mxu1 %v18331_v11 }
0x41aa   :  { %14684 = vmatprep.subr.bf16.mxu0 %v16021_v27  ;;  %14702 = vmatprep.subr.bf16.mxu1 %v16021_v27 }
0x4235   :  { %v10212_v53 = vpop.f32.mrb[224].mxu0  ;;  %v10355_v5 = vpop.f32.mrb[228].mxu1 }
0x4236   :  { %v10213_v63 = vadd.f32 %v13360_v23, %v10212_v53  ;;  %v14676_v50 = vpop.f32.mrb[225].mxu0  ;;  %v10357_v15 = vpop.f32.mrb[229].mxu1  ;;  %v10356_v17 = vadd.f32 %v10355_v5, %v10224_v43 }
0x4237   :  { %v10215_v1 = vpop.f32.mrb[226].mxu0  ;;  %v10359_v47 = vpop.f32.mrb[230].mxu1  ;;  %v10358_v59 = vadd.f32 %v10357_v15, %v10228_v36 }
0x4238   :  { %v18339_v62 = vpack.c.bf16 %v10213_v63, %v10213_v63  ;;  %v10360_v29 = vadd.f32 %v10359_v47, %v10224_v43  ;;  %v14677_v48 = vpop.f32.mrb[227].mxu0  ;;  %v10361_v22 = vpop.f32.mrb[231].mxu1  ;;  %v10365_v0 = vcombine.high %v10213_v63, %v10213_v63 }
0x4239   :  { %v10362_v26 = vadd.f32 %v10361_v22, %v10228_v36 }
0x423a   :  { %v18341_v35 = vpack.c.bf16 %v10360_v29, %v10356_v17  ;;  %14681 = vmatmul.mubr.msk.bf16.vlgmr.msra.gmra.mrb[228].mxu0 %vm308_vm0, %v18339_v62  ;;  %v18352_v20 = vpack.c.bf16 %v10365_v0, %v10365_v0 }
0x423b   :  { %v18345_v16 = vpack.c.bf16 %v10362_v26, %v10358_v59  ;;  %14686 = vmatprep.mubr.msk.bf16.mxu0 %vm16022_vm1, %v16021_v27 }
0x423c   :  { %v10423_v31 = vsel %vm308_vm0, %v18341_v35, 0 }
0x423d   :  { %14685 = vmatpush3.bf16.xpose.msra.mxu0 %v10423_v31 }
0x423e   :  { %14696 = vmatprep.subr.bf16.mxu0 %v16021_v27 }
0x4244   :  { %14687 = vmatmul.mubr.msk.bf16.vlgmr.msra.gmra.mrb[232].mxu0 %vm308_vm0, %v18352_v20 }
0x4245   :  { %14697 = vmatpush3.bf16.msra.mxu0 %v18345_v16  ;;  %14698 = vmatprep.mubr.msk.bf16.mxu0 %vm16022_vm1, %v16021_v27 }
0x4246   :  { %14708 = vmatprep.subr.bf16.mxu0 %v16021_v27 }
0x430d   :  { %v10413_v21 = vpop.f32.mrb[228].mxu0 }
0x430e   :  { %v10465_v32 = vmul.f32 0.17677669, %v10413_v21  ;;  %v14682_v7 = vpop.f32.mrb[229].mxu0 }
0x430f   :  { %v10416_v58 = vpop.f32.mrb[230].mxu0 }
0x4310   :  { %v10467_v24 = vadd.f32 %v18361_v28, %v10465_v32  ;;  %v14683_v61 = vpop.f32.mrb[231].mxu0 }
0x4312   :  { %v10470_v6 = vsel %vm10469_vm8, %v10467_v24, -inf }
0x4313   :  { %10471 = vmax.xlane.f32.xlu1 %v10470_v6 }
0x4317   :  { %v10459_v51 = vpop.f32.mrb[232].mxu0 }
0x4318   :  { %v10466_v33 = vmul.f32 0.17677669, %v10459_v51  ;;  %v14688_v41 = vpop.f32.mrb[233].mxu0 }
0x4319   :  { %v10462_v57 = vpop.f32.mrb[234].mxu0 }
0x431a   :  { %v10468_v2 = vadd.f32 %v18366_v37, %v10466_v33  ;;  %v14689_v10 = vpop.f32.mrb[235].mxu0 }
0x431c   :  { %v10473_v55 = vsel %vm10469_vm8, %v10468_v2, -inf }
0x431d   :  { %10474 = vmax.xlane.f32.xlu0 %v10473_v55 }
0x4324   :  { %10589 = vrot.lane.b32.xlu1 %v18329_v52, %s16025_s9 }
0x43a0   :  { %v10472_v4 = vpop.xlane.xlu1 %10471 }
0x43a1   :  { %v10476_v46 = vsub.f32 %v10467_v24, %v10472_v4 }
0x43a3   :  { %v10478_v45 = vmul.f32 1.442695, %v10476_v46 }
0x43a4   :  { %v10590_v9 = vpop.permute.xlu1 %10589 }
0x43a5   :  { %15866 = vpow2.f32 %v10478_v45  ;;  %v10595_v23 = vsel %vm308_vm0, %v10590_v9, 0 }
0x43aa   :  { %v10475_v40 = vpop.xlane.xlu0 %10474 }
0x43ab   :  { %v10477_v8 = vsub.f32 %v10468_v2, %v10475_v40 }
0x43ad   :  { %v10480_v43 = vmul.f32 1.442695, %v10477_v8 }
0x43af   :  { %v15867_v3 = vpop.eup %15866  ;;  %15868 = vpow2.f32 %v10480_v43 }
0x43b0   :  { %v10482_v36 = vsel %vm10469_vm8, %v15867_v3, 0.0 }
0x43b1   :  { %10483 = vadd.xlane.f32.xlu1 %v10482_v36 }
0x43b9   :  { %v15869_v42 = vpop.eup %15868 }
0x43ba   :  { %v10485_v34 = vsel %vm10469_vm8, %v15869_v42, 0.0 }
0x43bb   :  { %10486 = vadd.xlane.f32.xlu0 %v10485_v34 }
0x43c2   :  { %10586 = vrot.lane.b32.xlu1 %v18339_v62, %s16025_s9 }
0x43c6   :  { %10638 = vrot.lane.b32.xlu1 %v18352_v20, %s16025_s9 }
0x43d1   :  { %10641 = vrot.lane.b32.xlu0 %v18341_v35, %s16025_s9 }
0x443e   :  { %v10484_v13 = vpop.xlane.xlu1 %10483 }
0x443f   :  { %15870 = vrcp.f32 %v10484_v13 }
0x4442   :  { %v10587_v63 = vpop.permute.xlu1 %10586 }
0x4446   :  { %v10639_v47 = vpop.permute.xlu1 %10638 }
0x4448   :  { %v10487_v14 = vpop.xlane.xlu0 %10486 }
0x4449   :  { %v15871_v18 = vpop.eup %15870  ;;  %15872 = vrcp.f32 %v10487_v14 }
0x444a   :  { %v10490_v49 = vmul.f32 %v15871_v18, %v15867_v3 }
0x444c   :  { %v10492_v54 = vpack.c.bf16 %v10490_v49, %v10490_v49  ;;  %v10642_v50 = vpop.permute.xlu0 %10641 }
0x444d   :  { %v10647_v1 = vsel %vm308_vm0, %v10642_v50, 0  ;;  %v15386_v50 = vld [vmem:[%s18750_s2] sm:$0xff]  }
0x444e   :  { %14693 = vmatmul.mubr.msk.bf16.vlgmr.msra.gmra.mrb[232].mxu1 %vm446_vm2, %v10492_v54 }
0x444f   :  { %14703 = vmatpush3.bf16.xpose.msra.mxu1 %v10595_v23  ;;  %14704 = vmatprep.mubr.msk.bf16.mxu1 %vm16022_vm1, %v16021_v27 }
0x4450   :  { %14714 = vmatprep.subr.bf16.mxu1 %v16021_v27 }
0x4453   :  { %v15873_v53 = vpop.eup %15872 }
0x4454   :  { %v10491_v5 = vmul.f32 %v15873_v53, %v15869_v42 }
0x4456   :  { %14705 = vmatmul.mubr.msk.bf16.vlgmr.msra.gmra.mrb[236].mxu1 %vm308_vm0, %v10587_v63  ;;  %v10493_v15 = vpack.c.bf16 %v10491_v5, %v10491_v5 }
0x4457   :  { %14716 = vmatprep.mubr.msk.bf16.mxu1 %vm16022_vm1, %v16021_v27 }
0x4458   :  { %14699 = vmatmul.mubr.msk.bf16.vlgmr.msra.gmra.mrb[236].mxu0 %vm446_vm2, %v10493_v15 }
0x4459   :  { %14709 = vmatpush3.bf16.xpose.msra.mxu0 %v10647_v1  ;;  %14710 = vmatprep.mubr.msk.bf16.mxu0 %vm16022_vm1, %v16021_v27  ;;  %v15387_v1 = vld [vmem:[%s18750_s2 + $0x8] sm:$0xff]  }
0x445a   :  { %14720 = vmatprep.subr.bf16.mxu0 %v16021_v27 }
0x4460   :  { %14711 = vmatmul.mubr.msk.bf16.vlgmr.msra.gmra.mrb[240].mxu0 %vm308_vm0, %v10639_v47 }
0x4461   :  { %14722 = vmatprep.mubr.msk.bf16.mxu0 %vm16022_vm1, %v16021_v27 }
0x4521   :  { %v10531_v17 = vpop.f32.mrb[232].mxu1 }
0x4522   :  { %v14694_v29 = vpop.f32.mrb[233].mxu1 }
0x4523   :  { %v10534_v48 = vpop.f32.mrb[234].mxu1 }
0x4524   :  { %v14695_v22 = vpop.f32.mrb[235].mxu1 }
0x4529   :  { %v10631_v59 = vpop.f32.mrb[236].mxu1 }
0x452a   :  { %v10689_v26 = vmul.f32 0.17677669, %v10631_v59  ;;  %v14706_v31 = vpop.f32.mrb[237].mxu1  ;;  %v15388_v59 = vld [vmem:[%s18750_s2 + $0x10] sm:$0xff]  }
0x452b   :  { %v10574_v0 = vpop.f32.mrb[236].mxu0  ;;  %v10634_v21 = vpop.f32.mrb[238].mxu1 }
0x452c   :  { %v10691_v32 = vadd.f32 %v18361_v28, %v10689_v26  ;;  %v18397_v7 = vcombine.low %v10531_v17, %v10574_v0  ;;  %v14700_v58 = vpop.f32.mrb[237].mxu0  ;;  %v14707_v24 = vpop.f32.mrb[239].mxu1  ;;  %v15389_v26 = vld [vmem:[%s18750_s2 + $0x18] sm:$0xff]  }
0x452d   :  { %v10577_v61 = vpop.f32.mrb[238].mxu0 }
0x452e   :  { %v14701_v6 = vpop.f32.mrb[239].mxu0  ;;  %v10693_v51 = vsel %vm10469_vm8, %v10691_v32, -inf  ;;  %v10584_v17 = vpack.c.bf16 %v18397_v7, %v18397_v7 }
0x452f   :  { %10694 = vmax.xlane.f32.xlu0 %v10693_v51 }
0x4533   :  { %v10683_v33 = vpop.f32.mrb[240].mxu0 }
0x4534   :  { %v10690_v41 = vmul.f32 0.17677669, %v10683_v33  ;;  %v14712_v57 = vpop.f32.mrb[241].mxu0 }
0x4535   :  { %v10686_v2 = vpop.f32.mrb[242].mxu0 }
0x4536   :  { %v10692_v10 = vadd.f32 %v18366_v37, %v10690_v41  ;;  %v14713_v55 = vpop.f32.mrb[243].mxu0 }
0x4538   :  { %v10696_v4 = vsel %vm10469_vm8, %v10692_v10, -inf }
0x4539   :  { %10697 = vmax.xlane.f32.xlu1 %v10696_v4 }
0x454a   :  { %10718 = vrot.lane.b32.xlu1 %v18331_v11, %s16025_s9 }
0x454e   :  { %10928 = vrot.lane.b32.xlu1 %v18329_v52, %s16026_s17 }
0x4552   :  { %10978 = vrot.lane.b32.xlu1 %v18341_v35, %s16026_s17 }
0x4556   :  { %10976 = vrot.lane.b32.xlu1 %v18352_v20, %s16026_s17 }
0x45bc   :  { %v10695_v46 = vpop.xlane.xlu0 %10694 }
0x45bd   :  { %v10699_v45 = vsub.f32 %v10691_v32, %v10695_v46 }
0x45bf   :  { %v10701_v40 = vmul.f32 1.442695, %v10699_v45 }
0x45c1   :  { %15874 = vpow2.f32 %v10701_v40 }
0x45c6   :  { %v10698_v8 = vpop.xlane.xlu1 %10697 }
0x45c7   :  { %v10700_v43 = vsub.f32 %v10692_v10, %v10698_v8 }
0x45c9   :  { %v10703_v3 = vmul.f32 1.442695, %v10700_v43 }
0x45ca   :  { %v10719_v36 = vpop.permute.xlu1 %10718 }
0x45cb   :  { %v15875_v42 = vpop.eup %15874  ;;  %15876 = vpow2.f32 %v10703_v3  ;;  %14715 = vmatpush3.bf16.msra.mxu1 %v10719_v36 }
0x45cc   :  { %v10705_v34 = vsel %vm10469_vm8, %v15875_v42, 0.0  ;;  %14726 = vmatprep.subr.bf16.mxu1 %v16021_v27 }
0x45cd   :  { %10706 = vadd.xlane.f32.xlu0 %v10705_v34 }
0x45ce   :  { %v10929_v47 = vpop.permute.xlu1 %10928 }
0x45cf   :  { %v10934_v33 = vsel %vm308_vm0, %v10929_v47, 0 }
0x45d2   :  { %v10979_v29 = vpop.permute.xlu1 %10978 }
0x45d3   :  { %v10984_v48 = vsel %vm308_vm0, %v10979_v29, 0 }
0x45d5   :  { %v15877_v9 = vpop.eup %15876 }
0x45d6   :  { %v10708_v13 = vsel %vm10469_vm8, %v15877_v9, 0.0  ;;  %v10977_v22 = vpop.permute.xlu1 %10976 }
0x45d7   :  { %10709 = vadd.xlane.f32.xlu0 %v10708_v13 }
0x45ed   :  { %10765 = vrot.lane.b32.xlu0 %v18345_v16, %s16025_s9  ;;  %s18753_s9 = sld [smem:[#allocation33_spill]] }
0x45f1   :  { %10926 = vrot.lane.b32.xlu0 %v18339_v62, %s16026_s17 }
0x465a   :  { %v10707_v14 = vpop.xlane.xlu0 %10706 }
0x465b   :  { %15878 = vrcp.f32 %v10707_v14 }
0x4664   :  { %v10710_v18 = vpop.xlane.xlu0 %10709 }
0x4665   :  { %v15879_v49 = vpop.eup %15878  ;;  %15880 = vrcp.f32 %v10710_v18 }
0x4666   :  { %v10713_v54 = vmul.f32 %v15879_v49, %v15875_v42 }
0x4668   :  { %v10766_v23 = vpop.permute.xlu0 %10765  ;;  %v10715_v53 = vpack.c.bf16 %v10713_v54, %v10713_v54 }
0x4669   :  { %14721 = vmatpush3.bf16.msra.mxu0 %v10766_v23 }
0x466a   :  { %14717 = vmatmul.mubr.msk.bf16.vlgmr.msra.gmra.mrb[240].mxu1 %vm446_vm2, %v10715_v53  ;;  %14734 = vmatprep.subr.bf16.mxu0 %v16021_v27 }
0x466b   :  { %14730 = vmatprep.mubr.msk.bf16.mxu1 %vm16022_vm1, %v16021_v27  ;;  %14727 = vmatpush3.bf16.msra.mxu1 %v15388_v59 }
0x466c   :  { %14728 = vmatprep.subr.bf16.mxu1 %v16021_v27  ;;  %v10927_v55 = vpop.permute.xlu0 %10926 }
0x466f   :  { %v15881_v5 = vpop.eup %15880  ;;  %14729 = vmatpush3.bf16.msra.mxu1 %v15389_v26 }
0x4670   :  { %v10714_v63 = vmul.f32 %v15881_v5, %v15877_v9  ;;  %14742 = vmatprep.subr.bf16.mxu1 %v16021_v27 }
0x4672   :  { %v10716_v15 = vpack.c.bf16 %v10714_v63, %v10714_v63 }
0x4674   :  { %14723 = vmatmul.mubr.msk.bf16.vlgmr.msra.gmra.mrb[244].mxu0 %vm446_vm2, %v10716_v15 }
0x4675   :  { %14735 = vmatpush3.bf16.msra.mxu0 %v15386_v50  ;;  %14738 = vmatprep.mubr.msk.bf16.mxu0 %vm16022_vm1, %v16021_v27 }
0x4676   :  { %14736 = vmatprep.subr.bf16.mxu0 %v16021_v27 }
0x4679   :  { %14737 = vmatpush3.bf16.msra.mxu0 %v15387_v1 }
0x467a   :  { %14748 = vmatprep.subr.bf16.mxu0 %v16021_v27 }
0x467c   :  { %14739 = vmatmul.mubr.msk.bf16.vlgmr.msra.gmra.mrb[248].mxu0 %vm308_vm0, %v10584_v17 }
0x467d   :  { %14750 = vmatprep.mubr.msk.bf16.mxu0 %vm16022_vm1, %v16021_v27 }
0x4682   :  { %14749 = vmatpush3.bf16.xpose.msra.mxu0 %v10984_v48 }
0x4683   :  { %14760 = vmatprep.subr.bf16.mxu0 %v16021_v27 }
0x4689   :  { %14751 = vmatmul.mubr.msk.bf16.vlgmr.msra.gmra.mrb[252].mxu0 %vm308_vm0, %v10977_v22 }
0x468a   :  { %14762 = vmatprep.mubr.msk.bf16.mxu0 %vm16022_vm1, %v16021_v27 }
0x473d   :  { %v10758_v31 = vpop.f32.mrb[240].mxu1 }
0x473e   :  { %v14718_v0 = vpop.f32.mrb[241].mxu1 }
0x473f   :  { %v10761_v21 = vpop.f32.mrb[242].mxu1 }
0x4740   :  { %v14719_v32 = vpop.f32.mrb[243].mxu1 }
0x4747   :  { %v10805_v7 = vpop.f32.mrb[244].mxu0 }
0x4748   :  { %v10813_v58 = vcombine.low %v10758_v31, %v10805_v7  ;;  %v14724_v24 = vpop.f32.mrb[245].mxu0 }
0x4749   :  { %v10808_v61 = vpop.f32.mrb[246].mxu0 }
0x474a   :  { %v10815_v6 = vpack.c.bf16 %v10813_v58, %v10813_v58  ;;  %v14725_v51 = vpop.f32.mrb[247].mxu0 }
0x474b   :  { %v15391_v51 = vld [vmem:[%s18750_s2 + $0x28] sm:$0xff]  }
0x474c   :  { %14731 = vmatmul.mubr.msk.bf16.vlgmr.msra.gmra.mrb[244].mxu1 %vm308_vm0, %v10815_v6  ;;  %v15390_v6 = vld [vmem:[%s18750_s2 + $0x20] sm:$0xff]  }
0x474d   :  { %14743 = vmatpush3.bf16.xpose.msra.mxu1 %v10934_v33  ;;  %14744 = vmatprep.mubr.msk.bf16.mxu1 %vm16022_vm1, %v16021_v27 }
0x474e   :  { %14754 = vmatprep.subr.bf16.mxu1 %v16021_v27 }
0x474f   :  { %v10920_v41 = vpop.f32.mrb[248].mxu0 }
0x4750   :  { %v14740_v57 = vpop.f32.mrb[249].mxu0 }
0x4751   :  { %v10923_v2 = vpop.f32.mrb[250].mxu0 }
0x4752   :  { %v14741_v10 = vpop.f32.mrb[251].mxu0 }
0x4754   :  { %14745 = vmatmul.mubr.msk.bf16.vlgmr.msra.gmra.mrb[248].mxu1 %vm308_vm0, %v10927_v55 }
0x4755   :  { %14756 = vmatprep.mubr.msk.bf16.mxu1 %vm16022_vm1, %v16021_v27 }
0x475c   :  { %v11020_v4 = vpop.f32.mrb[252].mxu0 }
0x475d   :  { %v11027_v46 = vmul.f32 0.17677669, %v11020_v4  ;;  %v14752_v45 = vpop.f32.mrb[253].mxu0 }
0x475e   :  { %v11023_v40 = vpop.f32.mrb[254].mxu0 }
0x475f   :  { %v11029_v8 = vadd.f32 %v18366_v37, %v11027_v46  ;;  %v14753_v43 = vpop.f32.mrb[255].mxu0 }
0x4761   :  { %v11033_v3 = vsel %vm10469_vm8, %v11029_v8, -inf }
0x4762   :  { %11034 = vmax.xlane.f32.xlu1 %v11033_v3 }
0x4773   :  { %11054 = vrot.lane.b32.xlu1 %v18331_v11, %s16026_s17 }
0x4777   :  { %11209 = vrot.lane.b32.xlu1 %v18329_v52, %s16027_s25 }
0x477b   :  { %11259 = vrot.lane.b32.xlu1 %v18341_v35, %s16027_s25 }
0x477f   :  { %11257 = vrot.lane.b32.xlu1 %v18352_v20, %s16027_s25 }
0x47ef   :  { %v11035_v36 = vpop.xlane.xlu1 %11034 }
0x47f0   :  { %v11037_v34 = vsub.f32 %v11029_v8, %v11035_v36 }
0x47f2   :  { %v11040_v9 = vmul.f32 1.442695, %v11037_v34 }
0x47f3   :  { %v11055_v42 = vpop.permute.xlu1 %11054 }
0x47f4   :  { %14755 = vmatpush3.bf16.msra.mxu1 %v11055_v42  ;;  %15882 = vpow2.f32 %v11040_v9 }
0x47f5   :  { %14766 = vmatprep.subr.bf16.mxu1 %v16021_v27 }
0x47f7   :  { %v11210_v32 = vpop.permute.xlu1 %11209 }
0x47f8   :  { %v11215_v58 = vsel %vm308_vm0, %v11210_v32, 0 }
0x47fb   :  { %v11260_v46 = vpop.permute.xlu1 %11259 }
0x47fc   :  { %v11265_v43 = vsel %vm308_vm0, %v11260_v46, 0 }
0x47fe   :  { %v15883_v50 = vpop.eup %15882 }
0x47ff   :  { %v11045_v15 = vsel %vm10469_vm8, %v15883_v50, 0.0 }
0x481f   :  { %v10865_v13 = vpop.f32.mrb[244].mxu1 }
0x4820   :  { %v18461_v14 = vadd.f32 %v10920_v41, %v10865_v13  ;;  %v14732_v18 = vpop.f32.mrb[245].mxu1 }
0x4821   :  { %v10868_v49 = vpop.f32.mrb[246].mxu1 }
0x4822   :  { %v14733_v54 = vpop.f32.mrb[247].mxu1  ;;  %v11258_v49 = vpop.permute.xlu1 %11257 }
0x4827   :  { %v10970_v52 = vpop.f32.mrb[248].mxu1 }
0x4828   :  { %v11026_v23 = vmul.f32 0.17677669, %v10970_v52  ;;  %v14746_v35 = vpop.f32.mrb[249].mxu1 }
0x4829   :  { %v10973_v53 = vpop.f32.mrb[250].mxu1 }
0x482a   :  { %v11028_v20 = vadd.f32 %v18361_v28, %v11026_v23  ;;  %v14747_v5 = vpop.f32.mrb[251].mxu1 }
0x482c   :  { %v11030_v63 = vsel %vm10469_vm8, %v11028_v20, -inf }
0x482d   :  { %11031 = vmax.xlane.f32.xlu0 %v11030_v63 }
0x4831   :  { %11046 = vadd.xlane.f32.xlu0 %v11045_v15 }
0x48ba   :  { %v11032_v1 = vpop.xlane.xlu0 %11031 }
0x48bb   :  { %v11036_v47 = vsub.f32 %v11028_v20, %v11032_v1 }
0x48bd   :  { %v11038_v17 = vmul.f32 1.442695, %v11036_v47 }
0x48be   :  { %v11047_v22 = vpop.xlane.xlu0 %11046 }
0x48bf   :  { %15884 = vpow2.f32 %v11038_v17 }
0x48c0   :  { %15886 = vrcp.f32 %v11047_v22 }
0x48c9   :  { %v15885_v29 = vpop.eup %15884 }
0x48ca   :  { %v11042_v48 = vsel %vm10469_vm8, %v15885_v29, 0.0  ;;  %v15887_v59 = vpop.eup %15886 }
0x48cb   :  { %11043 = vadd.xlane.f32.xlu0 %v11042_v48  ;;  %v11051_v31 = vmul.f32 %v15887_v59, %v15883_v50 }
0x48cd   :  { %v11053_v21 = vpack.c.bf16 %v11051_v31, %v11051_v31 }
0x48e1   :  { %11100 = vrot.lane.b32.xlu0 %v18345_v16, %s16026_s17  ;;  %s18754_s17 = sld [smem:[#allocation34_spill]] }
0x48e5   :  { %11207 = vrot.lane.b32.xlu0 %v18339_v62, %s16027_s25 }
0x4958   :  { %v11044_v26 = vpop.xlane.xlu0 %11043 }
0x4959   :  { %15888 = vrcp.f32 %v11044_v26 }
0x495c   :  { %v11101_v0 = vpop.permute.xlu0 %11100 }
0x495d   :  { %14761 = vmatpush3.bf16.msra.mxu0 %v11101_v0 }
0x495e   :  { %14774 = vmatprep.subr.bf16.mxu0 %v16021_v27 }
0x4960   :  { %14763 = vmatmul.mubr.msk.bf16.vlgmr.msra.gmra.mrb[0].mxu0 %vm446_vm2, %v11053_v21  ;;  %v11208_v61 = vpop.permute.xlu0 %11207 }
0x4961   :  { %14776 = vmatprep.mubr.msk.bf16.mxu0 %vm16022_vm1, %v16021_v27 }
0x4963   :  { %v15889_v62 = vpop.eup %15888 }
0x4964   :  { %v11050_v7 = vmul.f32 %v15889_v62, %v15885_v29 }
0x4966   :  { %14775 = vmatpush3.bf16.xpose.msra.mxu0 %v11215_v58  ;;  %v11052_v24 = vpack.c.bf16 %v11050_v7, %v11050_v7  ;;  %v15392_v7 = vld [vmem:[%s18750_s2 + $0x30] sm:$0xff]  }
0x4967   :  { %14786 = vmatprep.subr.bf16.mxu0 %v16021_v27 }
0x4968   :  { %14757 = vmatmul.mubr.msk.bf16.vlgmr.msra.gmra.mrb[252].mxu1 %vm446_vm2, %v11052_v24 }
0x4969   :  { %14770 = vmatprep.mubr.msk.bf16.mxu1 %vm16022_vm1, %v16021_v27  ;;  %14767 = vmatpush3.bf16.msra.mxu1 %v15390_v6 }
0x496a   :  { %14768 = vmatprep.subr.bf16.mxu1 %v16021_v27 }
0x496d   :  { %14777 = vmatmul.mubr.msk.bf16.vlgmr.msra.gmra.mrb[4].mxu0 %vm308_vm0, %v11208_v61  ;;  %14769 = vmatpush3.bf16.msra.mxu1 %v15391_v51 }
0x496e   :  { %14788 = vmatprep.mubr.msk.bf16.mxu0 %vm16022_vm1, %v16021_v27  ;;  %14780 = vmatprep.subr.bf16.mxu1 %v16021_v27 }
0x4a33   :  { %v11140_v33 = vpop.f32.mrb[0].mxu0 }
0x4a34   :  { %v14764_v41 = vpop.f32.mrb[1].mxu0 }
0x4a35   :  { %v11143_v57 = vpop.f32.mrb[2].mxu0 }
0x4a36   :  { %v14765_v2 = vpop.f32.mrb[3].mxu0 }
0x4a37   :  { %v15393_v2 = vld [vmem:[%s18750_s2 + $0x38] sm:$0xff]  }
0x4a3b   :  { %v11094_v10 = vpop.f32.mrb[252].mxu1 }
0x4a3c   :  { %v11148_v55 = vcombine.low %v11094_v10, %v11140_v33  ;;  %v14758_v4 = vpop.f32.mrb[253].mxu1 }
0x4a3d   :  { %v11097_v45 = vpop.f32.mrb[254].mxu1 }
0x4a3e   :  { %v11150_v40 = vpack.c.bf16 %v11148_v55, %v11148_v55  ;;  %v14759_v8 = vpop.f32.mrb[255].mxu1 }
0x4a3f   :  { %v13413_v8 = vld [vmem:[%s18751_s0] ss:$0 sm:$0xff] }
0x4a40   :  { %14771 = vmatmul.mubr.msk.bf16.vlgmr.msra.gmra.mrb[0].mxu1 %vm308_vm0, %v11150_v40  ;;  %v11251_v3 = vpop.f32.mrb[4].mxu0 }
0x4a41   :  { %v11307_v36 = vmul.f32 0.17677669, %v11251_v3  ;;  %14781 = vmatpush3.bf16.xpose.msra.mxu1 %v11265_v43  ;;  %v14778_v42 = vpop.f32.mrb[5].mxu0  ;;  %14782 = vmatprep.mubr.msk.bf16.mxu1 %vm16022_vm1, %v16021_v27 }
0x4a42   :  { %v11254_v34 = vpop.f32.mrb[6].mxu0  ;;  %14792 = vmatprep.subr.bf16.mxu1 %v16021_v27 }
0x4a43   :  { %v11309_v9 = vadd.f32 %v18361_v28, %v11307_v36  ;;  %v14779_v13 = vpop.f32.mrb[7].mxu0 }
0x4a45   :  { %v11311_v18 = vsel %vm10469_vm8, %v11309_v9, -inf }
0x4a46   :  { %11312 = vmax.xlane.f32.xlu0 %v11311_v18 }
0x4a48   :  { %14783 = vmatmul.mubr.msk.bf16.vlgmr.msra.gmra.mrb[4].mxu1 %vm308_vm0, %v11258_v49 }
0x4a49   :  { %14794 = vmatprep.mubr.msk.bf16.mxu1 %vm16022_vm1, %v16021_v27 }
0x4ad3   :  { %v11313_v54 = vpop.xlane.xlu0 %11312 }
0x4ad4   :  { %v11317_v52 = vsub.f32 %v11309_v9, %v11313_v54 }
0x4ad6   :  { %v11319_v23 = vmul.f32 1.442695, %v11317_v52  ;;  %v15396_v52 = vld [vmem:[%s18752_s5 + $0x4] ss:$16 sps:$4 sm:$0xff]  }
0x4ad8   :  { %15890 = vpow2.f32 %v11319_v23  ;;  %v15397_v23 = vld [vmem:[%s18752_s5 + $0x8] ss:$16 sps:$4 sm:$0xff]  }
0x4ae2   :  { %v15891_v35 = vpop.eup %15890 }
0x4ae3   :  { %v11323_v53 = vsel %vm10469_vm8, %v15891_v35, 0.0 }
0x4ae4   :  { %11324 = vadd.xlane.f32.xlu0 %v11323_v53  ;;  %v15402_v53 = vld [vmem:[%s18752_s5 + $0x24] ss:$16 sps:$4 sm:$0xff]  }
0x4b13   :  { %v11200_v20 = vpop.f32.mrb[0].mxu1 }
0x4b14   :  { %v11206_v28 = vadd.f32 %v11200_v20, %v18461_v14  ;;  %v14772_v5 = vpop.f32.mrb[1].mxu1  ;;  %v15405_v20 = vld [vmem:[%s18752_s5 + $0x2c] ss:$16 sps:$4 sm:$0xff]  }
0x4b15   :  { %v11203_v63 = vpop.f32.mrb[2].mxu1 }
0x4b16   :  { %v14773_v50 = vpop.f32.mrb[3].mxu1 }
0x4b1b   :  { %v11301_v15 = vpop.f32.mrb[4].mxu1 }
0x4b1c   :  { %v11308_v1 = vmul.f32 0.17677669, %v11301_v15  ;;  %v14784_v47 = vpop.f32.mrb[5].mxu1 }
0x4b1d   :  { %v11304_v17 = vpop.f32.mrb[6].mxu1 }
0x4b1e   :  { %v11310_v29 = vadd.f32 %v18366_v37, %v11308_v1  ;;  %v14785_v48 = vpop.f32.mrb[7].mxu1 }
0x4b1f   :  { %v15408_v48 = vld [vmem:[%s18752_s5 + $0x44] ss:$16 sps:$4 sm:$0xff]  }
0x4b20   :  { %v11314_v22 = vsel %vm10469_vm8, %v11310_v29, -inf }
0x4b21   :  { %11315 = vmax.xlane.f32.xlu1 %v11314_v22  ;;  %v15411_v22 = vld [vmem:[%s18752_s5 + $0x4c] ss:$16 sps:$4 sm:$0xff]  }
0x4b32   :  { %11335 = vrot.lane.b32.xlu1 %v18331_v11, %s16027_s25 }
0x4b71   :  { %v11325_v59 = vpop.xlane.xlu0 %11324 }
0x4b72   :  { %15892 = vrcp.f32 %v11325_v59  ;;  %v15406_v59 = vld [vmem:[%s18752_s5 + $0x40] ss:$16 sps:$4 sm:$0xff]  }
0x4b7c   :  { %v15893_v26 = vpop.eup %15892 }
0x4b7d   :  { %v11331_v0 = vmul.f32 %v15893_v26, %v15891_v35  ;;  %v15399_v35 = vld [vmem:[%s18752_s5 + $0xc] ss:$16 sps:$4 sm:$0xff]   ;;  %v15409_v26 = vld [vmem:[%s18752_s5 + $0x48] ss:$16 sps:$4 sm:$0xff]  }
0x4b7f   :  { %v11333_v62 = vpack.c.bf16 %v11331_v0, %v11331_v0  ;;  %v15412_v0 = vld [vmem:[%s18752_s5 + $0x60] ss:$16 sps:$4 sm:$0xff]  }
0x4bae   :  { %v11316_v14 = vpop.xlane.xlu1 %11315 }
0x4baf   :  { %v11318_v31 = vsub.f32 %v11310_v29, %v11316_v14  ;;  %v15414_v14 = vld [vmem:[%s18752_s5 + $0x64] ss:$16 sps:$4 sm:$0xff]  }
0x4bb1   :  { %v11321_v21 = vmul.f32 1.442695, %v11318_v31  ;;  %v15417_v31 = vld [vmem:[%s18752_s5 + $0x6c] ss:$16 sps:$4 sm:$0xff]  }
0x4bb2   :  { %v11336_v32 = vpop.permute.xlu1 %11335 }
0x4bb3   :  { %15894 = vpow2.f32 %v11321_v21  ;;  %14787 = vmatpush3.bf16.msra.mxu0 %v11336_v32  ;;  %v15415_v21 = vld [vmem:[%s18752_s5 + $0x68] ss:$16 sps:$4 sm:$0xff]   ;;  %v15420_v32 = vld [vmem:[%s18752_s5 + $0x84] ss:$16 sps:$4 sm:$0xff]  }
0x4bb4   :  { %14798 = vmatprep.subr.bf16.mxu0 %v16021_v27 }
0x4bb6   :  { %14789 = vmatmul.mubr.msk.bf16.vlgmr.msra.gmra.mrb[8].mxu0 %vm446_vm2, %v11333_v62  ;;  %v15423_v62 = vld [vmem:[%s18752_s5 + $0x8c] ss:$16 sps:$4 sm:$0xff]  }
0x4bb7   :  { %14802 = vmatprep.mubr.msk.bf16.mxu0 %vm16022_vm1, %v16021_v27  ;;  %14799 = vmatpush3.bf16.msra.mxu0 %v15392_v7  ;;  %v15424_v7 = vld [vmem:[%s18752_s5 + $0xa0] ss:$16 sps:$4 sm:$0xff]  }
0x4bb8   :  { %14800 = vmatprep.subr.bf16.mxu0 %v16021_v27 }
0x4bbb   :  { %14801 = vmatpush3.bf16.msra.mxu0 %v15393_v2  ;;  %v15436_v2 = vld [vmem:[%s18752_s5 + $0xe0] ss:$16 sps:$4 sm:$0xff]  }
0x4bbc   :  { %11803 = vmatprep.subr.bf16.mxu0 %v15399_v35  ;;  %v15443_v35 = vld [vmem:[%s18755_s21 + $0xc0] sm:$0xff]  }
0x4bbd   :  { %v15895_v11 = vpop.eup %15894 }
0x4bbe   :  { %v11326_v37 = vsel %vm10469_vm8, %v15895_v11, 0.0 }
0x4bbf   :  { %11327 = vadd.xlane.f32.xlu0 %v11326_v37  ;;  %v15421_v37 = vld [vmem:[%s18752_s5 + $0x88] ss:$16 sps:$4 sm:$0xff]  }
0x4bd5   :  { %11381 = vrot.lane.b32.xlu0 %v18345_v16, %s16027_s25  ;;  %s18756_s25 = sld [smem:[#allocation36_spill]] }
0x4c4c   :  { %v11328_v58 = vpop.xlane.xlu0 %11327 }
0x4c4d   :  { %15896 = vrcp.f32 %v11328_v58  ;;  %v15426_v58 = vld [vmem:[%s18752_s5 + $0xa4] ss:$16 sps:$4 sm:$0xff]  }
0x4c50   :  { %v11382_v24 = vpop.permute.xlu0 %11381 }
0x4c51   :  { %14793 = vmatpush3.bf16.msra.mxu1 %v11382_v24  ;;  %v15427_v24 = vld [vmem:[%s18752_s5 + $0xa8] ss:$16 sps:$4 sm:$0xff]  }
0x4c52   :  { %11762 = vmatprep.subr.bf16.mxu1 %v15396_v52 }
0x4c57   :  { %v15897_v61 = vpop.eup %15896 }
0x4c58   :  { %v11332_v6 = vmul.f32 %v15897_v61, %v15895_v11  ;;  %v15418_v11 = vld [vmem:[%s18752_s5 + $0x80] ss:$16 sps:$4 sm:$0xff]   ;;  %v15429_v61 = vld [vmem:[%s18752_s5 + $0xac] ss:$16 sps:$4 sm:$0xff]  }
0x4c5a   :  { %v11334_v51 = vpack.c.bf16 %v11332_v6, %v11332_v6  ;;  %v15432_v6 = vld [vmem:[%s18752_s5 + $0xc4] ss:$16 sps:$4 sm:$0xff]  }
0x4c5c   :  { %14795 = vmatmul.mubr.msk.bf16.vlgmr.msra.gmra.mrb[8].mxu1 %vm446_vm2, %v11334_v51  ;;  %v15435_v51 = vld [vmem:[%s18752_s5 + $0xcc] ss:$16 sps:$4 sm:$0xff]  }
0x4c5d   :  { %11794 = vmatprep.mubr.bf16.mxu1 %v16023_v60 }
0x4c89   :  { %v11375_v33 = vpop.f32.mrb[8].mxu0 }
0x4c8a   :  { %v14790_v41 = vpop.f32.mrb[9].mxu0 }
0x4c8b   :  { %v11378_v16 = vpop.f32.mrb[10].mxu0  ;;  %v15433_v41 = vld [vmem:[%s18752_s5 + $0xc8] ss:$16 sps:$4 sm:$0xff]  }
0x4c8c   :  { %v14791_v57 = vpop.f32.mrb[11].mxu0  ;;  %v15438_v16 = vld [vmem:[%s18752_s5 + $0xe4] ss:$16 sps:$4 sm:$0xff]  }
0x4c8d   :  { %v15441_v57 = vld [vmem:[%s18752_s5 + $0xec] ss:$16 sps:$4 sm:$0xff]  }
0x4d2f   :  { %v11421_v10 = vpop.f32.mrb[8].mxu1 }
0x4d30   :  { %v11429_v55 = vcombine.low %v11375_v33, %v11421_v10  ;;  %v14796_v4 = vpop.f32.mrb[9].mxu1  ;;  %v15430_v33 = vld [vmem:[%s18752_s5 + $0xc0] ss:$16 sps:$4 sm:$0xff]   ;;  %v15439_v10 = vld [vmem:[%s18752_s5 + $0xe8] ss:$16 sps:$4 sm:$0xff]  }
0x4d31   :  { %v11424_v46 = vpop.f32.mrb[10].mxu1 }
0x4d32   :  { %v11431_v45 = vpack.c.bf16 %v11429_v55, %v11429_v55  ;;  %v14797_v40 = vpop.f32.mrb[11].mxu1 }
0x4d34   :  { %14803 = vmatmul.mubr.msk.bf16.vlgmr.msra.gmra.mrb[12].mxu0 %vm308_vm0, %v11431_v45  ;;  %v13414_v45 = vld [vmem:[%s18753_s9] ss:$0 sm:$0xff] }
0x4d35   :  { %11835 = vmatprep.mubr.bf16.mxu0 %v16023_v60  ;;  %v15394_v60 = vld [vmem:[%s18752_s5] ss:$16 sps:$4 sm:$0xff]   ;;  %11804 = vmatpush1.bf16.msra.mxu0 %v15397_v23 }
0x4d36   :  { %11763 = vmatpush1.bf16.msra.mxu1 %v15394_v60  ;;  %11805 = vmatprep.subr.bf16.mxu0 %v15405_v20  ;;  %v15442_v23 = vld [vmem:[%s18755_s21 + $0x40] sm:$0xff]  }
0x4d37   :  { %11764 = vmatprep.subr.bf16.mxu1 %v15402_v53  ;;  %v15444_v53 = vld [vmem:[%s18755_s21] sm:$0xff]  }
0x4d38   :  { %v15445_v20 = vld [vmem:[%s18755_s21 + $0x80] sm:$0xff]  }
0x4e07   :  { %v11481_v43 = vpop.f32.mrb[12].mxu0 }
0x4e08   :  { %v11487_v3 = vadd.f32 %v11481_v43, %v11206_v28  ;;  %v14804_v36 = vpop.f32.mrb[13].mxu0  ;;  %v15400_v28 = vld [vmem:[%s18752_s5 + $0x20] ss:$16 sps:$4 sm:$0xff]   ;;  %v11562_v43 = vcombine.high %v13414_v45, %v13414_v45 }
0x4e09   :  { %v11484_v42 = vpop.f32.mrb[14].mxu0  ;;  %11765 = vmatpush1.bf16.msra.mxu1 %v15400_v28  ;;  %v15446_v28 = vld [vmem:[%s18755_s21 + $0x48] sm:$0xff]  }
0x4e0a   :  { %v11494_v34 = vadd.f32 %v13413_v8, %v11487_v3  ;;  %v14805_v9 = vpop.f32.mrb[15].mxu0  ;;  %11766 = vmatprep.subr.bf16.mxu1 %v15408_v48  ;;  %v13415_v8 = vld [vmem:[%s18754_s17] ss:$0 sm:$0xff]  ;;  %v15457_v48 = vld [vmem:[%s18755_s21 + $0x98] sm:$0xff]  }
0x4e0b   :  { %v11572_v42 = vcombine.high %v13415_v8, %v13415_v8 }
0x4e0c   :  { %v11496_v13 = vcombine.high %v11494_v34, %v11494_v34  ;;  %v11498_v18 = vadd.f32 %v11494_v34, %v18316_v12  ;;  %v15403_v12 = vld [vmem:[%s18752_s5 + $0x28] ss:$16 sps:$4 sm:$0xff]  }
0x4e0d   :  { %11806 = vmatpush1.bf16.msra.mxu0 %v15403_v12  ;;  %11767 = vmatpush1.bf16.msra.mxu1 %v15406_v59  ;;  %v15447_v12 = vld [vmem:[%s18755_s21 + $0xc8] sm:$0xff]   ;;  %v15459_v59 = vld [vmem:[%s18755_s21 + $0xe0] sm:$0xff]  }
0x4e0e   :  { %v11499_v49 = vadd.f32 %v11496_v13, %v18318_v44  ;;  %11807 = vmatprep.subr.bf16.mxu0 %v15411_v22  ;;  %11768 = vmatprep.subr.bf16.mxu1 %v15414_v14  ;;  %v15458_v22 = vld [vmem:[%s18755_s21 + $0x60] sm:$0xff]  }
0x4e0f   :  { %v15461_v14 = vld [vmem:[%s18755_s21 + $0xa0] sm:$0xff]  }
0x4e10   :  { %v11502_v54 = vcombine.low %v11498_v18, %v11499_v49 }
0x4e11   :  { %11808 = vmatpush1.bf16.msra.mxu0 %v15409_v26  ;;  %11769 = vmatpush1.bf16.msra.mxu1 %v15412_v0  ;;  %v15460_v26 = vld [vmem:[%s18755_s21 + $0x20] sm:$0xff]   ;;  %v15463_v0 = vld [vmem:[%s18755_s21 + $0xe8] sm:$0xff]  }
0x4e12   :  { %11504 = vadd.xlane.f32.xlu1 %v11502_v54  ;;  %11809 = vmatprep.subr.bf16.mxu0 %v15417_v31  ;;  %v15462_v31 = vld [vmem:[%s18755_s21 + $0x68] sm:$0xff]  }
0x4e13   :  { %11770 = vmatprep.subr.bf16.mxu1 %v15420_v32  ;;  %v15465_v32 = vld [vmem:[%s18755_s21 + $0xa8] sm:$0xff]  }
0x4e15   :  { %11810 = vmatpush1.bf16.msra.mxu0 %v15415_v21  ;;  %11771 = vmatpush1.bf16.msra.mxu1 %v15418_v11  ;;  %v15464_v21 = vld [vmem:[%s18755_s21 + $0x28] sm:$0xff]   ;;  %v15467_v11 = vld [vmem:[%s18755_s21 + $0xf0] sm:$0xff]  }
0x4e16   :  { %11811 = vmatprep.subr.bf16.mxu0 %v15423_v62  ;;  %11772 = vmatprep.subr.bf16.mxu1 %v15426_v58  ;;  %v15466_v62 = vld [vmem:[%s18755_s21 + $0x70] sm:$0xff]   ;;  %v15470_v58 = vld [vmem:[%s18755_s21 + $0x78] sm:$0xff]  }
0x4e19   :  { %11812 = vmatpush1.bf16.msra.mxu0 %v15421_v37  ;;  %11773 = vmatpush1.bf16.msra.mxu1 %v15424_v7  ;;  %v15468_v37 = vld [vmem:[%s18755_s21 + $0x30] sm:$0xff]  }
0x4e1a   :  { %11813 = vmatprep.subr.bf16.mxu0 %v15429_v61  ;;  %11774 = vmatprep.subr.bf16.mxu1 %v15432_v6  ;;  %v15469_v7 = vld [vmem:[%s18755_s21 + $0xb0] sm:$0xff]   ;;  %v15472_v61 = vld [vmem:[%s18755_s21 + $0x38] sm:$0xff]  }
0x4e1b   :  { %v15473_v6 = vld [vmem:[%s18755_s21 + $0xb8] sm:$0xff]  }
0x4e1d   :  { %11814 = vmatpush1.bf16.msra.mxu0 %v15427_v24  ;;  %11775 = vmatpush1.bf16.msra.mxu1 %v15430_v33  ;;  %v15471_v24 = vld [vmem:[%s18755_s21 + $0xf8] sm:$0xff]  }
0x4e1e   :  { %11815 = vmatprep.subr.bf16.mxu0 %v15435_v51  ;;  %11776 = vmatprep.subr.bf16.mxu1 %v15438_v16  ;;  %v8588_v51 = vld [vmem:[%s18756_s25] sm:$0xf] }
0x4e1f   :  { %v11585_v33 = vrot.slane %v8588_v51, %v16448_v30  ;;  %v11589_v16 = vrot.slane %v8588_v51, %v16452_v38 }
0x4e21   :  { %11816 = vmatpush1.bf16.msra.mxu0 %v15433_v41  ;;  %11777 = vmatpush1.bf16.msra.mxu1 %v15436_v2  ;;  %v11593_v41 = vrot.slane %v8588_v51, %v16455_v39 }
0x4e22   :  { %11817 = vmatprep.subr.bf16.mxu0 %v15441_v57  ;;  %13966 = vmatprep.subr.bf16.mxu1 %v15442_v23  ;;  %v11597_v57 = vrot.slane %v8588_v51, %v16788_v56  ;;  %v13448_v51 = vld [vmem:[%s18757_s29] ss:$0 sm:$0xff] }
0x4e25   :  { %11818 = vmatpush1.bf16.msra.mxu0 %v15439_v10 }
0x4e26   :  { %13988 = vmatprep.subr.bf16.mxu0 %v15443_v35 }
0x4e9f   :  { %v11505_v44 = vpop.xlane.xlu1 %11504 }
0x4ea0   :  { %v11506_v5 = vmul.f32 0.0078125, %v11505_v44  ;;  %v15448_v44 = vld [vmem:[%s18755_s21 + $0x8] sm:$0xff]  }
0x4ea2   :  { %v11514_v63 = vrot.slane %v11506_v5, %v18268_v25  ;;  %v11521_v50 = vrot.slane %v11506_v5, %v18271_v19  ;;  %v15449_v5 = vld [vmem:[%s18755_s21 + $0x88] sm:$0xff]  }
0x4ea4   :  { %v18530_v15 = vsub.f32 %v11498_v18, %v11514_v63  ;;  %v18532_v1 = vsub.f32 %v11499_v49, %v11521_v50  ;;  %v15450_v63 = vld [vmem:[%s18755_s21 + $0x50] sm:$0xff]  }
0x4ea5   :  { %v15451_v50 = vld [vmem:[%s18755_s21 + $0xd0] sm:$0xff]  }
0x4ea6   :  { %v11526_v47 = vmul.f32 %v18530_v15, %v18530_v15  ;;  %v11527_v17 = vmul.f32 %v18532_v1, %v18532_v1 }
0x4ea8   :  { %v11530_v29 = vcombine.low %v11526_v47, %v11527_v17  ;;  %v15454_v47 = vld [vmem:[%s18755_s21 + $0x58] sm:$0xff]  }
0x4ea9   :  { %v15455_v17 = vld [vmem:[%s18755_s21 + $0xd8] sm:$0xff]  }
0x4eaa   :  { %11532 = vadd.xlane.f32.xlu0 %v11530_v29  ;;  %v15456_v29 = vld [vmem:[%s18755_s21 + $0x18] sm:$0xff]  }
0x4f37   :  { %v11533_v55 = vpop.xlane.xlu0 %11532 }
0x4f38   :  { %v11534_v4 = vmul.f32 0.0078125, %v11533_v55 }
0x4f3a   :  { %v11535_v46 = vadd.f32 1e-12, %v11534_v4 }
0x4f3c   :  { %15898 = vrsqrt.f32 %v11535_v46 }
0x4f46   :  { %v15899_v40 = vpop.eup %15898 }
0x4f47   :  { %v11544_v3 = vrot.slane %v15899_v40, %v18268_v25  ;;  %v11551_v36 = vrot.slane %v15899_v40, %v18271_v19 }
0x4f49   :  { %v11554_v34 = vmul.f32 %v11544_v3, %v18530_v15  ;;  %v11555_v9 = vmul.f32 %v11551_v36, %v18532_v1  ;;  %v15452_v15 = vld [vmem:[%s18755_s21 + $0x10] sm:$0xff]  }
0x4f4a   :  { %v15453_v1 = vld [vmem:[%s18755_s21 + $0x90] sm:$0xff]  }
0x4f4b   :  { %v11564_v13 = vmul.f32 %v13414_v45, %v11554_v34  ;;  %v11565_v18 = vmul.f32 %v11562_v43, %v11555_v9 }
0x4f4d   :  { %v18568_v49 = vadd.f32 %v13415_v8, %v11564_v13  ;;  %v18570_v54 = vadd.f32 %v11572_v42, %v11565_v18 }
0x4f4f   :  { %v11578_v60 = vcombine.low %v18568_v49, %v18570_v54 }
0x4f51   :  { %v11580_v52 = vpack.c.bf16 %v11578_v60, %v11578_v60 }
0x4f53   :  { %11795 = vmatmul.mubr.bf16.vlgmr.msra.gmra.mrb[12].mxu1 %v11580_v52  ;;  %11836 = vmatmul.mubr.bf16.vlgmr.msra.gmra.mrb[16].mxu0 %v11580_v52 }
0x4f54   :  { %13967 = vmatpush3.bf16.msra.mxu1 %v15444_v53  ;;  %13989 = vmatpush3.bf16.msra.mxu0 %v15445_v20 }
0x4f55   :  { %13968 = vmatprep.subr.bf16.mxu1 %v15446_v28  ;;  %13990 = vmatprep.subr.bf16.mxu0 %v15447_v12 }
0x4f58   :  { %13969 = vmatpush3.bf16.msra.mxu1 %v15448_v44  ;;  %13991 = vmatpush3.bf16.msra.mxu0 %v15449_v5 }
0x4f59   :  { %13970 = vmatprep.subr.bf16.mxu1 %v15450_v63  ;;  %13992 = vmatprep.subr.bf16.mxu0 %v15451_v50 }
0x4f5c   :  { %13971 = vmatpush3.bf16.msra.mxu1 %v15452_v15  ;;  %13993 = vmatpush3.bf16.msra.mxu0 %v15453_v1 }
0x4f5d   :  { %13972 = vmatprep.subr.bf16.mxu1 %v15454_v47  ;;  %13994 = vmatprep.subr.bf16.mxu0 %v15455_v17 }
0x4f60   :  { %13973 = vmatpush3.bf16.msra.mxu1 %v15456_v29  ;;  %13995 = vmatpush3.bf16.msra.mxu0 %v15457_v48 }
0x4f61   :  { %13974 = vmatprep.subr.bf16.mxu1 %v15458_v22  ;;  %13996 = vmatprep.subr.bf16.mxu0 %v15459_v59 }
0x4f64   :  { %13975 = vmatpush3.bf16.msra.mxu1 %v15460_v26  ;;  %13997 = vmatpush3.bf16.msra.mxu0 %v15461_v14 }
0x4f65   :  { %13976 = vmatprep.subr.bf16.mxu1 %v15462_v31  ;;  %13998 = vmatprep.subr.bf16.mxu0 %v15463_v0 }
0x4f68   :  { %13977 = vmatpush3.bf16.msra.mxu1 %v15464_v21  ;;  %13999 = vmatpush3.bf16.msra.mxu0 %v15465_v32 }
0x4f69   :  { %13978 = vmatprep.subr.bf16.mxu1 %v15466_v62  ;;  %14000 = vmatprep.subr.bf16.mxu0 %v15467_v11 }
0x4f6c   :  { %13979 = vmatpush3.bf16.msra.mxu1 %v15468_v37  ;;  %14001 = vmatpush3.bf16.msra.mxu0 %v15469_v7 }
0x4f6d   :  { %13980 = vmatprep.subr.bf16.mxu1 %v15470_v58  ;;  %14002 = vmatprep.subr.bf16.mxu0 %v15471_v24 }
0x4f70   :  { %13981 = vmatpush3.bf16.msra.mxu1 %v15472_v61  ;;  %14003 = vmatpush3.bf16.msra.mxu0 %v15473_v6 }
0x4f71   :  { %14806 = vmatprep.subr.bf16.mxu1 %v16021_v27  ;;  %14826 = vmatprep.subr.bf16.mxu0 %v16021_v27 }
0x5026   :  { %v11796_v2 = vpop.f32.mrb[12].mxu1  ;;  %v11837_v10 = vpop.f32.mrb[16].mxu0 }
0x5027   :  { %v11797_v55 = vadd.f32 %v11796_v2, %v11585_v33  ;;  %v11838_v4 = vadd.f32 %v11837_v10, %v11593_v41  ;;  %v11798_v46 = vpop.f32.mrb[13].mxu1  ;;  %v11839_v45 = vpop.f32.mrb[17].mxu0 }
0x5028   :  { %v11799_v40 = vadd.f32 %v11798_v46, %v11589_v16  ;;  %v11840_v8 = vadd.f32 %v11839_v45, %v11597_v57  ;;  %v11800_v43 = vpop.f32.mrb[14].mxu1  ;;  %v11841_v3 = vpop.f32.mrb[18].mxu0 }
0x5029   :  { %v11848_v36 = vmul.f32 0.044715, %v11797_v55  ;;  %v11850_v42 = vmul.f32 0.044715, %v11838_v4  ;;  %v11801_v9 = vpop.f32.mrb[15].mxu1  ;;  %v11842_v39 = vpop.f32.mrb[19].mxu0 }
0x502a   :  { %v11849_v34 = vmul.f32 0.044715, %v11799_v40  ;;  %v11851_v30 = vmul.f32 0.044715, %v11840_v8  ;;  %v11844_v29 = vmul.f32 0.5, %v11797_v55  ;;  %v11846_v59 = vmul.f32 0.5, %v11838_v4 }
0x502b   :  { %v11852_v13 = vmul.f32 %v11848_v36, %v11797_v55  ;;  %v11854_v38 = vmul.f32 %v11850_v42, %v11838_v4  ;;  %v11845_v26 = vmul.f32 0.5, %v11799_v40  ;;  %v11847_v0 = vmul.f32 0.5, %v11840_v8  ;;  %v15474_v36 = vld [vmem:[%s18758_s3] sm:$0xff]  }
0x502c   :  { %v11853_v18 = vmul.f32 %v11849_v34, %v11799_v40  ;;  %v11855_v56 = vmul.f32 %v11851_v30, %v11840_v8 }
0x502d   :  { %v11856_v60 = vmul.f32 %v11852_v13, %v11797_v55  ;;  %v11858_v52 = vmul.f32 %v11854_v38, %v11838_v4 }
0x502e   :  { %v11857_v23 = vmul.f32 %v11853_v18, %v11799_v40  ;;  %v11859_v35 = vmul.f32 %v11855_v56, %v11840_v8  ;;  %v15475_v18 = vld [vmem:[%s18758_s3 + $0x8] sm:$0xff]   ;;  %v15476_v56 = vld [vmem:[%s18758_s3 + $0x10] sm:$0xff]  }
0x502f   :  { %v11860_v53 = vadd.f32 %v11856_v60, %v11797_v55  ;;  %v11862_v20 = vadd.f32 %v11858_v52, %v11838_v4  ;;  %v15477_v60 = vld [vmem:[%s18758_s3 + $0x18] sm:$0xff]   ;;  %v15478_v52 = vld [vmem:[%s18758_s3 + $0x20] sm:$0xff]  }
0x5030   :  { %v11861_v28 = vadd.f32 %v11857_v23, %v11799_v40  ;;  %v11863_v12 = vadd.f32 %v11859_v35, %v11840_v8  ;;  %v15479_v23 = vld [vmem:[%s18758_s3 + $0x28] sm:$0xff]   ;;  %v15480_v35 = vld [vmem:[%s18758_s3 + $0x30] sm:$0xff]  }
0x5031   :  { %v11864_v44 = vmul.f32 0.7978846, %v11860_v53  ;;  %v11866_v5 = vmul.f32 0.7978846, %v11862_v20  ;;  %v15482_v53 = vld [vmem:[%s18759_s8] sm:$0xff]   ;;  %v15481_v20 = vld [vmem:[%s18758_s3 + $0x38] sm:$0xff]  }
0x5032   :  { %v11865_v63 = vmul.f32 0.7978846, %v11861_v28  ;;  %v11867_v50 = vmul.f32 0.7978846, %v11863_v12 }
0x5033   :  { %15900 = vtanh.f32 %v11864_v44 }
0x5034   :  { %15902 = vtanh.f32 %v11866_v5  ;;  %v13481_v5 = vld [vmem:[%s18760_s14] ss:$0 sm:$0xff] }
0x5035   :  { %15904 = vtanh.f32 %v11865_v63 }
0x5036   :  { %15906 = vtanh.f32 %v11867_v50  ;;  %v13482_v50 = vld [vmem:[%s18761_s19] ss:$0 sm:$0xff] }
0x503d   :  { %v15901_v15 = vpop.eup %15900 }
0x503e   :  { %v15903_v1 = vpop.eup %15902  ;;  %v11872_v47 = vadd.f32 1.0, %v15901_v15  ;;  %v12229_v15 = vcombine.high %v13481_v5, %v13481_v5 }
0x503f   :  { %v15905_v17 = vpop.eup %15904  ;;  %v11874_v48 = vadd.f32 1.0, %v15903_v1 }
0x5040   :  { %v15907_v22 = vpop.eup %15906  ;;  %v11873_v14 = vadd.f32 1.0, %v15905_v17  ;;  %v11876_v31 = vmul.f32 %v11872_v47, %v11844_v29  ;;  %v12239_v17 = vcombine.high %v13482_v50, %v13482_v50 }
0x5041   :  { %v11875_v21 = vadd.f32 1.0, %v15907_v22  ;;  %v11878_v32 = vmul.f32 %v11874_v48, %v11846_v59 }
0x5042   :  { %v11877_v62 = vmul.f32 %v11873_v14, %v11845_v26  ;;  %v11880_v7 = vpack.c.bf16 %v11876_v31, %v11876_v31 }
0x5043   :  { %v11879_v11 = vmul.f32 %v11875_v21, %v11847_v0  ;;  %v11882_v24 = vpack.c.bf16 %v11878_v32, %v11878_v32  ;;  %v15483_v21 = vld [vmem:[%s18759_s8 + $0x8] sm:$0xff]   ;;  %v15486_v32 = vld [vmem:[%s18759_s8 + $0x20] sm:$0xff]  }
0x5044   :  { %v11881_v37 = vpack.c.bf16 %v11877_v62, %v11877_v62  ;;  %v15487_v62 = vld [vmem:[%s18759_s8 + $0x28] sm:$0xff]  }
0x5045   :  { %v11883_v58 = vpack.c.bf16 %v11879_v11, %v11879_v11  ;;  %v15488_v11 = vld [vmem:[%s18759_s8 + $0x30] sm:$0xff]  }
0x5046   :  { %12114 = vmatprep.mubr.bf16.mxu1 %v11881_v37  ;;  %v15489_v37 = vld [vmem:[%s18759_s8 + $0x38] sm:$0xff]  }
0x5047   :  { %12154 = vmatprep.mubr.bf16.mxu0 %v11883_v58  ;;  %12115 = vmatmul.mubr.bf16.vlgmr.msra.gmra.mrb[16].mxu1 %v11880_v7  ;;  %v13483_v7 = vld [vmem:[%s18762_s24] ss:$0 sm:$0xff] }
0x5048   :  { %12155 = vmatmul.mubr.bf16.vlgmr.msra.gmra.mrb[20].mxu0 %v11882_v24  ;;  %14822 = vmatprep.mubr.msk.bf16.mxu1 %vm16022_vm1, %v16021_v27 }
0x5049   :  { %14842 = vmatprep.mubr.msk.bf16.mxu0 %vm16022_vm1, %v16021_v27  ;;  %14807 = vmatpush3.bf16.msra.mxu1 %v15474_v36 }
0x504a   :  { %14808 = vmatprep.subr.bf16.mxu1 %v16021_v27  ;;  %14827 = vmatpush3.bf16.msra.mxu0 %v15482_v53 }
0x504b   :  { %14828 = vmatprep.subr.bf16.mxu0 %v16021_v27 }
0x504d   :  { %14809 = vmatpush3.bf16.msra.mxu1 %v15475_v18 }
0x504e   :  { %14810 = vmatprep.subr.bf16.mxu1 %v16021_v27  ;;  %14829 = vmatpush3.bf16.msra.mxu0 %v15483_v21 }
0x504f   :  { %14830 = vmatprep.subr.bf16.mxu0 %v16021_v27 }
0x5051   :  { %14811 = vmatpush3.bf16.msra.mxu1 %v15476_v56 }
0x5052   :  { %14812 = vmatprep.subr.bf16.mxu1 %v16021_v27 }
0x5055   :  { %14813 = vmatpush3.bf16.msra.mxu1 %v15477_v60 }
0x5056   :  { %14814 = vmatprep.subr.bf16.mxu1 %v16021_v27 }
0x5059   :  { %14815 = vmatpush3.bf16.msra.mxu1 %v15478_v52 }
0x505a   :  { %14816 = vmatprep.subr.bf16.mxu1 %v16021_v27 }
0x505d   :  { %14817 = vmatpush3.bf16.msra.mxu1 %v15479_v23 }
0x505e   :  { %14818 = vmatprep.subr.bf16.mxu1 %v16021_v27 }
0x5061   :  { %14819 = vmatpush3.bf16.msra.mxu1 %v15480_v35 }
0x5062   :  { %14820 = vmatprep.subr.bf16.mxu1 %v16021_v27 }
0x5065   :  { %14821 = vmatpush3.bf16.msra.mxu1 %v15481_v20 }
0x511a   :  { %v13982_v61 = vpop.f32.mrb[16].mxu1 }
0x511b   :  { %v14004_v6 = vpop.f32.mrb[20].mxu0  ;;  %v13983_v33 = vpop.f32.mrb[17].mxu1 }
0x511c   :  { %v13984_v41 = vadd.f32 %v13983_v33, %v13982_v61  ;;  %v14005_v16 = vpop.f32.mrb[21].mxu0  ;;  %v13985_v57 = vpop.f32.mrb[18].mxu1 }
0x511d   :  { %v14006_v2 = vadd.f32 %v14005_v16, %v14004_v6  ;;  %v14007_v10 = vpop.f32.mrb[22].mxu0  ;;  %v13986_v55 = vpop.f32.mrb[19].mxu1 }
0x511e   :  { %v12117_v4 = vadd.f32 %v13984_v41, %v13448_v51  ;;  %v14008_v46 = vpop.f32.mrb[23].mxu0 }
0x5120   :  { %v12157_v45 = vadd.f32 %v14006_v2, %v12117_v4 }
0x5122   :  { %v12163_v40 = vcombine.high %v12157_v45, %v12157_v45  ;;  %v12165_v8 = vadd.f32 %v12157_v45, %v18568_v49 }
0x5124   :  { %v12166_v43 = vadd.f32 %v12163_v40, %v18570_v54 }
0x5126   :  { %v12169_v3 = vcombine.low %v12165_v8, %v12166_v43 }
0x5128   :  { %12171 = vadd.xlane.f32.xlu1 %v12169_v3 }
0x51b5   :  { %v12172_v42 = vpop.xlane.xlu1 %12171 }
0x51b6   :  { %v12173_v34 = vmul.f32 0.0078125, %v12172_v42 }
0x51b8   :  { %v12181_v30 = vrot.slane %v12173_v34, %v18268_v25  ;;  %v12188_v9 = vrot.slane %v12173_v34, %v18271_v19 }
0x51ba   :  { %v12191_v39 = vsub.f32 %v12165_v8, %v12181_v30  ;;  %v12192_v49 = vsub.f32 %v12166_v43, %v12188_v9 }
0x51bc   :  { %v12193_v13 = vmul.f32 %v12191_v39, %v12191_v39  ;;  %v12194_v54 = vmul.f32 %v12192_v49, %v12192_v49 }
0x51be   :  { %v12197_v38 = vcombine.low %v12193_v13, %v12194_v54 }
0x51c0   :  { %12199 = vadd.xlane.f32.xlu0 %v12197_v38 }
0x524d   :  { %v12200_v28 = vpop.xlane.xlu0 %12199 }
0x524e   :  { %v12201_v12 = vmul.f32 0.0078125, %v12200_v28 }
0x5250   :  { %v12202_v44 = vadd.f32 1e-12, %v12201_v12 }
0x5252   :  { %15908 = vrsqrt.f32 %v12202_v44 }
0x525c   :  { %v15909_v63 = vpop.eup %15908 }
0x525d   :  { %v12211_v1 = vrot.slane %v15909_v63, %v18268_v25  ;;  %v12218_v47 = vrot.slane %v15909_v63, %v18271_v19  ;;  %v15484_v25 = vld [vmem:[%s18759_s8 + $0x10] sm:$0xff]   ;;  %v15485_v19 = vld [vmem:[%s18759_s8 + $0x18] sm:$0xff]  }
0x525e   :  { %14831 = vmatpush3.bf16.msra.mxu0 %v15484_v25 }
0x525f   :  { %v12221_v29 = vmul.f32 %v12211_v1, %v12191_v39  ;;  %v12222_v48 = vmul.f32 %v12218_v47, %v12192_v49  ;;  %14832 = vmatprep.subr.bf16.mxu0 %v16021_v27 }
0x5261   :  { %v12231_v22 = vmul.f32 %v13481_v5, %v12221_v29  ;;  %v12232_v59 = vmul.f32 %v12229_v15, %v12222_v48 }
0x5262   :  { %14833 = vmatpush3.bf16.msra.mxu0 %v15485_v19 }
0x5263   :  { %v12241_v26 = vadd.f32 %v13482_v50, %v12231_v22  ;;  %v12242_v14 = vadd.f32 %v12239_v17, %v12232_v59  ;;  %14834 = vmatprep.subr.bf16.mxu0 %v16021_v27 }
0x5265   :  { %v12261_v31 = vcombine.low %v12241_v26, %v12242_v14 }
0x5266   :  { %14835 = vmatpush3.bf16.msra.mxu0 %v15486_v32 }
0x5267   :  { %v12263_v0 = vpack.c.bf16 %v12261_v31, %v12261_v31  ;;  %14836 = vmatprep.subr.bf16.mxu0 %v16021_v27 }
0x5269   :  { %14823 = vmatmul.mubr.bf16.vlgmr.msra.gmra.mrb[20].mxu1 %v12263_v0 }
0x526a   :  { %14837 = vmatpush3.bf16.msra.mxu0 %v15487_v62 }
0x526b   :  { %14838 = vmatprep.subr.bf16.mxu0 %v16021_v27 }
0x526e   :  { %14839 = vmatpush3.bf16.msra.mxu0 %v15488_v11 }
0x526f   :  { %14840 = vmatprep.subr.bf16.mxu0 %v16021_v27 }
0x5272   :  { %14841 = vmatpush3.bf16.msra.mxu0 %v15489_v37 }
0x533c   :  { %v12353_v58 = vpop.f32.mrb[20].mxu1 }
0x533d   :  { %v12354_v24 = vadd.f32 %v13483_v7, %v12353_v58  ;;  %v14824_v61 = vpop.f32.mrb[21].mxu1 }
0x533e   :  { %v12356_v6 = vpop.f32.mrb[22].mxu1 }
0x533f   :  { %v12361_v51 = vcombine.high %v12354_v24, %v12354_v24  ;;  %v12364_v33 = vsel %vm12363_vm9, %v12354_v24, 0.0  ;;  %12359 = vst [vmem:[#allocation3] sm:$0xff] %v12354_v24  ;;  %v14825_v41 = vpop.f32.mrb[23].mxu1 }
0x5340   :  { %v12365_v16 = vrot.slane %v12364_v33, 4 }
0x5341   :  { %v12371_v57 = vsel %vm12363_vm9, %v12361_v51, 0.0 }
0x5342   :  { %v12366_v2 = vadd.f32 %v12365_v16, %v12364_v33  ;;  %v12372_v10 = vrot.slane %v12371_v57, 4 }
0x5344   :  { %v12367_v55 = vrot.slane %v12366_v2, 2  ;;  %v12373_v4 = vadd.f32 %v12372_v10, %v12371_v57 }
0x5346   :  { %v12368_v46 = vadd.f32 %v12367_v55, %v12366_v2  ;;  %v12374_v45 = vrot.slane %v12373_v4, 2 }
0x5348   :  { %v12369_v27 = vrot.slane %v12368_v46, 1  ;;  %v12375_v40 = vadd.f32 %v12374_v45, %v12373_v4 }
0x534a   :  { %v12370_v8 = vadd.f32 %v12369_v27, %v12368_v46  ;;  %v12376_v43 = vrot.slane %v12375_v40, 1 }
0x534c   :  { %v12377_v3 = vadd.f32 %v12376_v43, %v12375_v40  ;;  %v12379_v36 = vmul.f32 0.25, %v12370_v8 }
0x534e   :  { %v12380_v42 = vmul.f32 0.25, %v12377_v3  ;;  %v12402_v34 = vpack.c.bf16 %v12379_v36, %v12379_v36 }
0x5350   :  { %v12403_v30 = vpack.c.bf16 %v12380_v42, %v12380_v42  ;;  %v12383_v9 = vsel %vm507_vm3, %v12380_v42, %v12379_v36  ;;  %v12413_v39 = vunpack.c.l.b16 %v12402_v34 }
0x5351   :  { %12385 = vst [vmem:[#allocation5] sm:$0x3] %v12383_v9 }
0x5352   :  { %v12414_v49 = vunpack.c.l.b16 %v12403_v30 }
0x5354   :  { %v12415_v13 = vsel %vm507_vm3, %v12414_v49, %v12413_v39 }
0x5355   :  { %v12416_v54 = vpack.c.b16 %v12415_v13, %v12415_v13 }
0x5357   :  { %14843 = vmatmul.mubr.bf16.vlgmr.msra.gmra.mrb[24].mxu0 %v12416_v54 }
0x5358   :  { %15931 = shalt.err (!%p15928_p4)
}
0x5359   :  { %s15932_s11 = scalar_lea.hbm %s16295_s20, 128 }
0x535a   :  { %p15933_p5 = scmp.ne.s32.totalorder %s16295_s20, %s15932_s11  ;;  %p15936_p6 = scmp.lt.u32.totalorder %s15932_s11, %s16295_s20 }
0x535c   :  { %p15938_p7 = pnand %p15936_p6, %p15933_p5 }
0x535e   :  { %15941 = shalt.err (!%p15938_p7)
}
0x535f   :  { %12516 = dma.vmem_to_hbm [thread:$0]  %s12514_s6, 128, %s16295_s20, [#allocation4]  }
0x5360   :  { %s15942_s15 = scalar_lea.vmem %s12524_s12, 32  ;;  %p15947_p9 = scmp.lt.s32.totalorder %s12524_s12, %s12524_s12 }
0x5361   :  { %p15943_p8 = scmp.ne.s32.totalorder %s12524_s12, %s15942_s15  ;;  %p15948_p10 = scmp.lt.s32.totalorder %s15942_s15, %s15942_s15 }
0x5363   :  { %p15949_p11 = por %p15948_p10, %p15947_p9 }
0x5365   :  { %p15950_p12 = pnand %p15949_p11, %p15943_p8 }
0x5367   :  { %15953 = shalt.err (!%p15950_p12)
}
0x5368   :  { %s15954_s16 = scalar_lea.hbm %s16300_s27, 32 }
0x5369   :  { %p15955_p13 = scmp.ne.s32.totalorder %s16300_s27, %s15954_s16  ;;  %p15958_p0 = scmp.lt.u32.totalorder %s15954_s16, %s16300_s27 }
0x536b   :  { %p15960_p1 = pnand %p15958_p0, %p15955_p13 }
0x536d   :  { %15963 = shalt.err (!%p15960_p1)
}
0x536e   :  { %12526 = dma.vmem_to_hbm [thread:$0]  %s12524_s12, 32, %s16300_s27, [#allocation6]   ;;  %v13492_v38 = vld [vmem:[%s16290_s13] ss:$0 sm:$0xff] }
0x542a   :  { %v12500_v18 = vpop.f32.mrb[24].mxu0 }
0x542b   :  { %v12501_v56 = vadd.f32 %v13492_v38, %v12500_v18  ;;  %v14844_v60 = vpop.f32.mrb[25].mxu0 }
0x542c   :  { %v12503_v52 = vpop.f32.mrb[26].mxu0 }
0x542d   :  { %12506 = vst [vmem:[%s16305_s4] sm:$0x3] %v12501_v56  ;;  %v14845_v23 = vpop.f32.mrb[27].mxu0 }
0x542e   :  { %15964 = dma.done.wait [#allocation4], 128  }
0x542f   :  { %15965 = vsyncadd [#allocation4], 4294967168 }
0x5430   :  { %15966 = dma.done.wait [#allocation6], 32  }
0x5431   :  { %15967 = vsyncadd [#allocation6], 4294967264 }
0x5432   :  { %12537 = vsyncpa [#allocation4], 1 }
0x5433   :  { %12538 = vsyncpa [#allocation6], 1 }

</bundles_post_ra>
